<compile_context>
chip_gen: v7x
topology: tpu7x:2x2x1
jax: 0.10.0
libtpu: 0.0.40
codegen_flags: <defaults>
</compile_context>

<pallas_src>
import functools

import jax
import jax.numpy as jnp
from jax.experimental import pallas as pl
from jax.experimental.pallas import tpu as pltpu


# ----------------------------------------------------------------------------
# Pallas kernels
# ----------------------------------------------------------------------------
def _apply_act(y, act):
    if act == "relu":
        return jnp.maximum(y, 0.0)
    if act == "sigmoid":
        return 1.0 / (1.0 + jnp.exp(-y))
    return y


def _mm_bias_act_kernel_1k(x_ref, w_ref, b_ref, o_ref, *, act):
    """Single K-step fused GEMM: o = act(x @ w + b).  No accumulator scratch."""
    y = jnp.dot(x_ref[...], w_ref[...], preferred_element_type=jnp.float32)
    y = _apply_act(y + b_ref[...], act)
    o_ref[...] = y.astype(o_ref.dtype)


def _mm_bias_act_kernel_mk(x_ref, w_ref, b_ref, o_ref, acc_ref, *, act):
    """Multi K-step fused GEMM with f32 VMEM accumulator (K reduction last)."""
    k = pl.program_id(2)

    @pl.when(k == 0)
    def _():
        acc_ref[...] = jnp.zeros_like(acc_ref)

    acc_ref[...] += jnp.dot(x_ref[...], w_ref[...],
                            preferred_element_type=jnp.float32)

    @pl.when(k == pl.num_programs(2) - 1)
    def _():
        y = _apply_act(acc_ref[...] + b_ref[...], act)
        o_ref[...] = y.astype(o_ref.dtype)


# ----------------------------------------------------------------------------
# Fused GEMM wrapper (tile selection sized to the actual problem)
# ----------------------------------------------------------------------------
def _round_up(x, m):
    return (x + m - 1) // m * m


def matmul_bias_act(x, w, b, act="none", out_dtype=jnp.float32):
    """y = act(x @ w + b) via a fused Pallas TPU GEMM.

    x: (M, K), w: (K, N), b: (N,). Operands cast to bf16 (f32 accumulation),
    bias + epilogue in f32. Single K-step path (no scratch) when K <= 2048.
    """
    M, K = x.shape
    K2, N = w.shape
    assert K == K2 and b.shape == (N,)

    # ---- tile selection ----
    Kp = _round_up(K, 128)
    if Kp <= 2048:
        tk = Kp                        # single K-step
    else:
        tk = 512
        Kp = _round_up(K, tk)
    Np = _round_up(N, 128)
    tn = min(Np, 512)
    Np = _round_up(N, tn)
    Mp = _round_up(M, 16)              # bf16 sublane packing
    tm = Mp if Mp <= 256 else 256      # >=2 M tiles for large-M layers (dual-TC v7x)
    Mp = _round_up(M, tm)

    # TODO(synk): replace full-array jnp.pad / output slice with masked
    # remainder tiles to avoid the (now small) extra HBM copies.
    xp = jnp.pad(x.astype(jnp.bfloat16), ((0, Mp - M), (0, Kp - K)))
    wp = jnp.pad(w.astype(jnp.bfloat16), ((0, Kp - K), (0, Np - N)))
    bp = jnp.pad(b.astype(jnp.float32).reshape(1, -1), ((0, 0), (0, Np - N)))

    if Kp // tk == 1:
        out = pl.pallas_call(
            functools.partial(_mm_bias_act_kernel_1k, act=act),
            out_shape=jax.ShapeDtypeStruct((Mp, Np), out_dtype),
            grid_spec=pltpu.PrefetchScalarGridSpec(
                num_scalar_prefetch=0,
                grid=(Mp // tm, Np // tn),
                in_specs=[
                    pl.BlockSpec((tm, Kp), lambda i, j: (i, 0)),
                    pl.BlockSpec((Kp, tn), lambda i, j: (0, j)),
                    pl.BlockSpec((1, tn), lambda i, j: (0, j)),
                ],
                out_specs=pl.BlockSpec((tm, tn), lambda i, j: (i, j)),
            ),
            compiler_params=pltpu.CompilerParams(
                dimension_semantics=("parallel", "parallel")),
        )(xp, wp, bp)
    else:
        out = pl.pallas_call(
            functools.partial(_mm_bias_act_kernel_mk, act=act),
            out_shape=jax.ShapeDtypeStruct((Mp, Np), out_dtype),
            grid_spec=pltpu.PrefetchScalarGridSpec(
                num_scalar_prefetch=0,
                grid=(Mp // tm, Np // tn, Kp // tk),
                in_specs=[
                    pl.BlockSpec((tm, tk), lambda i, j, k: (i, k)),
                    pl.BlockSpec((tk, tn), lambda i, j, k: (k, j)),
                    pl.BlockSpec((1, tn), lambda i, j, k: (0, j)),
                ],
                out_specs=pl.BlockSpec((tm, tn), lambda i, j, k: (i, j)),
                scratch_shapes=[pltpu.VMEM((tm, tn), jnp.float32)],
            ),
            compiler_params=pltpu.CompilerParams(
                dimension_semantics=("parallel", "parallel", "arbitrary")),
        )(xp, wp, bp)
    return out[:M, :N]


# ----------------------------------------------------------------------------
# Conv / ConvTranspose lowered onto the fused GEMM (NHWC activations)
# ----------------------------------------------------------------------------
def conv2d_nhwc(x, w, b, stride, act, out_dtype=jnp.bfloat16):
    """VALID conv; x: (B,H,W,C) NHWC; w: (Cout,Cin,kh,kw) PyTorch Conv2d layout."""
    B, H, W, C = x.shape
    Cout, Cin, kh, kw = w.shape
    assert C == Cin
    OH = (H - kh) // stride + 1
    OW = (W - kw) // stride + 1
    # TODO(synk): fuse patch extraction into the Pallas kernel (overlapping
    # windows via pl.Element / pl.ds) to avoid the kh*kw im2col HBM blowup.
    patches = []
    for a in range(kh):
        for c in range(kw):
            patches.append(
                x[:, a: a + stride * (OH - 1) + 1: stride,
                     c: c + stride * (OW - 1) + 1: stride, :])
    cols = jnp.stack(patches, axis=3).reshape(B * OH * OW, kh * kw * C)
    wm = jnp.transpose(w, (2, 3, 1, 0)).reshape(kh * kw * Cin, Cout)
    y = matmul_bias_act(cols, wm, b, act=act, out_dtype=out_dtype)
    return y.reshape(B, OH, OW, Cout)


def conv_transpose2d_s2_nhwc(x, w, b, act, out_dtype=jnp.bfloat16):
    """ConvTranspose2d(stride=2, padding=0) via sub-pixel decomposition.

    x: (B,H,W,Cin) NHWC; w: (Cin,Cout,kh,kw) PyTorch ConvTranspose2d layout.
    All 2x2 output phases share one dense stride-1 im2col, so the whole layer
    is a single GEMM with N = 4*Cout; outputs are interleaved afterwards.
    """
    B, H, W, C = x.shape
    Cin, Cout, kh, kw = w.shape
    assert C == Cin
    OH = (H - 1) * 2 + kh
    OW = (W - 1) * 2 + kw
    keh, kew = kh + (kh % 2), kw + (kw % 2)          # pad taps up to even size
    mh, mw = keh // 2, kew // 2
    wp = jnp.pad(w, ((0, 0), (0, 0), (0, keh - kh), (0, kew - kw)))
    # wsub[ci,co,a,rh,bb,rw] = wp[ci,co,2a+rh,2bb+rw]; flip the conv taps (a,bb).
    wsub = wp.reshape(Cin, Cout, mh, 2, mw, 2)[:, :, ::-1, :, ::-1, :]
    wm = jnp.transpose(wsub, (2, 4, 0, 3, 5, 1)).reshape(mh * mw * Cin, 4 * Cout)
    bias = jnp.tile(b, 4)

    xp = jnp.pad(x, ((0, 0), (mh - 1, mh - 1), (mw - 1, mw - 1), (0, 0)))
    Qh, Qw = H + mh - 1, W + mw - 1
    patches = []
    for a in range(mh):
        for c in range(mw):
            patches.append(xp[:, a: a + Qh, c: c + Qw, :])
    cols = jnp.stack(patches, axis=3).reshape(B * Qh * Qw, mh * mw * Cin)
    y = matmul_bias_act(cols, wm, bias, act=act, out_dtype=out_dtype)
    y = y.reshape(B, Qh, Qw, 2, 2, Cout)
    y = jnp.transpose(y, (0, 1, 3, 2, 4, 5)).reshape(B, 2 * Qh, 2 * Qw, Cout)
    return y[:, :OH, :OW, :]


def conv_transpose2d_from_1x1(x_flat, w, b, act, out_dtype=jnp.bfloat16):
    """ConvTranspose2d whose input is spatially 1x1 == a dense matmul."""
    Cin, Cout, kh, kw = w.shape
    wm = jnp.transpose(w, (0, 2, 3, 1)).reshape(Cin, kh * kw * Cout)
    bias = jnp.tile(b, kh * kw)
    y = matmul_bias_act(x_flat, wm, bias, act=act, out_dtype=out_dtype)
    return y.reshape(-1, kh, kw, Cout)


# ----------------------------------------------------------------------------
# VAE parameters (synthetic init) and forward pass
# ----------------------------------------------------------------------------
def init_params(key, input_channels, latent_dim=32, scale=0.05):
    keys = jax.random.split(key, 22)
    n = lambda k, s: scale * jax.random.normal(k, s, jnp.float32)
    return {
        # Encoder
        "conv1_w": n(keys[0], (32, input_channels, 4, 4)),  "conv1_b": n(keys[1], (32,)),
        "conv2_w": n(keys[2], (64, 32, 4, 4)),              "conv2_b": n(keys[3], (64,)),
        "conv3_w": n(keys[4], (128, 64, 4, 4)),             "conv3_b": n(keys[5], (128,)),
        "conv4_w": n(keys[6], (256, 128, 4, 4)),            "conv4_b": n(keys[7], (256,)),
        "fc_mu_w": n(keys[8], (latent_dim, 1024)),          "fc_mu_b": n(keys[9], (latent_dim,)),
        "fc_sigma_w": n(keys[10], (latent_dim, 1024)),      "fc_sigma_b": n(keys[11], (latent_dim,)),
        # Decoder
        "fc_w": n(keys[12], (1024, latent_dim)),            "fc_b": n(keys[13], (1024,)),
        "deconv1_w": n(keys[14], (1024, 128, 5, 5)),        "deconv1_b": n(keys[15], (128,)),
        "deconv2_w": n(keys[16], (128, 64, 5, 5)),          "deconv2_b": n(keys[17], (64,)),
        "deconv3_w": n(keys[18], (64, 32, 6, 6)),           "deconv3_b": n(keys[19], (32,)),
        "deconv4_w": n(keys[20], (32, input_channels, 6, 6)), "deconv4_b": n(keys[21], (input_channels,)),
    }


def vae_forward(x_nchw, params, eps):
    """x_nchw: (B, C, 64, 64) float32. Returns (reconstruction NCHW, mu, log_var)."""
    p = params
    B = x_nchw.shape[0]
    L = p["fc_mu_b"].shape[0]
    x = jnp.transpose(x_nchw, (0, 2, 3, 1))                       # NHWC internally

    # ---- Encoder ----
    h = conv2d_nhwc(x, p["conv1_w"], p["conv1_b"], 2, "relu")     # (B,31,31,32)
    h = conv2d_nhwc(h, p["conv2_w"], p["conv2_b"], 2, "relu")     # (B,14,14,64)
    h = conv2d_nhwc(h, p["conv3_w"], p["conv3_b"], 2, "relu")     # (B,6,6,128)
    h = conv2d_nhwc(h, p["conv4_w"], p["conv4_b"], 2, "relu")     # (B,2,2,256)
    flat = jnp.transpose(h, (0, 3, 1, 2)).reshape(B, -1)          # torch (C,H,W) flatten

    # fc_mu and fc_sigma fused into one GEMM (concat along N).
    w_head = jnp.concatenate([p["fc_mu_w"], p["fc_sigma_w"]], axis=0).T   # (1024, 2L)
    b_head = jnp.concatenate([p["fc_mu_b"], p["fc_sigma_b"]])
    head = matmul_bias_act(flat, w_head, b_head, act="none", out_dtype=jnp.float32)
    mu, log_var = head[:, :L], head[:, L:]
    # Reparameterization exactly as the PyTorch reference:
    # sigma = exp(log_var); eps ~ U[0,1) (rand_like); z = eps*sigma + mu.
    z = eps * jnp.exp(log_var) + mu

    # ---- Decoder ----
    d = matmul_bias_act(z, p["fc_w"].T, p["fc_b"], act="relu",
                        out_dtype=jnp.bfloat16)                                  # (B,1024)
    d = conv_transpose2d_from_1x1(d, p["deconv1_w"], p["deconv1_b"], "relu")     # (B,5,5,128)
    d = conv_transpose2d_s2_nhwc(d, p["deconv2_w"], p["deconv2_b"], "relu")      # (B,13,13,64)
    d = conv_transpose2d_s2_nhwc(d, p["deconv3_w"], p["deconv3_b"], "relu")      # (B,30,30,32)
    d = conv_transpose2d_s2_nhwc(d, p["deconv4_w"], p["deconv4_b"], "sigmoid",
                                 out_dtype=jnp.float32)                          # (B,64,64,C)
    recon = jnp.transpose(d, (0, 3, 1, 2))                        # NCHW at the boundary
    return recon, mu, log_var


# ----------------------------------------------------------------------------
if __name__ == "__main__":
    # Architecture fixes the spatial size: 64x64 -> 31 -> 14 -> 6 -> 2, so the
    # flattened encoder feature is 256*2*2 = 1024 (matches fc_mu / fc_sigma).
    batch, channels, size, latent_dim = 2, 3, 64, 32

    root = jax.random.PRNGKey(0)
    k_x, k_eps, k_params = jax.random.split(root, 3)
    x = jax.random.normal(k_x, (batch, channels, size, size), jnp.float32)
    eps = jax.random.uniform(k_eps, (batch, latent_dim), jnp.float32)  # torch.rand_like
    params = init_params(k_params, channels, latent_dim)

    fwd = jax.jit(vae_forward)
    recon, mu, log_var = fwd(x, params, eps)
    jax.block_until_ready((recon, mu, log_var))

    assert recon.shape == (batch, channels, size, size)
    assert mu.shape == (batch, latent_dim) and log_var.shape == (batch, latent_dim)
    assert recon.dtype == jnp.float32
    assert bool(jnp.all(jnp.isfinite(recon)))
    assert bool(jnp.all((recon >= 0.0) & (recon <= 1.0)))

    print("KERNEL_OK")
</pallas_src>

<mosaic_0001>
module attributes {stable_mosaic.version = 11 : i64} {
  func.func @_mm_bias_act_kernel_1k(%arg0: i32, %arg1: i32, %arg2: memref<256x128xbf16, #tpu.memory_space<vmem>>, %arg3: memref<128x128xbf16, #tpu.memory_space<vmem>>, %arg4: memref<1x128xf32, #tpu.memory_space<vmem>>, %arg5: memref<256x128xbf16, #tpu.memory_space<vmem>>) attributes {dimension_semantics = [#tpu.dimension_semantics<parallel>, #tpu.dimension_semantics<parallel>], iteration_bounds = array<i64: 8, 1>, scalar_prefetch = 0 : i64, scratch_operands = 0 : i64, tpu.core_type = #tpu.core_type<tc>, window_params = [{transform_indices = @transform_0, window_bounds = array<i64: 256, 128>}, {transform_indices = @transform_1, window_bounds = array<i64: 128, 128>}, {transform_indices = @transform_2, window_bounds = array<i64: 1, 128>}, {transform_indices = @transform_3, window_bounds = array<i64: 256, 128>}]} {
    %c0 = arith.constant 0 : index
    %c0_0 = arith.constant 0 : index
    %0 = vector.load %arg2[%c0, %c0_0] : memref<256x128xbf16, #tpu.memory_space<vmem>>, vector<256x128xbf16>
    %c0_1 = arith.constant 0 : index
    %c0_2 = arith.constant 0 : index
    %1 = vector.load %arg3[%c0_1, %c0_2] : memref<128x128xbf16, #tpu.memory_space<vmem>>, vector<128x128xbf16>
    %cst = arith.constant dense<0.000000e+00> : vector<256x128xf32>
    %2 = tpu.matmul %0, %1, %cst {dimension_numbers = #tpu.dot_dimension_numbers<[1], [0], [0], [1], [0, 0, 1, 1], [], []>} : vector<256x128xbf16>, vector<128x128xbf16>, vector<256x128xf32> -> vector<256x128xf32>
    %c0_3 = arith.constant 0 : index
    %c0_4 = arith.constant 0 : index
    %3 = vector.load %arg4[%c0_3, %c0_4] : memref<1x128xf32, #tpu.memory_space<vmem>>, vector<1x128xf32>
    %4 = vector.broadcast %3 : vector<1x128xf32> to vector<256x128xf32>
    %5 = arith.addf %2, %4 : vector<256x128xf32>
    %cst_5 = arith.constant 0.000000e+00 : f32
    %6 = vector.broadcast %cst_5 : f32 to vector<256x128xf32>
    %7 = arith.maximumf %5, %6 : vector<256x128xf32>
    %8 = arith.truncf %7 : vector<256x128xf32> to vector<256x128xbf16>
    %c0_6 = arith.constant 0 : index
    %c0_7 = arith.constant 0 : index
    %9 = vector.load %arg5[%c0_6, %c0_7] : memref<256x128xbf16, #tpu.memory_space<vmem>>, vector<256x128xbf16>
    tpu.vector_store %arg5[%c0_6, %c0_7], %8 {strides = array<i32>} : memref<256x128xbf16, #tpu.memory_space<vmem>>, vector<256x128xbf16>,
    return
  }
  func.func @transform_0(%arg0: i32, %arg1: i32) -> (i32, i32) {
    %c0_i32 = arith.constant 0 : i32
    %c0_i32_0 = arith.constant 0 : i32
    return %arg0, %c0_i32 : i32, i32
  }
  func.func @transform_1(%arg0: i32, %arg1: i32) -> (i32, i32) {
    %c0_i32 = arith.constant 0 : i32
    %c0_i32_0 = arith.constant 0 : i32
    return %c0_i32, %arg1 : i32, i32
  }
  func.func @transform_2(%arg0: i32, %arg1: i32) -> (i32, i32) {
    %c0_i32 = arith.constant 0 : i32
    %c0_i32_0 = arith.constant 0 : i32
    return %c0_i32, %arg1 : i32, i32
  }
  func.func @transform_3(%arg0: i32, %arg1: i32) -> (i32, i32) {
    %c0_i32 = arith.constant 0 : i32
    return %arg0, %arg1 : i32, i32
  }
}

module attributes {stable_mosaic.version = 11 : i64} {
  func.func @_mm_bias_act_kernel_1k(%arg0: i32, %arg1: i32, %arg2: memref<256x512xbf16, #tpu.memory_space<vmem>>, %arg3: memref<512x128xbf16, #tpu.memory_space<vmem>>, %arg4: memref<1x128xf32, #tpu.memory_space<vmem>>, %arg5: memref<256x128xbf16, #tpu.memory_space<vmem>>) attributes {dimension_semantics = [#tpu.dimension_semantics<parallel>, #tpu.dimension_semantics<parallel>], iteration_bounds = array<i64: 2, 1>, scalar_prefetch = 0 : i64, scratch_operands = 0 : i64, tpu.core_type = #tpu.core_type<tc>, window_params = [{transform_indices = @transform_0, window_bounds = array<i64: 256, 512>}, {transform_indices = @transform_1, window_bounds = array<i64: 512, 128>}, {transform_indices = @transform_2, window_bounds = array<i64: 1, 128>}, {transform_indices = @transform_3, window_bounds = array<i64: 256, 128>}]} {
    %c0 = arith.constant 0 : index
    %c0_0 = arith.constant 0 : index
    %0 = vector.load %arg2[%c0, %c0_0] : memref<256x512xbf16, #tpu.memory_space<vmem>>, vector<256x512xbf16>
    %c0_1 = arith.constant 0 : index
    %c0_2 = arith.constant 0 : index
    %1 = vector.load %arg3[%c0_1, %c0_2] : memref<512x128xbf16, #tpu.memory_space<vmem>>, vector<512x128xbf16>
    %cst = arith.constant dense<0.000000e+00> : vector<256x128xf32>
    %2 = tpu.matmul %0, %1, %cst {dimension_numbers = #tpu.dot_dimension_numbers<[1], [0], [0], [1], [0, 0, 1, 1], [], []>} : vector<256x512xbf16>, vector<512x128xbf16>, vector<256x128xf32> -> vector<256x128xf32>
    %c0_3 = arith.constant 0 : index
    %c0_4 = arith.constant 0 : index
    %3 = vector.load %arg4[%c0_3, %c0_4] : memref<1x128xf32, #tpu.memory_space<vmem>>, vector<1x128xf32>
    %4 = vector.broadcast %3 : vector<1x128xf32> to vector<256x128xf32>
    %5 = arith.addf %2, %4 : vector<256x128xf32>
    %cst_5 = arith.constant 0.000000e+00 : f32
    %6 = vector.broadcast %cst_5 : f32 to vector<256x128xf32>
    %7 = arith.maximumf %5, %6 : vector<256x128xf32>
    %8 = arith.truncf %7 : vector<256x128xf32> to vector<256x128xbf16>
    %c0_6 = arith.constant 0 : index
    %c0_7 = arith.constant 0 : index
    %9 = vector.load %arg5[%c0_6, %c0_7] : memref<256x128xbf16, #tpu.memory_space<vmem>>, vector<256x128xbf16>
    tpu.vector_store %arg5[%c0_6, %c0_7], %8 {strides = array<i32>} : memref<256x128xbf16, #tpu.memory_space<vmem>>, vector<256x128xbf16>,
    return
  }
  func.func @transform_0(%arg0: i32, %arg1: i32) -> (i32, i32) {
    %c0_i32 = arith.constant 0 : i32
    %c0_i32_0 = arith.constant 0 : i32
    return %arg0, %c0_i32 : i32, i32
  }
  func.func @transform_1(%arg0: i32, %arg1: i32) -> (i32, i32) {
    %c0_i32 = arith.constant 0 : i32
    %c0_i32_0 = arith.constant 0 : i32
    return %c0_i32, %arg1 : i32, i32
  }
  func.func @transform_2(%arg0: i32, %arg1: i32) -> (i32, i32) {
    %c0_i32 = arith.constant 0 : i32
    %c0_i32_0 = arith.constant 0 : i32
    return %c0_i32, %arg1 : i32, i32
  }
  func.func @transform_3(%arg0: i32, %arg1: i32) -> (i32, i32) {
    %c0_i32 = arith.constant 0 : i32
    return %arg0, %arg1 : i32, i32
  }
}

module attributes {stable_mosaic.version = 11 : i64} {
  func.func @_mm_bias_act_kernel_1k(%arg0: i32, %arg1: i32, %arg2: memref<80x1024xbf16, #tpu.memory_space<vmem>>, %arg3: memref<1024x128xbf16, #tpu.memory_space<vmem>>, %arg4: memref<1x128xf32, #tpu.memory_space<vmem>>, %arg5: memref<80x128xbf16, #tpu.memory_space<vmem>>) attributes {dimension_semantics = [#tpu.dimension_semantics<parallel>, #tpu.dimension_semantics<parallel>], iteration_bounds = array<i64: 1, 1>, scalar_prefetch = 0 : i64, scratch_operands = 0 : i64, tpu.core_type = #tpu.core_type<tc>, window_params = [{transform_indices = @transform_0, window_bounds = array<i64: 80, 1024>}, {transform_indices = @transform_1, window_bounds = array<i64: 1024, 128>}, {transform_indices = @transform_2, window_bounds = array<i64: 1, 128>}, {transform_indices = @transform_3, window_bounds = array<i64: 80, 128>}]} {
    %c0 = arith.constant 0 : index
    %c0_0 = arith.constant 0 : index
    %0 = vector.load %arg2[%c0, %c0_0] : memref<80x1024xbf16, #tpu.memory_space<vmem>>, vector<80x1024xbf16>
    %c0_1 = arith.constant 0 : index
    %c0_2 = arith.constant 0 : index
    %1 = vector.load %arg3[%c0_1, %c0_2] : memref<1024x128xbf16, #tpu.memory_space<vmem>>, vector<1024x128xbf16>
    %cst = arith.constant dense<0.000000e+00> : vector<80x128xf32>
    %2 = tpu.matmul %0, %1, %cst {dimension_numbers = #tpu.dot_dimension_numbers<[1], [0], [0], [1], [0, 0, 1, 1], [], []>} : vector<80x1024xbf16>, vector<1024x128xbf16>, vector<80x128xf32> -> vector<80x128xf32>
    %c0_3 = arith.constant 0 : index
    %c0_4 = arith.constant 0 : index
    %3 = vector.load %arg4[%c0_3, %c0_4] : memref<1x128xf32, #tpu.memory_space<vmem>>, vector<1x128xf32>
    %4 = vector.broadcast %3 : vector<1x128xf32> to vector<80x128xf32>
    %5 = arith.addf %2, %4 : vector<80x128xf32>
    %cst_5 = arith.constant 0.000000e+00 : f32
    %6 = vector.broadcast %cst_5 : f32 to vector<80x128xf32>
    %7 = arith.maximumf %5, %6 : vector<80x128xf32>
    %8 = arith.truncf %7 : vector<80x128xf32> to vector<80x128xbf16>
    %c0_6 = arith.constant 0 : index
    %c0_7 = arith.constant 0 : index
    %9 = vector.load %arg5[%c0_6, %c0_7] : memref<80x128xbf16, #tpu.memory_space<vmem>>, vector<80x128xbf16>
    tpu.vector_store %arg5[%c0_6, %c0_7], %8 {strides = array<i32>} : memref<80x128xbf16, #tpu.memory_space<vmem>>, vector<80x128xbf16>,
    return
  }
  func.func @transform_0(%arg0: i32, %arg1: i32) -> (i32, i32) {
    %c0_i32 = arith.constant 0 : i32
    %c0_i32_0 = arith.constant 0 : i32
    return %arg0, %c0_i32 : i32, i32
  }
  func.func @transform_1(%arg0: i32, %arg1: i32) -> (i32, i32) {
    %c0_i32 = arith.constant 0 : i32
    %c0_i32_0 = arith.constant 0 : i32
    return %c0_i32, %arg1 : i32, i32
  }
  func.func @transform_2(%arg0: i32, %arg1: i32) -> (i32, i32) {
    %c0_i32 = arith.constant 0 : i32
    %c0_i32_0 = arith.constant 0 : i32
    return %c0_i32, %arg1 : i32, i32
  }
  func.func @transform_3(%arg0: i32, %arg1: i32) -> (i32, i32) {
    %c0_i32 = arith.constant 0 : i32
    return %arg0, %arg1 : i32, i32
  }
}

module attributes {stable_mosaic.version = 11 : i64} {
  func.func @_mm_bias_act_kernel_1k(%arg0: i32, %arg1: i32, %arg2: memref<16x2048xbf16, #tpu.memory_space<vmem>>, %arg3: memref<2048x256xbf16, #tpu.memory_space<vmem>>, %arg4: memref<1x256xf32, #tpu.memory_space<vmem>>, %arg5: memref<16x256xbf16, #tpu.memory_space<vmem>>) attributes {dimension_semantics = [#tpu.dimension_semantics<parallel>, #tpu.dimension_semantics<parallel>], iteration_bounds = array<i64: 1, 1>, scalar_prefetch = 0 : i64, scratch_operands = 0 : i64, tpu.core_type = #tpu.core_type<tc>, window_params = [{transform_indices = @transform_0, window_bounds = array<i64: 16, 2048>}, {transform_indices = @transform_1, window_bounds = array<i64: 2048, 256>}, {transform_indices = @transform_2, window_bounds = array<i64: 1, 256>}, {transform_indices = @transform_3, window_bounds = array<i64: 16, 256>}]} {
    %c0 = arith.constant 0 : index
    %c0_0 = arith.constant 0 : index
    %0 = vector.load %arg2[%c0, %c0_0] : memref<16x2048xbf16, #tpu.memory_space<vmem>>, vector<16x2048xbf16>
    %c0_1 = arith.constant 0 : index
    %c0_2 = arith.constant 0 : index
    %1 = vector.load %arg3[%c0_1, %c0_2] : memref<2048x256xbf16, #tpu.memory_space<vmem>>, vector<2048x256xbf16>
    %cst = arith.constant dense<0.000000e+00> : vector<16x256xf32>
    %2 = tpu.matmul %0, %1, %cst {dimension_numbers = #tpu.dot_dimension_numbers<[1], [0], [0], [1], [0, 0, 1, 1], [], []>} : vector<16x2048xbf16>, vector<2048x256xbf16>, vector<16x256xf32> -> vector<16x256xf32>
    %c0_3 = arith.constant 0 : index
    %c0_4 = arith.constant 0 : index
    %3 = vector.load %arg4[%c0_3, %c0_4] : memref<1x256xf32, #tpu.memory_space<vmem>>, vector<1x256xf32>
    %4 = vector.broadcast %3 : vector<1x256xf32> to vector<16x256xf32>
    %5 = arith.addf %2, %4 : vector<16x256xf32>
    %cst_5 = arith.constant 0.000000e+00 : f32
    %6 = vector.broadcast %cst_5 : f32 to vector<16x256xf32>
    %7 = arith.maximumf %5, %6 : vector<16x256xf32>
    %8 = arith.truncf %7 : vector<16x256xf32> to vector<16x256xbf16>
    %c0_6 = arith.constant 0 : index
    %c0_7 = arith.constant 0 : index
    %9 = vector.load %arg5[%c0_6, %c0_7] : memref<16x256xbf16, #tpu.memory_space<vmem>>, vector<16x256xbf16>
    tpu.vector_store %arg5[%c0_6, %c0_7], %8 {strides = array<i32>} : memref<16x256xbf16, #tpu.memory_space<vmem>>, vector<16x256xbf16>,
    return
  }
  func.func @transform_0(%arg0: i32, %arg1: i32) -> (i32, i32) {
    %c0_i32 = arith.constant 0 : i32
    %c0_i32_0 = arith.constant 0 : i32
    return %arg0, %c0_i32 : i32, i32
  }
  func.func @transform_1(%arg0: i32, %arg1: i32) -> (i32, i32) {
    %c0_i32 = arith.constant 0 : i32
    %c0_i32_0 = arith.constant 0 : i32
    return %c0_i32, %arg1 : i32, i32
  }
  func.func @transform_2(%arg0: i32, %arg1: i32) -> (i32, i32) {
    %c0_i32 = arith.constant 0 : i32
    %c0_i32_0 = arith.constant 0 : i32
    return %c0_i32, %arg1 : i32, i32
  }
  func.func @transform_3(%arg0: i32, %arg1: i32) -> (i32, i32) {
    %c0_i32 = arith.constant 0 : i32
    return %arg0, %arg1 : i32, i32
  }
}

module attributes {stable_mosaic.version = 11 : i64} {
  func.func @_mm_bias_act_kernel_1k(%arg0: i32, %arg1: i32, %arg2: memref<16x1024xbf16, #tpu.memory_space<vmem>>, %arg3: memref<1024x128xbf16, #tpu.memory_space<vmem>>, %arg4: memref<1x128xf32, #tpu.memory_space<vmem>>, %arg5: memref<16x128xf32, #tpu.memory_space<vmem>>) attributes {dimension_semantics = [#tpu.dimension_semantics<parallel>, #tpu.dimension_semantics<parallel>], iteration_bounds = array<i64: 1, 1>, scalar_prefetch = 0 : i64, scratch_operands = 0 : i64, tpu.core_type = #tpu.core_type<tc>, window_params = [{transform_indices = @transform_0, window_bounds = array<i64: 16, 1024>}, {transform_indices = @transform_1, window_bounds = array<i64: 1024, 128>}, {transform_indices = @transform_2, window_bounds = array<i64: 1, 128>}, {transform_indices = @transform_3, window_bounds = array<i64: 16, 128>}]} {
    %c0 = arith.constant 0 : index
    %c0_0 = arith.constant 0 : index
    %0 = vector.load %arg2[%c0, %c0_0] : memref<16x1024xbf16, #tpu.memory_space<vmem>>, vector<16x1024xbf16>
    %c0_1 = arith.constant 0 : index
    %c0_2 = arith.constant 0 : index
    %1 = vector.load %arg3[%c0_1, %c0_2] : memref<1024x128xbf16, #tpu.memory_space<vmem>>, vector<1024x128xbf16>
    %cst = arith.constant dense<0.000000e+00> : vector<16x128xf32>
    %2 = tpu.matmul %0, %1, %cst {dimension_numbers = #tpu.dot_dimension_numbers<[1], [0], [0], [1], [0, 0, 1, 1], [], []>} : vector<16x1024xbf16>, vector<1024x128xbf16>, vector<16x128xf32> -> vector<16x128xf32>
    %c0_3 = arith.constant 0 : index
    %c0_4 = arith.constant 0 : index
    %3 = vector.load %arg4[%c0_3, %c0_4] : memref<1x128xf32, #tpu.memory_space<vmem>>, vector<1x128xf32>
    %4 = vector.broadcast %3 : vector<1x128xf32> to vector<16x128xf32>
    %5 = arith.addf %2, %4 : vector<16x128xf32>
    %c0_5 = arith.constant 0 : index
    %c0_6 = arith.constant 0 : index
    %6 = vector.load %arg5[%c0_5, %c0_6] : memref<16x128xf32, #tpu.memory_space<vmem>>, vector<16x128xf32>
    tpu.vector_store %arg5[%c0_5, %c0_6], %5 {strides = array<i32>} : memref<16x128xf32, #tpu.memory_space<vmem>>, vector<16x128xf32>,
    return
  }
  func.func @transform_0(%arg0: i32, %arg1: i32) -> (i32, i32) {
    %c0_i32 = arith.constant 0 : i32
    %c0_i32_0 = arith.constant 0 : i32
    return %arg0, %c0_i32 : i32, i32
  }
  func.func @transform_1(%arg0: i32, %arg1: i32) -> (i32, i32) {
    %c0_i32 = arith.constant 0 : i32
    %c0_i32_0 = arith.constant 0 : i32
    return %c0_i32, %arg1 : i32, i32
  }
  func.func @transform_2(%arg0: i32, %arg1: i32) -> (i32, i32) {
    %c0_i32 = arith.constant 0 : i32
    %c0_i32_0 = arith.constant 0 : i32
    return %c0_i32, %arg1 : i32, i32
  }
  func.func @transform_3(%arg0: i32, %arg1: i32) -> (i32, i32) {
    %c0_i32 = arith.constant 0 : i32
    return %arg0, %arg1 : i32, i32
  }
}

module attributes {stable_mosaic.version = 11 : i64} {
  func.func @_mm_bias_act_kernel_1k(%arg0: i32, %arg1: i32, %arg2: memref<16x128xbf16, #tpu.memory_space<vmem>>, %arg3: memref<128x512xbf16, #tpu.memory_space<vmem>>, %arg4: memref<1x512xf32, #tpu.memory_space<vmem>>, %arg5: memref<16x512xbf16, #tpu.memory_space<vmem>>) attributes {dimension_semantics = [#tpu.dimension_semantics<parallel>, #tpu.dimension_semantics<parallel>], iteration_bounds = array<i64: 1, 2>, scalar_prefetch = 0 : i64, scratch_operands = 0 : i64, tpu.core_type = #tpu.core_type<tc>, window_params = [{transform_indices = @transform_0, window_bounds = array<i64: 16, 128>}, {transform_indices = @transform_1, window_bounds = array<i64: 128, 512>}, {transform_indices = @transform_2, window_bounds = array<i64: 1, 512>}, {transform_indices = @transform_3, window_bounds = array<i64: 16, 512>}]} {
    %c0 = arith.constant 0 : index
    %c0_0 = arith.constant 0 : index
    %0 = vector.load %arg2[%c0, %c0_0] : memref<16x128xbf16, #tpu.memory_space<vmem>>, vector<16x128xbf16>
    %c0_1 = arith.constant 0 : index
    %c0_2 = arith.constant 0 : index
    %1 = vector.load %arg3[%c0_1, %c0_2] : memref<128x512xbf16, #tpu.memory_space<vmem>>, vector<128x512xbf16>
    %cst = arith.constant dense<0.000000e+00> : vector<16x512xf32>
    %2 = tpu.matmul %0, %1, %cst {dimension_numbers = #tpu.dot_dimension_numbers<[1], [0], [0], [1], [0, 0, 1, 1], [], []>} : vector<16x128xbf16>, vector<128x512xbf16>, vector<16x512xf32> -> vector<16x512xf32>
    %c0_3 = arith.constant 0 : index
    %c0_4 = arith.constant 0 : index
    %3 = vector.load %arg4[%c0_3, %c0_4] : memref<1x512xf32, #tpu.memory_space<vmem>>, vector<1x512xf32>
    %4 = vector.broadcast %3 : vector<1x512xf32> to vector<16x512xf32>
    %5 = arith.addf %2, %4 : vector<16x512xf32>
    %cst_5 = arith.constant 0.000000e+00 : f32
    %6 = vector.broadcast %cst_5 : f32 to vector<16x512xf32>
    %7 = arith.maximumf %5, %6 : vector<16x512xf32>
    %8 = arith.truncf %7 : vector<16x512xf32> to vector<16x512xbf16>
    %c0_6 = arith.constant 0 : index
    %c0_7 = arith.constant 0 : index
    %9 = vector.load %arg5[%c0_6, %c0_7] : memref<16x512xbf16, #tpu.memory_space<vmem>>, vector<16x512xbf16>
    tpu.vector_store %arg5[%c0_6, %c0_7], %8 {strides = array<i32>} : memref<16x512xbf16, #tpu.memory_space<vmem>>, vector<16x512xbf16>,
    return
  }
  func.func @transform_0(%arg0: i32, %arg1: i32) -> (i32, i32) {
    %c0_i32 = arith.constant 0 : i32
    %c0_i32_0 = arith.constant 0 : i32
    return %arg0, %c0_i32 : i32, i32
  }
  func.func @transform_1(%arg0: i32, %arg1: i32) -> (i32, i32) {
    %c0_i32 = arith.constant 0 : i32
    %c0_i32_0 = arith.constant 0 : i32
    return %c0_i32, %arg1 : i32, i32
  }
  func.func @transform_2(%arg0: i32, %arg1: i32) -> (i32, i32) {
    %c0_i32 = arith.constant 0 : i32
    %c0_i32_0 = arith.constant 0 : i32
    return %c0_i32, %arg1 : i32, i32
  }
  func.func @transform_3(%arg0: i32, %arg1: i32) -> (i32, i32) {
    %c0_i32 = arith.constant 0 : i32
    return %arg0, %arg1 : i32, i32
  }
}

module attributes {stable_mosaic.version = 11 : i64} {
  func.func @_mm_bias_act_kernel_1k(%arg0: i32, %arg1: i32, %arg2: memref<16x1024xbf16, #tpu.memory_space<vmem>>, %arg3: memref<1024x512xbf16, #tpu.memory_space<vmem>>, %arg4: memref<1x512xf32, #tpu.memory_space<vmem>>, %arg5: memref<16x512xbf16, #tpu.memory_space<vmem>>) attributes {dimension_semantics = [#tpu.dimension_semantics<parallel>, #tpu.dimension_semantics<parallel>], iteration_bounds = array<i64: 1, 7>, scalar_prefetch = 0 : i64, scratch_operands = 0 : i64, tpu.core_type = #tpu.core_type<tc>, window_params = [{transform_indices = @transform_0, window_bounds = array<i64: 16, 1024>}, {transform_indices = @transform_1, window_bounds = array<i64: 1024, 512>}, {transform_indices = @transform_2, window_bounds = array<i64: 1, 512>}, {transform_indices = @transform_3, window_bounds = array<i64: 16, 512>}]} {
    %c0 = arith.constant 0 : index
    %c0_0 = arith.constant 0 : index
    %0 = vector.load %arg2[%c0, %c0_0] : memref<16x1024xbf16, #tpu.memory_space<vmem>>, vector<16x1024xbf16>
    %c0_1 = arith.constant 0 : index
    %c0_2 = arith.constant 0 : index
    %1 = vector.load %arg3[%c0_1, %c0_2] : memref<1024x512xbf16, #tpu.memory_space<vmem>>, vector<1024x512xbf16>
    %cst = arith.constant dense<0.000000e+00> : vector<16x512xf32>
    %2 = tpu.matmul %0, %1, %cst {dimension_numbers = #tpu.dot_dimension_numbers<[1], [0], [0], [1], [0, 0, 1, 1], [], []>} : vector<16x1024xbf16>, vector<1024x512xbf16>, vector<16x512xf32> -> vector<16x512xf32>
    %c0_3 = arith.constant 0 : index
    %c0_4 = arith.constant 0 : index
    %3 = vector.load %arg4[%c0_3, %c0_4] : memref<1x512xf32, #tpu.memory_space<vmem>>, vector<1x512xf32>
    %4 = vector.broadcast %3 : vector<1x512xf32> to vector<16x512xf32>
    %5 = arith.addf %2, %4 : vector<16x512xf32>
    %cst_5 = arith.constant 0.000000e+00 : f32
    %6 = vector.broadcast %cst_5 : f32 to vector<16x512xf32>
    %7 = arith.maximumf %5, %6 : vector<16x512xf32>
    %8 = arith.truncf %7 : vector<16x512xf32> to vector<16x512xbf16>
    %c0_6 = arith.constant 0 : index
    %c0_7 = arith.constant 0 : index
    %9 = vector.load %arg5[%c0_6, %c0_7] : memref<16x512xbf16, #tpu.memory_space<vmem>>, vector<16x512xbf16>
    tpu.vector_store %arg5[%c0_6, %c0_7], %8 {strides = array<i32>} : memref<16x512xbf16, #tpu.memory_space<vmem>>, vector<16x512xbf16>,
    return
  }
  func.func @transform_0(%arg0: i32, %arg1: i32) -> (i32, i32) {
    %c0_i32 = arith.constant 0 : i32
    %c0_i32_0 = arith.constant 0 : i32
    return %arg0, %c0_i32 : i32, i32
  }
  func.func @transform_1(%arg0: i32, %arg1: i32) -> (i32, i32) {
    %c0_i32 = arith.constant 0 : i32
    %c0_i32_0 = arith.constant 0 : i32
    return %c0_i32, %arg1 : i32, i32
  }
  func.func @transform_2(%arg0: i32, %arg1: i32) -> (i32, i32) {
    %c0_i32 = arith.constant 0 : i32
    %c0_i32_0 = arith.constant 0 : i32
    return %c0_i32, %arg1 : i32, i32
  }
  func.func @transform_3(%arg0: i32, %arg1: i32) -> (i32, i32) {
    %c0_i32 = arith.constant 0 : i32
    return %arg0, %arg1 : i32, i32
  }
}

module attributes {stable_mosaic.version = 11 : i64} {
  func.func @_mm_bias_act_kernel_1k(%arg0: i32, %arg1: i32, %arg2: memref<112x1152xbf16, #tpu.memory_space<vmem>>, %arg3: memref<1152x256xbf16, #tpu.memory_space<vmem>>, %arg4: memref<1x256xf32, #tpu.memory_space<vmem>>, %arg5: memref<112x256xbf16, #tpu.memory_space<vmem>>) attributes {dimension_semantics = [#tpu.dimension_semantics<parallel>, #tpu.dimension_semantics<parallel>], iteration_bounds = array<i64: 1, 1>, scalar_prefetch = 0 : i64, scratch_operands = 0 : i64, tpu.core_type = #tpu.core_type<tc>, window_params = [{transform_indices = @transform_0, window_bounds = array<i64: 112, 1152>}, {transform_indices = @transform_1, window_bounds = array<i64: 1152, 256>}, {transform_indices = @transform_2, window_bounds = array<i64: 1, 256>}, {transform_indices = @transform_3, window_bounds = array<i64: 112, 256>}]} {
    %c0 = arith.constant 0 : index
    %c0_0 = arith.constant 0 : index
    %0 = vector.load %arg2[%c0, %c0_0] : memref<112x1152xbf16, #tpu.memory_space<vmem>>, vector<112x1152xbf16>
    %c0_1 = arith.constant 0 : index
    %c0_2 = arith.constant 0 : index
    %1 = vector.load %arg3[%c0_1, %c0_2] : memref<1152x256xbf16, #tpu.memory_space<vmem>>, vector<1152x256xbf16>
    %cst = arith.constant dense<0.000000e+00> : vector<112x256xf32>
    %2 = tpu.matmul %0, %1, %cst {dimension_numbers = #tpu.dot_dimension_numbers<[1], [0], [0], [1], [0, 0, 1, 1], [], []>} : vector<112x1152xbf16>, vector<1152x256xbf16>, vector<112x256xf32> -> vector<112x256xf32>
    %c0_3 = arith.constant 0 : index
    %c0_4 = arith.constant 0 : index
    %3 = vector.load %arg4[%c0_3, %c0_4] : memref<1x256xf32, #tpu.memory_space<vmem>>, vector<1x256xf32>
    %4 = vector.broadcast %3 : vector<1x256xf32> to vector<112x256xf32>
    %5 = arith.addf %2, %4 : vector<112x256xf32>
    %cst_5 = arith.constant 0.000000e+00 : f32
    %6 = vector.broadcast %cst_5 : f32 to vector<112x256xf32>
    %7 = arith.maximumf %5, %6 : vector<112x256xf32>
    %8 = arith.truncf %7 : vector<112x256xf32> to vector<112x256xbf16>
    %c0_6 = arith.constant 0 : index
    %c0_7 = arith.constant 0 : index
    %9 = vector.load %arg5[%c0_6, %c0_7] : memref<112x256xbf16, #tpu.memory_space<vmem>>, vector<112x256xbf16>
    tpu.vector_store %arg5[%c0_6, %c0_7], %8 {strides = array<i32>} : memref<112x256xbf16, #tpu.memory_space<vmem>>, vector<112x256xbf16>,
    return
  }
  func.func @transform_0(%arg0: i32, %arg1: i32) -> (i32, i32) {
    %c0_i32 = arith.constant 0 : i32
    %c0_i32_0 = arith.constant 0 : i32
    return %arg0, %c0_i32 : i32, i32
  }
  func.func @transform_1(%arg0: i32, %arg1: i32) -> (i32, i32) {
    %c0_i32 = arith.constant 0 : i32
    %c0_i32_0 = arith.constant 0 : i32
    return %c0_i32, %arg1 : i32, i32
  }
  func.func @transform_2(%arg0: i32, %arg1: i32) -> (i32, i32) {
    %c0_i32 = arith.constant 0 : i32
    %c0_i32_0 = arith.constant 0 : i32
    return %c0_i32, %arg1 : i32, i32
  }
  func.func @transform_3(%arg0: i32, %arg1: i32) -> (i32, i32) {
    %c0_i32 = arith.constant 0 : i32
    return %arg0, %arg1 : i32, i32
  }
}

module attributes {stable_mosaic.version = 11 : i64} {
  func.func @_mm_bias_act_kernel_1k(%arg0: i32, %arg1: i32, %arg2: memref<256x640xbf16, #tpu.memory_space<vmem>>, %arg3: memref<640x128xbf16, #tpu.memory_space<vmem>>, %arg4: memref<1x128xf32, #tpu.memory_space<vmem>>, %arg5: memref<256x128xbf16, #tpu.memory_space<vmem>>) attributes {dimension_semantics = [#tpu.dimension_semantics<parallel>, #tpu.dimension_semantics<parallel>], iteration_bounds = array<i64: 2, 1>, scalar_prefetch = 0 : i64, scratch_operands = 0 : i64, tpu.core_type = #tpu.core_type<tc>, window_params = [{transform_indices = @transform_0, window_bounds = array<i64: 256, 640>}, {transform_indices = @transform_1, window_bounds = array<i64: 640, 128>}, {transform_indices = @transform_2, window_bounds = array<i64: 1, 128>}, {transform_indices = @transform_3, window_bounds = array<i64: 256, 128>}]} {
    %c0 = arith.constant 0 : index
    %c0_0 = arith.constant 0 : index
    %0 = vector.load %arg2[%c0, %c0_0] : memref<256x640xbf16, #tpu.memory_space<vmem>>, vector<256x640xbf16>
    %c0_1 = arith.constant 0 : index
    %c0_2 = arith.constant 0 : index
    %1 = vector.load %arg3[%c0_1, %c0_2] : memref<640x128xbf16, #tpu.memory_space<vmem>>, vector<640x128xbf16>
    %cst = arith.constant dense<0.000000e+00> : vector<256x128xf32>
    %2 = tpu.matmul %0, %1, %cst {dimension_numbers = #tpu.dot_dimension_numbers<[1], [0], [0], [1], [0, 0, 1, 1], [], []>} : vector<256x640xbf16>, vector<640x128xbf16>, vector<256x128xf32> -> vector<256x128xf32>
    %c0_3 = arith.constant 0 : index
    %c0_4 = arith.constant 0 : index
    %3 = vector.load %arg4[%c0_3, %c0_4] : memref<1x128xf32, #tpu.memory_space<vmem>>, vector<1x128xf32>
    %4 = vector.broadcast %3 : vector<1x128xf32> to vector<256x128xf32>
    %5 = arith.addf %2, %4 : vector<256x128xf32>
    %cst_5 = arith.constant 0.000000e+00 : f32
    %6 = vector.broadcast %cst_5 : f32 to vector<256x128xf32>
    %7 = arith.maximumf %5, %6 : vector<256x128xf32>
    %8 = arith.truncf %7 : vector<256x128xf32> to vector<256x128xbf16>
    %c0_6 = arith.constant 0 : index
    %c0_7 = arith.constant 0 : index
    %9 = vector.load %arg5[%c0_6, %c0_7] : memref<256x128xbf16, #tpu.memory_space<vmem>>, vector<256x128xbf16>
    tpu.vector_store %arg5[%c0_6, %c0_7], %8 {strides = array<i32>} : memref<256x128xbf16, #tpu.memory_space<vmem>>, vector<256x128xbf16>,
    return
  }
  func.func @transform_0(%arg0: i32, %arg1: i32) -> (i32, i32) {
    %c0_i32 = arith.constant 0 : i32
    %c0_i32_0 = arith.constant 0 : i32
    return %arg0, %c0_i32 : i32, i32
  }
  func.func @transform_1(%arg0: i32, %arg1: i32) -> (i32, i32) {
    %c0_i32 = arith.constant 0 : i32
    %c0_i32_0 = arith.constant 0 : i32
    return %c0_i32, %arg1 : i32, i32
  }
  func.func @transform_2(%arg0: i32, %arg1: i32) -> (i32, i32) {
    %c0_i32 = arith.constant 0 : i32
    %c0_i32_0 = arith.constant 0 : i32
    return %c0_i32, %arg1 : i32, i32
  }
  func.func @transform_3(%arg0: i32, %arg1: i32) -> (i32, i32) {
    %c0_i32 = arith.constant 0 : i32
    return %arg0, %arg1 : i32, i32
  }
}

module attributes {stable_mosaic.version = 11 : i64} {
  func.func @_mm_bias_act_kernel_1k(%arg0: i32, %arg1: i32, %arg2: memref<256x384xbf16, #tpu.memory_space<vmem>>, %arg3: memref<384x128xbf16, #tpu.memory_space<vmem>>, %arg4: memref<1x128xf32, #tpu.memory_space<vmem>>, %arg5: memref<256x128xf32, #tpu.memory_space<vmem>>) attributes {dimension_semantics = [#tpu.dimension_semantics<parallel>, #tpu.dimension_semantics<parallel>], iteration_bounds = array<i64: 8, 1>, scalar_prefetch = 0 : i64, scratch_operands = 0 : i64, tpu.core_type = #tpu.core_type<tc>, window_params = [{transform_indices = @transform_0, window_bounds = array<i64: 256, 384>}, {transform_indices = @transform_1, window_bounds = array<i64: 384, 128>}, {transform_indices = @transform_2, window_bounds = array<i64: 1, 128>}, {transform_indices = @transform_3, window_bounds = array<i64: 256, 128>}]} {
    %c0 = arith.constant 0 : index
    %c0_0 = arith.constant 0 : index
    %0 = vector.load %arg2[%c0, %c0_0] : memref<256x384xbf16, #tpu.memory_space<vmem>>, vector<256x384xbf16>
    %c0_1 = arith.constant 0 : index
    %c0_2 = arith.constant 0 : index
    %1 = vector.load %arg3[%c0_1, %c0_2] : memref<384x128xbf16, #tpu.memory_space<vmem>>, vector<384x128xbf16>
    %cst = arith.constant dense<0.000000e+00> : vector<256x128xf32>
    %2 = tpu.matmul %0, %1, %cst {dimension_numbers = #tpu.dot_dimension_numbers<[1], [0], [0], [1], [0, 0, 1, 1], [], []>} : vector<256x384xbf16>, vector<384x128xbf16>, vector<256x128xf32> -> vector<256x128xf32>
    %c0_3 = arith.constant 0 : index
    %c0_4 = arith.constant 0 : index
    %3 = vector.load %arg4[%c0_3, %c0_4] : memref<1x128xf32, #tpu.memory_space<vmem>>, vector<1x128xf32>
    %4 = vector.broadcast %3 : vector<1x128xf32> to vector<256x128xf32>
    %5 = arith.addf %2, %4 : vector<256x128xf32>
    %cst_5 = arith.constant 0.000000e+00 : f32
    %6 = vector.broadcast %cst_5 : f32 to vector<256x128xf32>
    %7 = arith.subf %6, %5 : vector<256x128xf32>
    %8 = math.exp %7 : vector<256x128xf32>
    %cst_6 = arith.constant 1.000000e+00 : f32
    %9 = vector.broadcast %cst_6 : f32 to vector<256x128xf32>
    %10 = arith.addf %9, %8 : vector<256x128xf32>
    %cst_7 = arith.constant 1.000000e+00 : f32
    %11 = vector.broadcast %cst_7 : f32 to vector<256x128xf32>
    %12 = arith.divf %11, %10 : vector<256x128xf32>
    %c0_8 = arith.constant 0 : index
    %c0_9 = arith.constant 0 : index
    %13 = vector.load %arg5[%c0_8, %c0_9] : memref<256x128xf32, #tpu.memory_space<vmem>>, vector<256x128xf32>
    tpu.vector_store %arg5[%c0_8, %c0_9], %12 {strides = array<i32>} : memref<256x128xf32, #tpu.memory_space<vmem>>, vector<256x128xf32>,
    return
  }
  func.func @transform_0(%arg0: i32, %arg1: i32) -> (i32, i32) {
    %c0_i32 = arith.constant 0 : i32
    %c0_i32_0 = arith.constant 0 : i32
    return %arg0, %c0_i32 : i32, i32
  }
  func.func @transform_1(%arg0: i32, %arg1: i32) -> (i32, i32) {
    %c0_i32 = arith.constant 0 : i32
    %c0_i32_0 = arith.constant 0 : i32
    return %c0_i32, %arg1 : i32, i32
  }
  func.func @transform_2(%arg0: i32, %arg1: i32) -> (i32, i32) {
    %c0_i32 = arith.constant 0 : i32
    %c0_i32_0 = arith.constant 0 : i32
    return %c0_i32, %arg1 : i32, i32
  }
  func.func @transform_3(%arg0: i32, %arg1: i32) -> (i32, i32) {
    %c0_i32 = arith.constant 0 : i32
    return %arg0, %arg1 : i32, i32
  }
}

</mosaic_0001>

<bundles_post_ra>
// kernel: vae_forward.10
= control target key start
LH: loop header
LB: loop body
LE: loop exit
PB: predicated region body
PF: predicated region fallthrough
CT: control target
= control target key end

     0   :  { %s1257_s12 = smov 0   ;;  %s1259_s13 = smov 0   ;;  %s1394_s0 = inlined_call_operand.vmem [shape: bf16[2048,128], index: 0, kind: input, shape index: {}]   ;;  %s1395_s1 = inlined_call_operand.vmem [shape: bf16[128,128], index: 1, kind: input, shape index: {}]   ;;  %s1396_s2 = inlined_call_operand.vmem [shape: f32[1,128], index: 2, kind: input, shape index: {}]   ;;  %s1397_s3 = inlined_call_operand.vmem [shape: bf16[2048,128], index: 3, kind: output, shape index: {}]  }
   0x1   :  { %s1261_s14 = smov 0  }
   0x2 LB: > { %s25_s15 = sadd.s32 1, %s1231_s13  ;;  %p886_p0 = scmp.ge.s32.totalorder %s1235_s14, 1  ;;  %s1235_s14 = sphi %s1261_s14, %s13_s14   ;;  %s1231_s13 = sphi %s1259_s13, %s1399_s13   ;;  %s1227_s12 = sphi %s1257_s12, %s1398_s12  }
   0x3   : > { %p27_p1 = scmp.ge.s32.totalorder %s25_s15, 8  ;;  %p169_p2 = scmp.lt.s32.totalorder %s1235_s14, 9 }
   0x5   : > { %s1401_s15 = smov (%p27_p1, %s25_s15), 0  ;;  %p170_p3 = pnand %p886_p0, %p169_p2 }
   0x6   : > { %v1189_v0 = vld [vmem:[%s1395_s1] sm:$0xff] (!%p170_p3)   ;;  %s887_s18 = sshll.u32 (!%p170_p3), %s1227_s12, 5  ;;  %v1190_v1 = vld [vmem:[%s1395_s1 + $0x8] sm:$0xff] (!%p170_p3)   ;;  %v1191_v2 = vld [vmem:[%s1395_s1 + $0x10] sm:$0xff] (!%p170_p3)  }
   0x7   : > { %173 = sbr.rel (%p170_p3) target bundleno = 285 (0x11d), region = 32  ;;  %p204_p4 = scmp.lt.s32.totalorder (!%p170_p3), %s887_s18, 255  ;;  %1101 = vmatprep.subr.bf16.mxu0 (!%p170_p3), %v1189_v0  ;;  %1149 = vmatprep.subr.bf16.mxu1 (!%p170_p3), %v1189_v0  ;;  %v1192_v3 = vld [vmem:[%s1395_s1 + $0x18] sm:$0xff] (!%p170_p3)   ;;  %v1193_v6 = vld [vmem:[%s1395_s1 + $0x20] sm:$0xff] (!%p170_p3)   ;;  %v1194_v7 = vld [vmem:[%s1395_s1 + $0x28] sm:$0xff] (!%p170_p3)  }
   0x8   : > { %1102 = vmatpush3.bf16.msra.mxu0 (!%p170_p3), %v1189_v0  ;;  %1157 = vmatpush3.bf16.msra.mxu1 (!%p170_p3), %v1189_v0  ;;  %v1195_v8 = vld [vmem:[%s1395_s1 + $0x30] sm:$0xff] (!%p170_p3)   ;;  %v1196_v9 = vld [vmem:[%s1395_s1 + $0x38] sm:$0xff] (!%p170_p3)   ;;  %v1328_v24 = vld [vmem:[%s1396_s2] ss:$0 sm:$0xff] (!%p170_p3) }
   0x9   : > { %1103 = vmatprep.subr.bf16.mxu0 (!%p170_p3), %v1190_v1  ;;  %1150 = vmatprep.subr.bf16.mxu1 (!%p170_p3), %v1190_v1 }
   0xc   : > { %1104 = vmatpush3.bf16.msra.mxu0 (!%p170_p3), %v1190_v1  ;;  %1158 = vmatpush3.bf16.msra.mxu1 (!%p170_p3), %v1190_v1 }
   0xd   : > { %1105 = vmatprep.subr.bf16.mxu0 (!%p170_p3), %v1191_v2  ;;  %1151 = vmatprep.subr.bf16.mxu1 (!%p170_p3), %v1191_v2 }
   0xe   : > { %s1403_s18 = smov (!%p204_p4, %s887_s18), 255 }
   0xf   : > { %s888_s23 = sshll.u32 %s1403_s18, 2 }
  0x10   : > { %s1292_s26 = scalar_lea.vmem %s1394_s0, %s888_s23  ;;  %1106 = vmatpush3.bf16.msra.mxu0 %v1191_v2  ;;  %1159 = vmatpush3.bf16.msra.mxu1 %v1191_v2  ;;  %s1343_s17 = scalar_lea.vmem %s1397_s3, %s888_s23 }
  0x11   : > { %v1197_v4 = vld [vmem:[%s1292_s26] sm:$0xff]   ;;  %1107 = vmatprep.subr.bf16.mxu0 %v1192_v3  ;;  %1152 = vmatprep.subr.bf16.mxu1 %v1192_v3  ;;  %v1199_v10 = vld [vmem:[%s1292_s26 + $0x8] sm:$0xff]   ;;  %v1201_v12 = vld [vmem:[%s1292_s26 + $0x10] sm:$0xff]  }
  0x12   : > { %v1198_v5 = vld [vmem:[%s1292_s26 + $0x40] sm:$0xff]   ;;  %1117 = vmatprep.mubr.bf16.mxu0 %v1197_v4  ;;  %v1200_v11 = vld [vmem:[%s1292_s26 + $0x48] sm:$0xff]   ;;  %v1202_v13 = vld [vmem:[%s1292_s26 + $0x50] sm:$0xff]  }
  0x13   : > { %1133 = vmatprep.mubr.bf16.mxu1 %v1198_v5  ;;  %v1203_v14 = vld [vmem:[%s1292_s26 + $0x18] sm:$0xff]   ;;  %v1205_v16 = vld [vmem:[%s1292_s26 + $0x20] sm:$0xff]   ;;  %v1207_v18 = vld [vmem:[%s1292_s26 + $0x28] sm:$0xff]  }
  0x14   : > { %1108 = vmatpush3.bf16.msra.mxu0 %v1192_v3  ;;  %1160 = vmatpush3.bf16.msra.mxu1 %v1192_v3  ;;  %v1204_v15 = vld [vmem:[%s1292_s26 + $0x58] sm:$0xff]   ;;  %v1206_v17 = vld [vmem:[%s1292_s26 + $0x60] sm:$0xff]   ;;  %v1208_v19 = vld [vmem:[%s1292_s26 + $0x68] sm:$0xff]  }
  0x15   : > { %1109 = vmatprep.subr.bf16.mxu0 %v1193_v6  ;;  %1153 = vmatprep.subr.bf16.mxu1 %v1193_v6  ;;  %v1209_v20 = vld [vmem:[%s1292_s26 + $0x30] sm:$0xff]   ;;  %v1211_v22 = vld [vmem:[%s1292_s26 + $0x38] sm:$0xff]  }
  0x16   : > { %v1210_v21 = vld [vmem:[%s1292_s26 + $0x70] sm:$0xff]   ;;  %v1212_v23 = vld [vmem:[%s1292_s26 + $0x78] sm:$0xff]  }
  0x18   : > { %1110 = vmatpush3.bf16.msra.mxu0 %v1193_v6  ;;  %1161 = vmatpush3.bf16.msra.mxu1 %v1193_v6 }
  0x19   : > { %1111 = vmatprep.subr.bf16.mxu0 %v1194_v7  ;;  %1154 = vmatprep.subr.bf16.mxu1 %v1194_v7 }
  0x1c   : > { %1112 = vmatpush3.bf16.msra.mxu0 %v1194_v7  ;;  %1162 = vmatpush3.bf16.msra.mxu1 %v1194_v7 }
  0x1d   : > { %1113 = vmatprep.subr.bf16.mxu0 %v1195_v8  ;;  %1155 = vmatprep.subr.bf16.mxu1 %v1195_v8 }
  0x20   : > { %1114 = vmatpush3.bf16.msra.mxu0 %v1195_v8  ;;  %1163 = vmatpush3.bf16.msra.mxu1 %v1195_v8 }
  0x21   : > { %1115 = vmatprep.subr.bf16.mxu0 %v1196_v9  ;;  %1156 = vmatprep.subr.bf16.mxu1 %v1196_v9 }
  0x24   : > { %1116 = vmatpush3.bf16.msra.mxu0 %v1196_v9  ;;  %1164 = vmatpush3.bf16.msra.mxu1 %v1196_v9 }
  0x27   : > { %1118 = vmatmul.mubr.bf16.vlgmr.msra.gmra.mrb[0].mxu0 %v1199_v10  ;;  %1134 = vmatmul.mubr.bf16.vlgmr.msra.gmra.mrb[0].mxu1 %v1200_v11 }
  0x28   : > { %1121 = vmatprep.mubr.bf16.mxu0 %v1201_v12  ;;  %1137 = vmatprep.mubr.bf16.mxu1 %v1202_v13 }
  0x2f   : > { %1122 = vmatmul.mubr.bf16.gmra.mrb[4].mxu0 %v1203_v14  ;;  %1138 = vmatmul.mubr.bf16.gmra.mrb[4].mxu1 %v1204_v15 }
  0x30   : > { %1125 = vmatprep.mubr.bf16.mxu0 %v1205_v16  ;;  %1141 = vmatprep.mubr.bf16.mxu1 %v1206_v17 }
  0x37   : > { %1126 = vmatmul.mubr.bf16.gmra.mrb[8].mxu0 %v1207_v18  ;;  %1142 = vmatmul.mubr.bf16.gmra.mrb[8].mxu1 %v1208_v19 }
  0x38   : > { %1129 = vmatprep.mubr.bf16.mxu0 %v1209_v20  ;;  %1145 = vmatprep.mubr.bf16.mxu1 %v1210_v21 }
  0x3f   : > { %1130 = vmatmul.mubr.bf16.gmra.mrb[12].mxu0 %v1211_v22  ;;  %1146 = vmatmul.mubr.bf16.gmra.mrb[12].mxu1 %v1212_v23 }
  0xfa   : > { %v1119_v25 = vpop.f32.mrb[0].mxu0  ;;  %v1135_v26 = vpop.f32.mrb[0].mxu1 }
  0xfb   : > { %v468_v27 = vadd.f32 %v1119_v25, %v1328_v24  ;;  %v532_v28 = vadd.f32 %v1135_v26, %v1328_v24  ;;  %v459_v29 = vpop.f32.mrb[1].mxu0  ;;  %v523_v30 = vpop.f32.mrb[1].mxu1 }
  0xfc   : > { %v460_v31 = vadd.f32 %v1328_v24, %v459_v29  ;;  %v524_v32 = vadd.f32 %v1328_v24, %v523_v30  ;;  %v1120_v33 = vpop.f32.mrb[2].mxu0  ;;  %v1136_v34 = vpop.f32.mrb[2].mxu1 }
  0xfd   : > { %v471_v35 = vadd.f32 %v1120_v33, %v1328_v24  ;;  %v535_v36 = vadd.f32 %v1136_v34, %v1328_v24  ;;  %v462_v37 = vpop.f32.mrb[3].mxu0  ;;  %v526_v38 = vpop.f32.mrb[3].mxu1  ;;  %v588_v41 = vmax.f32 %v468_v27, 0.0  ;;  %v604_v42 = vmax.f32 %v532_v28, 0.0 }
  0xfe   : > { %v463_v39 = vadd.f32 %v1328_v24, %v462_v37  ;;  %v527_v40 = vadd.f32 %v1328_v24, %v526_v38  ;;  %v586_v45 = vmax.f32 %v460_v31, 0.0  ;;  %v602_v46 = vmax.f32 %v524_v32, 0.0 }
  0xff   : > { %v589_v43 = vmax.f32 %v471_v35, 0.0  ;;  %v605_v44 = vmax.f32 %v535_v36, 0.0 }
 0x100   : > { %v587_v47 = vmax.f32 %v463_v39, 0.0  ;;  %v603_v48 = vmax.f32 %v527_v40, 0.0 }
 0x101   : > { %v990_v49 = vpack.c.bf16 %v589_v43, %v588_v41  ;;  %v1030_v50 = vpack.c.bf16 %v605_v44, %v604_v42 }
 0x102   : > { %v985_v51 = vpack.c.bf16 %v587_v47, %v586_v45  ;;  %v1025_v52 = vpack.c.bf16 %v603_v48, %v602_v46  ;;  %v1123_v53 = vpop.f32.mrb[4].mxu0  ;;  %v1139_v54 = vpop.f32.mrb[4].mxu1 }
 0x103   : > { %1062 = vst [vmem:[%s1343_s17 + $0x8] sm:$0xff] %v990_v49   ;;  %1070 = vst [vmem:[%s1343_s17 + $0x48] sm:$0xff] %v1030_v50   ;;  %v484_v55 = vadd.f32 %v1123_v53, %v1328_v24  ;;  %v548_v56 = vadd.f32 %v1139_v54, %v1328_v24  ;;  %v475_v57 = vpop.f32.mrb[5].mxu0  ;;  %v539_v58 = vpop.f32.mrb[5].mxu1 }
 0x104   : > { %986 = vst [vmem:[%s1343_s17] sm:$0xff] %v985_v51   ;;  %1069 = vst [vmem:[%s1343_s17 + $0x40] sm:$0xff] %v1025_v52   ;;  %v476_v59 = vadd.f32 %v1328_v24, %v475_v57  ;;  %v540_v60 = vadd.f32 %v1328_v24, %v539_v58  ;;  %v1124_v61 = vpop.f32.mrb[6].mxu0  ;;  %v1140_v62 = vpop.f32.mrb[6].mxu1 }
 0x105   : > { %v487_v63 = vadd.f32 %v1124_v61, %v1328_v24  ;;  %v551_v0 = vadd.f32 %v1140_v62, %v1328_v24  ;;  %v478_v1 = vpop.f32.mrb[7].mxu0  ;;  %v542_v2 = vpop.f32.mrb[7].mxu1  ;;  %v592_v5 = vmax.f32 %v484_v55, 0.0  ;;  %v608_v6 = vmax.f32 %v548_v56, 0.0 }
 0x106   : > { %v479_v3 = vadd.f32 %v1328_v24, %v478_v1  ;;  %v543_v4 = vadd.f32 %v1328_v24, %v542_v2  ;;  %v590_v9 = vmax.f32 %v476_v59, 0.0  ;;  %v606_v10 = vmax.f32 %v540_v60, 0.0 }
 0x107   : > { %v593_v7 = vmax.f32 %v487_v63, 0.0  ;;  %v609_v8 = vmax.f32 %v551_v0, 0.0 }
 0x108   : > { %v591_v11 = vmax.f32 %v479_v3, 0.0  ;;  %v607_v12 = vmax.f32 %v543_v4, 0.0 }
 0x109   : > { %v1000_v13 = vpack.c.bf16 %v593_v7, %v592_v5  ;;  %v1040_v14 = vpack.c.bf16 %v609_v8, %v608_v6 }
 0x10a   : > { %v995_v15 = vpack.c.bf16 %v591_v11, %v590_v9  ;;  %v1035_v16 = vpack.c.bf16 %v607_v12, %v606_v10  ;;  %v1127_v17 = vpop.f32.mrb[8].mxu0  ;;  %v1143_v18 = vpop.f32.mrb[8].mxu1 }
 0x10b   : > { %1064 = vst [vmem:[%s1343_s17 + $0x18] sm:$0xff] %v1000_v13   ;;  %1072 = vst [vmem:[%s1343_s17 + $0x58] sm:$0xff] %v1040_v14   ;;  %v500_v19 = vadd.f32 %v1127_v17, %v1328_v24  ;;  %v564_v20 = vadd.f32 %v1143_v18, %v1328_v24  ;;  %v491_v21 = vpop.f32.mrb[9].mxu0  ;;  %v555_v22 = vpop.f32.mrb[9].mxu1 }
 0x10c   : > { %1063 = vst [vmem:[%s1343_s17 + $0x10] sm:$0xff] %v995_v15   ;;  %1071 = vst [vmem:[%s1343_s17 + $0x50] sm:$0xff] %v1035_v16   ;;  %v492_v23 = vadd.f32 %v1328_v24, %v491_v21  ;;  %v556_v25 = vadd.f32 %v1328_v24, %v555_v22  ;;  %v1128_v26 = vpop.f32.mrb[10].mxu0  ;;  %v1144_v27 = vpop.f32.mrb[10].mxu1 }
 0x10d   : > { %v503_v28 = vadd.f32 %v1128_v26, %v1328_v24  ;;  %v567_v29 = vadd.f32 %v1144_v27, %v1328_v24  ;;  %v494_v30 = vpop.f32.mrb[11].mxu0  ;;  %v558_v31 = vpop.f32.mrb[11].mxu1  ;;  %v596_v34 = vmax.f32 %v500_v19, 0.0  ;;  %v612_v35 = vmax.f32 %v564_v20, 0.0 }
 0x10e   : > { %v495_v32 = vadd.f32 %v1328_v24, %v494_v30  ;;  %v559_v33 = vadd.f32 %v1328_v24, %v558_v31  ;;  %v594_v38 = vmax.f32 %v492_v23, 0.0  ;;  %v610_v39 = vmax.f32 %v556_v25, 0.0 }
 0x10f   : > { %v597_v36 = vmax.f32 %v503_v28, 0.0  ;;  %v613_v37 = vmax.f32 %v567_v29, 0.0 }
 0x110   : > { %v595_v40 = vmax.f32 %v495_v32, 0.0  ;;  %v611_v41 = vmax.f32 %v559_v33, 0.0 }
 0x111   : > { %v1010_v42 = vpack.c.bf16 %v597_v36, %v596_v34  ;;  %v1050_v43 = vpack.c.bf16 %v613_v37, %v612_v35 }
 0x112   : > { %v1005_v44 = vpack.c.bf16 %v595_v40, %v594_v38  ;;  %v1045_v45 = vpack.c.bf16 %v611_v41, %v610_v39  ;;  %v1131_v46 = vpop.f32.mrb[12].mxu0  ;;  %v1147_v47 = vpop.f32.mrb[12].mxu1 }
 0x113   : > { %1066 = vst [vmem:[%s1343_s17 + $0x28] sm:$0xff] %v1010_v42   ;;  %1074 = vst [vmem:[%s1343_s17 + $0x68] sm:$0xff] %v1050_v43   ;;  %v516_v48 = vadd.f32 %v1131_v46, %v1328_v24  ;;  %v580_v49 = vadd.f32 %v1147_v47, %v1328_v24  ;;  %v507_v50 = vpop.f32.mrb[13].mxu0  ;;  %v571_v51 = vpop.f32.mrb[13].mxu1 }
 0x114   : > { %1065 = vst [vmem:[%s1343_s17 + $0x20] sm:$0xff] %v1005_v44   ;;  %1073 = vst [vmem:[%s1343_s17 + $0x60] sm:$0xff] %v1045_v45   ;;  %v508_v52 = vadd.f32 %v1328_v24, %v507_v50  ;;  %v572_v53 = vadd.f32 %v1328_v24, %v571_v51  ;;  %v1132_v54 = vpop.f32.mrb[14].mxu0  ;;  %v1148_v55 = vpop.f32.mrb[14].mxu1 }
 0x115   : > { %v519_v56 = vadd.f32 %v1132_v54, %v1328_v24  ;;  %v583_v57 = vadd.f32 %v1148_v55, %v1328_v24  ;;  %v510_v58 = vpop.f32.mrb[15].mxu0  ;;  %v574_v59 = vpop.f32.mrb[15].mxu1  ;;  %v600_v62 = vmax.f32 %v516_v48, 0.0  ;;  %v616_v63 = vmax.f32 %v580_v49, 0.0 }
 0x116   : > { %v511_v60 = vadd.f32 %v1328_v24, %v510_v58  ;;  %v575_v61 = vadd.f32 %v1328_v24, %v574_v59  ;;  %v598_v2 = vmax.f32 %v508_v52, 0.0  ;;  %v614_v3 = vmax.f32 %v572_v53, 0.0 }
 0x117   : > { %v601_v0 = vmax.f32 %v519_v56, 0.0  ;;  %v617_v1 = vmax.f32 %v583_v57, 0.0 }
 0x118   : > { %v599_v4 = vmax.f32 %v511_v60, 0.0  ;;  %v615_v5 = vmax.f32 %v575_v61, 0.0 }
 0x119   : > { %v1020_v6 = vpack.c.bf16 %v601_v0, %v600_v62  ;;  %v1060_v7 = vpack.c.bf16 %v617_v1, %v616_v63 }
 0x11a   : > { %v1015_v8 = vpack.c.bf16 %v599_v4, %v598_v2  ;;  %v1055_v9 = vpack.c.bf16 %v615_v5, %v614_v3 }
 0x11b   : > { %1068 = vst [vmem:[%s1343_s17 + $0x38] sm:$0xff] %v1020_v6   ;;  %1076 = vst [vmem:[%s1343_s17 + $0x78] sm:$0xff] %v1060_v7  }
 0x11c   : > { %1067 = vst [vmem:[%s1343_s17 + $0x30] sm:$0xff] %v1015_v8   ;;  %1075 = vst [vmem:[%s1343_s17 + $0x70] sm:$0xff] %v1055_v9  }
 0x11d PF: > { %s13_s14 = sadd.s32 1, %s1235_s14   ;;  %s1398_s12 = smov %s1231_s13 }
 0x11e   : > { %p10_p5 = scmp.ge.s32.totalorder %s13_s14, 10   ;;  %s1399_s13 = smov %s1401_s15 }
 0x120   :  { %12 = sbr.rel (!%p10_p5) target bundleno = 2 (0x2), region = 68 }

// kernel: vae_forward.11
= control target key start
LH: loop header
LB: loop body
LE: loop exit
PB: predicated region body
PF: predicated region fallthrough
CT: control target
= control target key end

     0   :  { %s2183_s12 = smov 0   ;;  %s2185_s13 = smov 0   ;;  %s2440_s0 = inlined_call_operand.vmem [shape: bf16[512,512], index: 0, kind: input, shape index: {}]   ;;  %s2441_s1 = inlined_call_operand.vmem [shape: bf16[512,128], index: 1, kind: input, shape index: {}]   ;;  %s2442_s2 = inlined_call_operand.vmem [shape: f32[1,128], index: 2, kind: input, shape index: {}]   ;;  %s2443_s3 = inlined_call_operand.vmem [shape: bf16[512,128], index: 3, kind: output, shape index: {}]  }
   0x1   :  { %s2187_s14 = smov 0  }
   0x2 LB: > { %s25_s15 = sadd.s32 1, %s2157_s13  ;;  %p1498_p0 = scmp.ge.s32.totalorder %s2161_s14, 1  ;;  %s2161_s14 = sphi %s2187_s14, %s13_s14   ;;  %s2157_s13 = sphi %s2185_s13, %s2445_s13   ;;  %s2153_s12 = sphi %s2183_s12, %s2444_s12  }
   0x3   : > { %p27_p1 = scmp.ge.s32.totalorder %s25_s15, 2  ;;  %p170_p2 = scmp.lt.s32.totalorder %s2161_s14, 3 }
   0x5   : > { %s2447_s15 = smov (%p27_p1, %s25_s15), 0  ;;  %p171_p3 = pnand %p1498_p0, %p170_p2 }
   0x6   : > { %v2011_v0 = vld [vmem:[%s2441_s1 + $0x40] sm:$0xff] (!%p171_p3)   ;;  %v2015_v4 = vld [vmem:[%s2441_s1 + $0x48] sm:$0xff] (!%p171_p3)   ;;  %v2019_v8 = vld [vmem:[%s2441_s1 + $0x50] sm:$0xff] (!%p171_p3)   ;;  %s1499_s25 = sshll.u32 (!%p171_p3), %s2153_s12, 5 }
   0x7   : > { %174 = sbr.rel (%p171_p3) target bundleno = 386 (0x182), region = 32  ;;  %v2012_v1 = vld [vmem:[%s2441_s1 + $0xc0] sm:$0xff] (!%p171_p3)   ;;  %1763 = vmatprep.subr.bf16.mxu0 (!%p171_p3), %v2011_v0  ;;  %v2016_v5 = vld [vmem:[%s2441_s1 + $0xc8] sm:$0xff] (!%p171_p3)   ;;  %v2020_v9 = vld [vmem:[%s2441_s1 + $0xd0] sm:$0xff] (!%p171_p3)   ;;  %p206_p4 = scmp.lt.s32.totalorder (!%p171_p3), %s1499_s25, 63 }
   0x8   : > { %v2013_v2 = vld [vmem:[%s2441_s1] sm:$0xff] (!%p171_p3)   ;;  %1875 = vmatprep.subr.bf16.mxu1 (!%p171_p3), %v2012_v1  ;;  %v2017_v6 = vld [vmem:[%s2441_s1 + $0x8] sm:$0xff] (!%p171_p3)   ;;  %v2021_v10 = vld [vmem:[%s2441_s1 + $0x10] sm:$0xff] (!%p171_p3)  }
   0x9   : > { %v2014_v3 = vld [vmem:[%s2441_s1 + $0x80] sm:$0xff] (!%p171_p3)   ;;  %1764 = vmatpush3.bf16.msra.mxu0 (!%p171_p3), %v2013_v2  ;;  %v2018_v7 = vld [vmem:[%s2441_s1 + $0x88] sm:$0xff] (!%p171_p3)   ;;  %v2022_v11 = vld [vmem:[%s2441_s1 + $0x90] sm:$0xff] (!%p171_p3)  }
   0xa   : > { %1876 = vmatpush3.bf16.msra.mxu1 (!%p171_p3), %v2014_v3  ;;  %1765 = vmatprep.subr.bf16.mxu0 (!%p171_p3), %v2015_v4  ;;  %v2023_v12 = vld [vmem:[%s2441_s1 + $0x58] sm:$0xff] (!%p171_p3)   ;;  %v2027_v16 = vld [vmem:[%s2441_s1 + $0x60] sm:$0xff] (!%p171_p3)   ;;  %v2031_v20 = vld [vmem:[%s2441_s1 + $0x68] sm:$0xff] (!%p171_p3)  }
   0xb   : > { %1877 = vmatprep.subr.bf16.mxu1 (!%p171_p3), %v2016_v5  ;;  %v2024_v13 = vld [vmem:[%s2441_s1 + $0xd8] sm:$0xff] (!%p171_p3)   ;;  %v2028_v17 = vld [vmem:[%s2441_s1 + $0xe0] sm:$0xff] (!%p171_p3)   ;;  %v2032_v21 = vld [vmem:[%s2441_s1 + $0xe8] sm:$0xff] (!%p171_p3)  }
   0xc   : > { %v2025_v14 = vld [vmem:[%s2441_s1 + $0x18] sm:$0xff] (!%p171_p3)   ;;  %v2029_v18 = vld [vmem:[%s2441_s1 + $0x20] sm:$0xff] (!%p171_p3)   ;;  %v2033_v22 = vld [vmem:[%s2441_s1 + $0x28] sm:$0xff] (!%p171_p3)  }
   0xd   : > { %1766 = vmatpush3.bf16.msra.mxu0 (!%p171_p3), %v2017_v6  ;;  %v2026_v15 = vld [vmem:[%s2441_s1 + $0x98] sm:$0xff] (!%p171_p3)   ;;  %v2030_v19 = vld [vmem:[%s2441_s1 + $0xa0] sm:$0xff] (!%p171_p3)   ;;  %v2034_v23 = vld [vmem:[%s2441_s1 + $0xa8] sm:$0xff] (!%p171_p3)  }
   0xe   : > { %1878 = vmatpush3.bf16.msra.mxu1 %v2018_v7  ;;  %1767 = vmatprep.subr.bf16.mxu0 %v2019_v8  ;;  %s2449_s25 = smov (!%p206_p4, %s1499_s25), 63  ;;  %v2035_v24 = vld [vmem:[%s2441_s1 + $0x70] sm:$0xff]   ;;  %v2039_v28 = vld [vmem:[%s2441_s1 + $0x78] sm:$0xff]  }
   0xf   : > { %1879 = vmatprep.subr.bf16.mxu1 %v2020_v9  ;;  %v2036_v25 = vld [vmem:[%s2441_s1 + $0xf0] sm:$0xff]   ;;  %s1635_s24 = sshll.u32 %s2449_s25, 4  ;;  %v2040_v29 = vld [vmem:[%s2441_s1 + $0xf8] sm:$0xff]   ;;  %s1503_s17 = sshll.u32 %s2449_s25, 2 }
  0x10   : > { %v2037_v26 = vld [vmem:[%s2441_s1 + $0x30] sm:$0xff]   ;;  %s2300_s12 = scalar_lea.vmem %s2440_s0, %s1635_s24  ;;  %v2041_v30 = vld [vmem:[%s2441_s1 + $0x38] sm:$0xff]   ;;  %s2383_s20 = scalar_lea.vmem %s2443_s3, %s1503_s17 }
  0x11   : > { %1768 = vmatpush3.bf16.msra.mxu0 %v2021_v10  ;;  %v2038_v27 = vld [vmem:[%s2441_s1 + $0xb0] sm:$0xff]   ;;  %v2042_v31 = vld [vmem:[%s2441_s1 + $0xb8] sm:$0xff]  }
  0x12   : > { %1880 = vmatpush3.bf16.msra.mxu1 %v2022_v11  ;;  %1769 = vmatprep.subr.bf16.mxu0 %v2023_v12  ;;  %v2043_v32 = vld [vmem:[%s2300_s12] ss:$16 sps:$4 sm:$0xff]   ;;  %v2045_v33 = vld [vmem:[%s2300_s12 + $0x4] ss:$16 sps:$4 sm:$0xff]   ;;  %v2046_v34 = vld [vmem:[%s2300_s12 + $0x8] ss:$16 sps:$4 sm:$0xff]  }
  0x13   : > { %1881 = vmatprep.subr.bf16.mxu1 %v2024_v13  ;;  %v2048_v35 = vld [vmem:[%s2300_s12 + $0xc] ss:$16 sps:$4 sm:$0xff]   ;;  %908 = vmatprep.mubr.bf16.mxu0 %v2045_v33  ;;  %v2049_v36 = vld [vmem:[%s2300_s12 + $0x24] ss:$16 sps:$4 sm:$0xff]   ;;  %v2053_v38 = vld [vmem:[%s2300_s12 + $0x20] ss:$16 sps:$4 sm:$0xff]  }
  0x14   : > { %1069 = vmatprep.mubr.bf16.mxu1 %v2048_v35  ;;  %v2051_v37 = vld [vmem:[%s2300_s12 + $0x2c] ss:$16 sps:$4 sm:$0xff]   ;;  %v2054_v39 = vld [vmem:[%s2300_s12 + $0x28] ss:$16 sps:$4 sm:$0xff]   ;;  %v2055_v40 = vld [vmem:[%s2300_s12 + $0x44] ss:$16 sps:$4 sm:$0xff]  }
  0x15   : > { %1770 = vmatpush3.bf16.msra.mxu0 %v2025_v14  ;;  %v2057_v41 = vld [vmem:[%s2300_s12 + $0x4c] ss:$16 sps:$4 sm:$0xff]   ;;  %v2059_v42 = vld [vmem:[%s2300_s12 + $0x40] ss:$16 sps:$4 sm:$0xff]   ;;  %v2060_v43 = vld [vmem:[%s2300_s12 + $0x48] ss:$16 sps:$4 sm:$0xff]  }
  0x16   : > { %1882 = vmatpush3.bf16.msra.mxu1 %v2026_v15  ;;  %1771 = vmatprep.subr.bf16.mxu0 %v2027_v16  ;;  %v2061_v44 = vld [vmem:[%s2300_s12 + $0x64] ss:$16 sps:$4 sm:$0xff]   ;;  %v2063_v45 = vld [vmem:[%s2300_s12 + $0x6c] ss:$16 sps:$4 sm:$0xff]   ;;  %v2065_v46 = vld [vmem:[%s2300_s12 + $0x60] ss:$16 sps:$4 sm:$0xff]  }
  0x17   : > { %1883 = vmatprep.subr.bf16.mxu1 %v2028_v17  ;;  %v2066_v47 = vld [vmem:[%s2300_s12 + $0x68] ss:$16 sps:$4 sm:$0xff]   ;;  %v2067_v48 = vld [vmem:[%s2300_s12 + $0x84] ss:$16 sps:$4 sm:$0xff]   ;;  %v2069_v49 = vld [vmem:[%s2300_s12 + $0x8c] ss:$16 sps:$4 sm:$0xff]  }
  0x18   : > { %v2071_v50 = vld [vmem:[%s2300_s12 + $0x80] ss:$16 sps:$4 sm:$0xff]   ;;  %v2072_v51 = vld [vmem:[%s2300_s12 + $0x88] ss:$16 sps:$4 sm:$0xff]   ;;  %v2073_v52 = vld [vmem:[%s2300_s12 + $0xa4] ss:$16 sps:$4 sm:$0xff]  }
  0x19   : > { %1772 = vmatpush3.bf16.msra.mxu0 %v2029_v18  ;;  %v2075_v53 = vld [vmem:[%s2300_s12 + $0xac] ss:$16 sps:$4 sm:$0xff]   ;;  %v2077_v54 = vld [vmem:[%s2300_s12 + $0xa0] ss:$16 sps:$4 sm:$0xff]   ;;  %v2078_v55 = vld [vmem:[%s2300_s12 + $0xa8] ss:$16 sps:$4 sm:$0xff]  }
  0x1a   : > { %1884 = vmatpush3.bf16.msra.mxu1 %v2030_v19  ;;  %1773 = vmatprep.subr.bf16.mxu0 %v2031_v20  ;;  %v2079_v56 = vld [vmem:[%s2300_s12 + $0xc4] ss:$16 sps:$4 sm:$0xff]   ;;  %v2081_v57 = vld [vmem:[%s2300_s12 + $0xcc] ss:$16 sps:$4 sm:$0xff]   ;;  %v2083_v58 = vld [vmem:[%s2300_s12 + $0xc0] ss:$16 sps:$4 sm:$0xff]  }
  0x1b   : > { %1885 = vmatprep.subr.bf16.mxu1 %v2032_v21  ;;  %v2084_v59 = vld [vmem:[%s2300_s12 + $0xc8] ss:$16 sps:$4 sm:$0xff]   ;;  %v2085_v60 = vld [vmem:[%s2300_s12 + $0xe4] ss:$16 sps:$4 sm:$0xff]   ;;  %v2087_v61 = vld [vmem:[%s2300_s12 + $0xec] ss:$16 sps:$4 sm:$0xff]  }
  0x1c   : > { %v2089_v62 = vld [vmem:[%s2300_s12 + $0xe0] ss:$16 sps:$4 sm:$0xff]   ;;  %v2090_v63 = vld [vmem:[%s2300_s12 + $0xe8] ss:$16 sps:$4 sm:$0xff]   ;;  %v2091_v0 = vld [vmem:[%s2300_s12 + $0x104] ss:$16 sps:$4 sm:$0xff]  }
  0x1d   : > { %1774 = vmatpush3.bf16.msra.mxu0 %v2033_v22  ;;  %v2093_v1 = vld [vmem:[%s2300_s12 + $0x10c] ss:$16 sps:$4 sm:$0xff]   ;;  %v2095_v2 = vld [vmem:[%s2300_s12 + $0x100] ss:$16 sps:$4 sm:$0xff]   ;;  %v2096_v3 = vld [vmem:[%s2300_s12 + $0x108] ss:$16 sps:$4 sm:$0xff]  }
  0x1e   : > { %1886 = vmatpush3.bf16.msra.mxu1 %v2034_v23  ;;  %1775 = vmatprep.subr.bf16.mxu0 %v2035_v24  ;;  %v2097_v4 = vld [vmem:[%s2300_s12 + $0x124] ss:$16 sps:$4 sm:$0xff]   ;;  %v2099_v5 = vld [vmem:[%s2300_s12 + $0x12c] ss:$16 sps:$4 sm:$0xff]   ;;  %v2101_v6 = vld [vmem:[%s2300_s12 + $0x120] ss:$16 sps:$4 sm:$0xff]  }
  0x1f   : > { %1887 = vmatprep.subr.bf16.mxu1 %v2036_v25  ;;  %v2102_v7 = vld [vmem:[%s2300_s12 + $0x128] ss:$16 sps:$4 sm:$0xff]   ;;  %v2103_v8 = vld [vmem:[%s2300_s12 + $0x144] ss:$16 sps:$4 sm:$0xff]   ;;  %v2105_v9 = vld [vmem:[%s2300_s12 + $0x14c] ss:$16 sps:$4 sm:$0xff]  }
  0x20   : > { %v2107_v10 = vld [vmem:[%s2300_s12 + $0x140] ss:$16 sps:$4 sm:$0xff]   ;;  %v2108_v11 = vld [vmem:[%s2300_s12 + $0x148] ss:$16 sps:$4 sm:$0xff]   ;;  %v2109_v12 = vld [vmem:[%s2300_s12 + $0x164] ss:$16 sps:$4 sm:$0xff]  }
  0x21   : > { %1776 = vmatpush3.bf16.msra.mxu0 %v2037_v26  ;;  %v2111_v13 = vld [vmem:[%s2300_s12 + $0x16c] ss:$16 sps:$4 sm:$0xff]   ;;  %v2113_v14 = vld [vmem:[%s2300_s12 + $0x160] ss:$16 sps:$4 sm:$0xff]   ;;  %v2114_v15 = vld [vmem:[%s2300_s12 + $0x168] ss:$16 sps:$4 sm:$0xff]  }
  0x22   : > { %1888 = vmatpush3.bf16.msra.mxu1 %v2038_v27  ;;  %1777 = vmatprep.subr.bf16.mxu0 %v2039_v28  ;;  %v2115_v16 = vld [vmem:[%s2300_s12 + $0x184] ss:$16 sps:$4 sm:$0xff]   ;;  %v2117_v17 = vld [vmem:[%s2300_s12 + $0x18c] ss:$16 sps:$4 sm:$0xff]   ;;  %v2119_v18 = vld [vmem:[%s2300_s12 + $0x180] ss:$16 sps:$4 sm:$0xff]  }
  0x23   : > { %1889 = vmatprep.subr.bf16.mxu1 %v2040_v29  ;;  %v2120_v19 = vld [vmem:[%s2300_s12 + $0x188] ss:$16 sps:$4 sm:$0xff]   ;;  %v2121_v20 = vld [vmem:[%s2300_s12 + $0x1a4] ss:$16 sps:$4 sm:$0xff]   ;;  %v2123_v21 = vld [vmem:[%s2300_s12 + $0x1ac] ss:$16 sps:$4 sm:$0xff]  }
  0x24   : > { %v2125_v22 = vld [vmem:[%s2300_s12 + $0x1a0] ss:$16 sps:$4 sm:$0xff]   ;;  %v2126_v23 = vld [vmem:[%s2300_s12 + $0x1a8] ss:$16 sps:$4 sm:$0xff]   ;;  %v2127_v24 = vld [vmem:[%s2300_s12 + $0x1c4] ss:$16 sps:$4 sm:$0xff]  }
  0x25   : > { %1778 = vmatpush3.bf16.msra.mxu0 %v2041_v30  ;;  %v2129_v25 = vld [vmem:[%s2300_s12 + $0x1cc] ss:$16 sps:$4 sm:$0xff]   ;;  %v2131_v26 = vld [vmem:[%s2300_s12 + $0x1c0] ss:$16 sps:$4 sm:$0xff]   ;;  %v2132_v27 = vld [vmem:[%s2300_s12 + $0x1c8] ss:$16 sps:$4 sm:$0xff]  }
  0x26   : > { %1890 = vmatpush3.bf16.msra.mxu1 %v2042_v31  ;;  %v2133_v28 = vld [vmem:[%s2300_s12 + $0x1e4] ss:$16 sps:$4 sm:$0xff]   ;;  %v2135_v29 = vld [vmem:[%s2300_s12 + $0x1ec] ss:$16 sps:$4 sm:$0xff]   ;;  %v2137_v30 = vld [vmem:[%s2300_s12 + $0x1e0] ss:$16 sps:$4 sm:$0xff]  }
  0x27   : > { %v2138_v31 = vld [vmem:[%s2300_s12 + $0x1e8] ss:$16 sps:$4 sm:$0xff]  }
  0x28   : > { %909 = vmatmul.mubr.bf16.vlgmr.msra.gmra.mrb[0].mxu0 %v2043_v32 }
  0x29   : > { %1070 = vmatmul.mubr.bf16.vlgmr.msra.gmra.mrb[0].mxu1 %v2046_v34  ;;  %916 = vmatprep.mubr.bf16.mxu0 %v2049_v36  ;;  %v2375_v34 = vld [vmem:[%s2442_s2] ss:$0 sm:$0xff] }
  0x2a   : > { %1077 = vmatprep.mubr.bf16.mxu1 %v2051_v37 }
  0x30   : > { %917 = vmatmul.mubr.bf16.gmra.mrb[4].mxu0 %v2053_v38 }
  0x31   : > { %1078 = vmatmul.mubr.bf16.gmra.mrb[4].mxu1 %v2054_v39  ;;  %924 = vmatprep.mubr.bf16.mxu0 %v2055_v40 }
  0x32   : > { %1085 = vmatprep.mubr.bf16.mxu1 %v2057_v41 }
  0x38   : > { %925 = vmatmul.mubr.bf16.gmra.mrb[8].mxu0 %v2059_v42 }
  0x39   : > { %1086 = vmatmul.mubr.bf16.gmra.mrb[8].mxu1 %v2060_v43  ;;  %932 = vmatprep.mubr.bf16.mxu0 %v2061_v44 }
  0x3a   : > { %1093 = vmatprep.mubr.bf16.mxu1 %v2063_v45 }
  0x40   : > { %933 = vmatmul.mubr.bf16.gmra.mrb[12].mxu0 %v2065_v46 }
  0x41   : > { %1094 = vmatmul.mubr.bf16.gmra.mrb[12].mxu1 %v2066_v47  ;;  %940 = vmatprep.mubr.bf16.mxu0 %v2067_v48 }
  0x42   : > { %1101 = vmatprep.mubr.bf16.mxu1 %v2069_v49 }
  0x48   : > { %941 = vmatmul.mubr.bf16.gmra.mrb[16].mxu0 %v2071_v50 }
  0x49   : > { %1102 = vmatmul.mubr.bf16.gmra.mrb[16].mxu1 %v2072_v51  ;;  %948 = vmatprep.mubr.bf16.mxu0 %v2073_v52 }
  0x4a   : > { %1109 = vmatprep.mubr.bf16.mxu1 %v2075_v53 }
  0x50   : > { %949 = vmatmul.mubr.bf16.gmra.mrb[20].mxu0 %v2077_v54 }
  0x51   : > { %1110 = vmatmul.mubr.bf16.gmra.mrb[20].mxu1 %v2078_v55  ;;  %956 = vmatprep.mubr.bf16.mxu0 %v2079_v56 }
  0x52   : > { %1117 = vmatprep.mubr.bf16.mxu1 %v2081_v57 }
  0x58   : > { %957 = vmatmul.mubr.bf16.gmra.mrb[24].mxu0 %v2083_v58 }
  0x59   : > { %1118 = vmatmul.mubr.bf16.gmra.mrb[24].mxu1 %v2084_v59  ;;  %964 = vmatprep.mubr.bf16.mxu0 %v2085_v60 }
  0x5a   : > { %1125 = vmatprep.mubr.bf16.mxu1 %v2087_v61 }
  0x60   : > { %965 = vmatmul.mubr.bf16.gmra.mrb[28].mxu0 %v2089_v62 }
  0x61   : > { %1126 = vmatmul.mubr.bf16.gmra.mrb[28].mxu1 %v2090_v63  ;;  %972 = vmatprep.mubr.bf16.mxu0 %v2091_v0 }
  0x62   : > { %1133 = vmatprep.mubr.bf16.mxu1 %v2093_v1 }
  0x68   : > { %973 = vmatmul.mubr.bf16.gmra.mrb[32].mxu0 %v2095_v2 }
  0x69   : > { %1134 = vmatmul.mubr.bf16.gmra.mrb[32].mxu1 %v2096_v3  ;;  %980 = vmatprep.mubr.bf16.mxu0 %v2097_v4 }
  0x6a   : > { %1141 = vmatprep.mubr.bf16.mxu1 %v2099_v5 }
  0x70   : > { %981 = vmatmul.mubr.bf16.gmra.mrb[36].mxu0 %v2101_v6 }
  0x71   : > { %1142 = vmatmul.mubr.bf16.gmra.mrb[36].mxu1 %v2102_v7  ;;  %988 = vmatprep.mubr.bf16.mxu0 %v2103_v8 }
  0x72   : > { %1149 = vmatprep.mubr.bf16.mxu1 %v2105_v9 }
  0x78   : > { %989 = vmatmul.mubr.bf16.gmra.mrb[40].mxu0 %v2107_v10 }
  0x79   : > { %1150 = vmatmul.mubr.bf16.gmra.mrb[40].mxu1 %v2108_v11  ;;  %996 = vmatprep.mubr.bf16.mxu0 %v2109_v12 }
  0x7a   : > { %1157 = vmatprep.mubr.bf16.mxu1 %v2111_v13 }
  0x80   : > { %997 = vmatmul.mubr.bf16.gmra.mrb[44].mxu0 %v2113_v14 }
  0x81   : > { %1158 = vmatmul.mubr.bf16.gmra.mrb[44].mxu1 %v2114_v15  ;;  %1004 = vmatprep.mubr.bf16.mxu0 %v2115_v16 }
  0x82   : > { %1165 = vmatprep.mubr.bf16.mxu1 %v2117_v17 }
  0x88   : > { %1005 = vmatmul.mubr.bf16.gmra.mrb[48].mxu0 %v2119_v18 }
  0x89   : > { %1166 = vmatmul.mubr.bf16.gmra.mrb[48].mxu1 %v2120_v19  ;;  %1012 = vmatprep.mubr.bf16.mxu0 %v2121_v20 }
  0x8a   : > { %1173 = vmatprep.mubr.bf16.mxu1 %v2123_v21 }
  0x90   : > { %1013 = vmatmul.mubr.bf16.gmra.mrb[52].mxu0 %v2125_v22 }
  0x91   : > { %1174 = vmatmul.mubr.bf16.gmra.mrb[52].mxu1 %v2126_v23  ;;  %1020 = vmatprep.mubr.bf16.mxu0 %v2127_v24 }
  0x92   : > { %1181 = vmatprep.mubr.bf16.mxu1 %v2129_v25 }
  0x98   : > { %1021 = vmatmul.mubr.bf16.gmra.mrb[56].mxu0 %v2131_v26 }
  0x99   : > { %1182 = vmatmul.mubr.bf16.gmra.mrb[56].mxu1 %v2132_v27  ;;  %1028 = vmatprep.mubr.bf16.mxu0 %v2133_v28 }
  0x9a   : > { %1189 = vmatprep.mubr.bf16.mxu1 %v2135_v29 }
  0xa0   : > { %1029 = vmatmul.mubr.bf16.gmra.mrb[60].mxu0 %v2137_v30 }
  0xa1   : > { %1190 = vmatmul.mubr.bf16.gmra.mrb[60].mxu1 %v2138_v31 }
  0xfb   : > { %v1779_v32 = vpop.f32.mrb[0].mxu0 }
  0xfc   : > { %v1891_v33 = vpop.f32.mrb[0].mxu1  ;;  %v1780_v35 = vpop.f32.mrb[1].mxu0 }
  0xfd   : > { %v1781_v36 = vadd.f32 %v1780_v35, %v1779_v32  ;;  %v1892_v37 = vpop.f32.mrb[1].mxu1  ;;  %v1782_v38 = vpop.f32.mrb[2].mxu0 }
  0xfe   : > { %v1893_v39 = vadd.f32 %v1892_v37, %v1891_v33  ;;  %v1894_v40 = vpop.f32.mrb[2].mxu1  ;;  %v1783_v41 = vpop.f32.mrb[3].mxu0 }
  0xff   : > { %v911_v42 = vadd.f32 %v1781_v36, %v2375_v34  ;;  %v1784_v43 = vadd.f32 %v1783_v41, %v1782_v38  ;;  %v1895_v44 = vpop.f32.mrb[3].mxu1 }
 0x100   : > { %v1896_v45 = vadd.f32 %v1895_v44, %v1894_v40 }
 0x101   : > { %v1072_v46 = vadd.f32 %v1893_v39, %v911_v42  ;;  %v914_v47 = vadd.f32 %v1784_v43, %v2375_v34 }
 0x103   : > { %v1075_v48 = vadd.f32 %v1896_v45, %v914_v47  ;;  %v1785_v49 = vpop.f32.mrb[4].mxu0  ;;  %v1198_v52 = vmax.f32 %v1072_v46, 0.0 }
 0x104   : > { %v1897_v50 = vpop.f32.mrb[4].mxu1  ;;  %v1786_v51 = vpop.f32.mrb[5].mxu0 }
 0x105   : > { %v1199_v53 = vmax.f32 %v1075_v48, 0.0  ;;  %v1787_v54 = vadd.f32 %v1786_v51, %v1785_v49  ;;  %v1898_v55 = vpop.f32.mrb[5].mxu1  ;;  %v1788_v56 = vpop.f32.mrb[6].mxu0 }
 0x106   : > { %v1899_v57 = vadd.f32 %v1898_v55, %v1897_v50  ;;  %v1900_v58 = vpop.f32.mrb[6].mxu1  ;;  %v1789_v59 = vpop.f32.mrb[7].mxu0 }
 0x107   : > { %v1671_v60 = vpack.c.bf16 %v1199_v53, %v1198_v52  ;;  %v919_v61 = vadd.f32 %v1787_v54, %v2375_v34  ;;  %v1790_v62 = vadd.f32 %v1789_v59, %v1788_v56  ;;  %v1901_v63 = vpop.f32.mrb[7].mxu1 }
 0x108   : > { %v1902_v0 = vadd.f32 %v1901_v63, %v1900_v58 }
 0x109   : > { %1672 = vst [vmem:[%s2383_s20] sm:$0xff] %v1671_v60   ;;  %v1080_v1 = vadd.f32 %v1899_v57, %v919_v61  ;;  %v922_v2 = vadd.f32 %v1790_v62, %v2375_v34 }
 0x10b   : > { %v1083_v3 = vadd.f32 %v1902_v0, %v922_v2  ;;  %v1791_v4 = vpop.f32.mrb[8].mxu0  ;;  %v1200_v7 = vmax.f32 %v1080_v1, 0.0 }
 0x10c   : > { %v1903_v5 = vpop.f32.mrb[8].mxu1  ;;  %v1792_v6 = vpop.f32.mrb[9].mxu0 }
 0x10d   : > { %v1201_v8 = vmax.f32 %v1083_v3, 0.0  ;;  %v1793_v9 = vadd.f32 %v1792_v6, %v1791_v4  ;;  %v1904_v10 = vpop.f32.mrb[9].mxu1  ;;  %v1794_v11 = vpop.f32.mrb[10].mxu0 }
 0x10e   : > { %v1905_v12 = vadd.f32 %v1904_v10, %v1903_v5  ;;  %v1906_v13 = vpop.f32.mrb[10].mxu1  ;;  %v1795_v14 = vpop.f32.mrb[11].mxu0 }
 0x10f   : > { %v1676_v15 = vpack.c.bf16 %v1201_v8, %v1200_v7  ;;  %v927_v16 = vadd.f32 %v1793_v9, %v2375_v34  ;;  %v1796_v17 = vadd.f32 %v1795_v14, %v1794_v11  ;;  %v1907_v18 = vpop.f32.mrb[11].mxu1 }
 0x110   : > { %v1908_v19 = vadd.f32 %v1907_v18, %v1906_v13 }
 0x111   : > { %1748 = vst [vmem:[%s2383_s20 + $0x8] sm:$0xff] %v1676_v15   ;;  %v1088_v20 = vadd.f32 %v1905_v12, %v927_v16  ;;  %v930_v21 = vadd.f32 %v1796_v17, %v2375_v34 }
 0x113   : > { %v1091_v22 = vadd.f32 %v1908_v19, %v930_v21  ;;  %v1797_v23 = vpop.f32.mrb[12].mxu0  ;;  %v1202_v26 = vmax.f32 %v1088_v20, 0.0 }
 0x114   : > { %v1909_v24 = vpop.f32.mrb[12].mxu1  ;;  %v1798_v25 = vpop.f32.mrb[13].mxu0 }
 0x115   : > { %v1203_v27 = vmax.f32 %v1091_v22, 0.0  ;;  %v1799_v28 = vadd.f32 %v1798_v25, %v1797_v23  ;;  %v1910_v29 = vpop.f32.mrb[13].mxu1  ;;  %v1800_v30 = vpop.f32.mrb[14].mxu0 }
 0x116   : > { %v1911_v31 = vadd.f32 %v1910_v29, %v1909_v24  ;;  %v1912_v32 = vpop.f32.mrb[14].mxu1  ;;  %v1801_v33 = vpop.f32.mrb[15].mxu0 }
 0x117   : > { %v1681_v35 = vpack.c.bf16 %v1203_v27, %v1202_v26  ;;  %v935_v36 = vadd.f32 %v1799_v28, %v2375_v34  ;;  %v1802_v37 = vadd.f32 %v1801_v33, %v1800_v30  ;;  %v1913_v38 = vpop.f32.mrb[15].mxu1 }
 0x118   : > { %v1914_v39 = vadd.f32 %v1913_v38, %v1912_v32 }
 0x119   : > { %1749 = vst [vmem:[%s2383_s20 + $0x10] sm:$0xff] %v1681_v35   ;;  %v1096_v40 = vadd.f32 %v1911_v31, %v935_v36  ;;  %v938_v41 = vadd.f32 %v1802_v37, %v2375_v34 }
 0x11b   : > { %v1099_v42 = vadd.f32 %v1914_v39, %v938_v41  ;;  %v1803_v43 = vpop.f32.mrb[16].mxu0  ;;  %v1204_v46 = vmax.f32 %v1096_v40, 0.0 }
 0x11c   : > { %v1915_v44 = vpop.f32.mrb[16].mxu1  ;;  %v1804_v45 = vpop.f32.mrb[17].mxu0 }
 0x11d   : > { %v1205_v47 = vmax.f32 %v1099_v42, 0.0  ;;  %v1805_v48 = vadd.f32 %v1804_v45, %v1803_v43  ;;  %v1916_v49 = vpop.f32.mrb[17].mxu1  ;;  %v1806_v50 = vpop.f32.mrb[18].mxu0 }
 0x11e   : > { %v1917_v51 = vadd.f32 %v1916_v49, %v1915_v44  ;;  %v1918_v52 = vpop.f32.mrb[18].mxu1  ;;  %v1807_v53 = vpop.f32.mrb[19].mxu0 }
 0x11f   : > { %v1686_v54 = vpack.c.bf16 %v1205_v47, %v1204_v46  ;;  %v943_v55 = vadd.f32 %v1805_v48, %v2375_v34  ;;  %v1808_v56 = vadd.f32 %v1807_v53, %v1806_v50  ;;  %v1919_v57 = vpop.f32.mrb[19].mxu1 }
 0x120   : > { %v1920_v58 = vadd.f32 %v1919_v57, %v1918_v52 }
 0x121   : > { %1750 = vst [vmem:[%s2383_s20 + $0x18] sm:$0xff] %v1686_v54   ;;  %v1104_v59 = vadd.f32 %v1917_v51, %v943_v55  ;;  %v946_v60 = vadd.f32 %v1808_v56, %v2375_v34 }
 0x123   : > { %v1107_v61 = vadd.f32 %v1920_v58, %v946_v60  ;;  %v1809_v62 = vpop.f32.mrb[20].mxu0  ;;  %v1206_v1 = vmax.f32 %v1104_v59, 0.0 }
 0x124   : > { %v1921_v63 = vpop.f32.mrb[20].mxu1  ;;  %v1810_v0 = vpop.f32.mrb[21].mxu0 }
 0x125   : > { %v1207_v2 = vmax.f32 %v1107_v61, 0.0  ;;  %v1811_v3 = vadd.f32 %v1810_v0, %v1809_v62  ;;  %v1922_v4 = vpop.f32.mrb[21].mxu1  ;;  %v1812_v5 = vpop.f32.mrb[22].mxu0 }
 0x126   : > { %v1923_v6 = vadd.f32 %v1922_v4, %v1921_v63  ;;  %v1924_v7 = vpop.f32.mrb[22].mxu1  ;;  %v1813_v8 = vpop.f32.mrb[23].mxu0 }
 0x127   : > { %v1691_v9 = vpack.c.bf16 %v1207_v2, %v1206_v1  ;;  %v951_v10 = vadd.f32 %v1811_v3, %v2375_v34  ;;  %v1814_v11 = vadd.f32 %v1813_v8, %v1812_v5  ;;  %v1925_v12 = vpop.f32.mrb[23].mxu1 }
 0x128   : > { %v1926_v13 = vadd.f32 %v1925_v12, %v1924_v7 }
 0x129   : > { %1751 = vst [vmem:[%s2383_s20 + $0x20] sm:$0xff] %v1691_v9   ;;  %v1112_v14 = vadd.f32 %v1923_v6, %v951_v10  ;;  %v954_v15 = vadd.f32 %v1814_v11, %v2375_v34 }
 0x12b   : > { %v1115_v16 = vadd.f32 %v1926_v13, %v954_v15  ;;  %v1815_v17 = vpop.f32.mrb[24].mxu0  ;;  %v1208_v20 = vmax.f32 %v1112_v14, 0.0 }
 0x12c   : > { %v1927_v18 = vpop.f32.mrb[24].mxu1  ;;  %v1816_v19 = vpop.f32.mrb[25].mxu0 }
 0x12d   : > { %v1209_v21 = vmax.f32 %v1115_v16, 0.0  ;;  %v1817_v22 = vadd.f32 %v1816_v19, %v1815_v17  ;;  %v1928_v23 = vpop.f32.mrb[25].mxu1  ;;  %v1818_v24 = vpop.f32.mrb[26].mxu0 }
 0x12e   : > { %v1929_v25 = vadd.f32 %v1928_v23, %v1927_v18  ;;  %v1930_v26 = vpop.f32.mrb[26].mxu1  ;;  %v1819_v27 = vpop.f32.mrb[27].mxu0 }
 0x12f   : > { %v1696_v28 = vpack.c.bf16 %v1209_v21, %v1208_v20  ;;  %v959_v29 = vadd.f32 %v1817_v22, %v2375_v34  ;;  %v1820_v30 = vadd.f32 %v1819_v27, %v1818_v24  ;;  %v1931_v31 = vpop.f32.mrb[27].mxu1 }
 0x130   : > { %v1932_v32 = vadd.f32 %v1931_v31, %v1930_v26 }
 0x131   : > { %1752 = vst [vmem:[%s2383_s20 + $0x28] sm:$0xff] %v1696_v28   ;;  %v1120_v33 = vadd.f32 %v1929_v25, %v959_v29  ;;  %v962_v35 = vadd.f32 %v1820_v30, %v2375_v34 }
 0x133   : > { %v1123_v36 = vadd.f32 %v1932_v32, %v962_v35  ;;  %v1821_v37 = vpop.f32.mrb[28].mxu0  ;;  %v1210_v40 = vmax.f32 %v1120_v33, 0.0 }
 0x134   : > { %v1933_v38 = vpop.f32.mrb[28].mxu1  ;;  %v1822_v39 = vpop.f32.mrb[29].mxu0 }
 0x135   : > { %v1211_v41 = vmax.f32 %v1123_v36, 0.0  ;;  %v1823_v42 = vadd.f32 %v1822_v39, %v1821_v37  ;;  %v1934_v43 = vpop.f32.mrb[29].mxu1  ;;  %v1824_v44 = vpop.f32.mrb[30].mxu0 }
 0x136   : > { %v1935_v45 = vadd.f32 %v1934_v43, %v1933_v38  ;;  %v1936_v46 = vpop.f32.mrb[30].mxu1  ;;  %v1825_v47 = vpop.f32.mrb[31].mxu0 }
 0x137   : > { %v1701_v48 = vpack.c.bf16 %v1211_v41, %v1210_v40  ;;  %v967_v49 = vadd.f32 %v1823_v42, %v2375_v34  ;;  %v1826_v50 = vadd.f32 %v1825_v47, %v1824_v44  ;;  %v1937_v51 = vpop.f32.mrb[31].mxu1 }
 0x138   : > { %v1938_v52 = vadd.f32 %v1937_v51, %v1936_v46 }
 0x139   : > { %1753 = vst [vmem:[%s2383_s20 + $0x30] sm:$0xff] %v1701_v48   ;;  %v1128_v53 = vadd.f32 %v1935_v45, %v967_v49  ;;  %v970_v54 = vadd.f32 %v1826_v50, %v2375_v34 }
 0x13b   : > { %v1131_v55 = vadd.f32 %v1938_v52, %v970_v54  ;;  %v1827_v56 = vpop.f32.mrb[32].mxu0  ;;  %v1212_v59 = vmax.f32 %v1128_v53, 0.0 }
 0x13c   : > { %v1939_v57 = vpop.f32.mrb[32].mxu1  ;;  %v1828_v58 = vpop.f32.mrb[33].mxu0 }
 0x13d   : > { %v1213_v60 = vmax.f32 %v1131_v55, 0.0  ;;  %v1829_v61 = vadd.f32 %v1828_v58, %v1827_v56  ;;  %v1940_v62 = vpop.f32.mrb[33].mxu1  ;;  %v1830_v63 = vpop.f32.mrb[34].mxu0 }
 0x13e   : > { %v1941_v0 = vadd.f32 %v1940_v62, %v1939_v57  ;;  %v1942_v1 = vpop.f32.mrb[34].mxu1  ;;  %v1831_v2 = vpop.f32.mrb[35].mxu0 }
 0x13f   : > { %v1706_v3 = vpack.c.bf16 %v1213_v60, %v1212_v59  ;;  %v975_v4 = vadd.f32 %v1829_v61, %v2375_v34  ;;  %v1832_v5 = vadd.f32 %v1831_v2, %v1830_v63  ;;  %v1943_v6 = vpop.f32.mrb[35].mxu1 }
 0x140   : > { %v1944_v7 = vadd.f32 %v1943_v6, %v1942_v1 }
 0x141   : > { %1754 = vst [vmem:[%s2383_s20 + $0x38] sm:$0xff] %v1706_v3   ;;  %v1136_v8 = vadd.f32 %v1941_v0, %v975_v4  ;;  %v978_v9 = vadd.f32 %v1832_v5, %v2375_v34 }
 0x143   : > { %v1139_v10 = vadd.f32 %v1944_v7, %v978_v9  ;;  %v1833_v11 = vpop.f32.mrb[36].mxu0  ;;  %v1214_v14 = vmax.f32 %v1136_v8, 0.0 }
 0x144   : > { %v1945_v12 = vpop.f32.mrb[36].mxu1  ;;  %v1834_v13 = vpop.f32.mrb[37].mxu0 }
 0x145   : > { %v1215_v15 = vmax.f32 %v1139_v10, 0.0  ;;  %v1835_v16 = vadd.f32 %v1834_v13, %v1833_v11  ;;  %v1946_v17 = vpop.f32.mrb[37].mxu1  ;;  %v1836_v18 = vpop.f32.mrb[38].mxu0 }
 0x146   : > { %v1947_v19 = vadd.f32 %v1946_v17, %v1945_v12  ;;  %v1948_v20 = vpop.f32.mrb[38].mxu1  ;;  %v1837_v21 = vpop.f32.mrb[39].mxu0 }
 0x147   : > { %v1711_v22 = vpack.c.bf16 %v1215_v15, %v1214_v14  ;;  %v983_v23 = vadd.f32 %v1835_v16, %v2375_v34  ;;  %v1838_v24 = vadd.f32 %v1837_v21, %v1836_v18  ;;  %v1949_v25 = vpop.f32.mrb[39].mxu1 }
 0x148   : > { %v1950_v26 = vadd.f32 %v1949_v25, %v1948_v20 }
 0x149   : > { %1755 = vst [vmem:[%s2383_s20 + $0x40] sm:$0xff] %v1711_v22   ;;  %v1144_v27 = vadd.f32 %v1947_v19, %v983_v23  ;;  %v986_v28 = vadd.f32 %v1838_v24, %v2375_v34 }
 0x14b   : > { %v1147_v29 = vadd.f32 %v1950_v26, %v986_v28  ;;  %v1839_v30 = vpop.f32.mrb[40].mxu0  ;;  %v1216_v33 = vmax.f32 %v1144_v27, 0.0 }
 0x14c   : > { %v1951_v31 = vpop.f32.mrb[40].mxu1  ;;  %v1840_v32 = vpop.f32.mrb[41].mxu0 }
 0x14d   : > { %v1217_v35 = vmax.f32 %v1147_v29, 0.0  ;;  %v1841_v36 = vadd.f32 %v1840_v32, %v1839_v30  ;;  %v1952_v37 = vpop.f32.mrb[41].mxu1  ;;  %v1842_v38 = vpop.f32.mrb[42].mxu0 }
 0x14e   : > { %v1953_v39 = vadd.f32 %v1952_v37, %v1951_v31  ;;  %v1954_v40 = vpop.f32.mrb[42].mxu1  ;;  %v1843_v41 = vpop.f32.mrb[43].mxu0 }
 0x14f   : > { %v1716_v42 = vpack.c.bf16 %v1217_v35, %v1216_v33  ;;  %v991_v43 = vadd.f32 %v1841_v36, %v2375_v34  ;;  %v1844_v44 = vadd.f32 %v1843_v41, %v1842_v38  ;;  %v1955_v45 = vpop.f32.mrb[43].mxu1 }
 0x150   : > { %v1956_v46 = vadd.f32 %v1955_v45, %v1954_v40 }
 0x151   : > { %1756 = vst [vmem:[%s2383_s20 + $0x48] sm:$0xff] %v1716_v42   ;;  %v1152_v47 = vadd.f32 %v1953_v39, %v991_v43  ;;  %v994_v48 = vadd.f32 %v1844_v44, %v2375_v34 }
 0x153   : > { %v1155_v49 = vadd.f32 %v1956_v46, %v994_v48  ;;  %v1845_v50 = vpop.f32.mrb[44].mxu0  ;;  %v1218_v53 = vmax.f32 %v1152_v47, 0.0 }
 0x154   : > { %v1957_v51 = vpop.f32.mrb[44].mxu1  ;;  %v1846_v52 = vpop.f32.mrb[45].mxu0 }
 0x155   : > { %v1219_v54 = vmax.f32 %v1155_v49, 0.0  ;;  %v1847_v55 = vadd.f32 %v1846_v52, %v1845_v50  ;;  %v1958_v56 = vpop.f32.mrb[45].mxu1  ;;  %v1848_v57 = vpop.f32.mrb[46].mxu0 }
 0x156   : > { %v1959_v58 = vadd.f32 %v1958_v56, %v1957_v51  ;;  %v1960_v59 = vpop.f32.mrb[46].mxu1  ;;  %v1849_v60 = vpop.f32.mrb[47].mxu0 }
 0x157   : > { %v1721_v61 = vpack.c.bf16 %v1219_v54, %v1218_v53  ;;  %v999_v62 = vadd.f32 %v1847_v55, %v2375_v34  ;;  %v1850_v63 = vadd.f32 %v1849_v60, %v1848_v57  ;;  %v1961_v0 = vpop.f32.mrb[47].mxu1 }
 0x158   : > { %v1962_v1 = vadd.f32 %v1961_v0, %v1960_v59 }
 0x159   : > { %1757 = vst [vmem:[%s2383_s20 + $0x50] sm:$0xff] %v1721_v61   ;;  %v1160_v2 = vadd.f32 %v1959_v58, %v999_v62  ;;  %v1002_v3 = vadd.f32 %v1850_v63, %v2375_v34 }
 0x15b   : > { %v1163_v4 = vadd.f32 %v1962_v1, %v1002_v3  ;;  %v1851_v5 = vpop.f32.mrb[48].mxu0  ;;  %v1220_v8 = vmax.f32 %v1160_v2, 0.0 }
 0x15c   : > { %v1963_v6 = vpop.f32.mrb[48].mxu1  ;;  %v1852_v7 = vpop.f32.mrb[49].mxu0 }
 0x15d   : > { %v1221_v9 = vmax.f32 %v1163_v4, 0.0  ;;  %v1853_v10 = vadd.f32 %v1852_v7, %v1851_v5  ;;  %v1964_v11 = vpop.f32.mrb[49].mxu1  ;;  %v1854_v12 = vpop.f32.mrb[50].mxu0 }
 0x15e   : > { %v1965_v13 = vadd.f32 %v1964_v11, %v1963_v6  ;;  %v1966_v14 = vpop.f32.mrb[50].mxu1  ;;  %v1855_v15 = vpop.f32.mrb[51].mxu0 }
 0x15f   : > { %v1726_v16 = vpack.c.bf16 %v1221_v9, %v1220_v8  ;;  %v1007_v17 = vadd.f32 %v1853_v10, %v2375_v34  ;;  %v1856_v18 = vadd.f32 %v1855_v15, %v1854_v12  ;;  %v1967_v19 = vpop.f32.mrb[51].mxu1 }
 0x160   : > { %v1968_v20 = vadd.f32 %v1967_v19, %v1966_v14 }
 0x161   : > { %1758 = vst [vmem:[%s2383_s20 + $0x58] sm:$0xff] %v1726_v16   ;;  %v1168_v21 = vadd.f32 %v1965_v13, %v1007_v17  ;;  %v1010_v22 = vadd.f32 %v1856_v18, %v2375_v34 }
 0x163   : > { %v1171_v23 = vadd.f32 %v1968_v20, %v1010_v22  ;;  %v1857_v24 = vpop.f32.mrb[52].mxu0  ;;  %v1222_v27 = vmax.f32 %v1168_v21, 0.0 }
 0x164   : > { %v1969_v25 = vpop.f32.mrb[52].mxu1  ;;  %v1858_v26 = vpop.f32.mrb[53].mxu0 }
 0x165   : > { %v1223_v28 = vmax.f32 %v1171_v23, 0.0  ;;  %v1859_v29 = vadd.f32 %v1858_v26, %v1857_v24  ;;  %v1970_v30 = vpop.f32.mrb[53].mxu1  ;;  %v1860_v31 = vpop.f32.mrb[54].mxu0 }
 0x166   : > { %v1971_v32 = vadd.f32 %v1970_v30, %v1969_v25  ;;  %v1972_v33 = vpop.f32.mrb[54].mxu1  ;;  %v1861_v35 = vpop.f32.mrb[55].mxu0 }
 0x167   : > { %v1731_v36 = vpack.c.bf16 %v1223_v28, %v1222_v27  ;;  %v1015_v37 = vadd.f32 %v1859_v29, %v2375_v34  ;;  %v1862_v38 = vadd.f32 %v1861_v35, %v1860_v31  ;;  %v1973_v39 = vpop.f32.mrb[55].mxu1 }
 0x168   : > { %v1974_v40 = vadd.f32 %v1973_v39, %v1972_v33 }
 0x169   : > { %1759 = vst [vmem:[%s2383_s20 + $0x60] sm:$0xff] %v1731_v36   ;;  %v1176_v41 = vadd.f32 %v1971_v32, %v1015_v37  ;;  %v1018_v42 = vadd.f32 %v1862_v38, %v2375_v34 }
 0x16b   : > { %v1179_v43 = vadd.f32 %v1974_v40, %v1018_v42  ;;  %v1863_v44 = vpop.f32.mrb[56].mxu0  ;;  %v1224_v47 = vmax.f32 %v1176_v41, 0.0 }
 0x16c   : > { %v1975_v45 = vpop.f32.mrb[56].mxu1  ;;  %v1864_v46 = vpop.f32.mrb[57].mxu0 }
 0x16d   : > { %v1225_v48 = vmax.f32 %v1179_v43, 0.0  ;;  %v1865_v49 = vadd.f32 %v1864_v46, %v1863_v44  ;;  %v1976_v50 = vpop.f32.mrb[57].mxu1  ;;  %v1866_v51 = vpop.f32.mrb[58].mxu0 }
 0x16e   : > { %v1977_v52 = vadd.f32 %v1976_v50, %v1975_v45  ;;  %v1978_v53 = vpop.f32.mrb[58].mxu1  ;;  %v1867_v54 = vpop.f32.mrb[59].mxu0 }
 0x16f   : > { %v1736_v55 = vpack.c.bf16 %v1225_v48, %v1224_v47  ;;  %v1023_v56 = vadd.f32 %v1865_v49, %v2375_v34  ;;  %v1868_v57 = vadd.f32 %v1867_v54, %v1866_v51  ;;  %v1979_v58 = vpop.f32.mrb[59].mxu1 }
 0x170   : > { %v1980_v59 = vadd.f32 %v1979_v58, %v1978_v53 }
 0x171   : > { %1760 = vst [vmem:[%s2383_s20 + $0x68] sm:$0xff] %v1736_v55   ;;  %v1184_v60 = vadd.f32 %v1977_v52, %v1023_v56  ;;  %v1026_v61 = vadd.f32 %v1868_v57, %v2375_v34 }
 0x173   : > { %v1187_v62 = vadd.f32 %v1980_v59, %v1026_v61  ;;  %v1869_v63 = vpop.f32.mrb[60].mxu0  ;;  %v1226_v2 = vmax.f32 %v1184_v60, 0.0 }
 0x174   : > { %v1981_v0 = vpop.f32.mrb[60].mxu1  ;;  %v1870_v1 = vpop.f32.mrb[61].mxu0 }
 0x175   : > { %v1227_v3 = vmax.f32 %v1187_v62, 0.0  ;;  %v1871_v4 = vadd.f32 %v1870_v1, %v1869_v63  ;;  %v1982_v5 = vpop.f32.mrb[61].mxu1  ;;  %v1872_v6 = vpop.f32.mrb[62].mxu0 }
 0x176   : > { %v1983_v7 = vadd.f32 %v1982_v5, %v1981_v0  ;;  %v1984_v8 = vpop.f32.mrb[62].mxu1  ;;  %v1873_v9 = vpop.f32.mrb[63].mxu0 }
 0x177   : > { %v1741_v10 = vpack.c.bf16 %v1227_v3, %v1226_v2  ;;  %v1031_v11 = vadd.f32 %v1871_v4, %v2375_v34  ;;  %v1874_v12 = vadd.f32 %v1873_v9, %v1872_v6  ;;  %v1985_v13 = vpop.f32.mrb[63].mxu1 }
 0x178   : > { %v1986_v14 = vadd.f32 %v1985_v13, %v1984_v8 }
 0x179   : > { %1761 = vst [vmem:[%s2383_s20 + $0x70] sm:$0xff] %v1741_v10   ;;  %v1192_v15 = vadd.f32 %v1983_v7, %v1031_v11  ;;  %v1034_v16 = vadd.f32 %v1874_v12, %v2375_v34 }
 0x17b   : > { %v1195_v17 = vadd.f32 %v1986_v14, %v1034_v16  ;;  %v1228_v18 = vmax.f32 %v1192_v15, 0.0 }
 0x17d   : > { %v1229_v19 = vmax.f32 %v1195_v17, 0.0 }
 0x17f   : > { %v1746_v20 = vpack.c.bf16 %v1229_v19, %v1228_v18 }
 0x181   : > { %1762 = vst [vmem:[%s2383_s20 + $0x78] sm:$0xff] %v1746_v20  }
 0x182 PF: > { %s13_s14 = sadd.s32 1, %s2161_s14   ;;  %s2444_s12 = smov %s2157_s13 }
 0x183   : > { %p10_p5 = scmp.ge.s32.totalorder %s13_s14, 4   ;;  %s2445_s13 = smov %s2447_s15 }
 0x185   :  { %12 = sbr.rel (!%p10_p5) target bundleno = 2 (0x2), region = 68 }

// kernel: vae_forward.12
= control target key start
LH: loop header
LB: loop body
LE: loop exit
PB: predicated region body
PF: predicated region fallthrough
CT: control target
= control target key end

     0   :  { %s1924_s1 = inlined_call_operand.vmem [shape: bf16[1024,128], index: 1, kind: input, shape index: {}]   ;;  %s1925_s0 = inlined_call_operand.vmem [shape: bf16[80,1024], index: 0, kind: input, shape index: {}]   ;;  %s1926_s2 = inlined_call_operand.vmem [shape: f32[1,128], index: 2, kind: input, shape index: {}]   ;;  %s1927_s3 = inlined_call_operand.vmem [shape: bf16[80,128], index: 3, kind: output, shape index: {}]  }
   0x1   :  { %v1468_v0 = vld [vmem:[%s1924_s1 + $0x40] sm:$0xff]   ;;  %v1472_v4 = vld [vmem:[%s1924_s1 + $0x48] sm:$0xff]   ;;  %v1476_v8 = vld [vmem:[%s1924_s1 + $0x50] sm:$0xff]  }
   0x2   :  { %v1469_v1 = vld [vmem:[%s1924_s1 + $0xc0] sm:$0xff]   ;;  %1284 = vmatprep.subr.bf16.mxu0 %v1468_v0  ;;  %v1473_v5 = vld [vmem:[%s1924_s1 + $0xc8] sm:$0xff]   ;;  %v1477_v9 = vld [vmem:[%s1924_s1 + $0xd0] sm:$0xff]  }
   0x3   :  { %v1470_v2 = vld [vmem:[%s1924_s1] sm:$0xff]   ;;  %1330 = vmatprep.subr.bf16.mxu1 %v1469_v1  ;;  %v1474_v6 = vld [vmem:[%s1924_s1 + $0x8] sm:$0xff]   ;;  %v1478_v10 = vld [vmem:[%s1924_s1 + $0x10] sm:$0xff]  }
   0x4   :  { %v1471_v3 = vld [vmem:[%s1924_s1 + $0x80] sm:$0xff]   ;;  %1285 = vmatpush3.bf16.msra.mxu0 %v1470_v2  ;;  %v1475_v7 = vld [vmem:[%s1924_s1 + $0x88] sm:$0xff]   ;;  %v1479_v11 = vld [vmem:[%s1924_s1 + $0x90] sm:$0xff]  }
   0x5   :  { %1331 = vmatpush3.bf16.msra.mxu1 %v1471_v3  ;;  %1286 = vmatprep.subr.bf16.mxu0 %v1472_v4  ;;  %v1480_v12 = vld [vmem:[%s1924_s1 + $0x58] sm:$0xff]   ;;  %v1484_v16 = vld [vmem:[%s1924_s1 + $0x60] sm:$0xff]   ;;  %v1488_v20 = vld [vmem:[%s1924_s1 + $0x68] sm:$0xff]  }
   0x6   :  { %1332 = vmatprep.subr.bf16.mxu1 %v1473_v5  ;;  %v1481_v13 = vld [vmem:[%s1924_s1 + $0xd8] sm:$0xff]   ;;  %v1485_v17 = vld [vmem:[%s1924_s1 + $0xe0] sm:$0xff]   ;;  %v1489_v21 = vld [vmem:[%s1924_s1 + $0xe8] sm:$0xff]  }
   0x7   :  { %v1482_v14 = vld [vmem:[%s1924_s1 + $0x18] sm:$0xff]   ;;  %v1486_v18 = vld [vmem:[%s1924_s1 + $0x20] sm:$0xff]   ;;  %v1490_v22 = vld [vmem:[%s1924_s1 + $0x28] sm:$0xff]  }
   0x8   :  { %1287 = vmatpush3.bf16.msra.mxu0 %v1474_v6  ;;  %v1483_v15 = vld [vmem:[%s1924_s1 + $0x98] sm:$0xff]   ;;  %v1487_v19 = vld [vmem:[%s1924_s1 + $0xa0] sm:$0xff]   ;;  %v1491_v23 = vld [vmem:[%s1924_s1 + $0xa8] sm:$0xff]  }
   0x9   :  { %1333 = vmatpush3.bf16.msra.mxu1 %v1475_v7  ;;  %1288 = vmatprep.subr.bf16.mxu0 %v1476_v8  ;;  %v1492_v24 = vld [vmem:[%s1924_s1 + $0x70] sm:$0xff]   ;;  %v1496_v28 = vld [vmem:[%s1924_s1 + $0x78] sm:$0xff]   ;;  %v15_v32 = vld [vmem:[%s1925_s0] sm:$0xff] }
   0xa   :  { %1334 = vmatprep.subr.bf16.mxu1 %v1477_v9  ;;  %v1493_v25 = vld [vmem:[%s1924_s1 + $0xf0] sm:$0xff]   ;;  %v1497_v29 = vld [vmem:[%s1924_s1 + $0xf8] sm:$0xff]   ;;  %v19_v33 = vld [vmem:[%s1925_s0 + $0x20] sm:$0xff] }
   0xb   :  { %v1494_v26 = vld [vmem:[%s1924_s1 + $0x30] sm:$0xff]   ;;  %v1498_v30 = vld [vmem:[%s1924_s1 + $0x38] sm:$0xff]   ;;  %v16_v34 = vld [vmem:[%s1925_s0 + $0x8] sm:$0xff]  ;;  %v1131_v35 = vcombine.low %v15_v32, %v19_v33  ;;  %v1132_v36 = vcombine.high %v15_v32, %v19_v33 }
   0xc   :  { %1289 = vmatpush3.bf16.msra.mxu0 %v1478_v10  ;;  %v1495_v27 = vld [vmem:[%s1924_s1 + $0xb0] sm:$0xff]   ;;  %v1499_v31 = vld [vmem:[%s1924_s1 + $0xb8] sm:$0xff]   ;;  %v20_v37 = vld [vmem:[%s1925_s0 + $0x28] sm:$0xff] }
   0xd   :  { %1335 = vmatpush3.bf16.msra.mxu1 %v1479_v11  ;;  %1290 = vmatprep.subr.bf16.mxu0 %v1480_v12  ;;  %v1133_v38 = vcombine.low %v16_v34, %v20_v37  ;;  %v1134_v39 = vcombine.high %v16_v34, %v20_v37  ;;  %v1500_v40 = vld [vmem:[%s1924_s1 + $0x140] sm:$0xff]   ;;  %v1504_v44 = vld [vmem:[%s1924_s1 + $0x148] sm:$0xff]   ;;  %v1508_v56 = vld [vmem:[%s1924_s1 + $0x150] sm:$0xff]  }
   0xe   :  { %1336 = vmatprep.subr.bf16.mxu1 %v1481_v13  ;;  %806 = vmatprep.mubr.bf16.mxu0 %v1132_v36  ;;  %v1501_v41 = vld [vmem:[%s1924_s1 + $0x100] sm:$0xff]   ;;  %v1505_v45 = vld [vmem:[%s1924_s1 + $0x108] sm:$0xff]   ;;  %v1509_v57 = vld [vmem:[%s1924_s1 + $0x110] sm:$0xff]  }
   0xf   :  { %879 = vmatprep.mubr.bf16.mxu1 %v1134_v39  ;;  %v1502_v42 = vld [vmem:[%s1924_s1 + $0x1c0] sm:$0xff]   ;;  %v24_v49 = vld [vmem:[%s1925_s0 + $0x48] sm:$0xff]  ;;  %v1510_v58 = vld [vmem:[%s1924_s1 + $0x1d0] sm:$0xff]  }
  0x10   :  { %1291 = vmatpush3.bf16.msra.mxu0 %v1482_v14  ;;  %v1503_v43 = vld [vmem:[%s1924_s1 + $0x180] sm:$0xff]   ;;  %v28_v50 = vld [vmem:[%s1925_s0 + $0x68] sm:$0xff]  ;;  %v1511_v59 = vld [vmem:[%s1924_s1 + $0x190] sm:$0xff]  }
  0x11   :  { %1337 = vmatpush3.bf16.msra.mxu1 %v1483_v15  ;;  %1292 = vmatprep.subr.bf16.mxu0 %v1484_v16  ;;  %v23_v46 = vld [vmem:[%s1925_s0 + $0x40] sm:$0xff]  ;;  %v1142_v52 = vcombine.high %v24_v49, %v28_v50  ;;  %v1506_v53 = vld [vmem:[%s1924_s1 + $0x1c8] sm:$0xff]   ;;  %v1141_v54 = vcombine.low %v24_v49, %v28_v50  ;;  %v1512_v2 = vld [vmem:[%s1924_s1 + $0x158] sm:$0xff]  }
  0x12   :  { %1338 = vmatprep.subr.bf16.mxu1 %v1485_v17  ;;  %v27_v47 = vld [vmem:[%s1925_s0 + $0x60] sm:$0xff]  ;;  %v1507_v55 = vld [vmem:[%s1924_s1 + $0x188] sm:$0xff]   ;;  %v1513_v5 = vld [vmem:[%s1924_s1 + $0x118] sm:$0xff]  }
  0x13   :  { %v1140_v48 = vcombine.high %v23_v46, %v27_v47  ;;  %v1139_v51 = vcombine.low %v23_v46, %v27_v47  ;;  %v31_v60 = vld [vmem:[%s1925_s0 + $0x80] sm:$0xff]  ;;  %v32_v62 = vld [vmem:[%s1925_s0 + $0x88] sm:$0xff]  ;;  %v1514_v6 = vld [vmem:[%s1924_s1 + $0x1d8] sm:$0xff]  }
  0x14   :  { %1293 = vmatpush3.bf16.msra.mxu0 %v1486_v18  ;;  %v35_v61 = vld [vmem:[%s1925_s0 + $0xa0] sm:$0xff]  ;;  %v36_v63 = vld [vmem:[%s1925_s0 + $0xa8] sm:$0xff]  ;;  %v1515_v7 = vld [vmem:[%s1924_s1 + $0x198] sm:$0xff]  }
  0x15   :  { %1339 = vmatpush3.bf16.msra.mxu1 %v1487_v19  ;;  %1294 = vmatprep.subr.bf16.mxu0 %v1488_v20  ;;  %v1148_v0 = vcombine.high %v31_v60, %v35_v61  ;;  %v1150_v1 = vcombine.high %v32_v62, %v36_v63  ;;  %v1147_v3 = vcombine.low %v31_v60, %v35_v61  ;;  %v1516_v8 = vld [vmem:[%s1924_s1 + $0x160] sm:$0xff]   ;;  %v40_v13 = vld [vmem:[%s1925_s0 + $0xc8] sm:$0xff]  ;;  %v1526_v34 = vld [vmem:[%s1924_s1 + $0x1f0] sm:$0xff]  }
  0x16   :  { %1340 = vmatprep.subr.bf16.mxu1 %v1489_v21  ;;  %v1149_v4 = vcombine.low %v32_v62, %v36_v63  ;;  %v1517_v9 = vld [vmem:[%s1924_s1 + $0x120] sm:$0xff]   ;;  %v44_v15 = vld [vmem:[%s1925_s0 + $0xe8] sm:$0xff]  ;;  %v1528_v36 = vld [vmem:[%s1924_s1 + $0x178] sm:$0xff]  }
  0x17   :  { %v1518_v10 = vld [vmem:[%s1924_s1 + $0x1e0] sm:$0xff]   ;;  %v1158_v17 = vcombine.high %v40_v13, %v44_v15  ;;  %v1157_v19 = vcombine.low %v40_v13, %v44_v15  ;;  %v1520_v20 = vld [vmem:[%s1924_s1 + $0x168] sm:$0xff]   ;;  %v1529_v37 = vld [vmem:[%s1924_s1 + $0x138] sm:$0xff]  }
  0x18   :  { %1295 = vmatpush3.bf16.msra.mxu0 %v1490_v22  ;;  %v39_v11 = vld [vmem:[%s1925_s0 + $0xc0] sm:$0xff]  ;;  %v1521_v21 = vld [vmem:[%s1924_s1 + $0x128] sm:$0xff]   ;;  %v1531_v39 = vld [vmem:[%s1924_s1 + $0x1b8] sm:$0xff]  }
  0x19   :  { %1341 = vmatpush3.bf16.msra.mxu1 %v1491_v23  ;;  %1296 = vmatprep.subr.bf16.mxu0 %v1492_v24  ;;  %v43_v12 = vld [vmem:[%s1925_s0 + $0xe0] sm:$0xff]  ;;  %v1522_v22 = vld [vmem:[%s1924_s1 + $0x1e8] sm:$0xff]   ;;  %v1524_v24 = vld [vmem:[%s1924_s1 + $0x170] sm:$0xff]  }
  0x1a   :  { %1342 = vmatprep.subr.bf16.mxu1 %v1493_v25  ;;  %v1156_v14 = vcombine.high %v39_v11, %v43_v12  ;;  %v1155_v16 = vcombine.low %v39_v11, %v43_v12  ;;  %v1519_v18 = vld [vmem:[%s1924_s1 + $0x1a0] sm:$0xff]   ;;  %v1523_v23 = vld [vmem:[%s1924_s1 + $0x1a8] sm:$0xff]   ;;  %v25_v47 = vld [vmem:[%s1925_s0 + $0x50] sm:$0xff] }
  0x1b   :  { %v47_v25 = vld [vmem:[%s1925_s0 + $0x100] sm:$0xff]  ;;  %v26_v49 = vld [vmem:[%s1925_s0 + $0x58] sm:$0xff]  ;;  %v41_v62 = vld [vmem:[%s1925_s0 + $0xd0] sm:$0xff] }
  0x1c   :  { %1297 = vmatpush3.bf16.msra.mxu0 %v1494_v26  ;;  %v51_v26 = vld [vmem:[%s1925_s0 + $0x120] sm:$0xff]  ;;  %v45_v63 = vld [vmem:[%s1925_s0 + $0xf0] sm:$0xff] }
  0x1d   :  { %1343 = vmatpush3.bf16.msra.mxu1 %v1495_v27  ;;  %1298 = vmatprep.subr.bf16.mxu0 %v1496_v28  ;;  %v1164_v27 = vcombine.high %v47_v25, %v51_v26  ;;  %v48_v28 = vld [vmem:[%s1925_s0 + $0x108] sm:$0xff]  ;;  %v1163_v32 = vcombine.low %v47_v25, %v51_v26 }
  0x1e   :  { %1344 = vmatprep.subr.bf16.mxu1 %v1497_v29  ;;  %v52_v29 = vld [vmem:[%s1925_s0 + $0x128] sm:$0xff] }
  0x1f   :  { %v1165_v33 = vcombine.low %v48_v28, %v52_v29 }
  0x20   :  { %1299 = vmatpush3.bf16.msra.mxu0 %v1498_v30  ;;  %v1166_v30 = vcombine.high %v48_v28, %v52_v29 }
  0x21   :  { %1345 = vmatpush3.bf16.msra.mxu1 %v1499_v31  ;;  %1376 = vmatprep.subr.bf16.mxu0 %v1500_v40  ;;  %v1525_v31 = vld [vmem:[%s1924_s1 + $0x130] sm:$0xff]  }
  0x22   :  { %1422 = vmatprep.subr.bf16.mxu1 %v1502_v42  ;;  %v17_v40 = vld [vmem:[%s1925_s0 + $0x10] sm:$0xff]  ;;  %v18_v42 = vld [vmem:[%s1925_s0 + $0x18] sm:$0xff] }
  0x23   :  { %807 = vmatmul.mubr.bf16.vlgmr.msra.gmra.mrb[0].mxu0 %v1131_v35  ;;  %v1527_v35 = vld [vmem:[%s1924_s1 + $0x1b0] sm:$0xff]  }
  0x24   :  { %880 = vmatmul.mubr.bf16.vlgmr.msra.gmra.mrb[0].mxu1 %v1133_v38  ;;  %1377 = vmatpush3.bf16.msra.mxu0 %v1501_v41  ;;  %v1530_v38 = vld [vmem:[%s1924_s1 + $0x1f8] sm:$0xff]   ;;  %v21_v41 = vld [vmem:[%s1925_s0 + $0x30] sm:$0xff] }
  0x25   :  { %1423 = vmatpush3.bf16.msra.mxu1 %v1503_v43  ;;  %1378 = vmatprep.subr.bf16.mxu0 %v1504_v44  ;;  %v22_v43 = vld [vmem:[%s1925_s0 + $0x38] sm:$0xff]  ;;  %v1135_v44 = vcombine.low %v17_v40, %v21_v41 }
  0x26   :  { %814 = vmatprep.mubr.bf16.mxu0 %v1140_v48  ;;  %887 = vmatprep.mubr.bf16.mxu1 %v1142_v52  ;;  %v1138_v46 = vcombine.high %v18_v42, %v22_v43  ;;  %v29_v48 = vld [vmem:[%s1925_s0 + $0x70] sm:$0xff]  ;;  %v1137_v50 = vcombine.low %v18_v42, %v22_v43  ;;  %v30_v52 = vld [vmem:[%s1925_s0 + $0x78] sm:$0xff] }
  0x27   :  { %1424 = vmatprep.subr.bf16.mxu1 %v1506_v53  ;;  %v1146_v53 = vcombine.high %v26_v49, %v30_v52 }
  0x28   :  { %1379 = vmatpush3.bf16.msra.mxu0 %v1505_v45  ;;  %v1136_v45 = vcombine.high %v17_v40, %v21_v41 }
  0x29   :  { %1425 = vmatpush3.bf16.msra.mxu1 %v1507_v55  ;;  %1380 = vmatprep.subr.bf16.mxu0 %v1508_v56  ;;  %v37_v55 = vld [vmem:[%s1925_s0 + $0xb0] sm:$0xff]  ;;  %v34_v56 = vld [vmem:[%s1925_s0 + $0x98] sm:$0xff] }
  0x2a   :  { %1426 = vmatprep.subr.bf16.mxu1 %v1510_v58  ;;  %v1143_v58 = vcombine.low %v25_v47, %v29_v48 }
  0x2b   :  { %815 = vmatmul.mubr.bf16.gmra.mrb[4].mxu0 %v1139_v51  ;;  %v1144_v51 = vcombine.high %v25_v47, %v29_v48 }
  0x2c   :  { %888 = vmatmul.mubr.bf16.gmra.mrb[4].mxu1 %v1141_v54  ;;  %1381 = vmatpush3.bf16.msra.mxu0 %v1509_v57  ;;  %v33_v54 = vld [vmem:[%s1925_s0 + $0x90] sm:$0xff]  ;;  %v38_v57 = vld [vmem:[%s1925_s0 + $0xb8] sm:$0xff] }
  0x2d   :  { %1427 = vmatpush3.bf16.msra.mxu1 %v1511_v59  ;;  %822 = vmatprep.mubr.bf16.mxu0 %v1148_v0  ;;  %v1145_v59 = vcombine.low %v26_v49, %v30_v52  ;;  %v1152_v60 = vcombine.high %v33_v54, %v37_v55  ;;  %v1154_v61 = vcombine.high %v34_v56, %v38_v57  ;;  %v42_v0 = vld [vmem:[%s1925_s0 + $0xd8] sm:$0xff] }
  0x2e   :  { %895 = vmatprep.mubr.bf16.mxu1 %v1150_v1  ;;  %1382 = vmatprep.subr.bf16.mxu0 %v1512_v2  ;;  %v46_v1 = vld [vmem:[%s1925_s0 + $0xf8] sm:$0xff]  ;;  %v1151_v2 = vcombine.low %v33_v54, %v37_v55 }
  0x2f   :  { %1428 = vmatprep.subr.bf16.mxu1 %v1514_v6  ;;  %v49_v6 = vld [vmem:[%s1925_s0 + $0x110] sm:$0xff]  ;;  %v1161_v11 = vcombine.low %v42_v0, %v46_v1 }
  0x30   :  { %1383 = vmatpush3.bf16.msra.mxu0 %v1513_v5  ;;  %v1162_v5 = vcombine.high %v42_v0, %v46_v1 }
  0x31   :  { %1429 = vmatpush3.bf16.msra.mxu1 %v1515_v7  ;;  %1384 = vmatprep.subr.bf16.mxu0 %v1516_v8  ;;  %v53_v7 = vld [vmem:[%s1925_s0 + $0x130] sm:$0xff]  ;;  %v50_v8 = vld [vmem:[%s1925_s0 + $0x118] sm:$0xff] }
  0x32   :  { %1430 = vmatprep.subr.bf16.mxu1 %v1518_v10  ;;  %v1159_v10 = vcombine.low %v41_v62, %v45_v63  ;;  %v1168_v12 = vcombine.high %v49_v6, %v53_v7 }
  0x33   :  { %823 = vmatmul.mubr.bf16.gmra.mrb[8].mxu0 %v1147_v3  ;;  %v1153_v3 = vcombine.low %v34_v56, %v38_v57 }
  0x34   :  { %896 = vmatmul.mubr.bf16.gmra.mrb[8].mxu1 %v1149_v4  ;;  %1385 = vmatpush3.bf16.msra.mxu0 %v1517_v9  ;;  %v1160_v4 = vcombine.high %v41_v62, %v45_v63  ;;  %v54_v9 = vld [vmem:[%s1925_s0 + $0x138] sm:$0xff] }
  0x35   :  { %830 = vmatprep.mubr.bf16.mxu0 %v1156_v14  ;;  %903 = vmatprep.mubr.bf16.mxu1 %v1158_v17  ;;  %v1170_v13 = vcombine.high %v50_v8, %v54_v9  ;;  %v1167_v14 = vcombine.low %v49_v6, %v53_v7  ;;  %v1169_v15 = vcombine.low %v50_v8, %v54_v9 }
  0x36   :  { %1431 = vmatpush3.bf16.msra.mxu1 %v1519_v18  ;;  %1386 = vmatprep.subr.bf16.mxu0 %v1520_v20  ;;  %v1867_v18 = vld [vmem:[%s1926_s2] ss:$0 sm:$0xff] }
  0x37   :  { %1432 = vmatprep.subr.bf16.mxu1 %v1522_v22 }
  0x38   :  { %1387 = vmatpush3.bf16.msra.mxu0 %v1521_v21 }
  0x39   :  { %1388 = vmatprep.subr.bf16.mxu0 %v1524_v24 }
  0x3a   :  { %1433 = vmatpush3.bf16.msra.mxu1 %v1523_v23 }
  0x3b   :  { %831 = vmatmul.mubr.bf16.gmra.mrb[12].mxu0 %v1155_v16  ;;  %1434 = vmatprep.subr.bf16.mxu1 %v1526_v34 }
  0x3c   :  { %904 = vmatmul.mubr.bf16.gmra.mrb[12].mxu1 %v1157_v19  ;;  %838 = vmatprep.mubr.bf16.mxu0 %v1164_v27 }
  0x3d   :  { %911 = vmatprep.mubr.bf16.mxu1 %v1166_v30  ;;  %1389 = vmatpush3.bf16.msra.mxu0 %v1525_v31 }
  0x3e   :  { %1435 = vmatpush3.bf16.msra.mxu1 %v1527_v35  ;;  %1390 = vmatprep.subr.bf16.mxu0 %v1528_v36 }
  0x3f   :  { %1436 = vmatprep.subr.bf16.mxu1 %v1530_v38 }
  0x41   :  { %1391 = vmatpush3.bf16.msra.mxu0 %v1529_v37 }
  0x42   :  { %1437 = vmatpush3.bf16.msra.mxu1 %v1531_v39 }
  0x43   :  { %839 = vmatmul.mubr.bf16.gmra.mrb[16].mxu0 %v1163_v32 }
  0x44   :  { %912 = vmatmul.mubr.bf16.gmra.mrb[16].mxu1 %v1165_v33  ;;  %952 = vmatprep.mubr.bf16.mxu0 %v1136_v45 }
  0x45   :  { %1025 = vmatprep.mubr.bf16.mxu1 %v1138_v46 }
  0x4b   :  { %953 = vmatmul.mubr.bf16.vlgmr.msra.gmra.mrb[20].mxu0 %v1135_v44 }
  0x4c   :  { %1026 = vmatmul.mubr.bf16.vlgmr.msra.gmra.mrb[20].mxu1 %v1137_v50  ;;  %960 = vmatprep.mubr.bf16.mxu0 %v1144_v51 }
  0x4d   :  { %1033 = vmatprep.mubr.bf16.mxu1 %v1146_v53 }
  0x53   :  { %961 = vmatmul.mubr.bf16.gmra.mrb[24].mxu0 %v1143_v58 }
  0x54   :  { %1034 = vmatmul.mubr.bf16.gmra.mrb[24].mxu1 %v1145_v59  ;;  %968 = vmatprep.mubr.bf16.mxu0 %v1152_v60 }
  0x55   :  { %1041 = vmatprep.mubr.bf16.mxu1 %v1154_v61 }
  0x5b   :  { %969 = vmatmul.mubr.bf16.gmra.mrb[28].mxu0 %v1151_v2 }
  0x5c   :  { %1042 = vmatmul.mubr.bf16.gmra.mrb[28].mxu1 %v1153_v3  ;;  %976 = vmatprep.mubr.bf16.mxu0 %v1160_v4 }
  0x5d   :  { %1049 = vmatprep.mubr.bf16.mxu1 %v1162_v5 }
  0x63   :  { %977 = vmatmul.mubr.bf16.gmra.mrb[32].mxu0 %v1159_v10 }
  0x64   :  { %1050 = vmatmul.mubr.bf16.gmra.mrb[32].mxu1 %v1161_v11  ;;  %984 = vmatprep.mubr.bf16.mxu0 %v1168_v12 }
  0x65   :  { %1057 = vmatprep.mubr.bf16.mxu1 %v1170_v13 }
  0x6b   :  { %985 = vmatmul.mubr.bf16.gmra.mrb[36].mxu0 %v1167_v14 }
  0x6c   :  { %1058 = vmatmul.mubr.bf16.gmra.mrb[36].mxu1 %v1169_v15 }
  0xf6   :  { %v1300_v16 = vpop.f32.mrb[0].mxu0 }
  0xf7   :  { %v1346_v17 = vpop.f32.mrb[0].mxu1  ;;  %v1301_v19 = vpop.f32.mrb[1].mxu0 }
  0xf8   :  { %v1302_v20 = vadd.f32 %v1301_v19, %v1300_v16  ;;  %v1347_v21 = vpop.f32.mrb[1].mxu1  ;;  %v1303_v22 = vpop.f32.mrb[2].mxu0 }
  0xf9   :  { %v1348_v23 = vadd.f32 %v1347_v21, %v1346_v17  ;;  %v1349_v24 = vpop.f32.mrb[2].mxu1  ;;  %v1304_v25 = vpop.f32.mrb[3].mxu0 }
  0xfa   :  { %v809_v26 = vadd.f32 %v1302_v20, %v1867_v18  ;;  %v1305_v27 = vadd.f32 %v1304_v25, %v1303_v22  ;;  %v1350_v28 = vpop.f32.mrb[3].mxu1 }
  0xfb   :  { %v1351_v29 = vadd.f32 %v1350_v28, %v1349_v24 }
  0xfc   :  { %v1870_v30 = vadd.f32 %v1348_v23, %v809_v26  ;;  %v812_v31 = vadd.f32 %v1305_v27, %v1867_v18 }
  0xfe   :  { %v1873_v32 = vadd.f32 %v1351_v29, %v812_v31  ;;  %v1306_v33 = vpop.f32.mrb[4].mxu0 }
  0xff   :  { %v1352_v34 = vpop.f32.mrb[4].mxu1  ;;  %v1307_v35 = vpop.f32.mrb[5].mxu0 }
 0x100   :  { %v1308_v36 = vadd.f32 %v1307_v35, %v1306_v33  ;;  %v1353_v37 = vpop.f32.mrb[5].mxu1  ;;  %v1309_v38 = vpop.f32.mrb[6].mxu0 }
 0x101   :  { %v1354_v39 = vadd.f32 %v1353_v37, %v1352_v34  ;;  %v1355_v40 = vpop.f32.mrb[6].mxu1  ;;  %v1310_v41 = vpop.f32.mrb[7].mxu0 }
 0x102   :  { %v817_v42 = vadd.f32 %v1308_v36, %v1867_v18  ;;  %v1311_v43 = vadd.f32 %v1310_v41, %v1309_v38  ;;  %v1356_v44 = vpop.f32.mrb[7].mxu1 }
 0x103   :  { %v1357_v45 = vadd.f32 %v1356_v44, %v1355_v40 }
 0x104   :  { %v1876_v46 = vadd.f32 %v1354_v39, %v817_v42  ;;  %v820_v47 = vadd.f32 %v1311_v43, %v1867_v18 }
 0x106   :  { %v1879_v48 = vadd.f32 %v1357_v45, %v820_v47  ;;  %v1312_v49 = vpop.f32.mrb[8].mxu0 }
 0x107   :  { %v1358_v50 = vpop.f32.mrb[8].mxu1  ;;  %v1313_v51 = vpop.f32.mrb[9].mxu0 }
 0x108   :  { %v1314_v52 = vadd.f32 %v1313_v51, %v1312_v49  ;;  %v1359_v53 = vpop.f32.mrb[9].mxu1  ;;  %v1315_v54 = vpop.f32.mrb[10].mxu0 }
 0x109   :  { %v1360_v55 = vadd.f32 %v1359_v53, %v1358_v50  ;;  %v1361_v56 = vpop.f32.mrb[10].mxu1  ;;  %v1316_v57 = vpop.f32.mrb[11].mxu0 }
 0x10a   :  { %v825_v58 = vadd.f32 %v1314_v52, %v1867_v18  ;;  %v1317_v59 = vadd.f32 %v1316_v57, %v1315_v54  ;;  %v1362_v60 = vpop.f32.mrb[11].mxu1 }
 0x10b   :  { %v1363_v61 = vadd.f32 %v1362_v60, %v1361_v56 }
 0x10c   :  { %v1882_v62 = vadd.f32 %v1360_v55, %v825_v58  ;;  %v828_v63 = vadd.f32 %v1317_v59, %v1867_v18 }
 0x10e   :  { %v1885_v0 = vadd.f32 %v1363_v61, %v828_v63  ;;  %v1318_v1 = vpop.f32.mrb[12].mxu0 }
 0x10f   :  { %v1364_v2 = vpop.f32.mrb[12].mxu1  ;;  %v1319_v3 = vpop.f32.mrb[13].mxu0 }
 0x110   :  { %v1320_v4 = vadd.f32 %v1319_v3, %v1318_v1  ;;  %v1365_v5 = vpop.f32.mrb[13].mxu1  ;;  %v1321_v6 = vpop.f32.mrb[14].mxu0 }
 0x111   :  { %v1366_v7 = vadd.f32 %v1365_v5, %v1364_v2  ;;  %v1367_v8 = vpop.f32.mrb[14].mxu1  ;;  %v1322_v9 = vpop.f32.mrb[15].mxu0 }
 0x112   :  { %v833_v10 = vadd.f32 %v1320_v4, %v1867_v18  ;;  %v1323_v11 = vadd.f32 %v1322_v9, %v1321_v6  ;;  %v1368_v12 = vpop.f32.mrb[15].mxu1 }
 0x113   :  { %v1369_v13 = vadd.f32 %v1368_v12, %v1367_v8 }
 0x114   :  { %v1888_v14 = vadd.f32 %v1366_v7, %v833_v10  ;;  %v836_v15 = vadd.f32 %v1323_v11, %v1867_v18 }
 0x116   :  { %v1891_v16 = vadd.f32 %v1369_v13, %v836_v15  ;;  %v1324_v17 = vpop.f32.mrb[16].mxu0 }
 0x117   :  { %v1370_v19 = vpop.f32.mrb[16].mxu1  ;;  %v1325_v20 = vpop.f32.mrb[17].mxu0 }
 0x118   :  { %v1326_v21 = vadd.f32 %v1325_v20, %v1324_v17  ;;  %v1371_v22 = vpop.f32.mrb[17].mxu1  ;;  %v1327_v23 = vpop.f32.mrb[18].mxu0 }
 0x119   :  { %v1372_v24 = vadd.f32 %v1371_v22, %v1370_v19  ;;  %v1373_v25 = vpop.f32.mrb[18].mxu1  ;;  %v1328_v26 = vpop.f32.mrb[19].mxu0 }
 0x11a   :  { %v841_v27 = vadd.f32 %v1326_v21, %v1867_v18  ;;  %v1329_v28 = vadd.f32 %v1328_v26, %v1327_v23  ;;  %v1374_v29 = vpop.f32.mrb[19].mxu1 }
 0x11b   :  { %v1375_v31 = vadd.f32 %v1374_v29, %v1373_v25 }
 0x11c   :  { %v1894_v33 = vadd.f32 %v1372_v24, %v841_v27  ;;  %v844_v34 = vadd.f32 %v1329_v28, %v1867_v18 }
 0x11e   :  { %v1897_v35 = vadd.f32 %v1375_v31, %v844_v34  ;;  %v1392_v36 = vpop.f32.mrb[20].mxu0 }
 0x11f   :  { %v1438_v37 = vpop.f32.mrb[20].mxu1  ;;  %v1393_v38 = vpop.f32.mrb[21].mxu0 }
 0x120   :  { %v1394_v39 = vadd.f32 %v1393_v38, %v1392_v36  ;;  %v1439_v40 = vpop.f32.mrb[21].mxu1  ;;  %v1395_v41 = vpop.f32.mrb[22].mxu0 }
 0x121   :  { %v1440_v42 = vadd.f32 %v1439_v40, %v1438_v37  ;;  %v1441_v43 = vpop.f32.mrb[22].mxu1  ;;  %v1396_v44 = vpop.f32.mrb[23].mxu0 }
 0x122   :  { %v955_v45 = vadd.f32 %v1394_v39, %v1870_v30  ;;  %v1397_v47 = vadd.f32 %v1396_v44, %v1395_v41  ;;  %v1442_v49 = vpop.f32.mrb[23].mxu1 }
 0x123   :  { %v1443_v50 = vadd.f32 %v1442_v49, %v1441_v43 }
 0x124   :  { %v1028_v51 = vadd.f32 %v1440_v42, %v955_v45  ;;  %v958_v52 = vadd.f32 %v1397_v47, %v1873_v32 }
 0x126   :  { %v1031_v18 = vadd.f32 %v1443_v50, %v958_v52  ;;  %v1398_v53 = vpop.f32.mrb[24].mxu0  ;;  %v1066_v56 = vmax.f32 %v1028_v51, 0.0 }
 0x127   :  { %v1444_v54 = vpop.f32.mrb[24].mxu1  ;;  %v1399_v55 = vpop.f32.mrb[25].mxu0 }
 0x128   :  { %v1067_v57 = vmax.f32 %v1031_v18, 0.0  ;;  %v1400_v58 = vadd.f32 %v1399_v55, %v1398_v53  ;;  %v1445_v59 = vpop.f32.mrb[25].mxu1  ;;  %v1401_v60 = vpop.f32.mrb[26].mxu0 }
 0x129   :  { %v1446_v61 = vadd.f32 %v1445_v59, %v1444_v54  ;;  %v1447_v63 = vpop.f32.mrb[26].mxu1  ;;  %v1402_v1 = vpop.f32.mrb[27].mxu0 }
 0x12a   :  { %v1258_v2 = vpack.c.bf16 %v1067_v57, %v1066_v56  ;;  %v963_v30 = vadd.f32 %v1400_v58, %v1876_v46  ;;  %v1403_v3 = vadd.f32 %v1402_v1, %v1401_v60  ;;  %v1448_v4 = vpop.f32.mrb[27].mxu1 }
 0x12b   :  { %v1449_v5 = vadd.f32 %v1448_v4, %v1447_v63 }
 0x12c   :  { %1259 = vst [vmem:[%s1927_s3] sm:$0xff] %v1258_v2   ;;  %v1036_v32 = vadd.f32 %v1446_v61, %v963_v30  ;;  %v966_v6 = vadd.f32 %v1403_v3, %v1879_v48 }
 0x12e   :  { %v1039_v7 = vadd.f32 %v1449_v5, %v966_v6  ;;  %v1404_v8 = vpop.f32.mrb[28].mxu0  ;;  %v1068_v11 = vmax.f32 %v1036_v32, 0.0 }
 0x12f   :  { %v1450_v9 = vpop.f32.mrb[28].mxu1  ;;  %v1405_v10 = vpop.f32.mrb[29].mxu0 }
 0x130   :  { %v1069_v12 = vmax.f32 %v1039_v7, 0.0  ;;  %v1406_v13 = vadd.f32 %v1405_v10, %v1404_v8  ;;  %v1451_v15 = vpop.f32.mrb[29].mxu1  ;;  %v1407_v17 = vpop.f32.mrb[30].mxu0 }
 0x131   :  { %v1452_v46 = vadd.f32 %v1451_v15, %v1450_v9  ;;  %v1453_v19 = vpop.f32.mrb[30].mxu1  ;;  %v1408_v20 = vpop.f32.mrb[31].mxu0 }
 0x132   :  { %v1263_v21 = vpack.c.bf16 %v1069_v12, %v1068_v11  ;;  %v971_v22 = vadd.f32 %v1406_v13, %v1882_v62  ;;  %v1409_v23 = vadd.f32 %v1408_v20, %v1407_v17  ;;  %v1454_v24 = vpop.f32.mrb[31].mxu1 }
 0x133   :  { %v1455_v25 = vadd.f32 %v1454_v24, %v1453_v19 }
 0x134   :  { %1280 = vst [vmem:[%s1927_s3 + $0x8] sm:$0xff] %v1263_v21   ;;  %v1044_v48 = vadd.f32 %v1452_v46, %v971_v22  ;;  %v974_v26 = vadd.f32 %v1409_v23, %v1885_v0 }
 0x136   :  { %v1047_v27 = vadd.f32 %v1455_v25, %v974_v26  ;;  %v1410_v28 = vpop.f32.mrb[32].mxu0  ;;  %v1070_v34 = vmax.f32 %v1044_v48, 0.0 }
 0x137   :  { %v1456_v29 = vpop.f32.mrb[32].mxu1  ;;  %v1411_v31 = vpop.f32.mrb[33].mxu0 }
 0x138   :  { %v1071_v36 = vmax.f32 %v1047_v27, 0.0  ;;  %v1412_v37 = vadd.f32 %v1411_v31, %v1410_v28  ;;  %v1457_v38 = vpop.f32.mrb[33].mxu1  ;;  %v1413_v39 = vpop.f32.mrb[34].mxu0 }
 0x139   :  { %v1458_v62 = vadd.f32 %v1457_v38, %v1456_v29  ;;  %v1459_v40 = vpop.f32.mrb[34].mxu1  ;;  %v1414_v41 = vpop.f32.mrb[35].mxu0 }
 0x13a   :  { %v1268_v42 = vpack.c.bf16 %v1071_v36, %v1070_v34  ;;  %v979_v43 = vadd.f32 %v1412_v37, %v1888_v14  ;;  %v1415_v44 = vadd.f32 %v1414_v41, %v1413_v39  ;;  %v1460_v45 = vpop.f32.mrb[35].mxu1 }
 0x13b   :  { %v1461_v47 = vadd.f32 %v1460_v45, %v1459_v40 }
 0x13c   :  { %1281 = vst [vmem:[%s1927_s3 + $0x10] sm:$0xff] %v1268_v42   ;;  %v1052_v0 = vadd.f32 %v1458_v62, %v979_v43  ;;  %v982_v49 = vadd.f32 %v1415_v44, %v1891_v16 }
 0x13e   :  { %v1055_v50 = vadd.f32 %v1461_v47, %v982_v49  ;;  %v1416_v51 = vpop.f32.mrb[36].mxu0  ;;  %v1072_v53 = vmax.f32 %v1052_v0, 0.0 }
 0x13f   :  { %v1462_v52 = vpop.f32.mrb[36].mxu1  ;;  %v1417_v18 = vpop.f32.mrb[37].mxu0 }
 0x140   :  { %v1073_v54 = vmax.f32 %v1055_v50, 0.0  ;;  %v1418_v55 = vadd.f32 %v1417_v18, %v1416_v51  ;;  %v1463_v56 = vpop.f32.mrb[37].mxu1  ;;  %v1419_v57 = vpop.f32.mrb[38].mxu0 }
 0x141   :  { %v1464_v14 = vadd.f32 %v1463_v56, %v1462_v52  ;;  %v1465_v58 = vpop.f32.mrb[38].mxu1  ;;  %v1420_v59 = vpop.f32.mrb[39].mxu0 }
 0x142   :  { %v1273_v60 = vpack.c.bf16 %v1073_v54, %v1072_v53  ;;  %v987_v61 = vadd.f32 %v1418_v55, %v1894_v33  ;;  %v1421_v63 = vadd.f32 %v1420_v59, %v1419_v57  ;;  %v1466_v1 = vpop.f32.mrb[39].mxu1 }
 0x143   :  { %v1467_v2 = vadd.f32 %v1466_v1, %v1465_v58 }
 0x144   :  { %1282 = vst [vmem:[%s1927_s3 + $0x18] sm:$0xff] %v1273_v60   ;;  %v1060_v16 = vadd.f32 %v1464_v14, %v987_v61  ;;  %v990_v30 = vadd.f32 %v1421_v63, %v1897_v35 }
 0x146   :  { %v1063_v3 = vadd.f32 %v1467_v2, %v990_v30  ;;  %v1074_v4 = vmax.f32 %v1060_v16, 0.0 }
 0x148   :  { %v1075_v5 = vmax.f32 %v1063_v3, 0.0 }
 0x14a   :  { %v1278_v32 = vpack.c.bf16 %v1075_v5, %v1074_v4 }
 0x14c   :  { %1283 = vst [vmem:[%s1927_s3 + $0x20] sm:$0xff] %v1278_v32  }

// kernel: vae_forward.13
= control target key start
LH: loop header
LB: loop body
LE: loop exit
PB: predicated region body
PF: predicated region fallthrough
CT: control target
= control target key end

     0   :  { %s3609_s1 = inlined_call_operand.vmem [shape: bf16[2048,256], index: 1, kind: input, shape index: {}]   ;;  %s3610_s0 = inlined_call_operand.vmem [shape: bf16[16,2048], index: 0, kind: input, shape index: {}]   ;;  %s3611_s2 = inlined_call_operand.vmem [shape: f32[1,256], index: 2, kind: input, shape index: {}]   ;;  %s3612_s3 = inlined_call_operand.vmem [shape: bf16[16,256], index: 3, kind: output, shape index: {}]  }
   0x1   :  { %v2332_v0 = vld [vmem:[%s3609_s1 + $0x4] ss:$8 sps:$4 sm:$0xff]   ;;  %v2336_v2 = vld [vmem:[%s3609_s1] ss:$8 sps:$4 sm:$0xff]   ;;  %v2338_v4 = vld [vmem:[%s3609_s1 + $0x14] ss:$8 sps:$4 sm:$0xff]  }
   0x2   :  { %v2334_v1 = vld [vmem:[%s3609_s1 + $0x404] ss:$8 sps:$4 sm:$0xff]   ;;  %1658 = vmatprep.subr.bf16.mxu1 %v2332_v0  ;;  %v2337_v3 = vld [vmem:[%s3609_s1 + $0x400] ss:$8 sps:$4 sm:$0xff]   ;;  %v2340_v5 = vld [vmem:[%s3609_s1 + $0x414] ss:$8 sps:$4 sm:$0xff]  }
   0x3   :  { %1830 = vmatprep.subr.bf16.mxu0 %v2334_v1  ;;  %1659 = vmatpush1.bf16.msra.mxu1 %v2336_v2  ;;  %v2342_v6 = vld [vmem:[%s3609_s1 + $0x10] ss:$8 sps:$4 sm:$0xff]   ;;  %v2344_v8 = vld [vmem:[%s3609_s1 + $0x24] ss:$8 sps:$4 sm:$0xff]   ;;  %v2348_v10 = vld [vmem:[%s3609_s1 + $0x20] ss:$8 sps:$4 sm:$0xff]  }
   0x4   :  { %1831 = vmatpush1.bf16.msra.mxu0 %v2337_v3  ;;  %1660 = vmatprep.subr.bf16.mxu1 %v2338_v4  ;;  %v2343_v7 = vld [vmem:[%s3609_s1 + $0x410] ss:$8 sps:$4 sm:$0xff]   ;;  %v2346_v9 = vld [vmem:[%s3609_s1 + $0x424] ss:$8 sps:$4 sm:$0xff]   ;;  %v2349_v11 = vld [vmem:[%s3609_s1 + $0x420] ss:$8 sps:$4 sm:$0xff]  }
   0x5   :  { %1832 = vmatprep.subr.bf16.mxu0 %v2340_v5  ;;  %v2350_v12 = vld [vmem:[%s3609_s1 + $0x34] ss:$8 sps:$4 sm:$0xff]   ;;  %v2354_v14 = vld [vmem:[%s3609_s1 + $0x30] ss:$8 sps:$4 sm:$0xff]   ;;  %v2356_v16 = vld [vmem:[%s3609_s1 + $0x44] ss:$8 sps:$4 sm:$0xff]  }
   0x6   :  { %v2352_v13 = vld [vmem:[%s3609_s1 + $0x434] ss:$8 sps:$4 sm:$0xff]   ;;  %v2355_v15 = vld [vmem:[%s3609_s1 + $0x430] ss:$8 sps:$4 sm:$0xff]   ;;  %v2358_v17 = vld [vmem:[%s3609_s1 + $0x444] ss:$8 sps:$4 sm:$0xff]  }
   0x7   :  { %1661 = vmatpush1.bf16.msra.mxu1 %v2342_v6  ;;  %v2360_v18 = vld [vmem:[%s3609_s1 + $0x40] ss:$8 sps:$4 sm:$0xff]   ;;  %v2362_v20 = vld [vmem:[%s3609_s1 + $0x54] ss:$8 sps:$4 sm:$0xff]   ;;  %v2366_v22 = vld [vmem:[%s3609_s1 + $0x50] ss:$8 sps:$4 sm:$0xff]  }
   0x8   :  { %1833 = vmatpush1.bf16.msra.mxu0 %v2343_v7  ;;  %1662 = vmatprep.subr.bf16.mxu1 %v2344_v8  ;;  %v2361_v19 = vld [vmem:[%s3609_s1 + $0x440] ss:$8 sps:$4 sm:$0xff]   ;;  %v2364_v21 = vld [vmem:[%s3609_s1 + $0x454] ss:$8 sps:$4 sm:$0xff]   ;;  %v2367_v23 = vld [vmem:[%s3609_s1 + $0x450] ss:$8 sps:$4 sm:$0xff]  }
   0x9   :  { %1834 = vmatprep.subr.bf16.mxu0 %v2346_v9  ;;  %v2368_v24 = vld [vmem:[%s3609_s1 + $0x64] ss:$8 sps:$4 sm:$0xff]   ;;  %v2372_v26 = vld [vmem:[%s3609_s1 + $0x60] ss:$8 sps:$4 sm:$0xff]   ;;  %v2374_v28 = vld [vmem:[%s3609_s1 + $0x74] ss:$8 sps:$4 sm:$0xff]  }
   0xa   :  { %v2370_v25 = vld [vmem:[%s3609_s1 + $0x464] ss:$8 sps:$4 sm:$0xff]   ;;  %v2373_v27 = vld [vmem:[%s3609_s1 + $0x460] ss:$8 sps:$4 sm:$0xff]   ;;  %v2376_v29 = vld [vmem:[%s3609_s1 + $0x474] ss:$8 sps:$4 sm:$0xff]  }
   0xb   :  { %1663 = vmatpush1.bf16.msra.mxu1 %v2348_v10  ;;  %v2378_v30 = vld [vmem:[%s3609_s1 + $0x70] ss:$8 sps:$4 sm:$0xff]   ;;  %v2380_v32 = vld [vmem:[%s3609_s1 + $0x84] ss:$8 sps:$4 sm:$0xff]   ;;  %v2384_v34 = vld [vmem:[%s3609_s1 + $0x80] ss:$8 sps:$4 sm:$0xff]  }
   0xc   :  { %1835 = vmatpush1.bf16.msra.mxu0 %v2349_v11  ;;  %1664 = vmatprep.subr.bf16.mxu1 %v2350_v12  ;;  %v2379_v31 = vld [vmem:[%s3609_s1 + $0x470] ss:$8 sps:$4 sm:$0xff]   ;;  %v2382_v33 = vld [vmem:[%s3609_s1 + $0x484] ss:$8 sps:$4 sm:$0xff]   ;;  %v2385_v35 = vld [vmem:[%s3609_s1 + $0x480] ss:$8 sps:$4 sm:$0xff]  }
   0xd   :  { %1836 = vmatprep.subr.bf16.mxu0 %v2352_v13  ;;  %v2386_v36 = vld [vmem:[%s3609_s1 + $0x94] ss:$8 sps:$4 sm:$0xff]   ;;  %v2390_v38 = vld [vmem:[%s3609_s1 + $0x90] ss:$8 sps:$4 sm:$0xff]   ;;  %v2392_v40 = vld [vmem:[%s3609_s1 + $0xa4] ss:$8 sps:$4 sm:$0xff]  }
   0xe   :  { %v2388_v37 = vld [vmem:[%s3609_s1 + $0x494] ss:$8 sps:$4 sm:$0xff]   ;;  %v2391_v39 = vld [vmem:[%s3609_s1 + $0x490] ss:$8 sps:$4 sm:$0xff]   ;;  %v2394_v41 = vld [vmem:[%s3609_s1 + $0x4a4] ss:$8 sps:$4 sm:$0xff]  }
   0xf   :  { %1665 = vmatpush1.bf16.msra.mxu1 %v2354_v14  ;;  %v2396_v42 = vld [vmem:[%s3609_s1 + $0xa0] ss:$8 sps:$4 sm:$0xff]   ;;  %v2398_v44 = vld [vmem:[%s3609_s1 + $0xb4] ss:$8 sps:$4 sm:$0xff]   ;;  %v2402_v46 = vld [vmem:[%s3609_s1 + $0xb0] ss:$8 sps:$4 sm:$0xff]  }
  0x10   :  { %1837 = vmatpush1.bf16.msra.mxu0 %v2355_v15  ;;  %1666 = vmatprep.subr.bf16.mxu1 %v2356_v16  ;;  %v2397_v43 = vld [vmem:[%s3609_s1 + $0x4a0] ss:$8 sps:$4 sm:$0xff]   ;;  %v2400_v45 = vld [vmem:[%s3609_s1 + $0x4b4] ss:$8 sps:$4 sm:$0xff]   ;;  %v2403_v47 = vld [vmem:[%s3609_s1 + $0x4b0] ss:$8 sps:$4 sm:$0xff]  }
  0x11   :  { %1838 = vmatprep.subr.bf16.mxu0 %v2358_v17  ;;  %v14_v48 = vld [vmem:[%s3610_s0] sm:$0xff]  ;;  %v2410_v58 = vld [vmem:[%s3609_s1 + $0xd4] ss:$8 sps:$4 sm:$0xff]   ;;  %v2414_v60 = vld [vmem:[%s3609_s1 + $0xd0] ss:$8 sps:$4 sm:$0xff]  }
  0x12   :  { %v22_v49 = vld [vmem:[%s3610_s0 + $0x40] sm:$0xff]  ;;  %v2412_v59 = vld [vmem:[%s3609_s1 + $0x4d4] ss:$8 sps:$4 sm:$0xff]   ;;  %v2415_v61 = vld [vmem:[%s3609_s1 + $0x4d0] ss:$8 sps:$4 sm:$0xff]  }
  0x13   :  { %1667 = vmatpush1.bf16.msra.mxu1 %v2360_v18  ;;  %v2404_v50 = vld [vmem:[%s3609_s1 + $0xc4] ss:$8 sps:$4 sm:$0xff]   ;;  %v2025_v52 = vcombine.high %v14_v48, %v22_v49  ;;  %v2408_v56 = vld [vmem:[%s3609_s1 + $0xc0] ss:$8 sps:$4 sm:$0xff]   ;;  %v2422_v2 = vld [vmem:[%s3609_s1 + $0xf4] ss:$8 sps:$4 sm:$0xff]   ;;  %v2024_v8 = vcombine.low %v14_v48, %v22_v49 }
  0x14   :  { %1839 = vmatpush1.bf16.msra.mxu0 %v2361_v19  ;;  %1668 = vmatprep.subr.bf16.mxu1 %v2362_v20  ;;  %v2406_v51 = vld [vmem:[%s3609_s1 + $0x4c4] ss:$8 sps:$4 sm:$0xff]   ;;  %v2409_v57 = vld [vmem:[%s3609_s1 + $0x4c0] ss:$8 sps:$4 sm:$0xff]   ;;  %v2424_v3 = vld [vmem:[%s3609_s1 + $0x4f4] ss:$8 sps:$4 sm:$0xff]  }
  0x15   :  { %1840 = vmatprep.subr.bf16.mxu0 %v2364_v21  ;;  %v18_v53 = vld [vmem:[%s3610_s0 + $0x20] sm:$0xff]  ;;  %1690 = vmatprep.mubr.bf16.mxu1 %v2025_v52  ;;  %v2426_v4 = vld [vmem:[%s3609_s1 + $0xf0] ss:$8 sps:$4 sm:$0xff]   ;;  %v2436_v12 = vld [vmem:[%s3609_s1 + $0x114] ss:$8 sps:$4 sm:$0xff]  }
  0x16   :  { %v26_v54 = vld [vmem:[%s3610_s0 + $0x60] sm:$0xff]  ;;  %v2427_v5 = vld [vmem:[%s3609_s1 + $0x4f0] ss:$8 sps:$4 sm:$0xff]   ;;  %v2439_v13 = vld [vmem:[%s3609_s1 + $0x514] ss:$8 sps:$4 sm:$0xff]  }
  0x17   :  { %1669 = vmatpush1.bf16.msra.mxu1 %v2366_v22  ;;  %v2033_v55 = vcombine.high %v18_v53, %v26_v54  ;;  %v2416_v62 = vld [vmem:[%s3609_s1 + $0xe4] ss:$8 sps:$4 sm:$0xff]   ;;  %v2420_v0 = vld [vmem:[%s3609_s1 + $0xe0] ss:$8 sps:$4 sm:$0xff]   ;;  %v2032_v10 = vcombine.low %v18_v53, %v26_v54  ;;  %v2434_v14 = vld [vmem:[%s3609_s1 + $0x110] ss:$8 sps:$4 sm:$0xff]  }
  0x18   :  { %1841 = vmatpush1.bf16.msra.mxu0 %v2367_v23  ;;  %1670 = vmatprep.subr.bf16.mxu1 %v2368_v24  ;;  %v2418_v63 = vld [vmem:[%s3609_s1 + $0x4e4] ss:$8 sps:$4 sm:$0xff]   ;;  %v2421_v1 = vld [vmem:[%s3609_s1 + $0x4e0] ss:$8 sps:$4 sm:$0xff]   ;;  %v2437_v15 = vld [vmem:[%s3609_s1 + $0x510] ss:$8 sps:$4 sm:$0xff]  }
  0x19   :  { %1842 = vmatprep.subr.bf16.mxu0 %v2370_v25  ;;  %1862 = vmatprep.mubr.bf16.mxu0 %v2033_v55  ;;  %v2430_v6 = vld [vmem:[%s3609_s1 + $0x104] ss:$8 sps:$4 sm:$0xff]   ;;  %v2428_v9 = vld [vmem:[%s3609_s1 + $0x100] ss:$8 sps:$4 sm:$0xff]   ;;  %v2448_v20 = vld [vmem:[%s3609_s1 + $0x134] ss:$8 sps:$4 sm:$0xff]  }
  0x1a   :  { %v2433_v7 = vld [vmem:[%s3609_s1 + $0x504] ss:$8 sps:$4 sm:$0xff]   ;;  %v2431_v11 = vld [vmem:[%s3609_s1 + $0x500] ss:$8 sps:$4 sm:$0xff]   ;;  %v2451_v21 = vld [vmem:[%s3609_s1 + $0x534] ss:$8 sps:$4 sm:$0xff]  }
  0x1b   :  { %1671 = vmatpush1.bf16.msra.mxu1 %v2372_v26  ;;  %v2442_v16 = vld [vmem:[%s3609_s1 + $0x124] ss:$8 sps:$4 sm:$0xff]   ;;  %v2440_v18 = vld [vmem:[%s3609_s1 + $0x120] ss:$8 sps:$4 sm:$0xff]   ;;  %v2446_v22 = vld [vmem:[%s3609_s1 + $0x130] ss:$8 sps:$4 sm:$0xff]  }
  0x1c   :  { %1843 = vmatpush1.bf16.msra.mxu0 %v2373_v27  ;;  %1672 = vmatprep.subr.bf16.mxu1 %v2374_v28  ;;  %v2445_v17 = vld [vmem:[%s3609_s1 + $0x524] ss:$8 sps:$4 sm:$0xff]   ;;  %v2443_v19 = vld [vmem:[%s3609_s1 + $0x520] ss:$8 sps:$4 sm:$0xff]   ;;  %v2449_v23 = vld [vmem:[%s3609_s1 + $0x530] ss:$8 sps:$4 sm:$0xff]  }
  0x1d   :  { %1844 = vmatprep.subr.bf16.mxu0 %v2376_v29  ;;  %v2454_v24 = vld [vmem:[%s3609_s1 + $0x144] ss:$8 sps:$4 sm:$0xff]   ;;  %v2452_v26 = vld [vmem:[%s3609_s1 + $0x140] ss:$8 sps:$4 sm:$0xff]   ;;  %v2460_v28 = vld [vmem:[%s3609_s1 + $0x154] ss:$8 sps:$4 sm:$0xff]  }
  0x1e   :  { %v2457_v25 = vld [vmem:[%s3609_s1 + $0x544] ss:$8 sps:$4 sm:$0xff]   ;;  %v2455_v27 = vld [vmem:[%s3609_s1 + $0x540] ss:$8 sps:$4 sm:$0xff]   ;;  %v2463_v29 = vld [vmem:[%s3609_s1 + $0x554] ss:$8 sps:$4 sm:$0xff]  }
  0x1f   :  { %1673 = vmatpush1.bf16.msra.mxu1 %v2378_v30  ;;  %v2458_v30 = vld [vmem:[%s3609_s1 + $0x150] ss:$8 sps:$4 sm:$0xff]   ;;  %v2476_v48 = vld [vmem:[%s3609_s1 + $0x180] ss:$8 sps:$4 sm:$0xff]   ;;  %v2490_v54 = vld [vmem:[%s3609_s1 + $0x1a4] ss:$8 sps:$4 sm:$0xff]  }
  0x20   :  { %1845 = vmatpush1.bf16.msra.mxu0 %v2379_v31  ;;  %1674 = vmatprep.subr.bf16.mxu1 %v2380_v32  ;;  %v2461_v31 = vld [vmem:[%s3609_s1 + $0x550] ss:$8 sps:$4 sm:$0xff]   ;;  %v2466_v32 = vld [vmem:[%s3609_s1 + $0x164] ss:$8 sps:$4 sm:$0xff]   ;;  %v2479_v49 = vld [vmem:[%s3609_s1 + $0x580] ss:$8 sps:$4 sm:$0xff]  }
  0x21   :  { %1846 = vmatprep.subr.bf16.mxu0 %v2382_v33  ;;  %v2469_v33 = vld [vmem:[%s3609_s1 + $0x564] ss:$8 sps:$4 sm:$0xff]   ;;  %v2482_v52 = vld [vmem:[%s3609_s1 + $0x190] ss:$8 sps:$4 sm:$0xff]  }
  0x22   :  { %v2485_v53 = vld [vmem:[%s3609_s1 + $0x590] ss:$8 sps:$4 sm:$0xff]   ;;  %v2493_v55 = vld [vmem:[%s3609_s1 + $0x5a4] ss:$8 sps:$4 sm:$0xff]  }
  0x23   :  { %1675 = vmatpush1.bf16.msra.mxu1 %v2384_v34  ;;  %v2464_v34 = vld [vmem:[%s3609_s1 + $0x160] ss:$8 sps:$4 sm:$0xff]  }
  0x24   :  { %1847 = vmatpush1.bf16.msra.mxu0 %v2385_v35  ;;  %1676 = vmatprep.subr.bf16.mxu1 %v2386_v36  ;;  %v2467_v35 = vld [vmem:[%s3609_s1 + $0x560] ss:$8 sps:$4 sm:$0xff]  }
  0x25   :  { %1848 = vmatprep.subr.bf16.mxu0 %v2388_v37  ;;  %v3027_v36 = vld [vmem:[%s3610_s0 + $0x8] sm:$0xff] }
  0x26   :  { %v3032_v37 = vld [vmem:[%s3610_s0 + $0x48] sm:$0xff] }
  0x27   :  { %1677 = vmatpush1.bf16.msra.mxu1 %v2390_v38  ;;  %v2472_v38 = vld [vmem:[%s3609_s1 + $0x174] ss:$8 sps:$4 sm:$0xff]  }
  0x28   :  { %1849 = vmatpush1.bf16.msra.mxu0 %v2391_v39  ;;  %1678 = vmatprep.subr.bf16.mxu1 %v2392_v40  ;;  %v2475_v39 = vld [vmem:[%s3609_s1 + $0x574] ss:$8 sps:$4 sm:$0xff]   ;;  %v2027_v40 = vcombine.high %v3027_v36, %v3032_v37 }
  0x29   :  { %1850 = vmatprep.subr.bf16.mxu0 %v2394_v41  ;;  %v3045_v41 = vld [vmem:[%s3610_s0 + $0x28] sm:$0xff] }
  0x2b   :  { %1679 = vmatpush1.bf16.msra.mxu1 %v2396_v42  ;;  %v3050_v42 = vld [vmem:[%s3610_s0 + $0x68] sm:$0xff] }
  0x2c   :  { %1851 = vmatpush1.bf16.msra.mxu0 %v2397_v43  ;;  %1680 = vmatprep.subr.bf16.mxu1 %v2398_v44  ;;  %v2035_v43 = vcombine.high %v3045_v41, %v3050_v42  ;;  %v2470_v44 = vld [vmem:[%s3609_s1 + $0x170] ss:$8 sps:$4 sm:$0xff]  }
  0x2d   :  { %1852 = vmatprep.subr.bf16.mxu0 %v2400_v45  ;;  %v2473_v45 = vld [vmem:[%s3609_s1 + $0x570] ss:$8 sps:$4 sm:$0xff]  }
  0x2f   :  { %1681 = vmatpush1.bf16.msra.mxu1 %v2402_v46  ;;  %v2478_v46 = vld [vmem:[%s3609_s1 + $0x184] ss:$8 sps:$4 sm:$0xff]  }
  0x30   :  { %1853 = vmatpush1.bf16.msra.mxu0 %v2403_v47  ;;  %1682 = vmatprep.subr.bf16.mxu1 %v2404_v50  ;;  %v2481_v47 = vld [vmem:[%s3609_s1 + $0x584] ss:$8 sps:$4 sm:$0xff]   ;;  %v2484_v50 = vld [vmem:[%s3609_s1 + $0x194] ss:$8 sps:$4 sm:$0xff]  }
  0x31   :  { %1854 = vmatprep.subr.bf16.mxu0 %v2406_v51  ;;  %v2487_v51 = vld [vmem:[%s3609_s1 + $0x594] ss:$8 sps:$4 sm:$0xff]  }
  0x33   :  { %1683 = vmatpush1.bf16.msra.mxu1 %v2408_v56  ;;  %v2488_v56 = vld [vmem:[%s3609_s1 + $0x1a0] ss:$8 sps:$4 sm:$0xff]  }
  0x34   :  { %1855 = vmatpush1.bf16.msra.mxu0 %v2409_v57  ;;  %1684 = vmatprep.subr.bf16.mxu1 %v2410_v58  ;;  %v2491_v57 = vld [vmem:[%s3609_s1 + $0x5a0] ss:$8 sps:$4 sm:$0xff]   ;;  %v2496_v58 = vld [vmem:[%s3609_s1 + $0x1b4] ss:$8 sps:$4 sm:$0xff]  }
  0x35   :  { %1856 = vmatprep.subr.bf16.mxu0 %v2412_v59  ;;  %v2499_v59 = vld [vmem:[%s3609_s1 + $0x5b4] ss:$8 sps:$4 sm:$0xff]  }
  0x37   :  { %1685 = vmatpush1.bf16.msra.mxu1 %v2414_v60  ;;  %v2494_v60 = vld [vmem:[%s3609_s1 + $0x1b0] ss:$8 sps:$4 sm:$0xff]  }
  0x38   :  { %1857 = vmatpush1.bf16.msra.mxu0 %v2415_v61  ;;  %1686 = vmatprep.subr.bf16.mxu1 %v2416_v62  ;;  %v2497_v61 = vld [vmem:[%s3609_s1 + $0x5b0] ss:$8 sps:$4 sm:$0xff]   ;;  %v2502_v62 = vld [vmem:[%s3609_s1 + $0x1c4] ss:$8 sps:$4 sm:$0xff]  }
  0x39   :  { %1858 = vmatprep.subr.bf16.mxu0 %v2418_v63  ;;  %v2505_v63 = vld [vmem:[%s3609_s1 + $0x5c4] ss:$8 sps:$4 sm:$0xff]  }
  0x3b   :  { %1687 = vmatpush1.bf16.msra.mxu1 %v2420_v0  ;;  %v2500_v0 = vld [vmem:[%s3609_s1 + $0x1c0] ss:$8 sps:$4 sm:$0xff]  }
  0x3c   :  { %1859 = vmatpush1.bf16.msra.mxu0 %v2421_v1  ;;  %1688 = vmatprep.subr.bf16.mxu1 %v2422_v2  ;;  %v2503_v1 = vld [vmem:[%s3609_s1 + $0x5c0] ss:$8 sps:$4 sm:$0xff]   ;;  %v2508_v2 = vld [vmem:[%s3609_s1 + $0x1d4] ss:$8 sps:$4 sm:$0xff]  }
  0x3d   :  { %1860 = vmatprep.subr.bf16.mxu0 %v2424_v3  ;;  %v2511_v3 = vld [vmem:[%s3609_s1 + $0x5d4] ss:$8 sps:$4 sm:$0xff]  }
  0x3f   :  { %1689 = vmatpush1.bf16.msra.mxu1 %v2426_v4  ;;  %v2506_v4 = vld [vmem:[%s3609_s1 + $0x1d0] ss:$8 sps:$4 sm:$0xff]  }
  0x40   :  { %1861 = vmatpush1.bf16.msra.mxu0 %v2427_v5  ;;  %1701 = vmatprep.subr.bf16.mxu1 %v2430_v6  ;;  %v2509_v5 = vld [vmem:[%s3609_s1 + $0x5d0] ss:$8 sps:$4 sm:$0xff]   ;;  %v2514_v6 = vld [vmem:[%s3609_s1 + $0x1e4] ss:$8 sps:$4 sm:$0xff]  }
  0x41   :  { %1873 = vmatprep.subr.bf16.mxu0 %v2433_v7  ;;  %v2517_v7 = vld [vmem:[%s3609_s1 + $0x5e4] ss:$8 sps:$4 sm:$0xff]  }
  0x42   :  { %1691 = vmatmul.mubr.bf16.vlgmr.msra.gmra.mrb[0].mxu1 %v2024_v8  ;;  %v2512_v8 = vld [vmem:[%s3609_s1 + $0x1e0] ss:$8 sps:$4 sm:$0xff]  }
  0x43   :  { %1863 = vmatmul.mubr.bf16.vlgmr.msra.gmra.mrb[0].mxu0 %v2032_v10  ;;  %1702 = vmatpush1.bf16.msra.mxu1 %v2428_v9  ;;  %v2515_v9 = vld [vmem:[%s3609_s1 + $0x5e0] ss:$8 sps:$4 sm:$0xff]   ;;  %v2520_v10 = vld [vmem:[%s3609_s1 + $0x1f4] ss:$8 sps:$4 sm:$0xff]  }
  0x44   :  { %1874 = vmatpush1.bf16.msra.mxu0 %v2431_v11  ;;  %1703 = vmatprep.subr.bf16.mxu1 %v2436_v12  ;;  %v2523_v11 = vld [vmem:[%s3609_s1 + $0x5f4] ss:$8 sps:$4 sm:$0xff]   ;;  %v2518_v12 = vld [vmem:[%s3609_s1 + $0x1f0] ss:$8 sps:$4 sm:$0xff]  }
  0x45   :  { %1875 = vmatprep.subr.bf16.mxu0 %v2439_v13  ;;  %1733 = vmatprep.mubr.bf16.mxu1 %v2027_v40  ;;  %v2521_v13 = vld [vmem:[%s3609_s1 + $0x5f0] ss:$8 sps:$4 sm:$0xff]   ;;  %v2548_v40 = vld [vmem:[%s3609_s1 + $0x240] ss:$8 sps:$4 sm:$0xff]  }
  0x46   :  { %1905 = vmatprep.mubr.bf16.mxu0 %v2035_v43  ;;  %v2559_v43 = vld [vmem:[%s3609_s1 + $0x654] ss:$8 sps:$4 sm:$0xff]  }
  0x47   :  { %1704 = vmatpush1.bf16.msra.mxu1 %v2434_v14  ;;  %v2526_v14 = vld [vmem:[%s3609_s1 + $0x204] ss:$8 sps:$4 sm:$0xff]  }
  0x48   :  { %1876 = vmatpush1.bf16.msra.mxu0 %v2437_v15  ;;  %1705 = vmatprep.subr.bf16.mxu1 %v2442_v16  ;;  %v2529_v15 = vld [vmem:[%s3609_s1 + $0x604] ss:$8 sps:$4 sm:$0xff]   ;;  %v2026_v16 = vcombine.low %v3027_v36, %v3032_v37  ;;  %v2542_v36 = vld [vmem:[%s3609_s1 + $0x230] ss:$8 sps:$4 sm:$0xff]  }
  0x49   :  { %1877 = vmatprep.subr.bf16.mxu0 %v2445_v17  ;;  %v2524_v17 = vld [vmem:[%s3609_s1 + $0x200] ss:$8 sps:$4 sm:$0xff]   ;;  %v2545_v37 = vld [vmem:[%s3609_s1 + $0x630] ss:$8 sps:$4 sm:$0xff]  }
  0x4b   :  { %1706 = vmatpush1.bf16.msra.mxu1 %v2440_v18  ;;  %v2034_v18 = vcombine.low %v3045_v41, %v3050_v42  ;;  %v2551_v41 = vld [vmem:[%s3609_s1 + $0x640] ss:$8 sps:$4 sm:$0xff]   ;;  %v2556_v42 = vld [vmem:[%s3609_s1 + $0x254] ss:$8 sps:$4 sm:$0xff]  }
  0x4c   :  { %1878 = vmatpush1.bf16.msra.mxu0 %v2443_v19  ;;  %1707 = vmatprep.subr.bf16.mxu1 %v2448_v20  ;;  %v2527_v19 = vld [vmem:[%s3609_s1 + $0x600] ss:$8 sps:$4 sm:$0xff]   ;;  %v2532_v20 = vld [vmem:[%s3609_s1 + $0x214] ss:$8 sps:$4 sm:$0xff]  }
  0x4d   :  { %1879 = vmatprep.subr.bf16.mxu0 %v2451_v21  ;;  %v2535_v21 = vld [vmem:[%s3609_s1 + $0x614] ss:$8 sps:$4 sm:$0xff]  }
  0x4f   :  { %1708 = vmatpush1.bf16.msra.mxu1 %v2446_v22  ;;  %v2530_v22 = vld [vmem:[%s3609_s1 + $0x210] ss:$8 sps:$4 sm:$0xff]  }
  0x50   :  { %1880 = vmatpush1.bf16.msra.mxu0 %v2449_v23  ;;  %1709 = vmatprep.subr.bf16.mxu1 %v2454_v24  ;;  %v2533_v23 = vld [vmem:[%s3609_s1 + $0x610] ss:$8 sps:$4 sm:$0xff]  }
  0x51   :  { %1881 = vmatprep.subr.bf16.mxu0 %v2457_v25  ;;  %v3187_v24 = vld [vmem:[%s3610_s0 + $0x10] sm:$0xff] }
  0x52   :  { %v3192_v25 = vld [vmem:[%s3610_s0 + $0x50] sm:$0xff] }
  0x53   :  { %1710 = vmatpush1.bf16.msra.mxu1 %v2452_v26  ;;  %v2538_v26 = vld [vmem:[%s3609_s1 + $0x224] ss:$8 sps:$4 sm:$0xff]  }
  0x54   :  { %1882 = vmatpush1.bf16.msra.mxu0 %v2455_v27  ;;  %1711 = vmatprep.subr.bf16.mxu1 %v2460_v28  ;;  %v2541_v27 = vld [vmem:[%s3609_s1 + $0x624] ss:$8 sps:$4 sm:$0xff]   ;;  %v2029_v28 = vcombine.high %v3187_v24, %v3192_v25 }
  0x55   :  { %1883 = vmatprep.subr.bf16.mxu0 %v2463_v29  ;;  %v3205_v29 = vld [vmem:[%s3610_s0 + $0x30] sm:$0xff] }
  0x57   :  { %1712 = vmatpush1.bf16.msra.mxu1 %v2458_v30  ;;  %v3210_v30 = vld [vmem:[%s3610_s0 + $0x70] sm:$0xff] }
  0x58   :  { %1884 = vmatpush1.bf16.msra.mxu0 %v2461_v31  ;;  %1713 = vmatprep.subr.bf16.mxu1 %v2466_v32  ;;  %v2037_v31 = vcombine.high %v3205_v29, %v3210_v30  ;;  %v2536_v32 = vld [vmem:[%s3609_s1 + $0x220] ss:$8 sps:$4 sm:$0xff]  }
  0x59   :  { %1885 = vmatprep.subr.bf16.mxu0 %v2469_v33  ;;  %v2539_v33 = vld [vmem:[%s3609_s1 + $0x620] ss:$8 sps:$4 sm:$0xff]  }
  0x5b   :  { %1714 = vmatpush1.bf16.msra.mxu1 %v2464_v34  ;;  %v2544_v34 = vld [vmem:[%s3609_s1 + $0x234] ss:$8 sps:$4 sm:$0xff]  }
  0x5c   :  { %1886 = vmatpush1.bf16.msra.mxu0 %v2467_v35  ;;  %1715 = vmatprep.subr.bf16.mxu1 %v2472_v38  ;;  %v2547_v35 = vld [vmem:[%s3609_s1 + $0x634] ss:$8 sps:$4 sm:$0xff]   ;;  %v2550_v38 = vld [vmem:[%s3609_s1 + $0x244] ss:$8 sps:$4 sm:$0xff]  }
  0x5d   :  { %1887 = vmatprep.subr.bf16.mxu0 %v2475_v39  ;;  %v2553_v39 = vld [vmem:[%s3609_s1 + $0x644] ss:$8 sps:$4 sm:$0xff]  }
  0x5f   :  { %1716 = vmatpush1.bf16.msra.mxu1 %v2470_v44  ;;  %v2554_v44 = vld [vmem:[%s3609_s1 + $0x250] ss:$8 sps:$4 sm:$0xff]  }
  0x60   :  { %1888 = vmatpush1.bf16.msra.mxu0 %v2473_v45  ;;  %1717 = vmatprep.subr.bf16.mxu1 %v2478_v46  ;;  %v2557_v45 = vld [vmem:[%s3609_s1 + $0x650] ss:$8 sps:$4 sm:$0xff]   ;;  %v2562_v46 = vld [vmem:[%s3609_s1 + $0x264] ss:$8 sps:$4 sm:$0xff]  }
  0x61   :  { %1889 = vmatprep.subr.bf16.mxu0 %v2481_v47  ;;  %v2565_v47 = vld [vmem:[%s3609_s1 + $0x664] ss:$8 sps:$4 sm:$0xff]  }
  0x63   :  { %1718 = vmatpush1.bf16.msra.mxu1 %v2476_v48  ;;  %v2560_v48 = vld [vmem:[%s3609_s1 + $0x260] ss:$8 sps:$4 sm:$0xff]  }
  0x64   :  { %1890 = vmatpush1.bf16.msra.mxu0 %v2479_v49  ;;  %1719 = vmatprep.subr.bf16.mxu1 %v2484_v50  ;;  %v2563_v49 = vld [vmem:[%s3609_s1 + $0x660] ss:$8 sps:$4 sm:$0xff]   ;;  %v2568_v50 = vld [vmem:[%s3609_s1 + $0x274] ss:$8 sps:$4 sm:$0xff]  }
  0x65   :  { %1891 = vmatprep.subr.bf16.mxu0 %v2487_v51  ;;  %v2571_v51 = vld [vmem:[%s3609_s1 + $0x674] ss:$8 sps:$4 sm:$0xff]  }
  0x67   :  { %1720 = vmatpush1.bf16.msra.mxu1 %v2482_v52  ;;  %v2566_v52 = vld [vmem:[%s3609_s1 + $0x270] ss:$8 sps:$4 sm:$0xff]  }
  0x68   :  { %1892 = vmatpush1.bf16.msra.mxu0 %v2485_v53  ;;  %1721 = vmatprep.subr.bf16.mxu1 %v2490_v54  ;;  %v2569_v53 = vld [vmem:[%s3609_s1 + $0x670] ss:$8 sps:$4 sm:$0xff]   ;;  %v2574_v54 = vld [vmem:[%s3609_s1 + $0x284] ss:$8 sps:$4 sm:$0xff]  }
  0x69   :  { %1893 = vmatprep.subr.bf16.mxu0 %v2493_v55  ;;  %v2577_v55 = vld [vmem:[%s3609_s1 + $0x684] ss:$8 sps:$4 sm:$0xff]  }
  0x6b   :  { %1722 = vmatpush1.bf16.msra.mxu1 %v2488_v56  ;;  %v2572_v56 = vld [vmem:[%s3609_s1 + $0x280] ss:$8 sps:$4 sm:$0xff]  }
  0x6c   :  { %1894 = vmatpush1.bf16.msra.mxu0 %v2491_v57  ;;  %1723 = vmatprep.subr.bf16.mxu1 %v2496_v58  ;;  %v2575_v57 = vld [vmem:[%s3609_s1 + $0x680] ss:$8 sps:$4 sm:$0xff]   ;;  %v2580_v58 = vld [vmem:[%s3609_s1 + $0x294] ss:$8 sps:$4 sm:$0xff]  }
  0x6d   :  { %1895 = vmatprep.subr.bf16.mxu0 %v2499_v59  ;;  %v2583_v59 = vld [vmem:[%s3609_s1 + $0x694] ss:$8 sps:$4 sm:$0xff]  }
  0x6f   :  { %1724 = vmatpush1.bf16.msra.mxu1 %v2494_v60  ;;  %v2578_v60 = vld [vmem:[%s3609_s1 + $0x290] ss:$8 sps:$4 sm:$0xff]  }
  0x70   :  { %1896 = vmatpush1.bf16.msra.mxu0 %v2497_v61  ;;  %1725 = vmatprep.subr.bf16.mxu1 %v2502_v62  ;;  %v2581_v61 = vld [vmem:[%s3609_s1 + $0x690] ss:$8 sps:$4 sm:$0xff]   ;;  %v2586_v62 = vld [vmem:[%s3609_s1 + $0x2a4] ss:$8 sps:$4 sm:$0xff]  }
  0x71   :  { %1897 = vmatprep.subr.bf16.mxu0 %v2505_v63  ;;  %v2589_v63 = vld [vmem:[%s3609_s1 + $0x6a4] ss:$8 sps:$4 sm:$0xff]  }
  0x73   :  { %1726 = vmatpush1.bf16.msra.mxu1 %v2500_v0  ;;  %v2584_v0 = vld [vmem:[%s3609_s1 + $0x2a0] ss:$8 sps:$4 sm:$0xff]  }
  0x74   :  { %1898 = vmatpush1.bf16.msra.mxu0 %v2503_v1  ;;  %1727 = vmatprep.subr.bf16.mxu1 %v2508_v2  ;;  %v2587_v1 = vld [vmem:[%s3609_s1 + $0x6a0] ss:$8 sps:$4 sm:$0xff]   ;;  %v2592_v2 = vld [vmem:[%s3609_s1 + $0x2b4] ss:$8 sps:$4 sm:$0xff]  }
  0x75   :  { %1899 = vmatprep.subr.bf16.mxu0 %v2511_v3  ;;  %v2595_v3 = vld [vmem:[%s3609_s1 + $0x6b4] ss:$8 sps:$4 sm:$0xff]  }
  0x77   :  { %1728 = vmatpush1.bf16.msra.mxu1 %v2506_v4  ;;  %v2590_v4 = vld [vmem:[%s3609_s1 + $0x2b0] ss:$8 sps:$4 sm:$0xff]  }
  0x78   :  { %1900 = vmatpush1.bf16.msra.mxu0 %v2509_v5  ;;  %1729 = vmatprep.subr.bf16.mxu1 %v2514_v6  ;;  %v2593_v5 = vld [vmem:[%s3609_s1 + $0x6b0] ss:$8 sps:$4 sm:$0xff]   ;;  %v2598_v6 = vld [vmem:[%s3609_s1 + $0x2c4] ss:$8 sps:$4 sm:$0xff]  }
  0x79   :  { %1901 = vmatprep.subr.bf16.mxu0 %v2517_v7  ;;  %v2601_v7 = vld [vmem:[%s3609_s1 + $0x6c4] ss:$8 sps:$4 sm:$0xff]  }
  0x7b   :  { %1730 = vmatpush1.bf16.msra.mxu1 %v2512_v8  ;;  %v2596_v8 = vld [vmem:[%s3609_s1 + $0x2c0] ss:$8 sps:$4 sm:$0xff]  }
  0x7c   :  { %1902 = vmatpush1.bf16.msra.mxu0 %v2515_v9  ;;  %1731 = vmatprep.subr.bf16.mxu1 %v2520_v10  ;;  %v2599_v9 = vld [vmem:[%s3609_s1 + $0x6c0] ss:$8 sps:$4 sm:$0xff]   ;;  %v2604_v10 = vld [vmem:[%s3609_s1 + $0x2d4] ss:$8 sps:$4 sm:$0xff]  }
  0x7d   :  { %1903 = vmatprep.subr.bf16.mxu0 %v2523_v11  ;;  %v2607_v11 = vld [vmem:[%s3609_s1 + $0x6d4] ss:$8 sps:$4 sm:$0xff]  }
  0x7f   :  { %1732 = vmatpush1.bf16.msra.mxu1 %v2518_v12  ;;  %v2602_v12 = vld [vmem:[%s3609_s1 + $0x2d0] ss:$8 sps:$4 sm:$0xff]  }
  0x80   :  { %1904 = vmatpush1.bf16.msra.mxu0 %v2521_v13  ;;  %1744 = vmatprep.subr.bf16.mxu1 %v2526_v14  ;;  %v2605_v13 = vld [vmem:[%s3609_s1 + $0x6d0] ss:$8 sps:$4 sm:$0xff]   ;;  %v2610_v14 = vld [vmem:[%s3609_s1 + $0x2e4] ss:$8 sps:$4 sm:$0xff]  }
  0x81   :  { %1916 = vmatprep.subr.bf16.mxu0 %v2529_v15  ;;  %v2613_v15 = vld [vmem:[%s3609_s1 + $0x6e4] ss:$8 sps:$4 sm:$0xff]  }
  0x82   :  { %1734 = vmatmul.mubr.bf16.vlgmr.msra.gmra.mrb[0].mxu1 %v2026_v16  ;;  %v2608_v16 = vld [vmem:[%s3609_s1 + $0x2e0] ss:$8 sps:$4 sm:$0xff]  }
  0x83   :  { %1906 = vmatmul.mubr.bf16.vlgmr.msra.gmra.mrb[0].mxu0 %v2034_v18  ;;  %1745 = vmatpush1.bf16.msra.mxu1 %v2524_v17  ;;  %v2611_v17 = vld [vmem:[%s3609_s1 + $0x6e0] ss:$8 sps:$4 sm:$0xff]   ;;  %v2616_v18 = vld [vmem:[%s3609_s1 + $0x2f4] ss:$8 sps:$4 sm:$0xff]  }
  0x84   :  { %1917 = vmatpush1.bf16.msra.mxu0 %v2527_v19  ;;  %1746 = vmatprep.subr.bf16.mxu1 %v2532_v20  ;;  %v2619_v19 = vld [vmem:[%s3609_s1 + $0x6f4] ss:$8 sps:$4 sm:$0xff]   ;;  %v2614_v20 = vld [vmem:[%s3609_s1 + $0x2f0] ss:$8 sps:$4 sm:$0xff]  }
  0x85   :  { %1918 = vmatprep.subr.bf16.mxu0 %v2535_v21  ;;  %1776 = vmatprep.mubr.bf16.mxu1 %v2029_v28  ;;  %v2617_v21 = vld [vmem:[%s3609_s1 + $0x6f0] ss:$8 sps:$4 sm:$0xff]   ;;  %v2036_v28 = vcombine.low %v3205_v29, %v3210_v30  ;;  %v2628_v29 = vld [vmem:[%s3609_s1 + $0x314] ss:$8 sps:$4 sm:$0xff]  }
  0x86   :  { %1948 = vmatprep.mubr.bf16.mxu0 %v2037_v31  ;;  %v3394_v31 = vld [vmem:[%s3610_s0 + $0x58] sm:$0xff] }
  0x87   :  { %1747 = vmatpush1.bf16.msra.mxu1 %v2530_v22  ;;  %v2622_v22 = vld [vmem:[%s3609_s1 + $0x304] ss:$8 sps:$4 sm:$0xff]   ;;  %v2631_v30 = vld [vmem:[%s3609_s1 + $0x714] ss:$8 sps:$4 sm:$0xff]  }
  0x88   :  { %1919 = vmatpush1.bf16.msra.mxu0 %v2533_v23  ;;  %1748 = vmatprep.subr.bf16.mxu1 %v2538_v26  ;;  %v2625_v23 = vld [vmem:[%s3609_s1 + $0x704] ss:$8 sps:$4 sm:$0xff]   ;;  %v3385_v26 = vld [vmem:[%s3610_s0 + $0x18] sm:$0xff] }
  0x89   :  { %1920 = vmatprep.subr.bf16.mxu0 %v2541_v27  ;;  %v2028_v27 = vcombine.low %v3187_v24, %v3192_v25  ;;  %v2620_v24 = vld [vmem:[%s3609_s1 + $0x300] ss:$8 sps:$4 sm:$0xff]  }
  0x8a   :  { %v2623_v25 = vld [vmem:[%s3609_s1 + $0x700] ss:$8 sps:$4 sm:$0xff]  }
  0x8b   :  { %1749 = vmatpush1.bf16.msra.mxu1 %v2536_v32  ;;  %v3399_v32 = vld [vmem:[%s3610_s0 + $0x38] sm:$0xff] }
  0x8c   :  { %1921 = vmatpush1.bf16.msra.mxu0 %v2539_v33  ;;  %1750 = vmatprep.subr.bf16.mxu1 %v2544_v34  ;;  %v3404_v33 = vld [vmem:[%s3610_s0 + $0x78] sm:$0xff]  ;;  %v2031_v34 = vcombine.high %v3385_v26, %v3394_v31 }
  0x8d   :  { %1922 = vmatprep.subr.bf16.mxu0 %v2547_v35  ;;  %v2039_v35 = vcombine.high %v3399_v32, %v3404_v33 }
  0x8f   :  { %1751 = vmatpush1.bf16.msra.mxu1 %v2542_v36  ;;  %v2626_v36 = vld [vmem:[%s3609_s1 + $0x310] ss:$8 sps:$4 sm:$0xff]  }
  0x90   :  { %1923 = vmatpush1.bf16.msra.mxu0 %v2545_v37  ;;  %1752 = vmatprep.subr.bf16.mxu1 %v2550_v38  ;;  %v2629_v37 = vld [vmem:[%s3609_s1 + $0x710] ss:$8 sps:$4 sm:$0xff]   ;;  %v2634_v38 = vld [vmem:[%s3609_s1 + $0x324] ss:$8 sps:$4 sm:$0xff]  }
  0x91   :  { %1924 = vmatprep.subr.bf16.mxu0 %v2553_v39  ;;  %v2637_v39 = vld [vmem:[%s3609_s1 + $0x724] ss:$8 sps:$4 sm:$0xff]  }
  0x93   :  { %1753 = vmatpush1.bf16.msra.mxu1 %v2548_v40  ;;  %v2632_v40 = vld [vmem:[%s3609_s1 + $0x320] ss:$8 sps:$4 sm:$0xff]  }
  0x94   :  { %1925 = vmatpush1.bf16.msra.mxu0 %v2551_v41  ;;  %1754 = vmatprep.subr.bf16.mxu1 %v2556_v42  ;;  %v2635_v41 = vld [vmem:[%s3609_s1 + $0x720] ss:$8 sps:$4 sm:$0xff]   ;;  %v2640_v42 = vld [vmem:[%s3609_s1 + $0x334] ss:$8 sps:$4 sm:$0xff]  }
  0x95   :  { %1926 = vmatprep.subr.bf16.mxu0 %v2559_v43  ;;  %v2643_v43 = vld [vmem:[%s3609_s1 + $0x734] ss:$8 sps:$4 sm:$0xff]  }
  0x97   :  { %1755 = vmatpush1.bf16.msra.mxu1 %v2554_v44  ;;  %v2638_v44 = vld [vmem:[%s3609_s1 + $0x330] ss:$8 sps:$4 sm:$0xff]  }
  0x98   :  { %1927 = vmatpush1.bf16.msra.mxu0 %v2557_v45  ;;  %1756 = vmatprep.subr.bf16.mxu1 %v2562_v46  ;;  %v2641_v45 = vld [vmem:[%s3609_s1 + $0x730] ss:$8 sps:$4 sm:$0xff]   ;;  %v2646_v46 = vld [vmem:[%s3609_s1 + $0x344] ss:$8 sps:$4 sm:$0xff]  }
  0x99   :  { %1928 = vmatprep.subr.bf16.mxu0 %v2565_v47  ;;  %v2649_v47 = vld [vmem:[%s3609_s1 + $0x744] ss:$8 sps:$4 sm:$0xff]  }
  0x9b   :  { %1757 = vmatpush1.bf16.msra.mxu1 %v2560_v48  ;;  %v2644_v48 = vld [vmem:[%s3609_s1 + $0x340] ss:$8 sps:$4 sm:$0xff]  }
  0x9c   :  { %1929 = vmatpush1.bf16.msra.mxu0 %v2563_v49  ;;  %1758 = vmatprep.subr.bf16.mxu1 %v2568_v50  ;;  %v2647_v49 = vld [vmem:[%s3609_s1 + $0x740] ss:$8 sps:$4 sm:$0xff]   ;;  %v2652_v50 = vld [vmem:[%s3609_s1 + $0x354] ss:$8 sps:$4 sm:$0xff]  }
  0x9d   :  { %1930 = vmatprep.subr.bf16.mxu0 %v2571_v51  ;;  %v2655_v51 = vld [vmem:[%s3609_s1 + $0x754] ss:$8 sps:$4 sm:$0xff]  }
  0x9f   :  { %1759 = vmatpush1.bf16.msra.mxu1 %v2566_v52  ;;  %v2650_v52 = vld [vmem:[%s3609_s1 + $0x350] ss:$8 sps:$4 sm:$0xff]  }
  0xa0   :  { %1931 = vmatpush1.bf16.msra.mxu0 %v2569_v53  ;;  %1760 = vmatprep.subr.bf16.mxu1 %v2574_v54  ;;  %v2653_v53 = vld [vmem:[%s3609_s1 + $0x750] ss:$8 sps:$4 sm:$0xff]   ;;  %v2658_v54 = vld [vmem:[%s3609_s1 + $0x364] ss:$8 sps:$4 sm:$0xff]  }
  0xa1   :  { %1932 = vmatprep.subr.bf16.mxu0 %v2577_v55  ;;  %v2661_v55 = vld [vmem:[%s3609_s1 + $0x764] ss:$8 sps:$4 sm:$0xff]  }
  0xa3   :  { %1761 = vmatpush1.bf16.msra.mxu1 %v2572_v56  ;;  %v2656_v56 = vld [vmem:[%s3609_s1 + $0x360] ss:$8 sps:$4 sm:$0xff]  }
  0xa4   :  { %1933 = vmatpush1.bf16.msra.mxu0 %v2575_v57  ;;  %1762 = vmatprep.subr.bf16.mxu1 %v2580_v58  ;;  %v2659_v57 = vld [vmem:[%s3609_s1 + $0x760] ss:$8 sps:$4 sm:$0xff]   ;;  %v2664_v58 = vld [vmem:[%s3609_s1 + $0x374] ss:$8 sps:$4 sm:$0xff]  }
  0xa5   :  { %1934 = vmatprep.subr.bf16.mxu0 %v2583_v59  ;;  %v2667_v59 = vld [vmem:[%s3609_s1 + $0x774] ss:$8 sps:$4 sm:$0xff]  }
  0xa7   :  { %1763 = vmatpush1.bf16.msra.mxu1 %v2578_v60  ;;  %v2662_v60 = vld [vmem:[%s3609_s1 + $0x370] ss:$8 sps:$4 sm:$0xff]  }
  0xa8   :  { %1935 = vmatpush1.bf16.msra.mxu0 %v2581_v61  ;;  %1764 = vmatprep.subr.bf16.mxu1 %v2586_v62  ;;  %v2665_v61 = vld [vmem:[%s3609_s1 + $0x770] ss:$8 sps:$4 sm:$0xff]   ;;  %v2670_v62 = vld [vmem:[%s3609_s1 + $0x384] ss:$8 sps:$4 sm:$0xff]  }
  0xa9   :  { %1936 = vmatprep.subr.bf16.mxu0 %v2589_v63  ;;  %v2673_v63 = vld [vmem:[%s3609_s1 + $0x784] ss:$8 sps:$4 sm:$0xff]  }
  0xab   :  { %1765 = vmatpush1.bf16.msra.mxu1 %v2584_v0  ;;  %v2668_v0 = vld [vmem:[%s3609_s1 + $0x380] ss:$8 sps:$4 sm:$0xff]  }
  0xac   :  { %1937 = vmatpush1.bf16.msra.mxu0 %v2587_v1  ;;  %1766 = vmatprep.subr.bf16.mxu1 %v2592_v2  ;;  %v2671_v1 = vld [vmem:[%s3609_s1 + $0x780] ss:$8 sps:$4 sm:$0xff]   ;;  %v2676_v2 = vld [vmem:[%s3609_s1 + $0x394] ss:$8 sps:$4 sm:$0xff]  }
  0xad   :  { %1938 = vmatprep.subr.bf16.mxu0 %v2595_v3  ;;  %v2679_v3 = vld [vmem:[%s3609_s1 + $0x794] ss:$8 sps:$4 sm:$0xff]  }
  0xaf   :  { %1767 = vmatpush1.bf16.msra.mxu1 %v2590_v4  ;;  %v2674_v4 = vld [vmem:[%s3609_s1 + $0x390] ss:$8 sps:$4 sm:$0xff]  }
  0xb0   :  { %1939 = vmatpush1.bf16.msra.mxu0 %v2593_v5  ;;  %1768 = vmatprep.subr.bf16.mxu1 %v2598_v6  ;;  %v2677_v5 = vld [vmem:[%s3609_s1 + $0x790] ss:$8 sps:$4 sm:$0xff]   ;;  %v2682_v6 = vld [vmem:[%s3609_s1 + $0x3a4] ss:$8 sps:$4 sm:$0xff]  }
  0xb1   :  { %1940 = vmatprep.subr.bf16.mxu0 %v2601_v7  ;;  %v2685_v7 = vld [vmem:[%s3609_s1 + $0x7a4] ss:$8 sps:$4 sm:$0xff]  }
  0xb3   :  { %1769 = vmatpush1.bf16.msra.mxu1 %v2596_v8  ;;  %v2680_v8 = vld [vmem:[%s3609_s1 + $0x3a0] ss:$8 sps:$4 sm:$0xff]  }
  0xb4   :  { %1941 = vmatpush1.bf16.msra.mxu0 %v2599_v9  ;;  %1770 = vmatprep.subr.bf16.mxu1 %v2604_v10  ;;  %v2683_v9 = vld [vmem:[%s3609_s1 + $0x7a0] ss:$8 sps:$4 sm:$0xff]   ;;  %v2688_v10 = vld [vmem:[%s3609_s1 + $0x3b4] ss:$8 sps:$4 sm:$0xff]  }
  0xb5   :  { %1942 = vmatprep.subr.bf16.mxu0 %v2607_v11  ;;  %v2691_v11 = vld [vmem:[%s3609_s1 + $0x7b4] ss:$8 sps:$4 sm:$0xff]  }
  0xb7   :  { %1771 = vmatpush1.bf16.msra.mxu1 %v2602_v12  ;;  %v2686_v12 = vld [vmem:[%s3609_s1 + $0x3b0] ss:$8 sps:$4 sm:$0xff]  }
  0xb8   :  { %1943 = vmatpush1.bf16.msra.mxu0 %v2605_v13  ;;  %1772 = vmatprep.subr.bf16.mxu1 %v2610_v14  ;;  %v2689_v13 = vld [vmem:[%s3609_s1 + $0x7b0] ss:$8 sps:$4 sm:$0xff]   ;;  %v2694_v14 = vld [vmem:[%s3609_s1 + $0x3c4] ss:$8 sps:$4 sm:$0xff]  }
  0xb9   :  { %1944 = vmatprep.subr.bf16.mxu0 %v2613_v15  ;;  %v2697_v15 = vld [vmem:[%s3609_s1 + $0x7c4] ss:$8 sps:$4 sm:$0xff]  }
  0xbb   :  { %1773 = vmatpush1.bf16.msra.mxu1 %v2608_v16  ;;  %v2692_v16 = vld [vmem:[%s3609_s1 + $0x3c0] ss:$8 sps:$4 sm:$0xff]  }
  0xbc   :  { %1945 = vmatpush1.bf16.msra.mxu0 %v2611_v17  ;;  %1774 = vmatprep.subr.bf16.mxu1 %v2616_v18  ;;  %v2695_v17 = vld [vmem:[%s3609_s1 + $0x7c0] ss:$8 sps:$4 sm:$0xff]   ;;  %v2700_v18 = vld [vmem:[%s3609_s1 + $0x3d4] ss:$8 sps:$4 sm:$0xff]  }
  0xbd   :  { %1946 = vmatprep.subr.bf16.mxu0 %v2619_v19  ;;  %v2703_v19 = vld [vmem:[%s3609_s1 + $0x7d4] ss:$8 sps:$4 sm:$0xff]  }
  0xbf   :  { %1775 = vmatpush1.bf16.msra.mxu1 %v2614_v20  ;;  %v2698_v20 = vld [vmem:[%s3609_s1 + $0x3d0] ss:$8 sps:$4 sm:$0xff]  }
  0xc0   :  { %1947 = vmatpush1.bf16.msra.mxu0 %v2617_v21  ;;  %1787 = vmatprep.subr.bf16.mxu1 %v2622_v22  ;;  %v2701_v21 = vld [vmem:[%s3609_s1 + $0x7d0] ss:$8 sps:$4 sm:$0xff]   ;;  %v2706_v22 = vld [vmem:[%s3609_s1 + $0x3e4] ss:$8 sps:$4 sm:$0xff]  }
  0xc1   :  { %1959 = vmatprep.subr.bf16.mxu0 %v2625_v23  ;;  %v2709_v23 = vld [vmem:[%s3609_s1 + $0x7e4] ss:$8 sps:$4 sm:$0xff]  }
  0xc2   :  { %1777 = vmatmul.mubr.bf16.vlgmr.msra.gmra.mrb[0].mxu1 %v2028_v27  ;;  %v2704_v27 = vld [vmem:[%s3609_s1 + $0x3e0] ss:$8 sps:$4 sm:$0xff]  }
  0xc3   :  { %1949 = vmatmul.mubr.bf16.vlgmr.msra.gmra.mrb[0].mxu0 %v2036_v28  ;;  %1788 = vmatpush1.bf16.msra.mxu1 %v2620_v24  ;;  %v2707_v28 = vld [vmem:[%s3609_s1 + $0x7e0] ss:$8 sps:$4 sm:$0xff]   ;;  %v2712_v24 = vld [vmem:[%s3609_s1 + $0x3f4] ss:$8 sps:$4 sm:$0xff]  }
  0xc4   :  { %1960 = vmatpush1.bf16.msra.mxu0 %v2623_v25  ;;  %1789 = vmatprep.subr.bf16.mxu1 %v2628_v29  ;;  %v2715_v25 = vld [vmem:[%s3609_s1 + $0x7f4] ss:$8 sps:$4 sm:$0xff]   ;;  %v2710_v29 = vld [vmem:[%s3609_s1 + $0x3f0] ss:$8 sps:$4 sm:$0xff]  }
  0xc5   :  { %1961 = vmatprep.subr.bf16.mxu0 %v2631_v30  ;;  %1819 = vmatprep.mubr.bf16.mxu1 %v2031_v34  ;;  %v2713_v30 = vld [vmem:[%s3609_s1 + $0x7f0] ss:$8 sps:$4 sm:$0xff]   ;;  %v2030_v34 = vcombine.low %v3385_v26, %v3394_v31 }
  0xc6   :  { %1991 = vmatprep.mubr.bf16.mxu0 %v2039_v35  ;;  %v2038_v35 = vcombine.low %v3399_v32, %v3404_v33 }
  0xc7   :  { %1790 = vmatpush1.bf16.msra.mxu1 %v2626_v36  ;;  %v288_v36 = vlaneseq }
  0xc8   :  { %1962 = vmatpush1.bf16.msra.mxu0 %v2629_v37  ;;  %1791 = vmatprep.subr.bf16.mxu1 %v2634_v38 }
  0xc9   :  { %1963 = vmatprep.subr.bf16.mxu0 %v2637_v39  ;;  %v289_v37 = vshrl.u32 %v288_v36, 7  ;;  %v286_v39 = vld [vmem:[%s3611_s2] sm:$0x3] }
  0xcb   :  { %1792 = vmatpush1.bf16.msra.mxu1 %v2632_v40  ;;  %v290_v38 = vsub.s32 0, %v289_v37  ;;  %v294_v40 = vsub.s32 1, %v289_v37 }
  0xcc   :  { %1964 = vmatpush1.bf16.msra.mxu0 %v2635_v41  ;;  %1793 = vmatprep.subr.bf16.mxu1 %v2640_v42 }
  0xcd   :  { %1965 = vmatprep.subr.bf16.mxu0 %v2643_v43  ;;  %v291_v41 = vrot.slane %v286_v39, %v290_v38  ;;  %v295_v42 = vrot.slane %v286_v39, %v294_v40 }
  0xcf   :  { %1794 = vmatpush1.bf16.msra.mxu1 %v2638_v44 }
  0xd0   :  { %1966 = vmatpush1.bf16.msra.mxu0 %v2641_v45  ;;  %1795 = vmatprep.subr.bf16.mxu1 %v2646_v46 }
  0xd1   :  { %1967 = vmatprep.subr.bf16.mxu0 %v2649_v47 }
  0xd3   :  { %1796 = vmatpush1.bf16.msra.mxu1 %v2644_v48 }
  0xd4   :  { %1968 = vmatpush1.bf16.msra.mxu0 %v2647_v49  ;;  %1797 = vmatprep.subr.bf16.mxu1 %v2652_v50 }
  0xd5   :  { %1969 = vmatprep.subr.bf16.mxu0 %v2655_v51 }
  0xd7   :  { %1798 = vmatpush1.bf16.msra.mxu1 %v2650_v52 }
  0xd8   :  { %1970 = vmatpush1.bf16.msra.mxu0 %v2653_v53  ;;  %1799 = vmatprep.subr.bf16.mxu1 %v2658_v54 }
  0xd9   :  { %1971 = vmatprep.subr.bf16.mxu0 %v2661_v55 }
  0xdb   :  { %1800 = vmatpush1.bf16.msra.mxu1 %v2656_v56 }
  0xdc   :  { %1972 = vmatpush1.bf16.msra.mxu0 %v2659_v57  ;;  %1801 = vmatprep.subr.bf16.mxu1 %v2664_v58 }
  0xdd   :  { %1973 = vmatprep.subr.bf16.mxu0 %v2667_v59 }
  0xdf   :  { %1802 = vmatpush1.bf16.msra.mxu1 %v2662_v60 }
  0xe0   :  { %1974 = vmatpush1.bf16.msra.mxu0 %v2665_v61  ;;  %1803 = vmatprep.subr.bf16.mxu1 %v2670_v62 }
  0xe1   :  { %1975 = vmatprep.subr.bf16.mxu0 %v2673_v63 }
  0xe3   :  { %1804 = vmatpush1.bf16.msra.mxu1 %v2668_v0 }
  0xe4   :  { %1976 = vmatpush1.bf16.msra.mxu0 %v2671_v1  ;;  %1805 = vmatprep.subr.bf16.mxu1 %v2676_v2 }
  0xe5   :  { %1977 = vmatprep.subr.bf16.mxu0 %v2679_v3 }
  0xe7   :  { %1806 = vmatpush1.bf16.msra.mxu1 %v2674_v4 }
  0xe8   :  { %1978 = vmatpush1.bf16.msra.mxu0 %v2677_v5  ;;  %1807 = vmatprep.subr.bf16.mxu1 %v2682_v6 }
  0xe9   :  { %1979 = vmatprep.subr.bf16.mxu0 %v2685_v7 }
  0xeb   :  { %1808 = vmatpush1.bf16.msra.mxu1 %v2680_v8 }
  0xec   :  { %1980 = vmatpush1.bf16.msra.mxu0 %v2683_v9  ;;  %1809 = vmatprep.subr.bf16.mxu1 %v2688_v10 }
  0xed   :  { %1981 = vmatprep.subr.bf16.mxu0 %v2691_v11 }
  0xef   :  { %1810 = vmatpush1.bf16.msra.mxu1 %v2686_v12 }
  0xf0   :  { %1982 = vmatpush1.bf16.msra.mxu0 %v2689_v13  ;;  %1811 = vmatprep.subr.bf16.mxu1 %v2694_v14 }
  0xf1   :  { %1983 = vmatprep.subr.bf16.mxu0 %v2697_v15 }
  0xf3   :  { %1812 = vmatpush1.bf16.msra.mxu1 %v2692_v16 }
  0xf4   :  { %1984 = vmatpush1.bf16.msra.mxu0 %v2695_v17  ;;  %1813 = vmatprep.subr.bf16.mxu1 %v2700_v18 }
  0xf5   :  { %1985 = vmatprep.subr.bf16.mxu0 %v2703_v19 }
  0xf7   :  { %1814 = vmatpush1.bf16.msra.mxu1 %v2698_v20 }
  0xf8   :  { %1986 = vmatpush1.bf16.msra.mxu0 %v2701_v21  ;;  %1815 = vmatprep.subr.bf16.mxu1 %v2706_v22 }
  0xf9   :  { %1987 = vmatprep.subr.bf16.mxu0 %v2709_v23 }
  0xfb   :  { %1816 = vmatpush1.bf16.msra.mxu1 %v2704_v27 }
  0xfc   :  { %1988 = vmatpush1.bf16.msra.mxu0 %v2707_v28  ;;  %1817 = vmatprep.subr.bf16.mxu1 %v2712_v24 }
  0xfd   :  { %1989 = vmatprep.subr.bf16.mxu0 %v2715_v25 }
  0xff   :  { %1818 = vmatpush1.bf16.msra.mxu1 %v2710_v29 }
 0x100   :  { %1990 = vmatpush1.bf16.msra.mxu0 %v2713_v30 }
 0x102   :  { %1820 = vmatmul.mubr.bf16.vlgmr.msra.gmra.mrb[0].mxu1 %v2030_v34 }
 0x103   :  { %1992 = vmatmul.mubr.bf16.vlgmr.msra.gmra.mrb[0].mxu0 %v2038_v35 }
 0x1d5   :  { %v1821_v43 = vpop.f32.mrb[0].mxu1 }
 0x1d6   :  { %v1993_v44 = vpop.f32.mrb[0].mxu0  ;;  %v2300_v26 = vadd.f32 %v1821_v43, %v291_v41  ;;  %v1823_v31 = vpop.f32.mrb[1].mxu1 }
 0x1d7   :  { %v1995_v45 = vpop.f32.mrb[1].mxu0  ;;  %v2302_v32 = vadd.f32 %v1823_v31, %v295_v42  ;;  %v1825_v33 = vpop.f32.mrb[2].mxu1 }
 0x1d8   :  { %v1997_v46 = vpop.f32.mrb[2].mxu0  ;;  %v2301_v47 = vadd.f32 %v2300_v26, %v1993_v44  ;;  %v2304_v48 = vadd.f32 %v1825_v33, %v291_v41  ;;  %v1827_v49 = vpop.f32.mrb[3].mxu1 }
 0x1d9   :  { %v1999_v50 = vpop.f32.mrb[3].mxu0  ;;  %v2303_v51 = vadd.f32 %v2302_v32, %v1995_v45  ;;  %v2306_v52 = vadd.f32 %v1827_v49, %v295_v42 }
 0x1da   :  { %v2002_v53 = vmax.f32 %v2301_v47, 0.0  ;;  %v2305_v54 = vadd.f32 %v2304_v48, %v1997_v46 }
 0x1db   :  { %v2003_v55 = vmax.f32 %v2303_v51, 0.0  ;;  %v2307_v56 = vadd.f32 %v2306_v52, %v1999_v50 }
 0x1dc   :  { %v2004_v57 = vmax.f32 %v2305_v54, 0.0 }
 0x1dd   :  { %v2298_v58 = vpack.c.bf16 %v2003_v55, %v2002_v53  ;;  %v2005_v59 = vmax.f32 %v2307_v56, 0.0 }
 0x1df   :  { %2018 = vst [vmem:[%s3612_s3] sm:$0xff] %v2298_v58  ;;  %v2299_v60 = vpack.c.bf16 %v2005_v59, %v2004_v57 }
 0x1e1   :  { %2019 = vst [vmem:[%s3612_s3 + $0x8] sm:$0xff] %v2299_v60 }

// kernel: vae_forward.14
= control target key start
LH: loop header
LB: loop body
LE: loop exit
PB: predicated region body
PF: predicated region fallthrough
CT: control target
= control target key end

     0   :  { %s1222_s1 = inlined_call_operand.vmem [shape: bf16[1024,128], index: 1, kind: input, shape index: {}]   ;;  %s1223_s0 = inlined_call_operand.vmem [shape: bf16[16,1024], index: 0, kind: input, shape index: {}]   ;;  %s1224_s2 = inlined_call_operand.vmem [shape: f32[1,128], index: 2, kind: input, shape index: {}]   ;;  %s1225_s3 = inlined_call_operand.vmem [shape: f32[16,128], index: 3, kind: output, shape index: {}]  }
   0x1   :  { %v913_v0 = vld [vmem:[%s1222_s1 + $0x40] sm:$0xff]   ;;  %v917_v4 = vld [vmem:[%s1222_s1 + $0x48] sm:$0xff]   ;;  %v921_v8 = vld [vmem:[%s1222_s1 + $0x50] sm:$0xff]  }
   0x2   :  { %v914_v1 = vld [vmem:[%s1222_s1 + $0xc0] sm:$0xff]   ;;  %825 = vmatprep.subr.bf16.mxu0 %v913_v0  ;;  %v918_v5 = vld [vmem:[%s1222_s1 + $0xc8] sm:$0xff]   ;;  %v922_v9 = vld [vmem:[%s1222_s1 + $0xd0] sm:$0xff]  }
   0x3   :  { %v915_v2 = vld [vmem:[%s1222_s1] sm:$0xff]   ;;  %847 = vmatprep.subr.bf16.mxu1 %v914_v1  ;;  %v919_v6 = vld [vmem:[%s1222_s1 + $0x8] sm:$0xff]   ;;  %v923_v10 = vld [vmem:[%s1222_s1 + $0x10] sm:$0xff]  }
   0x4   :  { %v916_v3 = vld [vmem:[%s1222_s1 + $0x80] sm:$0xff]   ;;  %826 = vmatpush3.bf16.msra.mxu0 %v915_v2  ;;  %v920_v7 = vld [vmem:[%s1222_s1 + $0x88] sm:$0xff]   ;;  %v924_v11 = vld [vmem:[%s1222_s1 + $0x90] sm:$0xff]  }
   0x5   :  { %848 = vmatpush3.bf16.msra.mxu1 %v916_v3  ;;  %827 = vmatprep.subr.bf16.mxu0 %v917_v4  ;;  %v925_v12 = vld [vmem:[%s1222_s1 + $0x58] sm:$0xff]   ;;  %v929_v16 = vld [vmem:[%s1222_s1 + $0x60] sm:$0xff]   ;;  %v933_v20 = vld [vmem:[%s1222_s1 + $0x68] sm:$0xff]  }
   0x6   :  { %849 = vmatprep.subr.bf16.mxu1 %v918_v5  ;;  %v926_v13 = vld [vmem:[%s1222_s1 + $0xd8] sm:$0xff]   ;;  %v930_v17 = vld [vmem:[%s1222_s1 + $0xe0] sm:$0xff]   ;;  %v934_v21 = vld [vmem:[%s1222_s1 + $0xe8] sm:$0xff]  }
   0x7   :  { %v927_v14 = vld [vmem:[%s1222_s1 + $0x18] sm:$0xff]   ;;  %v931_v18 = vld [vmem:[%s1222_s1 + $0x20] sm:$0xff]   ;;  %v935_v22 = vld [vmem:[%s1222_s1 + $0x28] sm:$0xff]  }
   0x8   :  { %828 = vmatpush3.bf16.msra.mxu0 %v919_v6  ;;  %v928_v15 = vld [vmem:[%s1222_s1 + $0x98] sm:$0xff]   ;;  %v932_v19 = vld [vmem:[%s1222_s1 + $0xa0] sm:$0xff]   ;;  %v936_v23 = vld [vmem:[%s1222_s1 + $0xa8] sm:$0xff]  }
   0x9   :  { %850 = vmatpush3.bf16.msra.mxu1 %v920_v7  ;;  %829 = vmatprep.subr.bf16.mxu0 %v921_v8  ;;  %v937_v24 = vld [vmem:[%s1222_s1 + $0x70] sm:$0xff]   ;;  %v941_v28 = vld [vmem:[%s1222_s1 + $0x78] sm:$0xff]   ;;  %v15_v32 = vld [vmem:[%s1223_s0] sm:$0xff] }
   0xa   :  { %851 = vmatprep.subr.bf16.mxu1 %v922_v9  ;;  %v938_v25 = vld [vmem:[%s1222_s1 + $0xf0] sm:$0xff]   ;;  %v942_v29 = vld [vmem:[%s1222_s1 + $0xf8] sm:$0xff]   ;;  %v19_v33 = vld [vmem:[%s1223_s0 + $0x20] sm:$0xff] }
   0xb   :  { %v939_v26 = vld [vmem:[%s1222_s1 + $0x30] sm:$0xff]   ;;  %v943_v30 = vld [vmem:[%s1222_s1 + $0x38] sm:$0xff]   ;;  %v16_v34 = vld [vmem:[%s1223_s0 + $0x8] sm:$0xff]  ;;  %v753_v35 = vcombine.low %v15_v32, %v19_v33  ;;  %v754_v36 = vcombine.high %v15_v32, %v19_v33 }
   0xc   :  { %830 = vmatpush3.bf16.msra.mxu0 %v923_v10  ;;  %v940_v27 = vld [vmem:[%s1222_s1 + $0xb0] sm:$0xff]   ;;  %v944_v31 = vld [vmem:[%s1222_s1 + $0xb8] sm:$0xff]   ;;  %v20_v37 = vld [vmem:[%s1223_s0 + $0x28] sm:$0xff] }
   0xd   :  { %852 = vmatpush3.bf16.msra.mxu1 %v924_v11  ;;  %831 = vmatprep.subr.bf16.mxu0 %v925_v12  ;;  %v755_v38 = vcombine.low %v16_v34, %v20_v37  ;;  %v756_v39 = vcombine.high %v16_v34, %v20_v37  ;;  %v945_v40 = vld [vmem:[%s1222_s1 + $0x140] sm:$0xff]   ;;  %v949_v44 = vld [vmem:[%s1222_s1 + $0x148] sm:$0xff]   ;;  %v953_v48 = vld [vmem:[%s1222_s1 + $0x150] sm:$0xff]  }
   0xe   :  { %853 = vmatprep.subr.bf16.mxu1 %v926_v13  ;;  %614 = vmatprep.mubr.bf16.mxu0 %v754_v36  ;;  %v946_v41 = vld [vmem:[%s1222_s1 + $0x1c0] sm:$0xff]   ;;  %v950_v45 = vld [vmem:[%s1222_s1 + $0x1c8] sm:$0xff]   ;;  %v954_v49 = vld [vmem:[%s1222_s1 + $0x1d0] sm:$0xff]  }
   0xf   :  { %655 = vmatprep.mubr.bf16.mxu1 %v756_v39  ;;  %v947_v42 = vld [vmem:[%s1222_s1 + $0x100] sm:$0xff]   ;;  %v951_v46 = vld [vmem:[%s1222_s1 + $0x108] sm:$0xff]   ;;  %v955_v50 = vld [vmem:[%s1222_s1 + $0x110] sm:$0xff]  }
  0x10   :  { %832 = vmatpush3.bf16.msra.mxu0 %v927_v14  ;;  %v948_v43 = vld [vmem:[%s1222_s1 + $0x180] sm:$0xff]   ;;  %v952_v47 = vld [vmem:[%s1222_s1 + $0x188] sm:$0xff]   ;;  %v956_v51 = vld [vmem:[%s1222_s1 + $0x190] sm:$0xff]  }
  0x11   :  { %854 = vmatpush3.bf16.msra.mxu1 %v928_v15  ;;  %833 = vmatprep.subr.bf16.mxu0 %v929_v16  ;;  %v957_v52 = vld [vmem:[%s1222_s1 + $0x158] sm:$0xff]   ;;  %v961_v56 = vld [vmem:[%s1222_s1 + $0x160] sm:$0xff]   ;;  %v965_v60 = vld [vmem:[%s1222_s1 + $0x168] sm:$0xff]  }
  0x12   :  { %855 = vmatprep.subr.bf16.mxu1 %v930_v17  ;;  %v958_v53 = vld [vmem:[%s1222_s1 + $0x1d8] sm:$0xff]   ;;  %v962_v57 = vld [vmem:[%s1222_s1 + $0x1e0] sm:$0xff]   ;;  %v966_v61 = vld [vmem:[%s1222_s1 + $0x1e8] sm:$0xff]  }
  0x13   :  { %v959_v54 = vld [vmem:[%s1222_s1 + $0x118] sm:$0xff]   ;;  %v963_v58 = vld [vmem:[%s1222_s1 + $0x120] sm:$0xff]   ;;  %v967_v62 = vld [vmem:[%s1222_s1 + $0x128] sm:$0xff]  }
  0x14   :  { %834 = vmatpush3.bf16.msra.mxu0 %v931_v18  ;;  %v960_v55 = vld [vmem:[%s1222_s1 + $0x198] sm:$0xff]   ;;  %v964_v59 = vld [vmem:[%s1222_s1 + $0x1a0] sm:$0xff]   ;;  %v968_v63 = vld [vmem:[%s1222_s1 + $0x1a8] sm:$0xff]  }
  0x15   :  { %856 = vmatpush3.bf16.msra.mxu1 %v932_v19  ;;  %835 = vmatprep.subr.bf16.mxu0 %v933_v20  ;;  %v969_v0 = vld [vmem:[%s1222_s1 + $0x170] sm:$0xff]   ;;  %v973_v4 = vld [vmem:[%s1222_s1 + $0x178] sm:$0xff]   ;;  %v752_v18 = vld [vmem:[%s1224_s2] ss:$0 sm:$0xff] }
  0x16   :  { %857 = vmatprep.subr.bf16.mxu1 %v934_v21  ;;  %v970_v1 = vld [vmem:[%s1222_s1 + $0x1f0] sm:$0xff]   ;;  %v974_v5 = vld [vmem:[%s1222_s1 + $0x1f8] sm:$0xff]  }
  0x17   :  { %v971_v2 = vld [vmem:[%s1222_s1 + $0x130] sm:$0xff]   ;;  %v975_v6 = vld [vmem:[%s1222_s1 + $0x138] sm:$0xff]  }
  0x18   :  { %836 = vmatpush3.bf16.msra.mxu0 %v935_v22  ;;  %v972_v3 = vld [vmem:[%s1222_s1 + $0x1b0] sm:$0xff]   ;;  %v976_v7 = vld [vmem:[%s1222_s1 + $0x1b8] sm:$0xff]  }
  0x19   :  { %858 = vmatpush3.bf16.msra.mxu1 %v936_v23  ;;  %837 = vmatprep.subr.bf16.mxu0 %v937_v24  ;;  %v17_v8 = vld [vmem:[%s1223_s0 + $0x10] sm:$0xff]  ;;  %v18_v12 = vld [vmem:[%s1223_s0 + $0x18] sm:$0xff] }
  0x1a   :  { %859 = vmatprep.subr.bf16.mxu1 %v938_v25  ;;  %v21_v9 = vld [vmem:[%s1223_s0 + $0x30] sm:$0xff]  ;;  %v22_v13 = vld [vmem:[%s1223_s0 + $0x38] sm:$0xff] }
  0x1b   :  { %v757_v10 = vcombine.low %v17_v8, %v21_v9  ;;  %v758_v11 = vcombine.high %v17_v8, %v21_v9  ;;  %v759_v14 = vcombine.low %v18_v12, %v22_v13  ;;  %v760_v15 = vcombine.high %v18_v12, %v22_v13 }
  0x1c   :  { %838 = vmatpush3.bf16.msra.mxu0 %v939_v26 }
  0x1d   :  { %860 = vmatpush3.bf16.msra.mxu1 %v940_v27  ;;  %839 = vmatprep.subr.bf16.mxu0 %v941_v28 }
  0x1e   :  { %861 = vmatprep.subr.bf16.mxu1 %v942_v29 }
  0x20   :  { %840 = vmatpush3.bf16.msra.mxu0 %v943_v30 }
  0x21   :  { %862 = vmatpush3.bf16.msra.mxu1 %v944_v31  ;;  %869 = vmatprep.subr.bf16.mxu0 %v945_v40 }
  0x22   :  { %891 = vmatprep.subr.bf16.mxu1 %v946_v41 }
  0x23   :  { %615 = vmatmul.mubr.bf16.vlgmr.msra.gmra.mrb[0].mxu0 %v753_v35 }
  0x24   :  { %656 = vmatmul.mubr.bf16.vlgmr.msra.gmra.mrb[0].mxu1 %v755_v38  ;;  %870 = vmatpush3.bf16.msra.mxu0 %v947_v42 }
  0x25   :  { %892 = vmatpush3.bf16.msra.mxu1 %v948_v43  ;;  %871 = vmatprep.subr.bf16.mxu0 %v949_v44 }
  0x26   :  { %893 = vmatprep.subr.bf16.mxu1 %v950_v45  ;;  %696 = vmatprep.mubr.bf16.mxu0 %v758_v11 }
  0x27   :  { %737 = vmatprep.mubr.bf16.mxu1 %v760_v15 }
  0x28   :  { %872 = vmatpush3.bf16.msra.mxu0 %v951_v46 }
  0x29   :  { %894 = vmatpush3.bf16.msra.mxu1 %v952_v47  ;;  %873 = vmatprep.subr.bf16.mxu0 %v953_v48 }
  0x2a   :  { %895 = vmatprep.subr.bf16.mxu1 %v954_v49 }
  0x2c   :  { %874 = vmatpush3.bf16.msra.mxu0 %v955_v50 }
  0x2d   :  { %896 = vmatpush3.bf16.msra.mxu1 %v956_v51  ;;  %875 = vmatprep.subr.bf16.mxu0 %v957_v52 }
  0x2e   :  { %897 = vmatprep.subr.bf16.mxu1 %v958_v53 }
  0x30   :  { %876 = vmatpush3.bf16.msra.mxu0 %v959_v54 }
  0x31   :  { %898 = vmatpush3.bf16.msra.mxu1 %v960_v55  ;;  %877 = vmatprep.subr.bf16.mxu0 %v961_v56 }
  0x32   :  { %899 = vmatprep.subr.bf16.mxu1 %v962_v57 }
  0x34   :  { %878 = vmatpush3.bf16.msra.mxu0 %v963_v58 }
  0x35   :  { %900 = vmatpush3.bf16.msra.mxu1 %v964_v59  ;;  %879 = vmatprep.subr.bf16.mxu0 %v965_v60 }
  0x36   :  { %901 = vmatprep.subr.bf16.mxu1 %v966_v61 }
  0x38   :  { %880 = vmatpush3.bf16.msra.mxu0 %v967_v62 }
  0x39   :  { %902 = vmatpush3.bf16.msra.mxu1 %v968_v63  ;;  %881 = vmatprep.subr.bf16.mxu0 %v969_v0 }
  0x3a   :  { %903 = vmatprep.subr.bf16.mxu1 %v970_v1 }
  0x3c   :  { %882 = vmatpush3.bf16.msra.mxu0 %v971_v2 }
  0x3d   :  { %904 = vmatpush3.bf16.msra.mxu1 %v972_v3  ;;  %883 = vmatprep.subr.bf16.mxu0 %v973_v4 }
  0x3e   :  { %905 = vmatprep.subr.bf16.mxu1 %v974_v5 }
  0x40   :  { %884 = vmatpush3.bf16.msra.mxu0 %v975_v6 }
  0x41   :  { %906 = vmatpush3.bf16.msra.mxu1 %v976_v7 }
  0x43   :  { %697 = vmatmul.mubr.bf16.vlgmr.msra.gmra.mrb[4].mxu0 %v757_v10 }
  0x44   :  { %738 = vmatmul.mubr.bf16.vlgmr.msra.gmra.mrb[4].mxu1 %v759_v14 }
  0xf6   :  { %v841_v16 = vpop.f32.mrb[0].mxu0 }
  0xf7   :  { %v863_v17 = vpop.f32.mrb[0].mxu1  ;;  %v842_v19 = vpop.f32.mrb[1].mxu0 }
  0xf8   :  { %v843_v20 = vadd.f32 %v842_v19, %v841_v16  ;;  %v864_v21 = vpop.f32.mrb[1].mxu1  ;;  %v844_v22 = vpop.f32.mrb[2].mxu0 }
  0xf9   :  { %v865_v23 = vadd.f32 %v864_v21, %v863_v17  ;;  %v866_v24 = vpop.f32.mrb[2].mxu1  ;;  %v845_v25 = vpop.f32.mrb[3].mxu0 }
  0xfa   :  { %v617_v26 = vadd.f32 %v843_v20, %v752_v18  ;;  %v846_v27 = vadd.f32 %v845_v25, %v844_v22  ;;  %v867_v28 = vpop.f32.mrb[3].mxu1 }
  0xfb   :  { %v868_v29 = vadd.f32 %v867_v28, %v866_v24 }
  0xfc   :  { %v658_v30 = vadd.f32 %v865_v23, %v617_v26  ;;  %v620_v31 = vadd.f32 %v846_v27, %v752_v18 }
  0xfe   :  { %v661_v32 = vadd.f32 %v868_v29, %v620_v31 }
 0x116   :  { %v885_v33 = vpop.f32.mrb[4].mxu0 }
 0x117   :  { %v907_v34 = vpop.f32.mrb[4].mxu1  ;;  %v886_v35 = vpop.f32.mrb[5].mxu0 }
 0x118   :  { %v887_v36 = vadd.f32 %v886_v35, %v885_v33  ;;  %v908_v37 = vpop.f32.mrb[5].mxu1  ;;  %v888_v38 = vpop.f32.mrb[6].mxu0 }
 0x119   :  { %v909_v39 = vadd.f32 %v908_v37, %v907_v34  ;;  %v910_v40 = vpop.f32.mrb[6].mxu1  ;;  %v889_v41 = vpop.f32.mrb[7].mxu0 }
 0x11a   :  { %v699_v42 = vadd.f32 %v887_v36, %v658_v30  ;;  %v890_v43 = vadd.f32 %v889_v41, %v888_v38  ;;  %v911_v44 = vpop.f32.mrb[7].mxu1 }
 0x11b   :  { %v912_v45 = vadd.f32 %v911_v44, %v910_v40 }
 0x11c   :  { %v740_v46 = vadd.f32 %v909_v39, %v699_v42  ;;  %v702_v47 = vadd.f32 %v890_v43, %v661_v32 }
 0x11e   :  { %746 = vst [vmem:[%s1225_s3] sm:$0xff] %v740_v46  ;;  %v743_v48 = vadd.f32 %v912_v45, %v702_v47 }
 0x120   :  { %747 = vst [vmem:[%s1225_s3 + $0x8] sm:$0xff] %v743_v48 }

// kernel: vae_forward.15
= control target key start
LH: loop header
LB: loop body
LE: loop exit
PB: predicated region body
PF: predicated region fallthrough
CT: control target
= control target key end

     0   :  { %s989_s12 = smov 0   ;;  %s991_s13 = smov 0   ;;  %s1174_s0 = inlined_call_operand.vmem [shape: bf16[16,128], index: 0, kind: input, shape index: {}]   ;;  %s1175_s1 = inlined_call_operand.vmem [shape: bf16[128,1024], index: 1, kind: input, shape index: {}]   ;;  %s1176_s2 = inlined_call_operand.vmem [shape: f32[1,1024], index: 2, kind: input, shape index: {}]   ;;  %s1177_s3 = inlined_call_operand.vmem [shape: bf16[16,1024], index: 3, kind: output, shape index: {}]  }
   0x1   :  { %s993_s14 = smov 0   ;;  %s995_s15 = smov 0  }
   0x2   :  { %s997_s16 = smov 0  }
   0x3 LB: > { %s22_s17 = sadd.s32 1, %s962_s15  ;;  %s778_s18 = sadd.s32 4294967295, %s966_s16   ;;  %s966_s16 = sphi %s997_s16, %s13_s16   ;;  %s962_s15 = sphi %s995_s15, %s1182_s15   ;;  %s958_s14 = sphi %s993_s14, %s1181_s14   ;;  %s954_s13 = sphi %s991_s13, %s1180_s13   ;;  %s950_s12 = sphi %s989_s12, %s1179_s12  }
   0x4   : > { %p23_p0 = scmp.ge.s32.totalorder %s22_s17, 2  ;;  %p65_p1 = scmp.ne.s32.totalorder %s954_s13, %s950_s12 }
   0x5   : > { %p66_p2 = scmp.eq.s32.totalorder %s966_s16, 0  ;;  %p123_p4 = scmp.eq.s32.totalorder %s778_s18, 1 }
   0x6   : > { %s1184_s17 = smov (%p23_p0, %s22_s17), 0  ;;  %s58_s20 = sadd.s32 1, %s954_s13 }
   0x7   : > { %p67_p3 = por %p66_p2, %p65_p1  ;;  %s55_s19 = ssub.s32 %s962_s15, %s1184_s17 }
   0x8   : > { %p56_p5 = scmp.eq.s32.totalorder %s55_s19, 0  ;;  %p1024_p6 = por %p123_p4, %p65_p1 }
   0x9   : > { %p782_p7 = scmp.ge.s32.totalorder %s966_s16, 2 }
   0xa   : > { %s1029_s22 = scalar_select %p56_p5, %s954_s13, %s58_s20  }
   0xb   : > { %154 = sbr.rel (%p782_p7) target bundleno = 38 (0x26), region = 20 }
  0x12   : > { %157 = sbr.rel (!%p67_p3) target bundleno = 38 (0x26), region = 24  ;;  %s159_s23 = sand.u32 (%p67_p3), 1, %s954_s13  }
  0x13   : > { %s832_s24 = sshll.u32 (%p67_p3), %s962_s15, 4  ;;  %s783_s25 = sshll.u32 (%p67_p3), %s159_s23, 8 }
  0x14   : > { %s1037_s28 = scalar_lea.vmem (%p67_p3), %s1175_s1, %s832_s24  ;;  %s1042_s29 = scalar_lea.vmem (%p67_p3), [#allocation2], %s783_s25 }
  0x15   : > { %v177_v0 = vld [vmem:[%s1037_s28] sm:$0xff] (%p67_p3)  ;;  %v179_v1 = vld [vmem:[%s1037_s28 + $0x8] sm:$0xff] (%p67_p3) }
  0x16   : > { %v181_v2 = vld [vmem:[%s1037_s28 + $0x20] sm:$0xff] (%p67_p3)  ;;  %178 = vst [vmem:[%s1042_s29] sm:$0xff] (%p67_p3), %v177_v0  ;;  %180 = vst [vmem:[%s1042_s29 + $0x8] sm:$0xff] (%p67_p3), %v179_v1  ;;  %v183_v3 = vld [vmem:[%s1037_s28 + $0x28] sm:$0xff] (%p67_p3) }
  0x17   : > { %182 = vst [vmem:[%s1042_s29 + $0x10] sm:$0xff] (%p67_p3), %v181_v2  ;;  %v185_v4 = vld [vmem:[%s1037_s28 + $0x40] sm:$0xff] (%p67_p3)  ;;  %v187_v5 = vld [vmem:[%s1037_s28 + $0x48] sm:$0xff] (%p67_p3)  ;;  %184 = vst [vmem:[%s1042_s29 + $0x18] sm:$0xff] (%p67_p3), %v183_v3 }
  0x18   : > { %186 = vst [vmem:[%s1042_s29 + $0x20] sm:$0xff] (%p67_p3), %v185_v4  ;;  %188 = vst [vmem:[%s1042_s29 + $0x28] sm:$0xff] (%p67_p3), %v187_v5  ;;  %v189_v6 = vld [vmem:[%s1037_s28 + $0x60] sm:$0xff] (%p67_p3)  ;;  %v191_v7 = vld [vmem:[%s1037_s28 + $0x68] sm:$0xff] (%p67_p3) }
  0x19   : > { %v193_v8 = vld [vmem:[%s1037_s28 + $0x80] sm:$0xff]  ;;  %190 = vst [vmem:[%s1042_s29 + $0x30] sm:$0xff] %v189_v6  ;;  %192 = vst [vmem:[%s1042_s29 + $0x38] sm:$0xff] %v191_v7  ;;  %v195_v9 = vld [vmem:[%s1037_s28 + $0x88] sm:$0xff] }
  0x1a   : > { %194 = vst [vmem:[%s1042_s29 + $0x40] sm:$0xff] %v193_v8  ;;  %v197_v10 = vld [vmem:[%s1037_s28 + $0xa0] sm:$0xff]  ;;  %v199_v11 = vld [vmem:[%s1037_s28 + $0xa8] sm:$0xff]  ;;  %196 = vst [vmem:[%s1042_s29 + $0x48] sm:$0xff] %v195_v9 }
  0x1b   : > { %198 = vst [vmem:[%s1042_s29 + $0x50] sm:$0xff] %v197_v10  ;;  %200 = vst [vmem:[%s1042_s29 + $0x58] sm:$0xff] %v199_v11  ;;  %v201_v12 = vld [vmem:[%s1037_s28 + $0xc0] sm:$0xff]  ;;  %v203_v13 = vld [vmem:[%s1037_s28 + $0xc8] sm:$0xff] }
  0x1c   : > { %v205_v14 = vld [vmem:[%s1037_s28 + $0xe0] sm:$0xff]  ;;  %202 = vst [vmem:[%s1042_s29 + $0x60] sm:$0xff] %v201_v12  ;;  %204 = vst [vmem:[%s1042_s29 + $0x68] sm:$0xff] %v203_v13  ;;  %v207_v15 = vld [vmem:[%s1037_s28 + $0xe8] sm:$0xff] }
  0x1d   : > { %206 = vst [vmem:[%s1042_s29 + $0x70] sm:$0xff] %v205_v14  ;;  %v209_v16 = vld [vmem:[%s1037_s28 + $0x100] sm:$0xff]  ;;  %v211_v17 = vld [vmem:[%s1037_s28 + $0x108] sm:$0xff]  ;;  %208 = vst [vmem:[%s1042_s29 + $0x78] sm:$0xff] %v207_v15 }
  0x1e   : > { %210 = vst [vmem:[%s1042_s29 + $0x80] sm:$0xff] %v209_v16  ;;  %212 = vst [vmem:[%s1042_s29 + $0x88] sm:$0xff] %v211_v17  ;;  %v213_v18 = vld [vmem:[%s1037_s28 + $0x120] sm:$0xff]  ;;  %v215_v19 = vld [vmem:[%s1037_s28 + $0x128] sm:$0xff] }
  0x1f   : > { %v217_v20 = vld [vmem:[%s1037_s28 + $0x140] sm:$0xff]  ;;  %214 = vst [vmem:[%s1042_s29 + $0x90] sm:$0xff] %v213_v18  ;;  %216 = vst [vmem:[%s1042_s29 + $0x98] sm:$0xff] %v215_v19  ;;  %v219_v21 = vld [vmem:[%s1037_s28 + $0x148] sm:$0xff] }
  0x20   : > { %218 = vst [vmem:[%s1042_s29 + $0xa0] sm:$0xff] %v217_v20  ;;  %v221_v22 = vld [vmem:[%s1037_s28 + $0x160] sm:$0xff]  ;;  %v223_v23 = vld [vmem:[%s1037_s28 + $0x168] sm:$0xff]  ;;  %220 = vst [vmem:[%s1042_s29 + $0xa8] sm:$0xff] %v219_v21 }
  0x21   : > { %222 = vst [vmem:[%s1042_s29 + $0xb0] sm:$0xff] %v221_v22  ;;  %224 = vst [vmem:[%s1042_s29 + $0xb8] sm:$0xff] %v223_v23  ;;  %v225_v24 = vld [vmem:[%s1037_s28 + $0x180] sm:$0xff]  ;;  %v227_v25 = vld [vmem:[%s1037_s28 + $0x188] sm:$0xff] }
  0x22   : > { %v229_v26 = vld [vmem:[%s1037_s28 + $0x1a0] sm:$0xff]  ;;  %226 = vst [vmem:[%s1042_s29 + $0xc0] sm:$0xff] %v225_v24  ;;  %228 = vst [vmem:[%s1042_s29 + $0xc8] sm:$0xff] %v227_v25  ;;  %v231_v27 = vld [vmem:[%s1037_s28 + $0x1a8] sm:$0xff] }
  0x23   : > { %230 = vst [vmem:[%s1042_s29 + $0xd0] sm:$0xff] %v229_v26  ;;  %v233_v28 = vld [vmem:[%s1037_s28 + $0x1c0] sm:$0xff]  ;;  %v235_v29 = vld [vmem:[%s1037_s28 + $0x1c8] sm:$0xff]  ;;  %232 = vst [vmem:[%s1042_s29 + $0xd8] sm:$0xff] %v231_v27 }
  0x24   : > { %234 = vst [vmem:[%s1042_s29 + $0xe0] sm:$0xff] %v233_v28  ;;  %236 = vst [vmem:[%s1042_s29 + $0xe8] sm:$0xff] %v235_v29  ;;  %v237_v30 = vld [vmem:[%s1037_s28 + $0x1e0] sm:$0xff]  ;;  %v239_v31 = vld [vmem:[%s1037_s28 + $0x1e8] sm:$0xff] }
  0x25   : > { %238 = vst [vmem:[%s1042_s29 + $0xf0] sm:$0xff] %v237_v30  ;;  %240 = vst [vmem:[%s1042_s29 + $0xf8] sm:$0xff] %v239_v31 }
  0x26 PF: > { %p786_p8 = scmp.ge.s32.totalorder %s966_s16, 1  ;;  %p253_p9 = scmp.lt.s32.totalorder %s966_s16, 3 }
  0x28   : > { %p254_p10 = pnand %p786_p8, %p253_p9 }
  0x29   : > { %s260_s30 = sand.u32 (!%p254_p10), 1, %s950_s12   ;;  %v968_v32 = vmov (!%p254_p10), 0   ;;  %v927_v1 = vld [vmem:[%s1174_s0] sm:$0xff] (!%p254_p10)   ;;  %s789_s8 = sshll.u32 (!%p254_p10), %s958_s14, 2  ;;  %v342_v2 = vlaneseq (!%p254_p10) }
  0x2a   : > { %257 = sbr.rel (%p254_p10) target bundleno = 307 (0x133), region = 51  ;;  %s787_s4 = sshll.u32 (!%p254_p10), %s260_s30, 8  ;;  %560 = vmatprep.mubr.bf16.mxu0 (!%p254_p10), %v968_v32  ;;  %603 = vmatprep.mubr.bf16.mxu1 (!%p254_p10), %v968_v32 }
  0x2b   : > { %s1110_s5 = scalar_lea.vmem (!%p254_p10), [#allocation2], %s787_s4  ;;  %p299_p11 = scmp.lt.s32.totalorder (!%p254_p10), %s789_s8, 7  ;;  %v343_v3 = vshrl.u32 (!%p254_p10), %v342_v2, 7 }
  0x2c   : > { %v879_v33 = vld [vmem:[%s1110_s5 + $0x4] ss:$16 sps:$4 sm:$0xff] (!%p254_p10)   ;;  %v881_v34 = vld [vmem:[%s1110_s5 + $0xc] ss:$16 sps:$4 sm:$0xff] (!%p254_p10)   ;;  %v883_v35 = vld [vmem:[%s1110_s5] ss:$16 sps:$4 sm:$0xff] (!%p254_p10)  }
  0x2d   : > { %528 = vmatprep.subr.bf16.mxu0 (!%p254_p10), %v879_v33  ;;  %v884_v36 = vld [vmem:[%s1110_s5 + $0x8] ss:$16 sps:$4 sm:$0xff] (!%p254_p10)   ;;  %571 = vmatprep.subr.bf16.mxu1 (!%p254_p10), %v881_v34  ;;  %v885_v37 = vld [vmem:[%s1110_s5 + $0x24] ss:$16 sps:$4 sm:$0xff] (!%p254_p10)   ;;  %v887_v38 = vld [vmem:[%s1110_s5 + $0x2c] ss:$16 sps:$4 sm:$0xff] (!%p254_p10)  }
  0x2e   : > { %529 = vmatpush1.bf16.msra.mxu0 (!%p254_p10), %v883_v35  ;;  %572 = vmatpush1.bf16.msra.mxu1 (!%p254_p10), %v884_v36  ;;  %v889_v39 = vld [vmem:[%s1110_s5 + $0x20] ss:$16 sps:$4 sm:$0xff] (!%p254_p10)   ;;  %v890_v40 = vld [vmem:[%s1110_s5 + $0x28] ss:$16 sps:$4 sm:$0xff] (!%p254_p10)   ;;  %v891_v41 = vld [vmem:[%s1110_s5 + $0x44] ss:$16 sps:$4 sm:$0xff] (!%p254_p10)  }
  0x2f   : > { %530 = vmatprep.subr.bf16.mxu0 (!%p254_p10), %v885_v37  ;;  %573 = vmatprep.subr.bf16.mxu1 (!%p254_p10), %v887_v38  ;;  %v893_v42 = vld [vmem:[%s1110_s5 + $0x4c] ss:$16 sps:$4 sm:$0xff] (!%p254_p10)   ;;  %v895_v43 = vld [vmem:[%s1110_s5 + $0x40] ss:$16 sps:$4 sm:$0xff] (!%p254_p10)   ;;  %v896_v44 = vld [vmem:[%s1110_s5 + $0x48] ss:$16 sps:$4 sm:$0xff] (!%p254_p10)  }
  0x30   : > { %v897_v45 = vld [vmem:[%s1110_s5 + $0x64] ss:$16 sps:$4 sm:$0xff] (!%p254_p10)   ;;  %v899_v46 = vld [vmem:[%s1110_s5 + $0x6c] ss:$16 sps:$4 sm:$0xff] (!%p254_p10)   ;;  %v901_v47 = vld [vmem:[%s1110_s5 + $0x60] ss:$16 sps:$4 sm:$0xff] (!%p254_p10)  }
  0x31   : > { %v902_v48 = vld [vmem:[%s1110_s5 + $0x68] ss:$16 sps:$4 sm:$0xff]   ;;  %v903_v49 = vld [vmem:[%s1110_s5 + $0x84] ss:$16 sps:$4 sm:$0xff]   ;;  %v905_v50 = vld [vmem:[%s1110_s5 + $0x8c] ss:$16 sps:$4 sm:$0xff]  }
  0x32   : > { %531 = vmatpush1.bf16.msra.mxu0 %v889_v39  ;;  %574 = vmatpush1.bf16.msra.mxu1 %v890_v40  ;;  %v907_v51 = vld [vmem:[%s1110_s5 + $0x80] ss:$16 sps:$4 sm:$0xff]   ;;  %v908_v52 = vld [vmem:[%s1110_s5 + $0x88] ss:$16 sps:$4 sm:$0xff]   ;;  %v909_v53 = vld [vmem:[%s1110_s5 + $0xa4] ss:$16 sps:$4 sm:$0xff]  }
  0x33   : > { %532 = vmatprep.subr.bf16.mxu0 %v891_v41  ;;  %575 = vmatprep.subr.bf16.mxu1 %v893_v42  ;;  %v911_v54 = vld [vmem:[%s1110_s5 + $0xac] ss:$16 sps:$4 sm:$0xff]   ;;  %v913_v55 = vld [vmem:[%s1110_s5 + $0xa0] ss:$16 sps:$4 sm:$0xff]   ;;  %v914_v56 = vld [vmem:[%s1110_s5 + $0xa8] ss:$16 sps:$4 sm:$0xff]  }
  0x34   : > { %v915_v57 = vld [vmem:[%s1110_s5 + $0xc4] ss:$16 sps:$4 sm:$0xff]   ;;  %v917_v58 = vld [vmem:[%s1110_s5 + $0xcc] ss:$16 sps:$4 sm:$0xff]   ;;  %v919_v59 = vld [vmem:[%s1110_s5 + $0xc0] ss:$16 sps:$4 sm:$0xff]  }
  0x35   : > { %v920_v60 = vld [vmem:[%s1110_s5 + $0xc8] ss:$16 sps:$4 sm:$0xff]   ;;  %v921_v61 = vld [vmem:[%s1110_s5 + $0xe4] ss:$16 sps:$4 sm:$0xff]   ;;  %v923_v62 = vld [vmem:[%s1110_s5 + $0xec] ss:$16 sps:$4 sm:$0xff]  }
  0x36   : > { %533 = vmatpush1.bf16.msra.mxu0 %v895_v43  ;;  %576 = vmatpush1.bf16.msra.mxu1 %v896_v44  ;;  %v925_v63 = vld [vmem:[%s1110_s5 + $0xe0] ss:$16 sps:$4 sm:$0xff]   ;;  %v926_v0 = vld [vmem:[%s1110_s5 + $0xe8] ss:$16 sps:$4 sm:$0xff]   ;;  %s1186_s8 = smov (!%p299_p11, %s789_s8), 7  ;;  %v344_v4 = vsub.s32 0, %v343_v3 }
  0x37   : > { %534 = vmatprep.subr.bf16.mxu0 %v897_v45  ;;  %577 = vmatprep.subr.bf16.mxu1 %v899_v46  ;;  %s301_s11 = scalar_lea.vmem %s1176_s2, %s1186_s8  ;;  %v352_v5 = vsub.s32 2, %v343_v3  ;;  %v348_v7 = vsub.s32 1, %v343_v3  ;;  %v356_v8 = vsub.s32 3, %v343_v3  ;;  %s788_s18 = sshll.u32 %s260_s30, 5 }
  0x38   : > { %v340_v6 = vld [vmem:[%s301_s11] sm:$0xf]  ;;  %s290_s12 = scalar_lea.vmem [#allocation3], %s788_s18  ;;  %s837_s19 = sshll.u32 (%p1024_p6), %s958_s14, 4 }
  0x39   : > { %v345_v9 = vrot.slane %v340_v6, %v344_v4  ;;  %v353_v10 = vrot.slane %v340_v6, %v352_v5  ;;  %v349_v11 = vrot.slane %v340_v6, %v348_v7  ;;  %v357_v12 = vrot.slane %v340_v6, %v356_v8  ;;  %s662_s24 = scalar_lea.vmem (%p1024_p6), %s1177_s3, %s837_s19 }
  0x3a   : > { %535 = vmatpush1.bf16.msra.mxu0 %v901_v47  ;;  %578 = vmatpush1.bf16.msra.mxu1 %v902_v48 }
  0x3b   : > { %536 = vmatprep.subr.bf16.mxu0 %v903_v49  ;;  %579 = vmatprep.subr.bf16.mxu1 %v905_v50 }
  0x3e   : > { %537 = vmatpush1.bf16.msra.mxu0 %v907_v51  ;;  %580 = vmatpush1.bf16.msra.mxu1 %v908_v52 }
  0x3f   : > { %538 = vmatprep.subr.bf16.mxu0 %v909_v53  ;;  %581 = vmatprep.subr.bf16.mxu1 %v911_v54 }
  0x42   : > { %539 = vmatpush1.bf16.msra.mxu0 %v913_v55  ;;  %582 = vmatpush1.bf16.msra.mxu1 %v914_v56 }
  0x43   : > { %540 = vmatprep.subr.bf16.mxu0 %v915_v57  ;;  %583 = vmatprep.subr.bf16.mxu1 %v917_v58 }
  0x46   : > { %541 = vmatpush1.bf16.msra.mxu0 %v919_v59  ;;  %584 = vmatpush1.bf16.msra.mxu1 %v920_v60 }
  0x47   : > { %542 = vmatprep.subr.bf16.mxu0 %v921_v61  ;;  %585 = vmatprep.subr.bf16.mxu1 %v923_v62 }
  0x4a   : > { %543 = vmatpush1.bf16.msra.mxu0 %v925_v63  ;;  %586 = vmatpush1.bf16.msra.mxu1 %v926_v0 }
  0x4d   : > { %561 = vmatmul.mubr.bf16.vlgmr.msra.gmra.mrb[0].mxu0 %v927_v1  ;;  %604 = vmatmul.mubr.bf16.vlgmr.msra.gmra.mrb[0].mxu1 %v927_v1 }
 0x120   : > { %v562_v13 = vpop.f32.mrb[0].mxu0  ;;  %v605_v14 = vpop.f32.mrb[0].mxu1 }
 0x121   : > { %v563_v15 = vadd.f32 %v562_v13, %v345_v9  ;;  %v606_v16 = vadd.f32 %v605_v14, %v353_v10  ;;  %v564_v17 = vpop.f32.mrb[1].mxu0  ;;  %v607_v18 = vpop.f32.mrb[1].mxu1 }
 0x122   : > { %v565_v19 = vadd.f32 %v564_v17, %v349_v11  ;;  %v608_v20 = vadd.f32 %v607_v18, %v357_v12  ;;  %v566_v21 = vpop.f32.mrb[2].mxu0  ;;  %v609_v22 = vpop.f32.mrb[2].mxu1 }
 0x123   : > { %v614_v23 = vmax.f32 %v563_v15, 0.0  ;;  %v616_v24 = vmax.f32 %v606_v16, 0.0  ;;  %v567_v25 = vadd.f32 %v566_v21, %v345_v9  ;;  %v610_v26 = vadd.f32 %v609_v22, %v353_v10  ;;  %v568_v27 = vpop.f32.mrb[3].mxu0  ;;  %v611_v28 = vpop.f32.mrb[3].mxu1 }
 0x124   : > { %v615_v29 = vmax.f32 %v565_v19, 0.0  ;;  %v617_v30 = vmax.f32 %v608_v20, 0.0  ;;  %v569_v31 = vadd.f32 %v568_v27, %v349_v11  ;;  %v612_v32 = vadd.f32 %v611_v28, %v357_v12  ;;  %656 = sbr.rel (!%p1024_p6) target bundleno = 307 (0x133), region = 59 }
 0x125   : > { %v618_v33 = vmax.f32 %v567_v25, 0.0  ;;  %v620_v34 = vmax.f32 %v610_v26, 0.0 }
 0x126   : > { %v833_v35 = vpack.c.bf16 %v615_v29, %v614_v23  ;;  %v834_v36 = vpack.c.bf16 %v617_v30, %v616_v24  ;;  %v619_v37 = vmax.f32 %v569_v31, 0.0  ;;  %v621_v38 = vmax.f32 %v612_v32, 0.0 }
 0x128   : > { %646 = vst [vmem:[%s290_s12] sm:$0xff] %v833_v35  ;;  %647 = vst [vmem:[%s290_s12 + $0x8] sm:$0xff] %v834_v36  ;;  %v835_v39 = vpack.c.bf16 %v619_v37, %v618_v33  ;;  %v836_v40 = vpack.c.bf16 %v621_v38, %v620_v34 }
 0x12a   : > { %648 = vst [vmem:[%s290_s12 + $0x10] sm:$0xff] %v835_v39  ;;  %649 = vst [vmem:[%s290_s12 + $0x18] sm:$0xff] %v836_v40 }
 0x12f   : > { %v675_v41 = vld [vmem:[%s290_s12] sm:$0xff]  ;;  %v677_v42 = vld [vmem:[%s290_s12 + $0x8] sm:$0xff] }
 0x130   : > { %676 = vst [vmem:[%s662_s24] sm:$0xff] %v675_v41  ;;  %678 = vst [vmem:[%s662_s24 + $0x8] sm:$0xff] %v677_v42 }
 0x131   : > { %v679_v43 = vld [vmem:[%s290_s12 + $0x10] sm:$0xff]  ;;  %v681_v44 = vld [vmem:[%s290_s12 + $0x18] sm:$0xff] }
 0x132   : > { %680 = vst [vmem:[%s662_s24 + $0x20] sm:$0xff] %v679_v43  ;;  %682 = vst [vmem:[%s662_s24 + $0x28] sm:$0xff] %v681_v44 }
 0x133 PF: > { %s13_s16 = sadd.s32 1, %s966_s16   ;;  %s1179_s12 = smov %s954_s13 }
 0x134   : > { %p10_p12 = scmp.ge.s32.totalorder %s13_s16, 4   ;;  %s1180_s13 = smov %s1029_s22 }
 0x135   : > { %s1181_s14 = smov %s962_s15  ;;  %s1182_s15 = smov %s1184_s17 }
 0x136   :  { %12 = sbr.rel (!%p10_p12) target bundleno = 3 (0x3), region = 119 }

// kernel: vae_forward.16
= control target key start
LH: loop header
LB: loop body
LE: loop exit
PB: predicated region body
PF: predicated region fallthrough
CT: control target
= control target key end

     0   :  { %s3677_s12 = smov 0   ;;  %s3679_s13 = smov 0   ;;  %s4583_s0 = inlined_call_operand.vmem [shape: bf16[16,1024], index: 0, kind: input, shape index: {}]   ;;  %s4584_s1 = inlined_call_operand.vmem [shape: bf16[1024,3584], index: 1, kind: input, shape index: {}]   ;;  %s4585_s2 = inlined_call_operand.vmem [shape: f32[1,3584], index: 2, kind: input, shape index: {}]   ;;  %s4586_s3 = inlined_call_operand.vmem [shape: bf16[16,3584], index: 3, kind: output, shape index: {}]  }
   0x1   :  { %s3681_s14 = smov 0   ;;  %s3683_s15 = smov 0  }
   0x2   :  { %s3685_s16 = smov 0  }
   0x3 LB: > { %s22_s17 = sadd.s32 1, %s3651_s15  ;;  %s2870_s18 = sadd.s32 4294967295, %s3655_s16   ;;  %s3655_s16 = sphi %s3685_s16, %s13_s16   ;;  %s3651_s15 = sphi %s3683_s15, %s4591_s15   ;;  %s3647_s14 = sphi %s3681_s14, %s4590_s14   ;;  %s3643_s13 = sphi %s3679_s13, %s4589_s13   ;;  %s3639_s12 = sphi %s3677_s12, %s4588_s12  }
   0x4   : > { %p23_p0 = scmp.ge.s32.totalorder %s22_s17, 7  ;;  %p65_p1 = scmp.ne.s32.totalorder %s3643_s13, %s3639_s12 }
   0x5   : > { %p66_p2 = scmp.eq.s32.totalorder %s3655_s16, 0  ;;  %p123_p4 = scmp.eq.s32.totalorder %s2870_s18, 6 }
   0x6   : > { %s4593_s17 = smov (%p23_p0, %s22_s17), 0  ;;  %s58_s20 = sadd.s32 1, %s3643_s13 }
   0x7   : > { %p67_p3 = por %p66_p2, %p65_p1  ;;  %s55_s19 = ssub.s32 %s3651_s15, %s4593_s17 }
   0x8   : > { %p56_p5 = scmp.eq.s32.totalorder %s55_s19, 0  ;;  %p3712_p6 = por %p123_p4, %p65_p1 }
   0x9   : > { %p2874_p7 = scmp.ge.s32.totalorder %s3655_s16, 7 }
   0xa   : > { %s3717_s22 = scalar_select %p56_p5, %s3643_s13, %s58_s20  }
   0xb   : > { %155 = sbr.rel (%p2874_p7) target bundleno = 150 (0x96), region = 20 }
  0x12   : > { %158 = sbr.rel (!%p67_p3) target bundleno = 150 (0x96), region = 24  ;;  %s160_s23 = sand.u32 (%p67_p3), 1, %s3643_s13  }
  0x13   : > { %s3155_s24 = sshll.u32 (%p67_p3), %s3651_s15, 4  ;;  %s2875_s25 = sshll.u32 (%p67_p3), %s160_s23, 11 }
  0x14   : > { %s3725_s28 = scalar_lea.vmem (%p67_p3), %s4584_s1, %s3155_s24  ;;  %s3730_s29 = scalar_lea.vmem (%p67_p3), [#allocation2], %s2875_s25 }
  0x15   : > { %v178_v0 = vld [vmem:[%s3725_s28] sm:$0xff] (%p67_p3)  ;;  %v180_v1 = vld [vmem:[%s3725_s28 + $0x8] sm:$0xff] (%p67_p3)  ;;  %v182_v2 = vld [vmem:[%s3725_s28 + $0x70] sm:$0xff] (%p67_p3) }
  0x16   : > { %179 = vst [vmem:[%s3730_s29] sm:$0xff] (%p67_p3), %v178_v0  ;;  %181 = vst [vmem:[%s3730_s29 + $0x8] sm:$0xff] (%p67_p3), %v180_v1  ;;  %v184_v3 = vld [vmem:[%s3725_s28 + $0x78] sm:$0xff] (%p67_p3)  ;;  %v186_v4 = vld [vmem:[%s3725_s28 + $0xe0] sm:$0xff] (%p67_p3) }
  0x17   : > { %183 = vst [vmem:[%s3730_s29 + $0x10] sm:$0xff] (%p67_p3), %v182_v2  ;;  %v188_v5 = vld [vmem:[%s3725_s28 + $0xe8] sm:$0xff] (%p67_p3)  ;;  %185 = vst [vmem:[%s3730_s29 + $0x18] sm:$0xff] (%p67_p3), %v184_v3  ;;  %v190_v6 = vld [vmem:[%s3725_s28 + $0x150] sm:$0xff] (%p67_p3) }
  0x18   : > { %187 = vst [vmem:[%s3730_s29 + $0x20] sm:$0xff] (%p67_p3), %v186_v4  ;;  %189 = vst [vmem:[%s3730_s29 + $0x28] sm:$0xff] (%p67_p3), %v188_v5  ;;  %v192_v7 = vld [vmem:[%s3725_s28 + $0x158] sm:$0xff] (%p67_p3)  ;;  %v194_v8 = vld [vmem:[%s3725_s28 + $0x1c0] sm:$0xff] (%p67_p3) }
  0x19   : > { %191 = vst [vmem:[%s3730_s29 + $0x30] sm:$0xff] %v190_v6  ;;  %193 = vst [vmem:[%s3730_s29 + $0x38] sm:$0xff] %v192_v7  ;;  %v196_v9 = vld [vmem:[%s3725_s28 + $0x1c8] sm:$0xff]  ;;  %v198_v10 = vld [vmem:[%s3725_s28 + $0x230] sm:$0xff] }
  0x1a   : > { %195 = vst [vmem:[%s3730_s29 + $0x40] sm:$0xff] %v194_v8  ;;  %v200_v11 = vld [vmem:[%s3725_s28 + $0x238] sm:$0xff]  ;;  %197 = vst [vmem:[%s3730_s29 + $0x48] sm:$0xff] %v196_v9  ;;  %v202_v12 = vld [vmem:[%s3725_s28 + $0x2a0] sm:$0xff] }
  0x1b   : > { %199 = vst [vmem:[%s3730_s29 + $0x50] sm:$0xff] %v198_v10  ;;  %201 = vst [vmem:[%s3730_s29 + $0x58] sm:$0xff] %v200_v11  ;;  %v204_v13 = vld [vmem:[%s3725_s28 + $0x2a8] sm:$0xff]  ;;  %v206_v14 = vld [vmem:[%s3725_s28 + $0x310] sm:$0xff] }
  0x1c   : > { %203 = vst [vmem:[%s3730_s29 + $0x60] sm:$0xff] %v202_v12  ;;  %205 = vst [vmem:[%s3730_s29 + $0x68] sm:$0xff] %v204_v13  ;;  %v208_v15 = vld [vmem:[%s3725_s28 + $0x318] sm:$0xff]  ;;  %v210_v16 = vld [vmem:[%s3725_s28 + $0x380] sm:$0xff] }
  0x1d   : > { %207 = vst [vmem:[%s3730_s29 + $0x70] sm:$0xff] %v206_v14  ;;  %v212_v17 = vld [vmem:[%s3725_s28 + $0x388] sm:$0xff]  ;;  %209 = vst [vmem:[%s3730_s29 + $0x78] sm:$0xff] %v208_v15  ;;  %v214_v18 = vld [vmem:[%s3725_s28 + $0x3f0] sm:$0xff] }
  0x1e   : > { %211 = vst [vmem:[%s3730_s29 + $0x80] sm:$0xff] %v210_v16  ;;  %213 = vst [vmem:[%s3730_s29 + $0x88] sm:$0xff] %v212_v17  ;;  %v216_v19 = vld [vmem:[%s3725_s28 + $0x3f8] sm:$0xff]  ;;  %v218_v20 = vld [vmem:[%s3725_s28 + $0x460] sm:$0xff] }
  0x1f   : > { %215 = vst [vmem:[%s3730_s29 + $0x90] sm:$0xff] %v214_v18  ;;  %217 = vst [vmem:[%s3730_s29 + $0x98] sm:$0xff] %v216_v19  ;;  %v220_v21 = vld [vmem:[%s3725_s28 + $0x468] sm:$0xff]  ;;  %v222_v22 = vld [vmem:[%s3725_s28 + $0x4d0] sm:$0xff] }
  0x20   : > { %219 = vst [vmem:[%s3730_s29 + $0xa0] sm:$0xff] %v218_v20  ;;  %v224_v23 = vld [vmem:[%s3725_s28 + $0x4d8] sm:$0xff]  ;;  %221 = vst [vmem:[%s3730_s29 + $0xa8] sm:$0xff] %v220_v21  ;;  %v226_v24 = vld [vmem:[%s3725_s28 + $0x540] sm:$0xff] }
  0x21   : > { %223 = vst [vmem:[%s3730_s29 + $0xb0] sm:$0xff] %v222_v22  ;;  %225 = vst [vmem:[%s3730_s29 + $0xb8] sm:$0xff] %v224_v23  ;;  %v228_v25 = vld [vmem:[%s3725_s28 + $0x548] sm:$0xff]  ;;  %v230_v26 = vld [vmem:[%s3725_s28 + $0x5b0] sm:$0xff] }
  0x22   : > { %227 = vst [vmem:[%s3730_s29 + $0xc0] sm:$0xff] %v226_v24  ;;  %229 = vst [vmem:[%s3730_s29 + $0xc8] sm:$0xff] %v228_v25  ;;  %v232_v27 = vld [vmem:[%s3725_s28 + $0x5b8] sm:$0xff]  ;;  %v234_v28 = vld [vmem:[%s3725_s28 + $0x620] sm:$0xff] }
  0x23   : > { %231 = vst [vmem:[%s3730_s29 + $0xd0] sm:$0xff] %v230_v26  ;;  %v236_v29 = vld [vmem:[%s3725_s28 + $0x628] sm:$0xff]  ;;  %233 = vst [vmem:[%s3730_s29 + $0xd8] sm:$0xff] %v232_v27  ;;  %v238_v30 = vld [vmem:[%s3725_s28 + $0x690] sm:$0xff] }
  0x24   : > { %235 = vst [vmem:[%s3730_s29 + $0xe0] sm:$0xff] %v234_v28  ;;  %237 = vst [vmem:[%s3730_s29 + $0xe8] sm:$0xff] %v236_v29  ;;  %v240_v31 = vld [vmem:[%s3725_s28 + $0x698] sm:$0xff]  ;;  %v242_v32 = vld [vmem:[%s3725_s28 + $0x700] sm:$0xff] }
  0x25   : > { %239 = vst [vmem:[%s3730_s29 + $0xf0] sm:$0xff] %v238_v30  ;;  %241 = vst [vmem:[%s3730_s29 + $0xf8] sm:$0xff] %v240_v31  ;;  %v244_v33 = vld [vmem:[%s3725_s28 + $0x708] sm:$0xff]  ;;  %v246_v34 = vld [vmem:[%s3725_s28 + $0x770] sm:$0xff] }
  0x26   : > { %243 = vst [vmem:[%s3730_s29 + $0x100] sm:$0xff] %v242_v32  ;;  %v248_v35 = vld [vmem:[%s3725_s28 + $0x778] sm:$0xff]  ;;  %245 = vst [vmem:[%s3730_s29 + $0x108] sm:$0xff] %v244_v33  ;;  %v250_v36 = vld [vmem:[%s3725_s28 + $0x7e0] sm:$0xff] }
  0x27   : > { %247 = vst [vmem:[%s3730_s29 + $0x110] sm:$0xff] %v246_v34  ;;  %249 = vst [vmem:[%s3730_s29 + $0x118] sm:$0xff] %v248_v35  ;;  %v252_v37 = vld [vmem:[%s3725_s28 + $0x7e8] sm:$0xff]  ;;  %v254_v38 = vld [vmem:[%s3725_s28 + $0x850] sm:$0xff] }
  0x28   : > { %251 = vst [vmem:[%s3730_s29 + $0x120] sm:$0xff] %v250_v36  ;;  %253 = vst [vmem:[%s3730_s29 + $0x128] sm:$0xff] %v252_v37  ;;  %v256_v39 = vld [vmem:[%s3725_s28 + $0x858] sm:$0xff]  ;;  %v258_v40 = vld [vmem:[%s3725_s28 + $0x8c0] sm:$0xff] }
  0x29   : > { %255 = vst [vmem:[%s3730_s29 + $0x130] sm:$0xff] %v254_v38  ;;  %v260_v41 = vld [vmem:[%s3725_s28 + $0x8c8] sm:$0xff]  ;;  %257 = vst [vmem:[%s3730_s29 + $0x138] sm:$0xff] %v256_v39  ;;  %v262_v42 = vld [vmem:[%s3725_s28 + $0x930] sm:$0xff] }
  0x2a   : > { %259 = vst [vmem:[%s3730_s29 + $0x140] sm:$0xff] %v258_v40  ;;  %261 = vst [vmem:[%s3730_s29 + $0x148] sm:$0xff] %v260_v41  ;;  %v264_v43 = vld [vmem:[%s3725_s28 + $0x938] sm:$0xff]  ;;  %v266_v44 = vld [vmem:[%s3725_s28 + $0x9a0] sm:$0xff] }
  0x2b   : > { %263 = vst [vmem:[%s3730_s29 + $0x150] sm:$0xff] %v262_v42  ;;  %265 = vst [vmem:[%s3730_s29 + $0x158] sm:$0xff] %v264_v43  ;;  %v268_v45 = vld [vmem:[%s3725_s28 + $0x9a8] sm:$0xff]  ;;  %v270_v46 = vld [vmem:[%s3725_s28 + $0xa10] sm:$0xff] }
  0x2c   : > { %267 = vst [vmem:[%s3730_s29 + $0x160] sm:$0xff] %v266_v44  ;;  %v272_v47 = vld [vmem:[%s3725_s28 + $0xa18] sm:$0xff]  ;;  %269 = vst [vmem:[%s3730_s29 + $0x168] sm:$0xff] %v268_v45  ;;  %v274_v48 = vld [vmem:[%s3725_s28 + $0xa80] sm:$0xff] }
  0x2d   : > { %271 = vst [vmem:[%s3730_s29 + $0x170] sm:$0xff] %v270_v46  ;;  %273 = vst [vmem:[%s3730_s29 + $0x178] sm:$0xff] %v272_v47  ;;  %v276_v49 = vld [vmem:[%s3725_s28 + $0xa88] sm:$0xff]  ;;  %v278_v50 = vld [vmem:[%s3725_s28 + $0xaf0] sm:$0xff] }
  0x2e   : > { %275 = vst [vmem:[%s3730_s29 + $0x180] sm:$0xff] %v274_v48  ;;  %277 = vst [vmem:[%s3730_s29 + $0x188] sm:$0xff] %v276_v49  ;;  %v280_v51 = vld [vmem:[%s3725_s28 + $0xaf8] sm:$0xff]  ;;  %v282_v52 = vld [vmem:[%s3725_s28 + $0xb60] sm:$0xff] }
  0x2f   : > { %279 = vst [vmem:[%s3730_s29 + $0x190] sm:$0xff] %v278_v50  ;;  %v284_v53 = vld [vmem:[%s3725_s28 + $0xb68] sm:$0xff]  ;;  %281 = vst [vmem:[%s3730_s29 + $0x198] sm:$0xff] %v280_v51  ;;  %v286_v54 = vld [vmem:[%s3725_s28 + $0xbd0] sm:$0xff] }
  0x30   : > { %283 = vst [vmem:[%s3730_s29 + $0x1a0] sm:$0xff] %v282_v52  ;;  %285 = vst [vmem:[%s3730_s29 + $0x1a8] sm:$0xff] %v284_v53  ;;  %v288_v55 = vld [vmem:[%s3725_s28 + $0xbd8] sm:$0xff]  ;;  %v290_v56 = vld [vmem:[%s3725_s28 + $0xc40] sm:$0xff] }
  0x31   : > { %287 = vst [vmem:[%s3730_s29 + $0x1b0] sm:$0xff] %v286_v54  ;;  %289 = vst [vmem:[%s3730_s29 + $0x1b8] sm:$0xff] %v288_v55  ;;  %v292_v57 = vld [vmem:[%s3725_s28 + $0xc48] sm:$0xff]  ;;  %v294_v58 = vld [vmem:[%s3725_s28 + $0xcb0] sm:$0xff] }
  0x32   : > { %291 = vst [vmem:[%s3730_s29 + $0x1c0] sm:$0xff] %v290_v56  ;;  %v296_v59 = vld [vmem:[%s3725_s28 + $0xcb8] sm:$0xff]  ;;  %293 = vst [vmem:[%s3730_s29 + $0x1c8] sm:$0xff] %v292_v57  ;;  %v298_v60 = vld [vmem:[%s3725_s28 + $0xd20] sm:$0xff] }
  0x33   : > { %295 = vst [vmem:[%s3730_s29 + $0x1d0] sm:$0xff] %v294_v58  ;;  %297 = vst [vmem:[%s3730_s29 + $0x1d8] sm:$0xff] %v296_v59  ;;  %v300_v61 = vld [vmem:[%s3725_s28 + $0xd28] sm:$0xff]  ;;  %v302_v62 = vld [vmem:[%s3725_s28 + $0xd90] sm:$0xff] }
  0x34   : > { %299 = vst [vmem:[%s3730_s29 + $0x1e0] sm:$0xff] %v298_v60  ;;  %301 = vst [vmem:[%s3730_s29 + $0x1e8] sm:$0xff] %v300_v61  ;;  %v304_v63 = vld [vmem:[%s3725_s28 + $0xd98] sm:$0xff]  ;;  %v306_v0 = vld [vmem:[%s3725_s28 + $0xe00] sm:$0xff] }
  0x35   : > { %303 = vst [vmem:[%s3730_s29 + $0x1f0] sm:$0xff] %v302_v62  ;;  %v308_v1 = vld [vmem:[%s3725_s28 + $0xe08] sm:$0xff]  ;;  %305 = vst [vmem:[%s3730_s29 + $0x1f8] sm:$0xff] %v304_v63  ;;  %v310_v2 = vld [vmem:[%s3725_s28 + $0xe70] sm:$0xff] }
  0x36   : > { %307 = vst [vmem:[%s3730_s29 + $0x200] sm:$0xff] %v306_v0  ;;  %309 = vst [vmem:[%s3730_s29 + $0x208] sm:$0xff] %v308_v1  ;;  %v312_v3 = vld [vmem:[%s3725_s28 + $0xe78] sm:$0xff]  ;;  %v314_v4 = vld [vmem:[%s3725_s28 + $0xee0] sm:$0xff] }
  0x37   : > { %311 = vst [vmem:[%s3730_s29 + $0x210] sm:$0xff] %v310_v2  ;;  %313 = vst [vmem:[%s3730_s29 + $0x218] sm:$0xff] %v312_v3  ;;  %v316_v5 = vld [vmem:[%s3725_s28 + $0xee8] sm:$0xff]  ;;  %v318_v6 = vld [vmem:[%s3725_s28 + $0xf50] sm:$0xff] }
  0x38   : > { %315 = vst [vmem:[%s3730_s29 + $0x220] sm:$0xff] %v314_v4  ;;  %v320_v7 = vld [vmem:[%s3725_s28 + $0xf58] sm:$0xff]  ;;  %317 = vst [vmem:[%s3730_s29 + $0x228] sm:$0xff] %v316_v5  ;;  %v322_v8 = vld [vmem:[%s3725_s28 + $0xfc0] sm:$0xff] }
  0x39   : > { %319 = vst [vmem:[%s3730_s29 + $0x230] sm:$0xff] %v318_v6  ;;  %321 = vst [vmem:[%s3730_s29 + $0x238] sm:$0xff] %v320_v7  ;;  %v324_v9 = vld [vmem:[%s3725_s28 + $0xfc8] sm:$0xff]  ;;  %v326_v10 = vld [vmem:[%s3725_s28 + $0x1030] sm:$0xff] }
  0x3a   : > { %323 = vst [vmem:[%s3730_s29 + $0x240] sm:$0xff] %v322_v8  ;;  %325 = vst [vmem:[%s3730_s29 + $0x248] sm:$0xff] %v324_v9  ;;  %v328_v11 = vld [vmem:[%s3725_s28 + $0x1038] sm:$0xff]  ;;  %v330_v12 = vld [vmem:[%s3725_s28 + $0x10a0] sm:$0xff] }
  0x3b   : > { %327 = vst [vmem:[%s3730_s29 + $0x250] sm:$0xff] %v326_v10  ;;  %v332_v13 = vld [vmem:[%s3725_s28 + $0x10a8] sm:$0xff]  ;;  %329 = vst [vmem:[%s3730_s29 + $0x258] sm:$0xff] %v328_v11  ;;  %v334_v14 = vld [vmem:[%s3725_s28 + $0x1110] sm:$0xff] }
  0x3c   : > { %331 = vst [vmem:[%s3730_s29 + $0x260] sm:$0xff] %v330_v12  ;;  %333 = vst [vmem:[%s3730_s29 + $0x268] sm:$0xff] %v332_v13  ;;  %v336_v15 = vld [vmem:[%s3725_s28 + $0x1118] sm:$0xff]  ;;  %v338_v16 = vld [vmem:[%s3725_s28 + $0x1180] sm:$0xff] }
  0x3d   : > { %335 = vst [vmem:[%s3730_s29 + $0x270] sm:$0xff] %v334_v14  ;;  %337 = vst [vmem:[%s3730_s29 + $0x278] sm:$0xff] %v336_v15  ;;  %v340_v17 = vld [vmem:[%s3725_s28 + $0x1188] sm:$0xff]  ;;  %v342_v18 = vld [vmem:[%s3725_s28 + $0x11f0] sm:$0xff] }
  0x3e   : > { %339 = vst [vmem:[%s3730_s29 + $0x280] sm:$0xff] %v338_v16  ;;  %v344_v19 = vld [vmem:[%s3725_s28 + $0x11f8] sm:$0xff]  ;;  %341 = vst [vmem:[%s3730_s29 + $0x288] sm:$0xff] %v340_v17  ;;  %v346_v20 = vld [vmem:[%s3725_s28 + $0x1260] sm:$0xff] }
  0x3f   : > { %343 = vst [vmem:[%s3730_s29 + $0x290] sm:$0xff] %v342_v18  ;;  %345 = vst [vmem:[%s3730_s29 + $0x298] sm:$0xff] %v344_v19  ;;  %v348_v21 = vld [vmem:[%s3725_s28 + $0x1268] sm:$0xff]  ;;  %v350_v22 = vld [vmem:[%s3725_s28 + $0x12d0] sm:$0xff] }
  0x40   : > { %347 = vst [vmem:[%s3730_s29 + $0x2a0] sm:$0xff] %v346_v20  ;;  %349 = vst [vmem:[%s3730_s29 + $0x2a8] sm:$0xff] %v348_v21  ;;  %v352_v23 = vld [vmem:[%s3725_s28 + $0x12d8] sm:$0xff]  ;;  %v354_v24 = vld [vmem:[%s3725_s28 + $0x1340] sm:$0xff] }
  0x41   : > { %351 = vst [vmem:[%s3730_s29 + $0x2b0] sm:$0xff] %v350_v22  ;;  %v356_v25 = vld [vmem:[%s3725_s28 + $0x1348] sm:$0xff]  ;;  %353 = vst [vmem:[%s3730_s29 + $0x2b8] sm:$0xff] %v352_v23  ;;  %v358_v26 = vld [vmem:[%s3725_s28 + $0x13b0] sm:$0xff] }
  0x42   : > { %355 = vst [vmem:[%s3730_s29 + $0x2c0] sm:$0xff] %v354_v24  ;;  %357 = vst [vmem:[%s3730_s29 + $0x2c8] sm:$0xff] %v356_v25  ;;  %v360_v27 = vld [vmem:[%s3725_s28 + $0x13b8] sm:$0xff]  ;;  %v362_v28 = vld [vmem:[%s3725_s28 + $0x1420] sm:$0xff] }
  0x43   : > { %359 = vst [vmem:[%s3730_s29 + $0x2d0] sm:$0xff] %v358_v26  ;;  %361 = vst [vmem:[%s3730_s29 + $0x2d8] sm:$0xff] %v360_v27  ;;  %v364_v29 = vld [vmem:[%s3725_s28 + $0x1428] sm:$0xff]  ;;  %v366_v30 = vld [vmem:[%s3725_s28 + $0x1490] sm:$0xff] }
  0x44   : > { %363 = vst [vmem:[%s3730_s29 + $0x2e0] sm:$0xff] %v362_v28  ;;  %v368_v31 = vld [vmem:[%s3725_s28 + $0x1498] sm:$0xff]  ;;  %365 = vst [vmem:[%s3730_s29 + $0x2e8] sm:$0xff] %v364_v29  ;;  %v370_v32 = vld [vmem:[%s3725_s28 + $0x1500] sm:$0xff] }
  0x45   : > { %367 = vst [vmem:[%s3730_s29 + $0x2f0] sm:$0xff] %v366_v30  ;;  %369 = vst [vmem:[%s3730_s29 + $0x2f8] sm:$0xff] %v368_v31  ;;  %v372_v33 = vld [vmem:[%s3725_s28 + $0x1508] sm:$0xff]  ;;  %v374_v34 = vld [vmem:[%s3725_s28 + $0x1570] sm:$0xff] }
  0x46   : > { %371 = vst [vmem:[%s3730_s29 + $0x300] sm:$0xff] %v370_v32  ;;  %373 = vst [vmem:[%s3730_s29 + $0x308] sm:$0xff] %v372_v33  ;;  %v376_v35 = vld [vmem:[%s3725_s28 + $0x1578] sm:$0xff]  ;;  %v378_v36 = vld [vmem:[%s3725_s28 + $0x15e0] sm:$0xff] }
  0x47   : > { %375 = vst [vmem:[%s3730_s29 + $0x310] sm:$0xff] %v374_v34  ;;  %v380_v37 = vld [vmem:[%s3725_s28 + $0x15e8] sm:$0xff]  ;;  %377 = vst [vmem:[%s3730_s29 + $0x318] sm:$0xff] %v376_v35  ;;  %v382_v38 = vld [vmem:[%s3725_s28 + $0x1650] sm:$0xff] }
  0x48   : > { %379 = vst [vmem:[%s3730_s29 + $0x320] sm:$0xff] %v378_v36  ;;  %381 = vst [vmem:[%s3730_s29 + $0x328] sm:$0xff] %v380_v37  ;;  %v384_v39 = vld [vmem:[%s3725_s28 + $0x1658] sm:$0xff]  ;;  %v386_v40 = vld [vmem:[%s3725_s28 + $0x16c0] sm:$0xff] }
  0x49   : > { %383 = vst [vmem:[%s3730_s29 + $0x330] sm:$0xff] %v382_v38  ;;  %385 = vst [vmem:[%s3730_s29 + $0x338] sm:$0xff] %v384_v39  ;;  %v388_v41 = vld [vmem:[%s3725_s28 + $0x16c8] sm:$0xff]  ;;  %v390_v42 = vld [vmem:[%s3725_s28 + $0x1730] sm:$0xff] }
  0x4a   : > { %387 = vst [vmem:[%s3730_s29 + $0x340] sm:$0xff] %v386_v40  ;;  %v392_v43 = vld [vmem:[%s3725_s28 + $0x1738] sm:$0xff]  ;;  %389 = vst [vmem:[%s3730_s29 + $0x348] sm:$0xff] %v388_v41  ;;  %v394_v44 = vld [vmem:[%s3725_s28 + $0x17a0] sm:$0xff] }
  0x4b   : > { %391 = vst [vmem:[%s3730_s29 + $0x350] sm:$0xff] %v390_v42  ;;  %393 = vst [vmem:[%s3730_s29 + $0x358] sm:$0xff] %v392_v43  ;;  %v396_v45 = vld [vmem:[%s3725_s28 + $0x17a8] sm:$0xff]  ;;  %v398_v46 = vld [vmem:[%s3725_s28 + $0x1810] sm:$0xff] }
  0x4c   : > { %395 = vst [vmem:[%s3730_s29 + $0x360] sm:$0xff] %v394_v44  ;;  %397 = vst [vmem:[%s3730_s29 + $0x368] sm:$0xff] %v396_v45  ;;  %v400_v47 = vld [vmem:[%s3725_s28 + $0x1818] sm:$0xff]  ;;  %v402_v48 = vld [vmem:[%s3725_s28 + $0x1880] sm:$0xff] }
  0x4d   : > { %399 = vst [vmem:[%s3730_s29 + $0x370] sm:$0xff] %v398_v46  ;;  %v404_v49 = vld [vmem:[%s3725_s28 + $0x1888] sm:$0xff]  ;;  %401 = vst [vmem:[%s3730_s29 + $0x378] sm:$0xff] %v400_v47  ;;  %v406_v50 = vld [vmem:[%s3725_s28 + $0x18f0] sm:$0xff] }
  0x4e   : > { %403 = vst [vmem:[%s3730_s29 + $0x380] sm:$0xff] %v402_v48  ;;  %405 = vst [vmem:[%s3730_s29 + $0x388] sm:$0xff] %v404_v49  ;;  %v408_v51 = vld [vmem:[%s3725_s28 + $0x18f8] sm:$0xff]  ;;  %v410_v52 = vld [vmem:[%s3725_s28 + $0x1960] sm:$0xff] }
  0x4f   : > { %407 = vst [vmem:[%s3730_s29 + $0x390] sm:$0xff] %v406_v50  ;;  %409 = vst [vmem:[%s3730_s29 + $0x398] sm:$0xff] %v408_v51  ;;  %v412_v53 = vld [vmem:[%s3725_s28 + $0x1968] sm:$0xff]  ;;  %v414_v54 = vld [vmem:[%s3725_s28 + $0x19d0] sm:$0xff] }
  0x50   : > { %411 = vst [vmem:[%s3730_s29 + $0x3a0] sm:$0xff] %v410_v52  ;;  %v416_v55 = vld [vmem:[%s3725_s28 + $0x19d8] sm:$0xff]  ;;  %413 = vst [vmem:[%s3730_s29 + $0x3a8] sm:$0xff] %v412_v53  ;;  %v418_v56 = vld [vmem:[%s3725_s28 + $0x1a40] sm:$0xff] }
  0x51   : > { %415 = vst [vmem:[%s3730_s29 + $0x3b0] sm:$0xff] %v414_v54  ;;  %417 = vst [vmem:[%s3730_s29 + $0x3b8] sm:$0xff] %v416_v55  ;;  %v420_v57 = vld [vmem:[%s3725_s28 + $0x1a48] sm:$0xff]  ;;  %v422_v58 = vld [vmem:[%s3725_s28 + $0x1ab0] sm:$0xff] }
  0x52   : > { %419 = vst [vmem:[%s3730_s29 + $0x3c0] sm:$0xff] %v418_v56  ;;  %421 = vst [vmem:[%s3730_s29 + $0x3c8] sm:$0xff] %v420_v57  ;;  %v424_v59 = vld [vmem:[%s3725_s28 + $0x1ab8] sm:$0xff]  ;;  %v426_v60 = vld [vmem:[%s3725_s28 + $0x1b20] sm:$0xff] }
  0x53   : > { %423 = vst [vmem:[%s3730_s29 + $0x3d0] sm:$0xff] %v422_v58  ;;  %v428_v61 = vld [vmem:[%s3725_s28 + $0x1b28] sm:$0xff]  ;;  %425 = vst [vmem:[%s3730_s29 + $0x3d8] sm:$0xff] %v424_v59  ;;  %v430_v62 = vld [vmem:[%s3725_s28 + $0x1b90] sm:$0xff] }
  0x54   : > { %427 = vst [vmem:[%s3730_s29 + $0x3e0] sm:$0xff] %v426_v60  ;;  %429 = vst [vmem:[%s3730_s29 + $0x3e8] sm:$0xff] %v428_v61  ;;  %v432_v63 = vld [vmem:[%s3725_s28 + $0x1b98] sm:$0xff]  ;;  %v434_v0 = vld [vmem:[%s3725_s28 + $0x1c00] sm:$0xff] }
  0x55   : > { %431 = vst [vmem:[%s3730_s29 + $0x3f0] sm:$0xff] %v430_v62  ;;  %433 = vst [vmem:[%s3730_s29 + $0x3f8] sm:$0xff] %v432_v63  ;;  %v436_v1 = vld [vmem:[%s3725_s28 + $0x1c08] sm:$0xff]  ;;  %v438_v2 = vld [vmem:[%s3725_s28 + $0x1c70] sm:$0xff] }
  0x56   : > { %435 = vst [vmem:[%s3730_s29 + $0x400] sm:$0xff] %v434_v0  ;;  %v440_v3 = vld [vmem:[%s3725_s28 + $0x1c78] sm:$0xff]  ;;  %437 = vst [vmem:[%s3730_s29 + $0x408] sm:$0xff] %v436_v1  ;;  %v442_v4 = vld [vmem:[%s3725_s28 + $0x1ce0] sm:$0xff] }
  0x57   : > { %439 = vst [vmem:[%s3730_s29 + $0x410] sm:$0xff] %v438_v2  ;;  %441 = vst [vmem:[%s3730_s29 + $0x418] sm:$0xff] %v440_v3  ;;  %v444_v5 = vld [vmem:[%s3725_s28 + $0x1ce8] sm:$0xff]  ;;  %v446_v6 = vld [vmem:[%s3725_s28 + $0x1d50] sm:$0xff] }
  0x58   : > { %443 = vst [vmem:[%s3730_s29 + $0x420] sm:$0xff] %v442_v4  ;;  %445 = vst [vmem:[%s3730_s29 + $0x428] sm:$0xff] %v444_v5  ;;  %v448_v7 = vld [vmem:[%s3725_s28 + $0x1d58] sm:$0xff]  ;;  %v450_v8 = vld [vmem:[%s3725_s28 + $0x1dc0] sm:$0xff] }
  0x59   : > { %447 = vst [vmem:[%s3730_s29 + $0x430] sm:$0xff] %v446_v6  ;;  %v452_v9 = vld [vmem:[%s3725_s28 + $0x1dc8] sm:$0xff]  ;;  %449 = vst [vmem:[%s3730_s29 + $0x438] sm:$0xff] %v448_v7  ;;  %v454_v10 = vld [vmem:[%s3725_s28 + $0x1e30] sm:$0xff] }
  0x5a   : > { %451 = vst [vmem:[%s3730_s29 + $0x440] sm:$0xff] %v450_v8  ;;  %453 = vst [vmem:[%s3730_s29 + $0x448] sm:$0xff] %v452_v9  ;;  %v456_v11 = vld [vmem:[%s3725_s28 + $0x1e38] sm:$0xff]  ;;  %v458_v12 = vld [vmem:[%s3725_s28 + $0x1ea0] sm:$0xff] }
  0x5b   : > { %455 = vst [vmem:[%s3730_s29 + $0x450] sm:$0xff] %v454_v10  ;;  %457 = vst [vmem:[%s3730_s29 + $0x458] sm:$0xff] %v456_v11  ;;  %v460_v13 = vld [vmem:[%s3725_s28 + $0x1ea8] sm:$0xff]  ;;  %v462_v14 = vld [vmem:[%s3725_s28 + $0x1f10] sm:$0xff] }
  0x5c   : > { %459 = vst [vmem:[%s3730_s29 + $0x460] sm:$0xff] %v458_v12  ;;  %v464_v15 = vld [vmem:[%s3725_s28 + $0x1f18] sm:$0xff]  ;;  %461 = vst [vmem:[%s3730_s29 + $0x468] sm:$0xff] %v460_v13  ;;  %v466_v16 = vld [vmem:[%s3725_s28 + $0x1f80] sm:$0xff] }
  0x5d   : > { %463 = vst [vmem:[%s3730_s29 + $0x470] sm:$0xff] %v462_v14  ;;  %465 = vst [vmem:[%s3730_s29 + $0x478] sm:$0xff] %v464_v15  ;;  %v468_v17 = vld [vmem:[%s3725_s28 + $0x1f88] sm:$0xff]  ;;  %v470_v18 = vld [vmem:[%s3725_s28 + $0x1ff0] sm:$0xff] }
  0x5e   : > { %467 = vst [vmem:[%s3730_s29 + $0x480] sm:$0xff] %v466_v16  ;;  %469 = vst [vmem:[%s3730_s29 + $0x488] sm:$0xff] %v468_v17  ;;  %v472_v19 = vld [vmem:[%s3725_s28 + $0x1ff8] sm:$0xff]  ;;  %v474_v20 = vld [vmem:[%s3725_s28 + $0x2060] sm:$0xff] }
  0x5f   : > { %471 = vst [vmem:[%s3730_s29 + $0x490] sm:$0xff] %v470_v18  ;;  %v476_v21 = vld [vmem:[%s3725_s28 + $0x2068] sm:$0xff]  ;;  %473 = vst [vmem:[%s3730_s29 + $0x498] sm:$0xff] %v472_v19  ;;  %v478_v22 = vld [vmem:[%s3725_s28 + $0x20d0] sm:$0xff] }
  0x60   : > { %475 = vst [vmem:[%s3730_s29 + $0x4a0] sm:$0xff] %v474_v20  ;;  %477 = vst [vmem:[%s3730_s29 + $0x4a8] sm:$0xff] %v476_v21  ;;  %v480_v23 = vld [vmem:[%s3725_s28 + $0x20d8] sm:$0xff]  ;;  %v482_v24 = vld [vmem:[%s3725_s28 + $0x2140] sm:$0xff] }
  0x61   : > { %479 = vst [vmem:[%s3730_s29 + $0x4b0] sm:$0xff] %v478_v22  ;;  %481 = vst [vmem:[%s3730_s29 + $0x4b8] sm:$0xff] %v480_v23  ;;  %v484_v25 = vld [vmem:[%s3725_s28 + $0x2148] sm:$0xff]  ;;  %v486_v26 = vld [vmem:[%s3725_s28 + $0x21b0] sm:$0xff] }
  0x62   : > { %483 = vst [vmem:[%s3730_s29 + $0x4c0] sm:$0xff] %v482_v24  ;;  %v488_v27 = vld [vmem:[%s3725_s28 + $0x21b8] sm:$0xff]  ;;  %485 = vst [vmem:[%s3730_s29 + $0x4c8] sm:$0xff] %v484_v25  ;;  %v490_v28 = vld [vmem:[%s3725_s28 + $0x2220] sm:$0xff] }
  0x63   : > { %487 = vst [vmem:[%s3730_s29 + $0x4d0] sm:$0xff] %v486_v26  ;;  %489 = vst [vmem:[%s3730_s29 + $0x4d8] sm:$0xff] %v488_v27  ;;  %v492_v29 = vld [vmem:[%s3725_s28 + $0x2228] sm:$0xff]  ;;  %v494_v30 = vld [vmem:[%s3725_s28 + $0x2290] sm:$0xff] }
  0x64   : > { %491 = vst [vmem:[%s3730_s29 + $0x4e0] sm:$0xff] %v490_v28  ;;  %493 = vst [vmem:[%s3730_s29 + $0x4e8] sm:$0xff] %v492_v29  ;;  %v496_v31 = vld [vmem:[%s3725_s28 + $0x2298] sm:$0xff]  ;;  %v498_v32 = vld [vmem:[%s3725_s28 + $0x2300] sm:$0xff] }
  0x65   : > { %495 = vst [vmem:[%s3730_s29 + $0x4f0] sm:$0xff] %v494_v30  ;;  %v500_v33 = vld [vmem:[%s3725_s28 + $0x2308] sm:$0xff]  ;;  %497 = vst [vmem:[%s3730_s29 + $0x4f8] sm:$0xff] %v496_v31  ;;  %v502_v34 = vld [vmem:[%s3725_s28 + $0x2370] sm:$0xff] }
  0x66   : > { %499 = vst [vmem:[%s3730_s29 + $0x500] sm:$0xff] %v498_v32  ;;  %501 = vst [vmem:[%s3730_s29 + $0x508] sm:$0xff] %v500_v33  ;;  %v504_v35 = vld [vmem:[%s3725_s28 + $0x2378] sm:$0xff]  ;;  %v506_v36 = vld [vmem:[%s3725_s28 + $0x23e0] sm:$0xff] }
  0x67   : > { %503 = vst [vmem:[%s3730_s29 + $0x510] sm:$0xff] %v502_v34  ;;  %505 = vst [vmem:[%s3730_s29 + $0x518] sm:$0xff] %v504_v35  ;;  %v508_v37 = vld [vmem:[%s3725_s28 + $0x23e8] sm:$0xff]  ;;  %v510_v38 = vld [vmem:[%s3725_s28 + $0x2450] sm:$0xff] }
  0x68   : > { %507 = vst [vmem:[%s3730_s29 + $0x520] sm:$0xff] %v506_v36  ;;  %v512_v39 = vld [vmem:[%s3725_s28 + $0x2458] sm:$0xff]  ;;  %509 = vst [vmem:[%s3730_s29 + $0x528] sm:$0xff] %v508_v37  ;;  %v514_v40 = vld [vmem:[%s3725_s28 + $0x24c0] sm:$0xff] }
  0x69   : > { %511 = vst [vmem:[%s3730_s29 + $0x530] sm:$0xff] %v510_v38  ;;  %513 = vst [vmem:[%s3730_s29 + $0x538] sm:$0xff] %v512_v39  ;;  %v516_v41 = vld [vmem:[%s3725_s28 + $0x24c8] sm:$0xff]  ;;  %v518_v42 = vld [vmem:[%s3725_s28 + $0x2530] sm:$0xff] }
  0x6a   : > { %515 = vst [vmem:[%s3730_s29 + $0x540] sm:$0xff] %v514_v40  ;;  %517 = vst [vmem:[%s3730_s29 + $0x548] sm:$0xff] %v516_v41  ;;  %v520_v43 = vld [vmem:[%s3725_s28 + $0x2538] sm:$0xff]  ;;  %v522_v44 = vld [vmem:[%s3725_s28 + $0x25a0] sm:$0xff] }
  0x6b   : > { %519 = vst [vmem:[%s3730_s29 + $0x550] sm:$0xff] %v518_v42  ;;  %v524_v45 = vld [vmem:[%s3725_s28 + $0x25a8] sm:$0xff]  ;;  %521 = vst [vmem:[%s3730_s29 + $0x558] sm:$0xff] %v520_v43  ;;  %v526_v46 = vld [vmem:[%s3725_s28 + $0x2610] sm:$0xff] }
  0x6c   : > { %523 = vst [vmem:[%s3730_s29 + $0x560] sm:$0xff] %v522_v44  ;;  %525 = vst [vmem:[%s3730_s29 + $0x568] sm:$0xff] %v524_v45  ;;  %v528_v47 = vld [vmem:[%s3725_s28 + $0x2618] sm:$0xff]  ;;  %v530_v48 = vld [vmem:[%s3725_s28 + $0x2680] sm:$0xff] }
  0x6d   : > { %527 = vst [vmem:[%s3730_s29 + $0x570] sm:$0xff] %v526_v46  ;;  %529 = vst [vmem:[%s3730_s29 + $0x578] sm:$0xff] %v528_v47  ;;  %v532_v49 = vld [vmem:[%s3725_s28 + $0x2688] sm:$0xff]  ;;  %v534_v50 = vld [vmem:[%s3725_s28 + $0x26f0] sm:$0xff] }
  0x6e   : > { %531 = vst [vmem:[%s3730_s29 + $0x580] sm:$0xff] %v530_v48  ;;  %v536_v51 = vld [vmem:[%s3725_s28 + $0x26f8] sm:$0xff]  ;;  %533 = vst [vmem:[%s3730_s29 + $0x588] sm:$0xff] %v532_v49  ;;  %v538_v52 = vld [vmem:[%s3725_s28 + $0x2760] sm:$0xff] }
  0x6f   : > { %535 = vst [vmem:[%s3730_s29 + $0x590] sm:$0xff] %v534_v50  ;;  %537 = vst [vmem:[%s3730_s29 + $0x598] sm:$0xff] %v536_v51  ;;  %v540_v53 = vld [vmem:[%s3725_s28 + $0x2768] sm:$0xff]  ;;  %v542_v54 = vld [vmem:[%s3725_s28 + $0x27d0] sm:$0xff] }
  0x70   : > { %539 = vst [vmem:[%s3730_s29 + $0x5a0] sm:$0xff] %v538_v52  ;;  %541 = vst [vmem:[%s3730_s29 + $0x5a8] sm:$0xff] %v540_v53  ;;  %v544_v55 = vld [vmem:[%s3725_s28 + $0x27d8] sm:$0xff]  ;;  %v546_v56 = vld [vmem:[%s3725_s28 + $0x2840] sm:$0xff] }
  0x71   : > { %543 = vst [vmem:[%s3730_s29 + $0x5b0] sm:$0xff] %v542_v54  ;;  %v548_v57 = vld [vmem:[%s3725_s28 + $0x2848] sm:$0xff]  ;;  %545 = vst [vmem:[%s3730_s29 + $0x5b8] sm:$0xff] %v544_v55  ;;  %v550_v58 = vld [vmem:[%s3725_s28 + $0x28b0] sm:$0xff] }
  0x72   : > { %547 = vst [vmem:[%s3730_s29 + $0x5c0] sm:$0xff] %v546_v56  ;;  %549 = vst [vmem:[%s3730_s29 + $0x5c8] sm:$0xff] %v548_v57  ;;  %v552_v59 = vld [vmem:[%s3725_s28 + $0x28b8] sm:$0xff]  ;;  %v554_v60 = vld [vmem:[%s3725_s28 + $0x2920] sm:$0xff] }
  0x73   : > { %551 = vst [vmem:[%s3730_s29 + $0x5d0] sm:$0xff] %v550_v58  ;;  %553 = vst [vmem:[%s3730_s29 + $0x5d8] sm:$0xff] %v552_v59  ;;  %v556_v61 = vld [vmem:[%s3725_s28 + $0x2928] sm:$0xff]  ;;  %v558_v62 = vld [vmem:[%s3725_s28 + $0x2990] sm:$0xff] }
  0x74   : > { %555 = vst [vmem:[%s3730_s29 + $0x5e0] sm:$0xff] %v554_v60  ;;  %v560_v63 = vld [vmem:[%s3725_s28 + $0x2998] sm:$0xff]  ;;  %557 = vst [vmem:[%s3730_s29 + $0x5e8] sm:$0xff] %v556_v61  ;;  %v562_v0 = vld [vmem:[%s3725_s28 + $0x2a00] sm:$0xff] }
  0x75   : > { %559 = vst [vmem:[%s3730_s29 + $0x5f0] sm:$0xff] %v558_v62  ;;  %561 = vst [vmem:[%s3730_s29 + $0x5f8] sm:$0xff] %v560_v63  ;;  %v564_v1 = vld [vmem:[%s3725_s28 + $0x2a08] sm:$0xff]  ;;  %v566_v2 = vld [vmem:[%s3725_s28 + $0x2a70] sm:$0xff] }
  0x76   : > { %563 = vst [vmem:[%s3730_s29 + $0x600] sm:$0xff] %v562_v0  ;;  %565 = vst [vmem:[%s3730_s29 + $0x608] sm:$0xff] %v564_v1  ;;  %v568_v3 = vld [vmem:[%s3725_s28 + $0x2a78] sm:$0xff]  ;;  %v570_v4 = vld [vmem:[%s3725_s28 + $0x2ae0] sm:$0xff] }
  0x77   : > { %567 = vst [vmem:[%s3730_s29 + $0x610] sm:$0xff] %v566_v2  ;;  %v572_v5 = vld [vmem:[%s3725_s28 + $0x2ae8] sm:$0xff]  ;;  %569 = vst [vmem:[%s3730_s29 + $0x618] sm:$0xff] %v568_v3  ;;  %v574_v6 = vld [vmem:[%s3725_s28 + $0x2b50] sm:$0xff] }
  0x78   : > { %571 = vst [vmem:[%s3730_s29 + $0x620] sm:$0xff] %v570_v4  ;;  %573 = vst [vmem:[%s3730_s29 + $0x628] sm:$0xff] %v572_v5  ;;  %v576_v7 = vld [vmem:[%s3725_s28 + $0x2b58] sm:$0xff]  ;;  %v578_v8 = vld [vmem:[%s3725_s28 + $0x2bc0] sm:$0xff] }
  0x79   : > { %575 = vst [vmem:[%s3730_s29 + $0x630] sm:$0xff] %v574_v6  ;;  %577 = vst [vmem:[%s3730_s29 + $0x638] sm:$0xff] %v576_v7  ;;  %v580_v9 = vld [vmem:[%s3725_s28 + $0x2bc8] sm:$0xff]  ;;  %v582_v10 = vld [vmem:[%s3725_s28 + $0x2c30] sm:$0xff] }
  0x7a   : > { %579 = vst [vmem:[%s3730_s29 + $0x640] sm:$0xff] %v578_v8  ;;  %v584_v11 = vld [vmem:[%s3725_s28 + $0x2c38] sm:$0xff]  ;;  %581 = vst [vmem:[%s3730_s29 + $0x648] sm:$0xff] %v580_v9  ;;  %v586_v12 = vld [vmem:[%s3725_s28 + $0x2ca0] sm:$0xff] }
  0x7b   : > { %583 = vst [vmem:[%s3730_s29 + $0x650] sm:$0xff] %v582_v10  ;;  %585 = vst [vmem:[%s3730_s29 + $0x658] sm:$0xff] %v584_v11  ;;  %v588_v13 = vld [vmem:[%s3725_s28 + $0x2ca8] sm:$0xff]  ;;  %v590_v14 = vld [vmem:[%s3725_s28 + $0x2d10] sm:$0xff] }
  0x7c   : > { %587 = vst [vmem:[%s3730_s29 + $0x660] sm:$0xff] %v586_v12  ;;  %589 = vst [vmem:[%s3730_s29 + $0x668] sm:$0xff] %v588_v13  ;;  %v592_v15 = vld [vmem:[%s3725_s28 + $0x2d18] sm:$0xff]  ;;  %v594_v16 = vld [vmem:[%s3725_s28 + $0x2d80] sm:$0xff] }
  0x7d   : > { %591 = vst [vmem:[%s3730_s29 + $0x670] sm:$0xff] %v590_v14  ;;  %v596_v17 = vld [vmem:[%s3725_s28 + $0x2d88] sm:$0xff]  ;;  %593 = vst [vmem:[%s3730_s29 + $0x678] sm:$0xff] %v592_v15  ;;  %v598_v18 = vld [vmem:[%s3725_s28 + $0x2df0] sm:$0xff] }
  0x7e   : > { %595 = vst [vmem:[%s3730_s29 + $0x680] sm:$0xff] %v594_v16  ;;  %597 = vst [vmem:[%s3730_s29 + $0x688] sm:$0xff] %v596_v17  ;;  %v600_v19 = vld [vmem:[%s3725_s28 + $0x2df8] sm:$0xff]  ;;  %v602_v20 = vld [vmem:[%s3725_s28 + $0x2e60] sm:$0xff] }
  0x7f   : > { %599 = vst [vmem:[%s3730_s29 + $0x690] sm:$0xff] %v598_v18  ;;  %601 = vst [vmem:[%s3730_s29 + $0x698] sm:$0xff] %v600_v19  ;;  %v604_v21 = vld [vmem:[%s3725_s28 + $0x2e68] sm:$0xff]  ;;  %v606_v22 = vld [vmem:[%s3725_s28 + $0x2ed0] sm:$0xff] }
  0x80   : > { %603 = vst [vmem:[%s3730_s29 + $0x6a0] sm:$0xff] %v602_v20  ;;  %v608_v23 = vld [vmem:[%s3725_s28 + $0x2ed8] sm:$0xff]  ;;  %605 = vst [vmem:[%s3730_s29 + $0x6a8] sm:$0xff] %v604_v21  ;;  %v610_v24 = vld [vmem:[%s3725_s28 + $0x2f40] sm:$0xff] }
  0x81   : > { %607 = vst [vmem:[%s3730_s29 + $0x6b0] sm:$0xff] %v606_v22  ;;  %609 = vst [vmem:[%s3730_s29 + $0x6b8] sm:$0xff] %v608_v23  ;;  %v612_v25 = vld [vmem:[%s3725_s28 + $0x2f48] sm:$0xff]  ;;  %v614_v26 = vld [vmem:[%s3725_s28 + $0x2fb0] sm:$0xff] }
  0x82   : > { %611 = vst [vmem:[%s3730_s29 + $0x6c0] sm:$0xff] %v610_v24  ;;  %613 = vst [vmem:[%s3730_s29 + $0x6c8] sm:$0xff] %v612_v25  ;;  %v616_v27 = vld [vmem:[%s3725_s28 + $0x2fb8] sm:$0xff]  ;;  %v618_v28 = vld [vmem:[%s3725_s28 + $0x3020] sm:$0xff] }
  0x83   : > { %615 = vst [vmem:[%s3730_s29 + $0x6d0] sm:$0xff] %v614_v26  ;;  %v620_v29 = vld [vmem:[%s3725_s28 + $0x3028] sm:$0xff]  ;;  %617 = vst [vmem:[%s3730_s29 + $0x6d8] sm:$0xff] %v616_v27  ;;  %v622_v30 = vld [vmem:[%s3725_s28 + $0x3090] sm:$0xff] }
  0x84   : > { %619 = vst [vmem:[%s3730_s29 + $0x6e0] sm:$0xff] %v618_v28  ;;  %621 = vst [vmem:[%s3730_s29 + $0x6e8] sm:$0xff] %v620_v29  ;;  %v624_v31 = vld [vmem:[%s3725_s28 + $0x3098] sm:$0xff]  ;;  %v626_v32 = vld [vmem:[%s3725_s28 + $0x3100] sm:$0xff] }
  0x85   : > { %623 = vst [vmem:[%s3730_s29 + $0x6f0] sm:$0xff] %v622_v30  ;;  %625 = vst [vmem:[%s3730_s29 + $0x6f8] sm:$0xff] %v624_v31  ;;  %v628_v33 = vld [vmem:[%s3725_s28 + $0x3108] sm:$0xff]  ;;  %v630_v34 = vld [vmem:[%s3725_s28 + $0x3170] sm:$0xff] }
  0x86   : > { %627 = vst [vmem:[%s3730_s29 + $0x700] sm:$0xff] %v626_v32  ;;  %v632_v35 = vld [vmem:[%s3725_s28 + $0x3178] sm:$0xff]  ;;  %629 = vst [vmem:[%s3730_s29 + $0x708] sm:$0xff] %v628_v33  ;;  %v634_v36 = vld [vmem:[%s3725_s28 + $0x31e0] sm:$0xff] }
  0x87   : > { %631 = vst [vmem:[%s3730_s29 + $0x710] sm:$0xff] %v630_v34  ;;  %633 = vst [vmem:[%s3730_s29 + $0x718] sm:$0xff] %v632_v35  ;;  %v636_v37 = vld [vmem:[%s3725_s28 + $0x31e8] sm:$0xff]  ;;  %v638_v38 = vld [vmem:[%s3725_s28 + $0x3250] sm:$0xff] }
  0x88   : > { %635 = vst [vmem:[%s3730_s29 + $0x720] sm:$0xff] %v634_v36  ;;  %637 = vst [vmem:[%s3730_s29 + $0x728] sm:$0xff] %v636_v37  ;;  %v640_v39 = vld [vmem:[%s3725_s28 + $0x3258] sm:$0xff]  ;;  %v642_v40 = vld [vmem:[%s3725_s28 + $0x32c0] sm:$0xff] }
  0x89   : > { %639 = vst [vmem:[%s3730_s29 + $0x730] sm:$0xff] %v638_v38  ;;  %v644_v41 = vld [vmem:[%s3725_s28 + $0x32c8] sm:$0xff]  ;;  %641 = vst [vmem:[%s3730_s29 + $0x738] sm:$0xff] %v640_v39  ;;  %v646_v42 = vld [vmem:[%s3725_s28 + $0x3330] sm:$0xff] }
  0x8a   : > { %643 = vst [vmem:[%s3730_s29 + $0x740] sm:$0xff] %v642_v40  ;;  %645 = vst [vmem:[%s3730_s29 + $0x748] sm:$0xff] %v644_v41  ;;  %v648_v43 = vld [vmem:[%s3725_s28 + $0x3338] sm:$0xff]  ;;  %v650_v44 = vld [vmem:[%s3725_s28 + $0x33a0] sm:$0xff] }
  0x8b   : > { %647 = vst [vmem:[%s3730_s29 + $0x750] sm:$0xff] %v646_v42  ;;  %649 = vst [vmem:[%s3730_s29 + $0x758] sm:$0xff] %v648_v43  ;;  %v652_v45 = vld [vmem:[%s3725_s28 + $0x33a8] sm:$0xff]  ;;  %v654_v46 = vld [vmem:[%s3725_s28 + $0x3410] sm:$0xff] }
  0x8c   : > { %651 = vst [vmem:[%s3730_s29 + $0x760] sm:$0xff] %v650_v44  ;;  %v656_v47 = vld [vmem:[%s3725_s28 + $0x3418] sm:$0xff]  ;;  %653 = vst [vmem:[%s3730_s29 + $0x768] sm:$0xff] %v652_v45  ;;  %v658_v48 = vld [vmem:[%s3725_s28 + $0x3480] sm:$0xff] }
  0x8d   : > { %655 = vst [vmem:[%s3730_s29 + $0x770] sm:$0xff] %v654_v46  ;;  %657 = vst [vmem:[%s3730_s29 + $0x778] sm:$0xff] %v656_v47  ;;  %v660_v49 = vld [vmem:[%s3725_s28 + $0x3488] sm:$0xff]  ;;  %v662_v50 = vld [vmem:[%s3725_s28 + $0x34f0] sm:$0xff] }
  0x8e   : > { %659 = vst [vmem:[%s3730_s29 + $0x780] sm:$0xff] %v658_v48  ;;  %661 = vst [vmem:[%s3730_s29 + $0x788] sm:$0xff] %v660_v49  ;;  %v664_v51 = vld [vmem:[%s3725_s28 + $0x34f8] sm:$0xff]  ;;  %v666_v52 = vld [vmem:[%s3725_s28 + $0x3560] sm:$0xff] }
  0x8f   : > { %663 = vst [vmem:[%s3730_s29 + $0x790] sm:$0xff] %v662_v50  ;;  %v668_v53 = vld [vmem:[%s3725_s28 + $0x3568] sm:$0xff]  ;;  %665 = vst [vmem:[%s3730_s29 + $0x798] sm:$0xff] %v664_v51  ;;  %v670_v54 = vld [vmem:[%s3725_s28 + $0x35d0] sm:$0xff] }
  0x90   : > { %667 = vst [vmem:[%s3730_s29 + $0x7a0] sm:$0xff] %v666_v52  ;;  %669 = vst [vmem:[%s3730_s29 + $0x7a8] sm:$0xff] %v668_v53  ;;  %v672_v55 = vld [vmem:[%s3725_s28 + $0x35d8] sm:$0xff]  ;;  %v674_v56 = vld [vmem:[%s3725_s28 + $0x3640] sm:$0xff] }
  0x91   : > { %671 = vst [vmem:[%s3730_s29 + $0x7b0] sm:$0xff] %v670_v54  ;;  %673 = vst [vmem:[%s3730_s29 + $0x7b8] sm:$0xff] %v672_v55  ;;  %v676_v57 = vld [vmem:[%s3725_s28 + $0x3648] sm:$0xff]  ;;  %v678_v58 = vld [vmem:[%s3725_s28 + $0x36b0] sm:$0xff] }
  0x92   : > { %675 = vst [vmem:[%s3730_s29 + $0x7c0] sm:$0xff] %v674_v56  ;;  %v680_v59 = vld [vmem:[%s3725_s28 + $0x36b8] sm:$0xff]  ;;  %677 = vst [vmem:[%s3730_s29 + $0x7c8] sm:$0xff] %v676_v57  ;;  %v682_v60 = vld [vmem:[%s3725_s28 + $0x3720] sm:$0xff] }
  0x93   : > { %679 = vst [vmem:[%s3730_s29 + $0x7d0] sm:$0xff] %v678_v58  ;;  %681 = vst [vmem:[%s3730_s29 + $0x7d8] sm:$0xff] %v680_v59  ;;  %v684_v61 = vld [vmem:[%s3725_s28 + $0x3728] sm:$0xff]  ;;  %v686_v62 = vld [vmem:[%s3725_s28 + $0x3790] sm:$0xff] }
  0x94   : > { %683 = vst [vmem:[%s3730_s29 + $0x7e0] sm:$0xff] %v682_v60  ;;  %685 = vst [vmem:[%s3730_s29 + $0x7e8] sm:$0xff] %v684_v61  ;;  %v688_v63 = vld [vmem:[%s3725_s28 + $0x3798] sm:$0xff] }
  0x95   : > { %687 = vst [vmem:[%s3730_s29 + $0x7f0] sm:$0xff] %v686_v62  ;;  %689 = vst [vmem:[%s3730_s29 + $0x7f8] sm:$0xff] %v688_v63 }
  0x96 PF: > { %p2878_p8 = scmp.ge.s32.totalorder %s3655_s16, 1  ;;  %p702_p9 = scmp.lt.s32.totalorder %s3655_s16, 8 }
  0x98   : > { %p703_p10 = pnand %p2878_p8, %p702_p9 }
  0x99   : > { %s709_s30 = sand.u32 (!%p703_p10), 1, %s3639_s12   ;;  %v756_v0 = vld [vmem:[%s4583_s0] sm:$0xff] (!%p703_p10)  ;;  %s2881_s4 = sshll.u32 (!%p703_p10), %s3647_s14, 2 }
  0x9a   : > { %706 = sbr.rel (%p703_p10) target bundleno = 644 (0x284), region = 51  ;;  %v760_v1 = vld [vmem:[%s4583_s0 + $0x20] sm:$0xff] (!%p703_p10)  ;;  %s2879_s8 = sshll.u32 (!%p703_p10), %s709_s30, 11 }
  0x9b   : > { %v4252_v2 = vcombine.low (!%p703_p10), %v756_v0, %v760_v1  ;;  %v2883_v3 = vcombine.high (!%p703_p10), %v756_v0, %v760_v1  ;;  %s4254_s9 = scalar_lea.vmem (!%p703_p10), [#allocation2], %s2879_s8  ;;  %p750_p11 = scmp.lt.s32.totalorder (!%p703_p10), %s2881_s4, 27 }
  0x9c   : > { %v3233_v4 = vld [vmem:[%s4254_s9 + $0x4] ss:$16 sps:$4 sm:$0xff] (!%p703_p10)   ;;  %v3235_v5 = vld [vmem:[%s4254_s9 + $0xc] ss:$16 sps:$4 sm:$0xff] (!%p703_p10)   ;;  %v3237_v6 = vld [vmem:[%s4254_s9] ss:$16 sps:$4 sm:$0xff] (!%p703_p10)  }
  0x9d   : > { %2394 = vmatprep.mubr.bf16.mxu0 (!%p703_p10), %v2883_v3  ;;  %2566 = vmatprep.mubr.bf16.mxu1 (!%p703_p10), %v2883_v3  ;;  %v3238_v7 = vld [vmem:[%s4254_s9 + $0x8] ss:$16 sps:$4 sm:$0xff] (!%p703_p10)   ;;  %v3239_v8 = vld [vmem:[%s4254_s9 + $0x24] ss:$16 sps:$4 sm:$0xff] (!%p703_p10)   ;;  %v3241_v9 = vld [vmem:[%s4254_s9 + $0x2c] ss:$16 sps:$4 sm:$0xff] (!%p703_p10)  }
  0x9e   : > { %2362 = vmatprep.subr.bf16.mxu0 (!%p703_p10), %v3233_v4  ;;  %2534 = vmatprep.subr.bf16.mxu1 (!%p703_p10), %v3235_v5  ;;  %v3243_v10 = vld [vmem:[%s4254_s9 + $0x20] ss:$16 sps:$4 sm:$0xff] (!%p703_p10)   ;;  %v3244_v11 = vld [vmem:[%s4254_s9 + $0x28] ss:$16 sps:$4 sm:$0xff] (!%p703_p10)   ;;  %v3245_v12 = vld [vmem:[%s4254_s9 + $0x44] ss:$16 sps:$4 sm:$0xff] (!%p703_p10)  }
  0x9f   : > { %2363 = vmatpush1.bf16.msra.mxu0 (!%p703_p10), %v3237_v6  ;;  %2535 = vmatpush1.bf16.msra.mxu1 (!%p703_p10), %v3238_v7  ;;  %v3247_v13 = vld [vmem:[%s4254_s9 + $0x4c] ss:$16 sps:$4 sm:$0xff] (!%p703_p10)   ;;  %v3249_v14 = vld [vmem:[%s4254_s9 + $0x40] ss:$16 sps:$4 sm:$0xff] (!%p703_p10)   ;;  %v3250_v15 = vld [vmem:[%s4254_s9 + $0x48] ss:$16 sps:$4 sm:$0xff] (!%p703_p10)  }
  0xa0   : > { %2364 = vmatprep.subr.bf16.mxu0 (!%p703_p10), %v3239_v8  ;;  %2536 = vmatprep.subr.bf16.mxu1 (!%p703_p10), %v3241_v9  ;;  %v3251_v16 = vld [vmem:[%s4254_s9 + $0x64] ss:$16 sps:$4 sm:$0xff] (!%p703_p10)   ;;  %v3253_v17 = vld [vmem:[%s4254_s9 + $0x6c] ss:$16 sps:$4 sm:$0xff] (!%p703_p10)   ;;  %v3255_v18 = vld [vmem:[%s4254_s9 + $0x60] ss:$16 sps:$4 sm:$0xff] (!%p703_p10)  }
  0xa1   : > { %v3256_v19 = vld [vmem:[%s4254_s9 + $0x68] ss:$16 sps:$4 sm:$0xff]   ;;  %v3257_v20 = vld [vmem:[%s4254_s9 + $0x84] ss:$16 sps:$4 sm:$0xff]   ;;  %v3259_v21 = vld [vmem:[%s4254_s9 + $0x8c] ss:$16 sps:$4 sm:$0xff]  }
  0xa2   : > { %v3261_v22 = vld [vmem:[%s4254_s9 + $0x80] ss:$16 sps:$4 sm:$0xff]   ;;  %v3262_v23 = vld [vmem:[%s4254_s9 + $0x88] ss:$16 sps:$4 sm:$0xff]   ;;  %v3263_v24 = vld [vmem:[%s4254_s9 + $0xa4] ss:$16 sps:$4 sm:$0xff]  }
  0xa3   : > { %2365 = vmatpush1.bf16.msra.mxu0 %v3243_v10  ;;  %2537 = vmatpush1.bf16.msra.mxu1 %v3244_v11  ;;  %v3265_v25 = vld [vmem:[%s4254_s9 + $0xac] ss:$16 sps:$4 sm:$0xff]   ;;  %v3267_v26 = vld [vmem:[%s4254_s9 + $0xa0] ss:$16 sps:$4 sm:$0xff]   ;;  %v3268_v27 = vld [vmem:[%s4254_s9 + $0xa8] ss:$16 sps:$4 sm:$0xff]  }
  0xa4   : > { %2366 = vmatprep.subr.bf16.mxu0 %v3245_v12  ;;  %2538 = vmatprep.subr.bf16.mxu1 %v3247_v13  ;;  %v3269_v28 = vld [vmem:[%s4254_s9 + $0xc4] ss:$16 sps:$4 sm:$0xff]   ;;  %v3271_v29 = vld [vmem:[%s4254_s9 + $0xcc] ss:$16 sps:$4 sm:$0xff]   ;;  %v3273_v30 = vld [vmem:[%s4254_s9 + $0xc0] ss:$16 sps:$4 sm:$0xff]  }
  0xa5   : > { %v3274_v31 = vld [vmem:[%s4254_s9 + $0xc8] ss:$16 sps:$4 sm:$0xff]   ;;  %v3275_v32 = vld [vmem:[%s4254_s9 + $0xe4] ss:$16 sps:$4 sm:$0xff]   ;;  %v3277_v33 = vld [vmem:[%s4254_s9 + $0xec] ss:$16 sps:$4 sm:$0xff]  }
  0xa6   : > { %v3279_v34 = vld [vmem:[%s4254_s9 + $0xe0] ss:$16 sps:$4 sm:$0xff]   ;;  %v3280_v35 = vld [vmem:[%s4254_s9 + $0xe8] ss:$16 sps:$4 sm:$0xff]   ;;  %v3281_v36 = vld [vmem:[%s4254_s9 + $0x104] ss:$16 sps:$4 sm:$0xff]  }
  0xa7   : > { %2367 = vmatpush1.bf16.msra.mxu0 %v3249_v14  ;;  %2539 = vmatpush1.bf16.msra.mxu1 %v3250_v15  ;;  %v3283_v37 = vld [vmem:[%s4254_s9 + $0x10c] ss:$16 sps:$4 sm:$0xff]   ;;  %v3285_v38 = vld [vmem:[%s4254_s9 + $0x100] ss:$16 sps:$4 sm:$0xff]   ;;  %v3286_v39 = vld [vmem:[%s4254_s9 + $0x108] ss:$16 sps:$4 sm:$0xff]  }
  0xa8   : > { %2368 = vmatprep.subr.bf16.mxu0 %v3251_v16  ;;  %2540 = vmatprep.subr.bf16.mxu1 %v3253_v17  ;;  %v3287_v40 = vld [vmem:[%s4254_s9 + $0x124] ss:$16 sps:$4 sm:$0xff]   ;;  %v3289_v41 = vld [vmem:[%s4254_s9 + $0x12c] ss:$16 sps:$4 sm:$0xff]   ;;  %v3291_v42 = vld [vmem:[%s4254_s9 + $0x120] ss:$16 sps:$4 sm:$0xff]  }
  0xa9   : > { %v3292_v43 = vld [vmem:[%s4254_s9 + $0x128] ss:$16 sps:$4 sm:$0xff]   ;;  %v3293_v44 = vld [vmem:[%s4254_s9 + $0x144] ss:$16 sps:$4 sm:$0xff]   ;;  %v3295_v45 = vld [vmem:[%s4254_s9 + $0x14c] ss:$16 sps:$4 sm:$0xff]  }
  0xaa   : > { %v3297_v46 = vld [vmem:[%s4254_s9 + $0x140] ss:$16 sps:$4 sm:$0xff]   ;;  %v3298_v47 = vld [vmem:[%s4254_s9 + $0x148] ss:$16 sps:$4 sm:$0xff]   ;;  %v3299_v48 = vld [vmem:[%s4254_s9 + $0x164] ss:$16 sps:$4 sm:$0xff]  }
  0xab   : > { %2369 = vmatpush1.bf16.msra.mxu0 %v3255_v18  ;;  %2541 = vmatpush1.bf16.msra.mxu1 %v3256_v19  ;;  %v3301_v49 = vld [vmem:[%s4254_s9 + $0x16c] ss:$16 sps:$4 sm:$0xff]   ;;  %v3303_v50 = vld [vmem:[%s4254_s9 + $0x160] ss:$16 sps:$4 sm:$0xff]   ;;  %v3304_v51 = vld [vmem:[%s4254_s9 + $0x168] ss:$16 sps:$4 sm:$0xff]  }
  0xac   : > { %2370 = vmatprep.subr.bf16.mxu0 %v3257_v20  ;;  %2542 = vmatprep.subr.bf16.mxu1 %v3259_v21  ;;  %v3305_v52 = vld [vmem:[%s4254_s9 + $0x184] ss:$16 sps:$4 sm:$0xff]   ;;  %v3307_v53 = vld [vmem:[%s4254_s9 + $0x18c] ss:$16 sps:$4 sm:$0xff]   ;;  %v3309_v54 = vld [vmem:[%s4254_s9 + $0x180] ss:$16 sps:$4 sm:$0xff]  }
  0xad   : > { %v3310_v55 = vld [vmem:[%s4254_s9 + $0x188] ss:$16 sps:$4 sm:$0xff]   ;;  %v3311_v56 = vld [vmem:[%s4254_s9 + $0x1a4] ss:$16 sps:$4 sm:$0xff]   ;;  %v3313_v57 = vld [vmem:[%s4254_s9 + $0x1ac] ss:$16 sps:$4 sm:$0xff]  }
  0xae   : > { %v3315_v58 = vld [vmem:[%s4254_s9 + $0x1a0] ss:$16 sps:$4 sm:$0xff]   ;;  %v3316_v59 = vld [vmem:[%s4254_s9 + $0x1a8] ss:$16 sps:$4 sm:$0xff]   ;;  %v3317_v60 = vld [vmem:[%s4254_s9 + $0x1c4] ss:$16 sps:$4 sm:$0xff]  }
  0xaf   : > { %2371 = vmatpush1.bf16.msra.mxu0 %v3261_v22  ;;  %2543 = vmatpush1.bf16.msra.mxu1 %v3262_v23  ;;  %v3319_v61 = vld [vmem:[%s4254_s9 + $0x1cc] ss:$16 sps:$4 sm:$0xff]   ;;  %v3321_v62 = vld [vmem:[%s4254_s9 + $0x1c0] ss:$16 sps:$4 sm:$0xff]   ;;  %v3322_v63 = vld [vmem:[%s4254_s9 + $0x1c8] ss:$16 sps:$4 sm:$0xff]  }
  0xb0   : > { %2372 = vmatprep.subr.bf16.mxu0 %v3263_v24  ;;  %2544 = vmatprep.subr.bf16.mxu1 %v3265_v25  ;;  %v3323_v0 = vld [vmem:[%s4254_s9 + $0x1e4] ss:$16 sps:$4 sm:$0xff]   ;;  %v3325_v1 = vld [vmem:[%s4254_s9 + $0x1ec] ss:$16 sps:$4 sm:$0xff]   ;;  %v3327_v3 = vld [vmem:[%s4254_s9 + $0x1e0] ss:$16 sps:$4 sm:$0xff]  }
  0xb1   : > { %v3328_v4 = vld [vmem:[%s4254_s9 + $0x1e8] ss:$16 sps:$4 sm:$0xff]   ;;  %v3331_v5 = vld [vmem:[%s4254_s9 + $0x204] ss:$16 sps:$4 sm:$0xff]   ;;  %v3334_v6 = vld [vmem:[%s4254_s9 + $0x20c] ss:$16 sps:$4 sm:$0xff]  }
  0xb2   : > { %v3329_v7 = vld [vmem:[%s4254_s9 + $0x200] ss:$16 sps:$4 sm:$0xff]   ;;  %v3332_v8 = vld [vmem:[%s4254_s9 + $0x208] ss:$16 sps:$4 sm:$0xff]   ;;  %v3337_v9 = vld [vmem:[%s4254_s9 + $0x224] ss:$16 sps:$4 sm:$0xff]  }
  0xb3   : > { %2373 = vmatpush1.bf16.msra.mxu0 %v3267_v26  ;;  %2545 = vmatpush1.bf16.msra.mxu1 %v3268_v27  ;;  %v3340_v10 = vld [vmem:[%s4254_s9 + $0x22c] ss:$16 sps:$4 sm:$0xff]   ;;  %v3335_v11 = vld [vmem:[%s4254_s9 + $0x220] ss:$16 sps:$4 sm:$0xff]   ;;  %v3338_v12 = vld [vmem:[%s4254_s9 + $0x228] ss:$16 sps:$4 sm:$0xff]  }
  0xb4   : > { %2374 = vmatprep.subr.bf16.mxu0 %v3269_v28  ;;  %2546 = vmatprep.subr.bf16.mxu1 %v3271_v29  ;;  %v3343_v13 = vld [vmem:[%s4254_s9 + $0x244] ss:$16 sps:$4 sm:$0xff]   ;;  %v3346_v14 = vld [vmem:[%s4254_s9 + $0x24c] ss:$16 sps:$4 sm:$0xff]   ;;  %v3341_v15 = vld [vmem:[%s4254_s9 + $0x240] ss:$16 sps:$4 sm:$0xff]  }
  0xb5   : > { %v3344_v16 = vld [vmem:[%s4254_s9 + $0x248] ss:$16 sps:$4 sm:$0xff]   ;;  %v3352_v17 = vld [vmem:[%s4254_s9 + $0x26c] ss:$16 sps:$4 sm:$0xff]   ;;  %v3347_v18 = vld [vmem:[%s4254_s9 + $0x260] ss:$16 sps:$4 sm:$0xff]  }
  0xb6   : > { %v3350_v19 = vld [vmem:[%s4254_s9 + $0x268] ss:$16 sps:$4 sm:$0xff]   ;;  %v3355_v20 = vld [vmem:[%s4254_s9 + $0x284] ss:$16 sps:$4 sm:$0xff]   ;;  %v3358_v21 = vld [vmem:[%s4254_s9 + $0x28c] ss:$16 sps:$4 sm:$0xff]  }
  0xb7   : > { %2375 = vmatpush1.bf16.msra.mxu0 %v3273_v30  ;;  %2547 = vmatpush1.bf16.msra.mxu1 %v3274_v31  ;;  %v3353_v22 = vld [vmem:[%s4254_s9 + $0x280] ss:$16 sps:$4 sm:$0xff]   ;;  %v3356_v23 = vld [vmem:[%s4254_s9 + $0x288] ss:$16 sps:$4 sm:$0xff]   ;;  %v3361_v24 = vld [vmem:[%s4254_s9 + $0x2a4] ss:$16 sps:$4 sm:$0xff]  }
  0xb8   : > { %2376 = vmatprep.subr.bf16.mxu0 %v3275_v32  ;;  %2548 = vmatprep.subr.bf16.mxu1 %v3277_v33  ;;  %v3364_v25 = vld [vmem:[%s4254_s9 + $0x2ac] ss:$16 sps:$4 sm:$0xff]   ;;  %v3359_v26 = vld [vmem:[%s4254_s9 + $0x2a0] ss:$16 sps:$4 sm:$0xff]   ;;  %v3362_v27 = vld [vmem:[%s4254_s9 + $0x2a8] ss:$16 sps:$4 sm:$0xff]  }
  0xb9   : > { %v3367_v28 = vld [vmem:[%s4254_s9 + $0x2c4] ss:$16 sps:$4 sm:$0xff]   ;;  %v3370_v29 = vld [vmem:[%s4254_s9 + $0x2cc] ss:$16 sps:$4 sm:$0xff]   ;;  %v3365_v33 = vld [vmem:[%s4254_s9 + $0x2c0] ss:$16 sps:$4 sm:$0xff]  }
  0xba   : > { %v4351_v30 = vld [vmem:[%s4583_s0 + $0x8] sm:$0xff]  ;;  %s4595_s4 = smov (!%p750_p11, %s2881_s4), 27  ;;  %s2880_s8 = sshll.u32 %s709_s30, 5 }
  0xbb   : > { %2377 = vmatpush1.bf16.msra.mxu0 %v3279_v34  ;;  %2549 = vmatpush1.bf16.msra.mxu1 %v3280_v35  ;;  %v4356_v31 = vld [vmem:[%s4583_s0 + $0x28] sm:$0xff]  ;;  %v3373_v35 = vld [vmem:[%s4254_s9 + $0x2e4] ss:$16 sps:$4 sm:$0xff]   ;;  %s752_s7 = scalar_lea.vmem %s4585_s2, %s4595_s4  ;;  %s740_s12 = scalar_lea.vmem [#allocation3], %s2880_s8 }
  0xbc   : > { %2378 = vmatprep.subr.bf16.mxu0 %v3281_v36  ;;  %2550 = vmatprep.subr.bf16.mxu1 %v3283_v37  ;;  %v2885_v32 = vcombine.high %v4351_v30, %v4356_v31  ;;  %v3368_v34 = vld [vmem:[%s4254_s9 + $0x2c8] ss:$16 sps:$4 sm:$0xff]   ;;  %v3376_v36 = vld [vmem:[%s4254_s9 + $0x2ec] ss:$16 sps:$4 sm:$0xff]   ;;  %v3371_v37 = vld [vmem:[%s4254_s9 + $0x2e0] ss:$16 sps:$4 sm:$0xff]  }
  0xbd   : > { %s3160_s30 = sshll.u32 (%p3712_p6), %s3647_s14, 4 }
  0xbe   : > { %s2754_s11 = scalar_lea.vmem (%p3712_p6), %s4586_s3, %s3160_s30 }
  0xbf   : > { %2379 = vmatpush1.bf16.msra.mxu0 %v3285_v38  ;;  %2551 = vmatpush1.bf16.msra.mxu1 %v3286_v39  ;;  %v3374_v38 = vld [vmem:[%s4254_s9 + $0x2e8] ss:$16 sps:$4 sm:$0xff]   ;;  %v3379_v39 = vld [vmem:[%s4254_s9 + $0x304] ss:$16 sps:$4 sm:$0xff]  }
  0xc0   : > { %2380 = vmatprep.subr.bf16.mxu0 %v3287_v40  ;;  %2552 = vmatprep.subr.bf16.mxu1 %v3289_v41  ;;  %v3382_v40 = vld [vmem:[%s4254_s9 + $0x30c] ss:$16 sps:$4 sm:$0xff]   ;;  %v3377_v41 = vld [vmem:[%s4254_s9 + $0x300] ss:$16 sps:$4 sm:$0xff]  }
  0xc3   : > { %2381 = vmatpush1.bf16.msra.mxu0 %v3291_v42  ;;  %2553 = vmatpush1.bf16.msra.mxu1 %v3292_v43  ;;  %v3380_v42 = vld [vmem:[%s4254_s9 + $0x308] ss:$16 sps:$4 sm:$0xff]   ;;  %v3385_v43 = vld [vmem:[%s4254_s9 + $0x324] ss:$16 sps:$4 sm:$0xff]  }
  0xc4   : > { %2382 = vmatprep.subr.bf16.mxu0 %v3293_v44  ;;  %2554 = vmatprep.subr.bf16.mxu1 %v3295_v45  ;;  %v3388_v44 = vld [vmem:[%s4254_s9 + $0x32c] ss:$16 sps:$4 sm:$0xff]   ;;  %v3383_v45 = vld [vmem:[%s4254_s9 + $0x320] ss:$16 sps:$4 sm:$0xff]  }
  0xc7   : > { %2383 = vmatpush1.bf16.msra.mxu0 %v3297_v46  ;;  %2555 = vmatpush1.bf16.msra.mxu1 %v3298_v47  ;;  %v3386_v46 = vld [vmem:[%s4254_s9 + $0x328] ss:$16 sps:$4 sm:$0xff]   ;;  %v3391_v47 = vld [vmem:[%s4254_s9 + $0x344] ss:$16 sps:$4 sm:$0xff]  }
  0xc8   : > { %2384 = vmatprep.subr.bf16.mxu0 %v3299_v48  ;;  %2556 = vmatprep.subr.bf16.mxu1 %v3301_v49  ;;  %v3394_v48 = vld [vmem:[%s4254_s9 + $0x34c] ss:$16 sps:$4 sm:$0xff]   ;;  %v3389_v49 = vld [vmem:[%s4254_s9 + $0x340] ss:$16 sps:$4 sm:$0xff]  }
  0xcb   : > { %2385 = vmatpush1.bf16.msra.mxu0 %v3303_v50  ;;  %2557 = vmatpush1.bf16.msra.mxu1 %v3304_v51  ;;  %v3392_v50 = vld [vmem:[%s4254_s9 + $0x348] ss:$16 sps:$4 sm:$0xff]   ;;  %v3397_v51 = vld [vmem:[%s4254_s9 + $0x364] ss:$16 sps:$4 sm:$0xff]  }
  0xcc   : > { %2386 = vmatprep.subr.bf16.mxu0 %v3305_v52  ;;  %2558 = vmatprep.subr.bf16.mxu1 %v3307_v53  ;;  %v3400_v52 = vld [vmem:[%s4254_s9 + $0x36c] ss:$16 sps:$4 sm:$0xff]   ;;  %v3395_v53 = vld [vmem:[%s4254_s9 + $0x360] ss:$16 sps:$4 sm:$0xff]  }
  0xcf   : > { %2387 = vmatpush1.bf16.msra.mxu0 %v3309_v54  ;;  %2559 = vmatpush1.bf16.msra.mxu1 %v3310_v55  ;;  %v3398_v54 = vld [vmem:[%s4254_s9 + $0x368] ss:$16 sps:$4 sm:$0xff]   ;;  %v3403_v55 = vld [vmem:[%s4254_s9 + $0x384] ss:$16 sps:$4 sm:$0xff]  }
  0xd0   : > { %2388 = vmatprep.subr.bf16.mxu0 %v3311_v56  ;;  %2560 = vmatprep.subr.bf16.mxu1 %v3313_v57  ;;  %v3406_v56 = vld [vmem:[%s4254_s9 + $0x38c] ss:$16 sps:$4 sm:$0xff]   ;;  %v3401_v57 = vld [vmem:[%s4254_s9 + $0x380] ss:$16 sps:$4 sm:$0xff]  }
  0xd3   : > { %2389 = vmatpush1.bf16.msra.mxu0 %v3315_v58  ;;  %2561 = vmatpush1.bf16.msra.mxu1 %v3316_v59  ;;  %v3404_v58 = vld [vmem:[%s4254_s9 + $0x388] ss:$16 sps:$4 sm:$0xff]   ;;  %v3409_v59 = vld [vmem:[%s4254_s9 + $0x3a4] ss:$16 sps:$4 sm:$0xff]  }
  0xd4   : > { %2390 = vmatprep.subr.bf16.mxu0 %v3317_v60  ;;  %2562 = vmatprep.subr.bf16.mxu1 %v3319_v61  ;;  %v3412_v60 = vld [vmem:[%s4254_s9 + $0x3ac] ss:$16 sps:$4 sm:$0xff]   ;;  %v3407_v61 = vld [vmem:[%s4254_s9 + $0x3a0] ss:$16 sps:$4 sm:$0xff]  }
  0xd7   : > { %2391 = vmatpush1.bf16.msra.mxu0 %v3321_v62  ;;  %2563 = vmatpush1.bf16.msra.mxu1 %v3322_v63  ;;  %v3410_v62 = vld [vmem:[%s4254_s9 + $0x3a8] ss:$16 sps:$4 sm:$0xff]   ;;  %v3415_v63 = vld [vmem:[%s4254_s9 + $0x3c4] ss:$16 sps:$4 sm:$0xff]  }
  0xd8   : > { %2392 = vmatprep.subr.bf16.mxu0 %v3323_v0  ;;  %2564 = vmatprep.subr.bf16.mxu1 %v3325_v1  ;;  %v3418_v0 = vld [vmem:[%s4254_s9 + $0x3cc] ss:$16 sps:$4 sm:$0xff]   ;;  %v3413_v1 = vld [vmem:[%s4254_s9 + $0x3c0] ss:$16 sps:$4 sm:$0xff]  }
  0xdb   : > { %2393 = vmatpush1.bf16.msra.mxu0 %v3327_v3  ;;  %2565 = vmatpush1.bf16.msra.mxu1 %v3328_v4  ;;  %v3416_v3 = vld [vmem:[%s4254_s9 + $0x3c8] ss:$16 sps:$4 sm:$0xff]   ;;  %v3421_v4 = vld [vmem:[%s4254_s9 + $0x3e4] ss:$16 sps:$4 sm:$0xff]  }
  0xdc   : > { %2405 = vmatprep.subr.bf16.mxu0 %v3331_v5  ;;  %2577 = vmatprep.subr.bf16.mxu1 %v3334_v6  ;;  %v3424_v5 = vld [vmem:[%s4254_s9 + $0x3ec] ss:$16 sps:$4 sm:$0xff]   ;;  %v3419_v6 = vld [vmem:[%s4254_s9 + $0x3e0] ss:$16 sps:$4 sm:$0xff]  }
  0xde   : > { %2395 = vmatmul.mubr.bf16.vlgmr.msra.gmra.mrb[0].mxu0 %v4252_v2  ;;  %2567 = vmatmul.mubr.bf16.vlgmr.msra.gmra.mrb[0].mxu1 %v4252_v2  ;;  %v3349_v2 = vld [vmem:[%s4254_s9 + $0x264] ss:$16 sps:$4 sm:$0xff]  }
  0xdf   : > { %2406 = vmatpush1.bf16.msra.mxu0 %v3329_v7  ;;  %2578 = vmatpush1.bf16.msra.mxu1 %v3332_v8  ;;  %v3422_v7 = vld [vmem:[%s4254_s9 + $0x3e8] ss:$16 sps:$4 sm:$0xff]   ;;  %v3427_v8 = vld [vmem:[%s4254_s9 + $0x404] ss:$16 sps:$4 sm:$0xff]  }
  0xe0   : > { %2407 = vmatprep.subr.bf16.mxu0 %v3337_v9  ;;  %2579 = vmatprep.subr.bf16.mxu1 %v3340_v10  ;;  %v3430_v9 = vld [vmem:[%s4254_s9 + $0x40c] ss:$16 sps:$4 sm:$0xff]   ;;  %v3425_v10 = vld [vmem:[%s4254_s9 + $0x400] ss:$16 sps:$4 sm:$0xff]  }
  0xe1   : > { %2437 = vmatprep.mubr.bf16.mxu0 %v2885_v32  ;;  %2609 = vmatprep.mubr.bf16.mxu1 %v2885_v32  ;;  %v3460_v32 = vld [vmem:[%s4254_s9 + $0x4ac] ss:$16 sps:$4 sm:$0xff]  }
  0xe3   : > { %2408 = vmatpush1.bf16.msra.mxu0 %v3335_v11  ;;  %2580 = vmatpush1.bf16.msra.mxu1 %v3338_v12  ;;  %v2884_v11 = vcombine.low %v4351_v30, %v4356_v31  ;;  %v3428_v12 = vld [vmem:[%s4254_s9 + $0x408] ss:$16 sps:$4 sm:$0xff]   ;;  %v3457_v31 = vld [vmem:[%s4254_s9 + $0x4a4] ss:$16 sps:$4 sm:$0xff]  }
  0xe4   : > { %2409 = vmatprep.subr.bf16.mxu0 %v3343_v13  ;;  %2581 = vmatprep.subr.bf16.mxu1 %v3346_v14  ;;  %v3433_v13 = vld [vmem:[%s4254_s9 + $0x424] ss:$16 sps:$4 sm:$0xff]   ;;  %v3436_v14 = vld [vmem:[%s4254_s9 + $0x42c] ss:$16 sps:$4 sm:$0xff]   ;;  %v3452_v30 = vld [vmem:[%s4254_s9 + $0x488] ss:$16 sps:$4 sm:$0xff]  }
  0xe7   : > { %2410 = vmatpush1.bf16.msra.mxu0 %v3341_v15  ;;  %2582 = vmatpush1.bf16.msra.mxu1 %v3344_v16  ;;  %v4409_v15 = vld [vmem:[%s4583_s0 + $0x10] sm:$0xff] }
  0xe8   : > { %2411 = vmatprep.subr.bf16.mxu0 %v3349_v2  ;;  %2583 = vmatprep.subr.bf16.mxu1 %v3352_v17  ;;  %v4414_v16 = vld [vmem:[%s4583_s0 + $0x30] sm:$0xff] }
  0xe9   : > { %v2887_v2 = vcombine.high %v4409_v15, %v4414_v16  ;;  %v3431_v17 = vld [vmem:[%s4254_s9 + $0x420] ss:$16 sps:$4 sm:$0xff]  }
  0xeb   : > { %2412 = vmatpush1.bf16.msra.mxu0 %v3347_v18  ;;  %2584 = vmatpush1.bf16.msra.mxu1 %v3350_v19  ;;  %v3434_v18 = vld [vmem:[%s4254_s9 + $0x428] ss:$16 sps:$4 sm:$0xff]   ;;  %v3439_v19 = vld [vmem:[%s4254_s9 + $0x444] ss:$16 sps:$4 sm:$0xff]  }
  0xec   : > { %2413 = vmatprep.subr.bf16.mxu0 %v3355_v20  ;;  %2585 = vmatprep.subr.bf16.mxu1 %v3358_v21  ;;  %v3442_v20 = vld [vmem:[%s4254_s9 + $0x44c] ss:$16 sps:$4 sm:$0xff]   ;;  %v3437_v21 = vld [vmem:[%s4254_s9 + $0x440] ss:$16 sps:$4 sm:$0xff]  }
  0xef   : > { %2414 = vmatpush1.bf16.msra.mxu0 %v3353_v22  ;;  %2586 = vmatpush1.bf16.msra.mxu1 %v3356_v23  ;;  %v3440_v22 = vld [vmem:[%s4254_s9 + $0x448] ss:$16 sps:$4 sm:$0xff]   ;;  %v3445_v23 = vld [vmem:[%s4254_s9 + $0x464] ss:$16 sps:$4 sm:$0xff]  }
  0xf0   : > { %2415 = vmatprep.subr.bf16.mxu0 %v3361_v24  ;;  %2587 = vmatprep.subr.bf16.mxu1 %v3364_v25  ;;  %v3448_v24 = vld [vmem:[%s4254_s9 + $0x46c] ss:$16 sps:$4 sm:$0xff]   ;;  %v3443_v25 = vld [vmem:[%s4254_s9 + $0x460] ss:$16 sps:$4 sm:$0xff]  }
  0xf3   : > { %2416 = vmatpush1.bf16.msra.mxu0 %v3359_v26  ;;  %2588 = vmatpush1.bf16.msra.mxu1 %v3362_v27  ;;  %v3446_v26 = vld [vmem:[%s4254_s9 + $0x468] ss:$16 sps:$4 sm:$0xff]   ;;  %v3451_v27 = vld [vmem:[%s4254_s9 + $0x484] ss:$16 sps:$4 sm:$0xff]  }
  0xf4   : > { %2417 = vmatprep.subr.bf16.mxu0 %v3367_v28  ;;  %2589 = vmatprep.subr.bf16.mxu1 %v3370_v29  ;;  %v3454_v28 = vld [vmem:[%s4254_s9 + $0x48c] ss:$16 sps:$4 sm:$0xff]   ;;  %v3449_v29 = vld [vmem:[%s4254_s9 + $0x480] ss:$16 sps:$4 sm:$0xff]  }
  0xf7   : > { %2418 = vmatpush1.bf16.msra.mxu0 %v3365_v33  ;;  %2590 = vmatpush1.bf16.msra.mxu1 %v3368_v34  ;;  %v3455_v33 = vld [vmem:[%s4254_s9 + $0x4a0] ss:$16 sps:$4 sm:$0xff]   ;;  %v3458_v34 = vld [vmem:[%s4254_s9 + $0x4a8] ss:$16 sps:$4 sm:$0xff]  }
  0xf8   : > { %2419 = vmatprep.subr.bf16.mxu0 %v3373_v35  ;;  %2591 = vmatprep.subr.bf16.mxu1 %v3376_v36  ;;  %v3463_v35 = vld [vmem:[%s4254_s9 + $0x4c4] ss:$16 sps:$4 sm:$0xff]   ;;  %v3466_v36 = vld [vmem:[%s4254_s9 + $0x4cc] ss:$16 sps:$4 sm:$0xff]  }
  0xfb   : > { %2420 = vmatpush1.bf16.msra.mxu0 %v3371_v37  ;;  %2592 = vmatpush1.bf16.msra.mxu1 %v3374_v38  ;;  %v3461_v37 = vld [vmem:[%s4254_s9 + $0x4c0] ss:$16 sps:$4 sm:$0xff]   ;;  %v3464_v38 = vld [vmem:[%s4254_s9 + $0x4c8] ss:$16 sps:$4 sm:$0xff]  }
  0xfc   : > { %2421 = vmatprep.subr.bf16.mxu0 %v3379_v39  ;;  %2593 = vmatprep.subr.bf16.mxu1 %v3382_v40  ;;  %v3469_v39 = vld [vmem:[%s4254_s9 + $0x4e4] ss:$16 sps:$4 sm:$0xff]   ;;  %v3472_v40 = vld [vmem:[%s4254_s9 + $0x4ec] ss:$16 sps:$4 sm:$0xff]  }
  0xff   : > { %2422 = vmatpush1.bf16.msra.mxu0 %v3377_v41  ;;  %2594 = vmatpush1.bf16.msra.mxu1 %v3380_v42  ;;  %v3467_v41 = vld [vmem:[%s4254_s9 + $0x4e0] ss:$16 sps:$4 sm:$0xff]   ;;  %v3470_v42 = vld [vmem:[%s4254_s9 + $0x4e8] ss:$16 sps:$4 sm:$0xff]  }
 0x100   : > { %2423 = vmatprep.subr.bf16.mxu0 %v3385_v43  ;;  %2595 = vmatprep.subr.bf16.mxu1 %v3388_v44  ;;  %v3475_v43 = vld [vmem:[%s4254_s9 + $0x504] ss:$16 sps:$4 sm:$0xff]   ;;  %v3478_v44 = vld [vmem:[%s4254_s9 + $0x50c] ss:$16 sps:$4 sm:$0xff]  }
 0x103   : > { %2424 = vmatpush1.bf16.msra.mxu0 %v3383_v45  ;;  %2596 = vmatpush1.bf16.msra.mxu1 %v3386_v46  ;;  %v3473_v45 = vld [vmem:[%s4254_s9 + $0x500] ss:$16 sps:$4 sm:$0xff]   ;;  %v3476_v46 = vld [vmem:[%s4254_s9 + $0x508] ss:$16 sps:$4 sm:$0xff]  }
 0x104   : > { %2425 = vmatprep.subr.bf16.mxu0 %v3391_v47  ;;  %2597 = vmatprep.subr.bf16.mxu1 %v3394_v48  ;;  %v3481_v47 = vld [vmem:[%s4254_s9 + $0x524] ss:$16 sps:$4 sm:$0xff]   ;;  %v3484_v48 = vld [vmem:[%s4254_s9 + $0x52c] ss:$16 sps:$4 sm:$0xff]  }
 0x107   : > { %2426 = vmatpush1.bf16.msra.mxu0 %v3389_v49  ;;  %2598 = vmatpush1.bf16.msra.mxu1 %v3392_v50  ;;  %v3479_v49 = vld [vmem:[%s4254_s9 + $0x520] ss:$16 sps:$4 sm:$0xff]   ;;  %v3482_v50 = vld [vmem:[%s4254_s9 + $0x528] ss:$16 sps:$4 sm:$0xff]  }
 0x108   : > { %2427 = vmatprep.subr.bf16.mxu0 %v3397_v51  ;;  %2599 = vmatprep.subr.bf16.mxu1 %v3400_v52  ;;  %v3487_v51 = vld [vmem:[%s4254_s9 + $0x544] ss:$16 sps:$4 sm:$0xff]   ;;  %v3490_v52 = vld [vmem:[%s4254_s9 + $0x54c] ss:$16 sps:$4 sm:$0xff]  }
 0x10b   : > { %2428 = vmatpush1.bf16.msra.mxu0 %v3395_v53  ;;  %2600 = vmatpush1.bf16.msra.mxu1 %v3398_v54  ;;  %v3485_v53 = vld [vmem:[%s4254_s9 + $0x540] ss:$16 sps:$4 sm:$0xff]   ;;  %v3488_v54 = vld [vmem:[%s4254_s9 + $0x548] ss:$16 sps:$4 sm:$0xff]  }
 0x10c   : > { %2429 = vmatprep.subr.bf16.mxu0 %v3403_v55  ;;  %2601 = vmatprep.subr.bf16.mxu1 %v3406_v56  ;;  %v3493_v55 = vld [vmem:[%s4254_s9 + $0x564] ss:$16 sps:$4 sm:$0xff]   ;;  %v3496_v56 = vld [vmem:[%s4254_s9 + $0x56c] ss:$16 sps:$4 sm:$0xff]  }
 0x10f   : > { %2430 = vmatpush1.bf16.msra.mxu0 %v3401_v57  ;;  %2602 = vmatpush1.bf16.msra.mxu1 %v3404_v58  ;;  %v3491_v57 = vld [vmem:[%s4254_s9 + $0x560] ss:$16 sps:$4 sm:$0xff]   ;;  %v3494_v58 = vld [vmem:[%s4254_s9 + $0x568] ss:$16 sps:$4 sm:$0xff]  }
 0x110   : > { %2431 = vmatprep.subr.bf16.mxu0 %v3409_v59  ;;  %2603 = vmatprep.subr.bf16.mxu1 %v3412_v60  ;;  %v3499_v59 = vld [vmem:[%s4254_s9 + $0x584] ss:$16 sps:$4 sm:$0xff]   ;;  %v3502_v60 = vld [vmem:[%s4254_s9 + $0x58c] ss:$16 sps:$4 sm:$0xff]  }
 0x113   : > { %2432 = vmatpush1.bf16.msra.mxu0 %v3407_v61  ;;  %2604 = vmatpush1.bf16.msra.mxu1 %v3410_v62  ;;  %v3497_v61 = vld [vmem:[%s4254_s9 + $0x580] ss:$16 sps:$4 sm:$0xff]   ;;  %v3500_v62 = vld [vmem:[%s4254_s9 + $0x588] ss:$16 sps:$4 sm:$0xff]  }
 0x114   : > { %2433 = vmatprep.subr.bf16.mxu0 %v3415_v63  ;;  %2605 = vmatprep.subr.bf16.mxu1 %v3418_v0  ;;  %v3505_v63 = vld [vmem:[%s4254_s9 + $0x5a4] ss:$16 sps:$4 sm:$0xff]   ;;  %v3508_v0 = vld [vmem:[%s4254_s9 + $0x5ac] ss:$16 sps:$4 sm:$0xff]  }
 0x117   : > { %2434 = vmatpush1.bf16.msra.mxu0 %v3413_v1  ;;  %2606 = vmatpush1.bf16.msra.mxu1 %v3416_v3  ;;  %v3503_v1 = vld [vmem:[%s4254_s9 + $0x5a0] ss:$16 sps:$4 sm:$0xff]   ;;  %v3506_v3 = vld [vmem:[%s4254_s9 + $0x5a8] ss:$16 sps:$4 sm:$0xff]  }
 0x118   : > { %2435 = vmatprep.subr.bf16.mxu0 %v3421_v4  ;;  %2607 = vmatprep.subr.bf16.mxu1 %v3424_v5  ;;  %v3511_v4 = vld [vmem:[%s4254_s9 + $0x5c4] ss:$16 sps:$4 sm:$0xff]   ;;  %v3514_v5 = vld [vmem:[%s4254_s9 + $0x5cc] ss:$16 sps:$4 sm:$0xff]  }
 0x11b   : > { %2436 = vmatpush1.bf16.msra.mxu0 %v3419_v6  ;;  %2608 = vmatpush1.bf16.msra.mxu1 %v3422_v7  ;;  %v3509_v6 = vld [vmem:[%s4254_s9 + $0x5c0] ss:$16 sps:$4 sm:$0xff]   ;;  %v3512_v7 = vld [vmem:[%s4254_s9 + $0x5c8] ss:$16 sps:$4 sm:$0xff]  }
 0x11c   : > { %2448 = vmatprep.subr.bf16.mxu0 %v3427_v8  ;;  %2620 = vmatprep.subr.bf16.mxu1 %v3430_v9  ;;  %v3517_v8 = vld [vmem:[%s4254_s9 + $0x5e4] ss:$16 sps:$4 sm:$0xff]   ;;  %v3520_v9 = vld [vmem:[%s4254_s9 + $0x5ec] ss:$16 sps:$4 sm:$0xff]  }
 0x11e   : > { %2438 = vmatmul.mubr.bf16.vlgmr.msra.gmra.mrb[0].mxu0 %v2884_v11  ;;  %2610 = vmatmul.mubr.bf16.vlgmr.msra.gmra.mrb[0].mxu1 %v2884_v11  ;;  %v3518_v11 = vld [vmem:[%s4254_s9 + $0x5e8] ss:$16 sps:$4 sm:$0xff]  }
 0x11f   : > { %2449 = vmatpush1.bf16.msra.mxu0 %v3425_v10  ;;  %2621 = vmatpush1.bf16.msra.mxu1 %v3428_v12  ;;  %v3515_v10 = vld [vmem:[%s4254_s9 + $0x5e0] ss:$16 sps:$4 sm:$0xff]   ;;  %v3523_v12 = vld [vmem:[%s4254_s9 + $0x604] ss:$16 sps:$4 sm:$0xff]  }
 0x120   : > { %2450 = vmatprep.subr.bf16.mxu0 %v3433_v13  ;;  %2622 = vmatprep.subr.bf16.mxu1 %v3436_v14  ;;  %v3526_v13 = vld [vmem:[%s4254_s9 + $0x60c] ss:$16 sps:$4 sm:$0xff]   ;;  %v2886_v14 = vcombine.low %v4409_v15, %v4414_v16  ;;  %v3529_v15 = vld [vmem:[%s4254_s9 + $0x624] ss:$16 sps:$4 sm:$0xff]  }
 0x121   : > { %2480 = vmatprep.mubr.bf16.mxu0 %v2887_v2  ;;  %2652 = vmatprep.mubr.bf16.mxu1 %v2887_v2  ;;  %v4483_v2 = vld [vmem:[%s4583_s0 + $0x18] sm:$0xff] }
 0x122   : > { %v3532_v16 = vld [vmem:[%s4254_s9 + $0x62c] ss:$16 sps:$4 sm:$0xff]  }
 0x123   : > { %2451 = vmatpush1.bf16.msra.mxu0 %v3431_v17  ;;  %2623 = vmatpush1.bf16.msra.mxu1 %v3434_v18  ;;  %v4488_v17 = vld [vmem:[%s4583_s0 + $0x38] sm:$0xff]  ;;  %v3521_v18 = vld [vmem:[%s4254_s9 + $0x600] ss:$16 sps:$4 sm:$0xff]  }
 0x124   : > { %2452 = vmatprep.subr.bf16.mxu0 %v3439_v19  ;;  %2624 = vmatprep.subr.bf16.mxu1 %v3442_v20  ;;  %v3524_v19 = vld [vmem:[%s4254_s9 + $0x608] ss:$16 sps:$4 sm:$0xff]   ;;  %v2889_v20 = vcombine.high %v4483_v2, %v4488_v17 }
 0x127   : > { %2453 = vmatpush1.bf16.msra.mxu0 %v3437_v21  ;;  %2625 = vmatpush1.bf16.msra.mxu1 %v3440_v22  ;;  %v3527_v21 = vld [vmem:[%s4254_s9 + $0x620] ss:$16 sps:$4 sm:$0xff]   ;;  %v3530_v22 = vld [vmem:[%s4254_s9 + $0x628] ss:$16 sps:$4 sm:$0xff]  }
 0x128   : > { %2454 = vmatprep.subr.bf16.mxu0 %v3445_v23  ;;  %2626 = vmatprep.subr.bf16.mxu1 %v3448_v24  ;;  %v3535_v23 = vld [vmem:[%s4254_s9 + $0x644] ss:$16 sps:$4 sm:$0xff]   ;;  %v3538_v24 = vld [vmem:[%s4254_s9 + $0x64c] ss:$16 sps:$4 sm:$0xff]  }
 0x12b   : > { %2455 = vmatpush1.bf16.msra.mxu0 %v3443_v25  ;;  %2627 = vmatpush1.bf16.msra.mxu1 %v3446_v26  ;;  %v3533_v25 = vld [vmem:[%s4254_s9 + $0x640] ss:$16 sps:$4 sm:$0xff]   ;;  %v3536_v26 = vld [vmem:[%s4254_s9 + $0x648] ss:$16 sps:$4 sm:$0xff]  }
 0x12c   : > { %2456 = vmatprep.subr.bf16.mxu0 %v3451_v27  ;;  %2628 = vmatprep.subr.bf16.mxu1 %v3454_v28  ;;  %v3541_v27 = vld [vmem:[%s4254_s9 + $0x664] ss:$16 sps:$4 sm:$0xff]   ;;  %v3544_v28 = vld [vmem:[%s4254_s9 + $0x66c] ss:$16 sps:$4 sm:$0xff]  }
 0x12f   : > { %2457 = vmatpush1.bf16.msra.mxu0 %v3449_v29  ;;  %2629 = vmatpush1.bf16.msra.mxu1 %v3452_v30  ;;  %v3539_v29 = vld [vmem:[%s4254_s9 + $0x660] ss:$16 sps:$4 sm:$0xff]   ;;  %v3542_v30 = vld [vmem:[%s4254_s9 + $0x668] ss:$16 sps:$4 sm:$0xff]  }
 0x130   : > { %2458 = vmatprep.subr.bf16.mxu0 %v3457_v31  ;;  %2630 = vmatprep.subr.bf16.mxu1 %v3460_v32  ;;  %v3547_v31 = vld [vmem:[%s4254_s9 + $0x684] ss:$16 sps:$4 sm:$0xff]   ;;  %v3550_v32 = vld [vmem:[%s4254_s9 + $0x68c] ss:$16 sps:$4 sm:$0xff]  }
 0x133   : > { %2459 = vmatpush1.bf16.msra.mxu0 %v3455_v33  ;;  %2631 = vmatpush1.bf16.msra.mxu1 %v3458_v34  ;;  %v3545_v33 = vld [vmem:[%s4254_s9 + $0x680] ss:$16 sps:$4 sm:$0xff]   ;;  %v3548_v34 = vld [vmem:[%s4254_s9 + $0x688] ss:$16 sps:$4 sm:$0xff]  }
 0x134   : > { %2460 = vmatprep.subr.bf16.mxu0 %v3463_v35  ;;  %2632 = vmatprep.subr.bf16.mxu1 %v3466_v36  ;;  %v3553_v35 = vld [vmem:[%s4254_s9 + $0x6a4] ss:$16 sps:$4 sm:$0xff]   ;;  %v3556_v36 = vld [vmem:[%s4254_s9 + $0x6ac] ss:$16 sps:$4 sm:$0xff]  }
 0x137   : > { %2461 = vmatpush1.bf16.msra.mxu0 %v3461_v37  ;;  %2633 = vmatpush1.bf16.msra.mxu1 %v3464_v38  ;;  %v3551_v37 = vld [vmem:[%s4254_s9 + $0x6a0] ss:$16 sps:$4 sm:$0xff]   ;;  %v3554_v38 = vld [vmem:[%s4254_s9 + $0x6a8] ss:$16 sps:$4 sm:$0xff]  }
 0x138   : > { %2462 = vmatprep.subr.bf16.mxu0 %v3469_v39  ;;  %2634 = vmatprep.subr.bf16.mxu1 %v3472_v40  ;;  %v3559_v39 = vld [vmem:[%s4254_s9 + $0x6c4] ss:$16 sps:$4 sm:$0xff]   ;;  %v3562_v40 = vld [vmem:[%s4254_s9 + $0x6cc] ss:$16 sps:$4 sm:$0xff]  }
 0x13b   : > { %2463 = vmatpush1.bf16.msra.mxu0 %v3467_v41  ;;  %2635 = vmatpush1.bf16.msra.mxu1 %v3470_v42  ;;  %v3557_v41 = vld [vmem:[%s4254_s9 + $0x6c0] ss:$16 sps:$4 sm:$0xff]   ;;  %v3560_v42 = vld [vmem:[%s4254_s9 + $0x6c8] ss:$16 sps:$4 sm:$0xff]  }
 0x13c   : > { %2464 = vmatprep.subr.bf16.mxu0 %v3475_v43  ;;  %2636 = vmatprep.subr.bf16.mxu1 %v3478_v44  ;;  %v3565_v43 = vld [vmem:[%s4254_s9 + $0x6e4] ss:$16 sps:$4 sm:$0xff]   ;;  %v3568_v44 = vld [vmem:[%s4254_s9 + $0x6ec] ss:$16 sps:$4 sm:$0xff]  }
 0x13f   : > { %2465 = vmatpush1.bf16.msra.mxu0 %v3473_v45  ;;  %2637 = vmatpush1.bf16.msra.mxu1 %v3476_v46  ;;  %v3563_v45 = vld [vmem:[%s4254_s9 + $0x6e0] ss:$16 sps:$4 sm:$0xff]   ;;  %v3566_v46 = vld [vmem:[%s4254_s9 + $0x6e8] ss:$16 sps:$4 sm:$0xff]  }
 0x140   : > { %2466 = vmatprep.subr.bf16.mxu0 %v3481_v47  ;;  %2638 = vmatprep.subr.bf16.mxu1 %v3484_v48  ;;  %v3571_v47 = vld [vmem:[%s4254_s9 + $0x704] ss:$16 sps:$4 sm:$0xff]   ;;  %v3574_v48 = vld [vmem:[%s4254_s9 + $0x70c] ss:$16 sps:$4 sm:$0xff]  }
 0x143   : > { %2467 = vmatpush1.bf16.msra.mxu0 %v3479_v49  ;;  %2639 = vmatpush1.bf16.msra.mxu1 %v3482_v50  ;;  %v3569_v49 = vld [vmem:[%s4254_s9 + $0x700] ss:$16 sps:$4 sm:$0xff]   ;;  %v3572_v50 = vld [vmem:[%s4254_s9 + $0x708] ss:$16 sps:$4 sm:$0xff]  }
 0x144   : > { %2468 = vmatprep.subr.bf16.mxu0 %v3487_v51  ;;  %2640 = vmatprep.subr.bf16.mxu1 %v3490_v52  ;;  %v3577_v51 = vld [vmem:[%s4254_s9 + $0x724] ss:$16 sps:$4 sm:$0xff]   ;;  %v3580_v52 = vld [vmem:[%s4254_s9 + $0x72c] ss:$16 sps:$4 sm:$0xff]  }
 0x147   : > { %2469 = vmatpush1.bf16.msra.mxu0 %v3485_v53  ;;  %2641 = vmatpush1.bf16.msra.mxu1 %v3488_v54  ;;  %v3575_v53 = vld [vmem:[%s4254_s9 + $0x720] ss:$16 sps:$4 sm:$0xff]   ;;  %v3578_v54 = vld [vmem:[%s4254_s9 + $0x728] ss:$16 sps:$4 sm:$0xff]  }
 0x148   : > { %2470 = vmatprep.subr.bf16.mxu0 %v3493_v55  ;;  %2642 = vmatprep.subr.bf16.mxu1 %v3496_v56  ;;  %v3583_v55 = vld [vmem:[%s4254_s9 + $0x744] ss:$16 sps:$4 sm:$0xff]   ;;  %v3586_v56 = vld [vmem:[%s4254_s9 + $0x74c] ss:$16 sps:$4 sm:$0xff]  }
 0x14b   : > { %2471 = vmatpush1.bf16.msra.mxu0 %v3491_v57  ;;  %2643 = vmatpush1.bf16.msra.mxu1 %v3494_v58  ;;  %v3581_v57 = vld [vmem:[%s4254_s9 + $0x740] ss:$16 sps:$4 sm:$0xff]   ;;  %v3584_v58 = vld [vmem:[%s4254_s9 + $0x748] ss:$16 sps:$4 sm:$0xff]  }
 0x14c   : > { %2472 = vmatprep.subr.bf16.mxu0 %v3499_v59  ;;  %2644 = vmatprep.subr.bf16.mxu1 %v3502_v60  ;;  %v3589_v59 = vld [vmem:[%s4254_s9 + $0x764] ss:$16 sps:$4 sm:$0xff]   ;;  %v3592_v60 = vld [vmem:[%s4254_s9 + $0x76c] ss:$16 sps:$4 sm:$0xff]  }
 0x14f   : > { %2473 = vmatpush1.bf16.msra.mxu0 %v3497_v61  ;;  %2645 = vmatpush1.bf16.msra.mxu1 %v3500_v62  ;;  %v3587_v61 = vld [vmem:[%s4254_s9 + $0x760] ss:$16 sps:$4 sm:$0xff]   ;;  %v3590_v62 = vld [vmem:[%s4254_s9 + $0x768] ss:$16 sps:$4 sm:$0xff]  }
 0x150   : > { %2474 = vmatprep.subr.bf16.mxu0 %v3505_v63  ;;  %2646 = vmatprep.subr.bf16.mxu1 %v3508_v0  ;;  %v3595_v63 = vld [vmem:[%s4254_s9 + $0x784] ss:$16 sps:$4 sm:$0xff]   ;;  %v3598_v0 = vld [vmem:[%s4254_s9 + $0x78c] ss:$16 sps:$4 sm:$0xff]  }
 0x153   : > { %2475 = vmatpush1.bf16.msra.mxu0 %v3503_v1  ;;  %2647 = vmatpush1.bf16.msra.mxu1 %v3506_v3  ;;  %v3593_v1 = vld [vmem:[%s4254_s9 + $0x780] ss:$16 sps:$4 sm:$0xff]   ;;  %v3596_v3 = vld [vmem:[%s4254_s9 + $0x788] ss:$16 sps:$4 sm:$0xff]  }
 0x154   : > { %2476 = vmatprep.subr.bf16.mxu0 %v3511_v4  ;;  %2648 = vmatprep.subr.bf16.mxu1 %v3514_v5  ;;  %v3601_v4 = vld [vmem:[%s4254_s9 + $0x7a4] ss:$16 sps:$4 sm:$0xff]   ;;  %v3604_v5 = vld [vmem:[%s4254_s9 + $0x7ac] ss:$16 sps:$4 sm:$0xff]  }
 0x157   : > { %2477 = vmatpush1.bf16.msra.mxu0 %v3509_v6  ;;  %2649 = vmatpush1.bf16.msra.mxu1 %v3512_v7  ;;  %v3599_v6 = vld [vmem:[%s4254_s9 + $0x7a0] ss:$16 sps:$4 sm:$0xff]   ;;  %v3602_v7 = vld [vmem:[%s4254_s9 + $0x7a8] ss:$16 sps:$4 sm:$0xff]  }
 0x158   : > { %2478 = vmatprep.subr.bf16.mxu0 %v3517_v8  ;;  %2650 = vmatprep.subr.bf16.mxu1 %v3520_v9  ;;  %v3607_v8 = vld [vmem:[%s4254_s9 + $0x7c4] ss:$16 sps:$4 sm:$0xff]   ;;  %v3610_v9 = vld [vmem:[%s4254_s9 + $0x7cc] ss:$16 sps:$4 sm:$0xff]  }
 0x15b   : > { %2479 = vmatpush1.bf16.msra.mxu0 %v3515_v10  ;;  %2651 = vmatpush1.bf16.msra.mxu1 %v3518_v11  ;;  %v3605_v10 = vld [vmem:[%s4254_s9 + $0x7c0] ss:$16 sps:$4 sm:$0xff]   ;;  %v3608_v11 = vld [vmem:[%s4254_s9 + $0x7c8] ss:$16 sps:$4 sm:$0xff]  }
 0x15c   : > { %2491 = vmatprep.subr.bf16.mxu0 %v3523_v12  ;;  %2663 = vmatprep.subr.bf16.mxu1 %v3526_v13  ;;  %v3613_v12 = vld [vmem:[%s4254_s9 + $0x7e4] ss:$16 sps:$4 sm:$0xff]   ;;  %v3616_v13 = vld [vmem:[%s4254_s9 + $0x7ec] ss:$16 sps:$4 sm:$0xff]  }
 0x15e   : > { %2481 = vmatmul.mubr.bf16.vlgmr.msra.gmra.mrb[0].mxu0 %v2886_v14  ;;  %2653 = vmatmul.mubr.bf16.vlgmr.msra.gmra.mrb[0].mxu1 %v2886_v14  ;;  %v3611_v14 = vld [vmem:[%s4254_s9 + $0x7e0] ss:$16 sps:$4 sm:$0xff]  }
 0x15f   : > { %2492 = vmatpush1.bf16.msra.mxu0 %v3521_v18  ;;  %2664 = vmatpush1.bf16.msra.mxu1 %v3524_v19  ;;  %v3614_v18 = vld [vmem:[%s4254_s9 + $0x7e8] ss:$16 sps:$4 sm:$0xff]   ;;  %v2888_v19 = vcombine.low %v4483_v2, %v4488_v17 }
 0x160   : > { %2493 = vmatprep.subr.bf16.mxu0 %v3529_v15  ;;  %2665 = vmatprep.subr.bf16.mxu1 %v3532_v16  ;;  %v1022_v15 = vlaneseq }
 0x161   : > { %2523 = vmatprep.mubr.bf16.mxu0 %v2889_v20  ;;  %2695 = vmatprep.mubr.bf16.mxu1 %v2889_v20 }
 0x162   : > { %v1023_v16 = vshrl.u32 %v1022_v15, 7 }
 0x163   : > { %2494 = vmatpush1.bf16.msra.mxu0 %v3527_v21  ;;  %2666 = vmatpush1.bf16.msra.mxu1 %v3530_v22  ;;  %v1020_v22 = vld [vmem:[%s752_s7] sm:$0xf] }
 0x164   : > { %2495 = vmatprep.subr.bf16.mxu0 %v3535_v23  ;;  %2667 = vmatprep.subr.bf16.mxu1 %v3538_v24  ;;  %v1024_v20 = vsub.s32 0, %v1023_v16  ;;  %v1032_v21 = vsub.s32 2, %v1023_v16  ;;  %v1028_v23 = vsub.s32 1, %v1023_v16  ;;  %v1036_v24 = vsub.s32 3, %v1023_v16 }
 0x166   : > { %v1025_v2 = vrot.slane %v1020_v22, %v1024_v20  ;;  %v1033_v17 = vrot.slane %v1020_v22, %v1032_v21 }
 0x167   : > { %2496 = vmatpush1.bf16.msra.mxu0 %v3533_v25  ;;  %2668 = vmatpush1.bf16.msra.mxu1 %v3536_v26  ;;  %v1029_v25 = vrot.slane %v1020_v22, %v1028_v23  ;;  %v1037_v26 = vrot.slane %v1020_v22, %v1036_v24 }
 0x168   : > { %2497 = vmatprep.subr.bf16.mxu0 %v3541_v27  ;;  %2669 = vmatprep.subr.bf16.mxu1 %v3544_v28 }
 0x16b   : > { %2498 = vmatpush1.bf16.msra.mxu0 %v3539_v29  ;;  %2670 = vmatpush1.bf16.msra.mxu1 %v3542_v30 }
 0x16c   : > { %2499 = vmatprep.subr.bf16.mxu0 %v3547_v31  ;;  %2671 = vmatprep.subr.bf16.mxu1 %v3550_v32 }
 0x16f   : > { %2500 = vmatpush1.bf16.msra.mxu0 %v3545_v33  ;;  %2672 = vmatpush1.bf16.msra.mxu1 %v3548_v34 }
 0x170   : > { %2501 = vmatprep.subr.bf16.mxu0 %v3553_v35  ;;  %2673 = vmatprep.subr.bf16.mxu1 %v3556_v36 }
 0x173   : > { %2502 = vmatpush1.bf16.msra.mxu0 %v3551_v37  ;;  %2674 = vmatpush1.bf16.msra.mxu1 %v3554_v38 }
 0x174   : > { %2503 = vmatprep.subr.bf16.mxu0 %v3559_v39  ;;  %2675 = vmatprep.subr.bf16.mxu1 %v3562_v40 }
 0x177   : > { %2504 = vmatpush1.bf16.msra.mxu0 %v3557_v41  ;;  %2676 = vmatpush1.bf16.msra.mxu1 %v3560_v42 }
 0x178   : > { %2505 = vmatprep.subr.bf16.mxu0 %v3565_v43  ;;  %2677 = vmatprep.subr.bf16.mxu1 %v3568_v44 }
 0x17b   : > { %2506 = vmatpush1.bf16.msra.mxu0 %v3563_v45  ;;  %2678 = vmatpush1.bf16.msra.mxu1 %v3566_v46 }
 0x17c   : > { %2507 = vmatprep.subr.bf16.mxu0 %v3571_v47  ;;  %2679 = vmatprep.subr.bf16.mxu1 %v3574_v48 }
 0x17f   : > { %2508 = vmatpush1.bf16.msra.mxu0 %v3569_v49  ;;  %2680 = vmatpush1.bf16.msra.mxu1 %v3572_v50 }
 0x180   : > { %2509 = vmatprep.subr.bf16.mxu0 %v3577_v51  ;;  %2681 = vmatprep.subr.bf16.mxu1 %v3580_v52 }
 0x183   : > { %2510 = vmatpush1.bf16.msra.mxu0 %v3575_v53  ;;  %2682 = vmatpush1.bf16.msra.mxu1 %v3578_v54 }
 0x184   : > { %2511 = vmatprep.subr.bf16.mxu0 %v3583_v55  ;;  %2683 = vmatprep.subr.bf16.mxu1 %v3586_v56 }
 0x187   : > { %2512 = vmatpush1.bf16.msra.mxu0 %v3581_v57  ;;  %2684 = vmatpush1.bf16.msra.mxu1 %v3584_v58 }
 0x188   : > { %2513 = vmatprep.subr.bf16.mxu0 %v3589_v59  ;;  %2685 = vmatprep.subr.bf16.mxu1 %v3592_v60 }
 0x18b   : > { %2514 = vmatpush1.bf16.msra.mxu0 %v3587_v61  ;;  %2686 = vmatpush1.bf16.msra.mxu1 %v3590_v62 }
 0x18c   : > { %2515 = vmatprep.subr.bf16.mxu0 %v3595_v63  ;;  %2687 = vmatprep.subr.bf16.mxu1 %v3598_v0 }
 0x18f   : > { %2516 = vmatpush1.bf16.msra.mxu0 %v3593_v1  ;;  %2688 = vmatpush1.bf16.msra.mxu1 %v3596_v3 }
 0x190   : > { %2517 = vmatprep.subr.bf16.mxu0 %v3601_v4  ;;  %2689 = vmatprep.subr.bf16.mxu1 %v3604_v5 }
 0x193   : > { %2518 = vmatpush1.bf16.msra.mxu0 %v3599_v6  ;;  %2690 = vmatpush1.bf16.msra.mxu1 %v3602_v7 }
 0x194   : > { %2519 = vmatprep.subr.bf16.mxu0 %v3607_v8  ;;  %2691 = vmatprep.subr.bf16.mxu1 %v3610_v9 }
 0x197   : > { %2520 = vmatpush1.bf16.msra.mxu0 %v3605_v10  ;;  %2692 = vmatpush1.bf16.msra.mxu1 %v3608_v11 }
 0x198   : > { %2521 = vmatprep.subr.bf16.mxu0 %v3613_v12  ;;  %2693 = vmatprep.subr.bf16.mxu1 %v3616_v13 }
 0x19b   : > { %2522 = vmatpush1.bf16.msra.mxu0 %v3611_v14  ;;  %2694 = vmatpush1.bf16.msra.mxu1 %v3614_v18 }
 0x19e   : > { %2524 = vmatmul.mubr.bf16.vlgmr.msra.gmra.mrb[0].mxu0 %v2888_v19  ;;  %2696 = vmatmul.mubr.bf16.vlgmr.msra.gmra.mrb[0].mxu1 %v2888_v19 }
 0x271   : > { %v2525_v27 = vpop.f32.mrb[0].mxu0  ;;  %v2697_v28 = vpop.f32.mrb[0].mxu1 }
 0x272   : > { %v3161_v29 = vadd.f32 %v2525_v27, %v1025_v2  ;;  %v3165_v30 = vadd.f32 %v2697_v28, %v1033_v17  ;;  %v2527_v31 = vpop.f32.mrb[1].mxu0  ;;  %v2699_v32 = vpop.f32.mrb[1].mxu1 }
 0x273   : > { %v3162_v33 = vadd.f32 %v2527_v31, %v1029_v25  ;;  %v3166_v34 = vadd.f32 %v2699_v32, %v1037_v26  ;;  %v2529_v35 = vpop.f32.mrb[2].mxu0  ;;  %v2701_v36 = vpop.f32.mrb[2].mxu1 }
 0x274   : > { %v2706_v37 = vmax.f32 %v3161_v29, 0.0  ;;  %v2708_v38 = vmax.f32 %v3165_v30, 0.0  ;;  %v3163_v39 = vadd.f32 %v2529_v35, %v1025_v2  ;;  %v3167_v40 = vadd.f32 %v2701_v36, %v1033_v17  ;;  %v2531_v41 = vpop.f32.mrb[3].mxu0  ;;  %v2703_v42 = vpop.f32.mrb[3].mxu1 }
 0x275   : > { %v2707_v43 = vmax.f32 %v3162_v33, 0.0  ;;  %v2709_v44 = vmax.f32 %v3166_v34, 0.0  ;;  %v3164_v45 = vadd.f32 %v2531_v41, %v1029_v25  ;;  %v3168_v46 = vadd.f32 %v2703_v42, %v1037_v26  ;;  %2748 = sbr.rel (!%p3712_p6) target bundleno = 644 (0x284), region = 59 }
 0x276   : > { %v2710_v47 = vmax.f32 %v3163_v39, 0.0  ;;  %v2712_v48 = vmax.f32 %v3167_v40, 0.0 }
 0x277   : > { %v3156_v49 = vpack.c.bf16 %v2707_v43, %v2706_v37  ;;  %v3157_v50 = vpack.c.bf16 %v2709_v44, %v2708_v38  ;;  %v2711_v51 = vmax.f32 %v3164_v45, 0.0  ;;  %v2713_v52 = vmax.f32 %v3168_v46, 0.0 }
 0x279   : > { %2738 = vst [vmem:[%s740_s12] sm:$0xff] %v3156_v49  ;;  %2739 = vst [vmem:[%s740_s12 + $0x8] sm:$0xff] %v3157_v50  ;;  %v3158_v53 = vpack.c.bf16 %v2711_v51, %v2710_v47  ;;  %v3159_v54 = vpack.c.bf16 %v2713_v52, %v2712_v48 }
 0x27b   : > { %2740 = vst [vmem:[%s740_s12 + $0x10] sm:$0xff] %v3158_v53  ;;  %2741 = vst [vmem:[%s740_s12 + $0x18] sm:$0xff] %v3159_v54 }
 0x280   : > { %v2767_v55 = vld [vmem:[%s740_s12] sm:$0xff]  ;;  %v2769_v56 = vld [vmem:[%s740_s12 + $0x8] sm:$0xff] }
 0x281   : > { %2768 = vst [vmem:[%s2754_s11] sm:$0xff] %v2767_v55  ;;  %2770 = vst [vmem:[%s2754_s11 + $0x8] sm:$0xff] %v2769_v56 }
 0x282   : > { %v2771_v57 = vld [vmem:[%s740_s12 + $0x10] sm:$0xff]  ;;  %v2773_v58 = vld [vmem:[%s740_s12 + $0x18] sm:$0xff] }
 0x283   : > { %2772 = vst [vmem:[%s2754_s11 + $0x70] sm:$0xff] %v2771_v57  ;;  %2774 = vst [vmem:[%s2754_s11 + $0x78] sm:$0xff] %v2773_v58 }
 0x284 PF: > { %s13_s16 = sadd.s32 1, %s3655_s16   ;;  %s4588_s12 = smov %s3643_s13 }
 0x285   : > { %p10_p12 = scmp.ge.s32.totalorder %s13_s16, 9   ;;  %s4589_s13 = smov %s3717_s22 }
 0x286   : > { %s4590_s14 = smov %s3651_s15  ;;  %s4591_s15 = smov %s4593_s17 }
 0x287   :  { %12 = sbr.rel (!%p10_p12) target bundleno = 3 (0x3), region = 119 }

// kernel: tile.28
= control target key start
LH: loop header
LB: loop body
LE: loop exit
PB: predicated region body
PF: predicated region fallthrough
CT: control target
= control target key end

     0   :  { %s22_s0 = inlined_call_operand.vmem [shape: f32[64], index: 0, kind: input, shape index: {}]   ;;  %s23_s1 = inlined_call_operand.vmem [shape: f32[4,64], index: 1, kind: output, shape index: {}]  }
   0x1   :  { %v4_v0 = vld [vmem:[%s22_s0] ss:$0 sm:$0xff] }
   0x2   :  { %5 = vst [vmem:[%s23_s1] sm:$0xf] %v4_v0 }

// kernel: tile.29
= control target key start
LH: loop header
LB: loop body
LE: loop exit
PB: predicated region body
PF: predicated region fallthrough
CT: control target
= control target key end

     0   :  { %s6_s8 = smov 3  ;;  %vm8_vm0 = vcmask 523264   ;;  %s30_s9 = smov 64   ;;  %vm15_vm1 = vcmask 1048064   ;;  %s50_s0 = inlined_call_operand.vmem [shape: f32[4,64], index: 0, kind: input, shape index: {}]   ;;  %s51_s1 = inlined_call_operand.vmem [shape: f32[1,256], index: 1, kind: output, shape index: {}]  }
   0x1   :  { %v4_v0 = vld [vmem:[%s50_s0] sm:$0xf]  ;;  %s11_s0 = smov 3 }
   0x2   :  { %5 = vst [vmem:[#allocation1] sm:$0xf] %v4_v0 }
   0x9   :  { %v12_v1 = vld [vmem:[#allocation1 + $0x1] ss:$2 sm:%s11_s0]   ;;  %v7_v2 = vld [vmem:[#allocation1] ss:$2 sm:%s6_s8]  }
   0xa   :  { %13 = vrot.lane.b32.xlu0 %v12_v1, %s30_s9  ;;  %9 = vst.msk [vmem:[#allocation0] ss:$8 sm:$0x3] %vm8_vm0, %v7_v2  }
  0x7c   :  { %v14_v3 = vpop.permute.xlu0 %13  }
  0x7d   :  { %16 = vst.msk [vmem:[#allocation0] ss:$8 sm:$0x3] %vm15_vm1, %v14_v3  }
  0x84   :  { %v20_v4 = vld [vmem:[#allocation0] sm:$0x1]  ;;  %v24_v5 = vld [vmem:[#allocation0 + $0x8] sm:$0x1] }
  0x85   :  { %22 = vst [vmem:[%s51_s1] sm:$0x1] %v20_v4  ;;  %28 = vst [vmem:[%s51_s1 + $0x1] sm:$0x1] %v24_v5 }

// kernel: vae_forward.17
= control target key start
LH: loop header
LB: loop body
LE: loop exit
PB: predicated region body
PF: predicated region fallthrough
CT: control target
= control target key end

     0   :  { %s3574_s1 = inlined_call_operand.vmem [shape: bf16[1152,256], index: 1, kind: input, shape index: {}]   ;;  %s3575_s0 = inlined_call_operand.vmem [shape: bf16[112,1152], index: 0, kind: input, shape index: {}]   ;;  %s3576_s2 = inlined_call_operand.vmem [shape: f32[1,256], index: 2, kind: input, shape index: {}]   ;;  %s3577_s3 = inlined_call_operand.vmem [shape: bf16[112,256], index: 3, kind: output, shape index: {}]  }
   0x1   :  { %v2336_v0 = vld [vmem:[%s3574_s1 + $0x4] ss:$8 sps:$4 sm:$0xff]   ;;  %v2340_v2 = vld [vmem:[%s3574_s1] ss:$8 sps:$4 sm:$0xff]   ;;  %v2342_v4 = vld [vmem:[%s3574_s1 + $0x14] ss:$8 sps:$4 sm:$0xff]  }
   0x2   :  { %v2338_v1 = vld [vmem:[%s3574_s1 + $0x204] ss:$8 sps:$4 sm:$0xff]   ;;  %1283 = vmatprep.subr.bf16.mxu1 %v2336_v0  ;;  %v2341_v3 = vld [vmem:[%s3574_s1 + $0x200] ss:$8 sps:$4 sm:$0xff]   ;;  %v2344_v5 = vld [vmem:[%s3574_s1 + $0x214] ss:$8 sps:$4 sm:$0xff]  }
   0x3   :  { %1489 = vmatprep.subr.bf16.mxu0 %v2338_v1  ;;  %1284 = vmatpush1.bf16.msra.mxu1 %v2340_v2  ;;  %v2346_v6 = vld [vmem:[%s3574_s1 + $0x10] ss:$8 sps:$4 sm:$0xff]   ;;  %v2348_v8 = vld [vmem:[%s3574_s1 + $0x24] ss:$8 sps:$4 sm:$0xff]   ;;  %v2352_v10 = vld [vmem:[%s3574_s1 + $0x20] ss:$8 sps:$4 sm:$0xff]  }
   0x4   :  { %1490 = vmatpush1.bf16.msra.mxu0 %v2341_v3  ;;  %1285 = vmatprep.subr.bf16.mxu1 %v2342_v4  ;;  %v2347_v7 = vld [vmem:[%s3574_s1 + $0x210] ss:$8 sps:$4 sm:$0xff]   ;;  %v2350_v9 = vld [vmem:[%s3574_s1 + $0x224] ss:$8 sps:$4 sm:$0xff]   ;;  %v2353_v11 = vld [vmem:[%s3574_s1 + $0x220] ss:$8 sps:$4 sm:$0xff]  }
   0x5   :  { %1491 = vmatprep.subr.bf16.mxu0 %v2344_v5  ;;  %v2354_v12 = vld [vmem:[%s3574_s1 + $0x34] ss:$8 sps:$4 sm:$0xff]   ;;  %v2358_v14 = vld [vmem:[%s3574_s1 + $0x30] ss:$8 sps:$4 sm:$0xff]   ;;  %v2360_v16 = vld [vmem:[%s3574_s1 + $0x44] ss:$8 sps:$4 sm:$0xff]  }
   0x6   :  { %v2356_v13 = vld [vmem:[%s3574_s1 + $0x234] ss:$8 sps:$4 sm:$0xff]   ;;  %v2359_v15 = vld [vmem:[%s3574_s1 + $0x230] ss:$8 sps:$4 sm:$0xff]   ;;  %v2362_v17 = vld [vmem:[%s3574_s1 + $0x244] ss:$8 sps:$4 sm:$0xff]  }
   0x7   :  { %1286 = vmatpush1.bf16.msra.mxu1 %v2346_v6  ;;  %v2364_v18 = vld [vmem:[%s3574_s1 + $0x40] ss:$8 sps:$4 sm:$0xff]   ;;  %v2366_v20 = vld [vmem:[%s3574_s1 + $0x54] ss:$8 sps:$4 sm:$0xff]   ;;  %v2370_v22 = vld [vmem:[%s3574_s1 + $0x50] ss:$8 sps:$4 sm:$0xff]  }
   0x8   :  { %1492 = vmatpush1.bf16.msra.mxu0 %v2347_v7  ;;  %1287 = vmatprep.subr.bf16.mxu1 %v2348_v8  ;;  %v2365_v19 = vld [vmem:[%s3574_s1 + $0x240] ss:$8 sps:$4 sm:$0xff]   ;;  %v2368_v21 = vld [vmem:[%s3574_s1 + $0x254] ss:$8 sps:$4 sm:$0xff]   ;;  %v2371_v23 = vld [vmem:[%s3574_s1 + $0x250] ss:$8 sps:$4 sm:$0xff]  }
   0x9   :  { %1493 = vmatprep.subr.bf16.mxu0 %v2350_v9  ;;  %v2372_v24 = vld [vmem:[%s3574_s1 + $0x64] ss:$8 sps:$4 sm:$0xff]   ;;  %v2376_v26 = vld [vmem:[%s3574_s1 + $0x60] ss:$8 sps:$4 sm:$0xff]   ;;  %v2378_v28 = vld [vmem:[%s3574_s1 + $0x74] ss:$8 sps:$4 sm:$0xff]  }
   0xa   :  { %v2374_v25 = vld [vmem:[%s3574_s1 + $0x264] ss:$8 sps:$4 sm:$0xff]   ;;  %v2377_v27 = vld [vmem:[%s3574_s1 + $0x260] ss:$8 sps:$4 sm:$0xff]   ;;  %v2380_v29 = vld [vmem:[%s3574_s1 + $0x274] ss:$8 sps:$4 sm:$0xff]  }
   0xb   :  { %1288 = vmatpush1.bf16.msra.mxu1 %v2352_v10  ;;  %v2382_v30 = vld [vmem:[%s3574_s1 + $0x70] ss:$8 sps:$4 sm:$0xff]   ;;  %v2384_v32 = vld [vmem:[%s3574_s1 + $0x84] ss:$8 sps:$4 sm:$0xff]   ;;  %v2388_v34 = vld [vmem:[%s3574_s1 + $0x80] ss:$8 sps:$4 sm:$0xff]  }
   0xc   :  { %1494 = vmatpush1.bf16.msra.mxu0 %v2353_v11  ;;  %1289 = vmatprep.subr.bf16.mxu1 %v2354_v12  ;;  %v2383_v31 = vld [vmem:[%s3574_s1 + $0x270] ss:$8 sps:$4 sm:$0xff]   ;;  %v2386_v33 = vld [vmem:[%s3574_s1 + $0x284] ss:$8 sps:$4 sm:$0xff]   ;;  %v2389_v35 = vld [vmem:[%s3574_s1 + $0x280] ss:$8 sps:$4 sm:$0xff]  }
   0xd   :  { %1495 = vmatprep.subr.bf16.mxu0 %v2356_v13  ;;  %v2390_v36 = vld [vmem:[%s3574_s1 + $0x94] ss:$8 sps:$4 sm:$0xff]   ;;  %v2394_v38 = vld [vmem:[%s3574_s1 + $0x90] ss:$8 sps:$4 sm:$0xff]   ;;  %v2396_v40 = vld [vmem:[%s3574_s1 + $0xa4] ss:$8 sps:$4 sm:$0xff]  }
   0xe   :  { %v2392_v37 = vld [vmem:[%s3574_s1 + $0x294] ss:$8 sps:$4 sm:$0xff]   ;;  %v2395_v39 = vld [vmem:[%s3574_s1 + $0x290] ss:$8 sps:$4 sm:$0xff]   ;;  %v2398_v41 = vld [vmem:[%s3574_s1 + $0x2a4] ss:$8 sps:$4 sm:$0xff]  }
   0xf   :  { %1290 = vmatpush1.bf16.msra.mxu1 %v2358_v14  ;;  %v2400_v42 = vld [vmem:[%s3574_s1 + $0xa0] ss:$8 sps:$4 sm:$0xff]   ;;  %v2402_v44 = vld [vmem:[%s3574_s1 + $0xb4] ss:$8 sps:$4 sm:$0xff]   ;;  %v2406_v46 = vld [vmem:[%s3574_s1 + $0xb0] ss:$8 sps:$4 sm:$0xff]  }
  0x10   :  { %1496 = vmatpush1.bf16.msra.mxu0 %v2359_v15  ;;  %1291 = vmatprep.subr.bf16.mxu1 %v2360_v16  ;;  %v2401_v43 = vld [vmem:[%s3574_s1 + $0x2a0] ss:$8 sps:$4 sm:$0xff]   ;;  %v2404_v45 = vld [vmem:[%s3574_s1 + $0x2b4] ss:$8 sps:$4 sm:$0xff]   ;;  %v2407_v47 = vld [vmem:[%s3574_s1 + $0x2b0] ss:$8 sps:$4 sm:$0xff]  }
  0x11   :  { %1497 = vmatprep.subr.bf16.mxu0 %v2362_v17  ;;  %v2434_v48 = vld [vmem:[%s3575_s0 + $0x4] ss:$36 sps:$4 sm:$0xff]   ;;  %v2440_v51 = vld [vmem:[%s3575_s0 + $0x14] ss:$36 sps:$4 sm:$0xff]   ;;  %v2462_v10 = vld [vmem:[%s3575_s0 + $0x5c] ss:$36 sps:$4 sm:$0xff]  }
  0x12   :  { %v2408_v49 = vld [vmem:[%s3574_s1 + $0xc4] ss:$8 sps:$4 sm:$0xff]   ;;  %1315 = vmatprep.mubr.bf16.mxu1 %v2434_v48  ;;  %v2412_v52 = vld [vmem:[%s3574_s1 + $0xc0] ss:$8 sps:$4 sm:$0xff]   ;;  %v2414_v54 = vld [vmem:[%s3574_s1 + $0xd4] ss:$8 sps:$4 sm:$0xff]   ;;  %1521 = vmatprep.mubr.bf16.mxu0 %v2440_v51 }
  0x13   :  { %1292 = vmatpush1.bf16.msra.mxu1 %v2364_v18  ;;  %v2410_v50 = vld [vmem:[%s3574_s1 + $0x2c4] ss:$8 sps:$4 sm:$0xff]   ;;  %v2413_v53 = vld [vmem:[%s3574_s1 + $0x2c0] ss:$8 sps:$4 sm:$0xff]   ;;  %v2416_v55 = vld [vmem:[%s3574_s1 + $0x2d4] ss:$8 sps:$4 sm:$0xff]  }
  0x14   :  { %1498 = vmatpush1.bf16.msra.mxu0 %v2365_v19  ;;  %1293 = vmatprep.subr.bf16.mxu1 %v2366_v20  ;;  %v2418_v56 = vld [vmem:[%s3574_s1 + $0xd0] ss:$8 sps:$4 sm:$0xff]   ;;  %v2420_v58 = vld [vmem:[%s3574_s1 + $0xe4] ss:$8 sps:$4 sm:$0xff]   ;;  %v2424_v60 = vld [vmem:[%s3574_s1 + $0xe0] ss:$8 sps:$4 sm:$0xff]  }
  0x15   :  { %1499 = vmatprep.subr.bf16.mxu0 %v2368_v21  ;;  %v2419_v57 = vld [vmem:[%s3574_s1 + $0x2d0] ss:$8 sps:$4 sm:$0xff]   ;;  %v2422_v59 = vld [vmem:[%s3574_s1 + $0x2e4] ss:$8 sps:$4 sm:$0xff]   ;;  %v2425_v61 = vld [vmem:[%s3574_s1 + $0x2e0] ss:$8 sps:$4 sm:$0xff]  }
  0x16   :  { %v2426_v62 = vld [vmem:[%s3574_s1 + $0xf4] ss:$8 sps:$4 sm:$0xff]   ;;  %v2430_v0 = vld [vmem:[%s3574_s1 + $0xf0] ss:$8 sps:$4 sm:$0xff]   ;;  %v2437_v2 = vld [vmem:[%s3574_s1 + $0x104] ss:$8 sps:$4 sm:$0xff]  }
  0x17   :  { %1294 = vmatpush1.bf16.msra.mxu1 %v2370_v22  ;;  %v2428_v63 = vld [vmem:[%s3574_s1 + $0x2f4] ss:$8 sps:$4 sm:$0xff]   ;;  %v2431_v1 = vld [vmem:[%s3574_s1 + $0x2f0] ss:$8 sps:$4 sm:$0xff]   ;;  %v2868_v3 = vld [vmem:[%s3574_s1 + $0x304] ss:$8 sps:$4 sm:$0xff]  }
  0x18   :  { %1500 = vmatpush1.bf16.msra.mxu0 %v2371_v23  ;;  %1295 = vmatprep.subr.bf16.mxu1 %v2372_v24  ;;  %v2432_v4 = vld [vmem:[%s3575_s0] ss:$36 sps:$4 sm:$0xff]   ;;  %v2438_v6 = vld [vmem:[%s3575_s0 + $0x10] ss:$36 sps:$4 sm:$0xff]   ;;  %v2466_v18 = vld [vmem:[%s3575_s0 + $0x58] ss:$36 sps:$4 sm:$0xff]  }
  0x19   :  { %1501 = vmatprep.subr.bf16.mxu0 %v2374_v25  ;;  %v2435_v5 = vld [vmem:[%s3574_s1 + $0x100] ss:$8 sps:$4 sm:$0xff]   ;;  %v2446_v8 = vld [vmem:[%s3574_s1 + $0x114] ss:$8 sps:$4 sm:$0xff]   ;;  %v2464_v11 = vld [vmem:[%s3575_s0 + $0x4c] ss:$36 sps:$4 sm:$0xff]  }
  0x1a   :  { %v2882_v7 = vld [vmem:[%s3574_s1 + $0x300] ss:$8 sps:$4 sm:$0xff]   ;;  %v2891_v9 = vld [vmem:[%s3574_s1 + $0x314] ss:$8 sps:$4 sm:$0xff]   ;;  %v2444_v12 = vld [vmem:[%s3574_s1 + $0x110] ss:$8 sps:$4 sm:$0xff]  }
  0x1b   :  { %1296 = vmatpush1.bf16.msra.mxu1 %v2376_v26  ;;  %v2905_v13 = vld [vmem:[%s3574_s1 + $0x310] ss:$8 sps:$4 sm:$0xff]   ;;  %v2452_v14 = vld [vmem:[%s3574_s1 + $0x124] ss:$8 sps:$4 sm:$0xff]   ;;  %v2450_v16 = vld [vmem:[%s3574_s1 + $0x120] ss:$8 sps:$4 sm:$0xff]  }
  0x1c   :  { %1502 = vmatpush1.bf16.msra.mxu0 %v2377_v27  ;;  %1297 = vmatprep.subr.bf16.mxu1 %v2378_v28  ;;  %v2915_v15 = vld [vmem:[%s3574_s1 + $0x324] ss:$8 sps:$4 sm:$0xff]   ;;  %v2923_v17 = vld [vmem:[%s3574_s1 + $0x320] ss:$8 sps:$4 sm:$0xff]   ;;  %v2458_v20 = vld [vmem:[%s3574_s1 + $0x134] ss:$8 sps:$4 sm:$0xff]  }
  0x1d   :  { %1503 = vmatprep.subr.bf16.mxu0 %v2380_v29  ;;  %v2467_v19 = vld [vmem:[%s3575_s0 + $0x48] ss:$36 sps:$4 sm:$0xff]   ;;  %v2939_v21 = vld [vmem:[%s3574_s1 + $0x334] ss:$8 sps:$4 sm:$0xff]   ;;  %v2456_v24 = vld [vmem:[%s3574_s1 + $0x130] ss:$8 sps:$4 sm:$0xff]  }
  0x1e   :  { %v2480_v22 = vld [vmem:[%s3575_s0 + $0xa4] ss:$36 sps:$4 sm:$0xff]   ;;  %v2482_v23 = vld [vmem:[%s3575_s0 + $0x94] ss:$36 sps:$4 sm:$0xff]  }
  0x1f   :  { %1298 = vmatpush1.bf16.msra.mxu1 %v2382_v30  ;;  %v2953_v25 = vld [vmem:[%s3574_s1 + $0x330] ss:$8 sps:$4 sm:$0xff]   ;;  %v2470_v26 = vld [vmem:[%s3574_s1 + $0x144] ss:$8 sps:$4 sm:$0xff]   ;;  %v2468_v28 = vld [vmem:[%s3574_s1 + $0x140] ss:$8 sps:$4 sm:$0xff]  }
  0x20   :  { %1504 = vmatpush1.bf16.msra.mxu0 %v2383_v31  ;;  %1299 = vmatprep.subr.bf16.mxu1 %v2384_v32  ;;  %v2963_v27 = vld [vmem:[%s3574_s1 + $0x344] ss:$8 sps:$4 sm:$0xff]   ;;  %v2971_v29 = vld [vmem:[%s3574_s1 + $0x340] ss:$8 sps:$4 sm:$0xff]   ;;  %v2485_v31 = vld [vmem:[%s3575_s0 + $0x90] ss:$36 sps:$4 sm:$0xff]  }
  0x21   :  { %1505 = vmatprep.subr.bf16.mxu0 %v2386_v33  ;;  %v2484_v30 = vld [vmem:[%s3575_s0 + $0xa0] ss:$36 sps:$4 sm:$0xff]   ;;  %v2476_v32 = vld [vmem:[%s3574_s1 + $0x154] ss:$8 sps:$4 sm:$0xff]   ;;  %v2492_v48 = vld [vmem:[%s3574_s1 + $0x170] ss:$8 sps:$4 sm:$0xff]  }
  0x22   :  { %v2987_v33 = vld [vmem:[%s3574_s1 + $0x354] ss:$8 sps:$4 sm:$0xff]   ;;  %v3059_v51 = vld [vmem:[%s3574_s1 + $0x384] ss:$8 sps:$4 sm:$0xff]  }
  0x23   :  { %1300 = vmatpush1.bf16.msra.mxu1 %v2388_v34  ;;  %v2498_v34 = vld [vmem:[%s3575_s0 + $0xec] ss:$36 sps:$4 sm:$0xff]  }
  0x24   :  { %1506 = vmatpush1.bf16.msra.mxu0 %v2389_v35  ;;  %1301 = vmatprep.subr.bf16.mxu1 %v2390_v36  ;;  %v2500_v35 = vld [vmem:[%s3575_s0 + $0xdc] ss:$36 sps:$4 sm:$0xff]   ;;  %v2474_v36 = vld [vmem:[%s3574_s1 + $0x150] ss:$8 sps:$4 sm:$0xff]  }
  0x25   :  { %1507 = vmatprep.subr.bf16.mxu0 %v2392_v37  ;;  %v3001_v37 = vld [vmem:[%s3574_s1 + $0x350] ss:$8 sps:$4 sm:$0xff]  }
  0x27   :  { %1302 = vmatpush1.bf16.msra.mxu1 %v2394_v38  ;;  %v2488_v38 = vld [vmem:[%s3574_s1 + $0x164] ss:$8 sps:$4 sm:$0xff]  }
  0x28   :  { %1508 = vmatpush1.bf16.msra.mxu0 %v2395_v39  ;;  %1303 = vmatprep.subr.bf16.mxu1 %v2396_v40  ;;  %v3011_v39 = vld [vmem:[%s3574_s1 + $0x364] ss:$8 sps:$4 sm:$0xff]   ;;  %v2486_v40 = vld [vmem:[%s3574_s1 + $0x160] ss:$8 sps:$4 sm:$0xff]  }
  0x29   :  { %1509 = vmatprep.subr.bf16.mxu0 %v2398_v41  ;;  %v3019_v41 = vld [vmem:[%s3574_s1 + $0x360] ss:$8 sps:$4 sm:$0xff]  }
  0x2b   :  { %1304 = vmatpush1.bf16.msra.mxu1 %v2400_v42  ;;  %v2502_v42 = vld [vmem:[%s3575_s0 + $0xe8] ss:$36 sps:$4 sm:$0xff]  }
  0x2c   :  { %1510 = vmatpush1.bf16.msra.mxu0 %v2401_v43  ;;  %1305 = vmatprep.subr.bf16.mxu1 %v2402_v44  ;;  %v2503_v43 = vld [vmem:[%s3575_s0 + $0xd8] ss:$36 sps:$4 sm:$0xff]  }
  0x2d   :  { %1511 = vmatprep.subr.bf16.mxu0 %v2404_v45  ;;  %v2494_v44 = vld [vmem:[%s3574_s1 + $0x174] ss:$8 sps:$4 sm:$0xff]  }
  0x2e   :  { %v3035_v45 = vld [vmem:[%s3574_s1 + $0x374] ss:$8 sps:$4 sm:$0xff]  }
  0x2f   :  { %1306 = vmatpush1.bf16.msra.mxu1 %v2406_v46  ;;  %v2516_v46 = vld [vmem:[%s3575_s0 + $0x134] ss:$36 sps:$4 sm:$0xff]  }
  0x30   :  { %1512 = vmatpush1.bf16.msra.mxu0 %v2407_v47  ;;  %1307 = vmatprep.subr.bf16.mxu1 %v2408_v49  ;;  %v2518_v47 = vld [vmem:[%s3575_s0 + $0x124] ss:$36 sps:$4 sm:$0xff]   ;;  %v3049_v49 = vld [vmem:[%s3574_s1 + $0x370] ss:$8 sps:$4 sm:$0xff]  }
  0x31   :  { %1513 = vmatprep.subr.bf16.mxu0 %v2410_v50  ;;  %v2506_v50 = vld [vmem:[%s3574_s1 + $0x184] ss:$8 sps:$4 sm:$0xff]  }
  0x33   :  { %1308 = vmatpush1.bf16.msra.mxu1 %v2412_v52  ;;  %v2504_v52 = vld [vmem:[%s3574_s1 + $0x180] ss:$8 sps:$4 sm:$0xff]  }
  0x34   :  { %1514 = vmatpush1.bf16.msra.mxu0 %v2413_v53  ;;  %1309 = vmatprep.subr.bf16.mxu1 %v2414_v54  ;;  %v3067_v53 = vld [vmem:[%s3574_s1 + $0x380] ss:$8 sps:$4 sm:$0xff]   ;;  %v2520_v54 = vld [vmem:[%s3575_s0 + $0x130] ss:$36 sps:$4 sm:$0xff]  }
  0x35   :  { %1515 = vmatprep.subr.bf16.mxu0 %v2416_v55  ;;  %v2521_v55 = vld [vmem:[%s3575_s0 + $0x120] ss:$36 sps:$4 sm:$0xff]  }
  0x37   :  { %1310 = vmatpush1.bf16.msra.mxu1 %v2418_v56  ;;  %v2512_v56 = vld [vmem:[%s3574_s1 + $0x194] ss:$8 sps:$4 sm:$0xff]  }
  0x38   :  { %1516 = vmatpush1.bf16.msra.mxu0 %v2419_v57  ;;  %1311 = vmatprep.subr.bf16.mxu1 %v2420_v58  ;;  %v3083_v57 = vld [vmem:[%s3574_s1 + $0x394] ss:$8 sps:$4 sm:$0xff]  }
  0x39   :  { %1517 = vmatprep.subr.bf16.mxu0 %v2422_v59  ;;  %v2534_v58 = vld [vmem:[%s3575_s0 + $0x17c] ss:$36 sps:$4 sm:$0xff]   ;;  %v2536_v59 = vld [vmem:[%s3575_s0 + $0x16c] ss:$36 sps:$4 sm:$0xff]  }
  0x3b   :  { %1312 = vmatpush1.bf16.msra.mxu1 %v2424_v60  ;;  %v2510_v60 = vld [vmem:[%s3574_s1 + $0x190] ss:$8 sps:$4 sm:$0xff]  }
  0x3c   :  { %1518 = vmatpush1.bf16.msra.mxu0 %v2425_v61  ;;  %1313 = vmatprep.subr.bf16.mxu1 %v2426_v62  ;;  %v3097_v61 = vld [vmem:[%s3574_s1 + $0x390] ss:$8 sps:$4 sm:$0xff]   ;;  %v2524_v62 = vld [vmem:[%s3574_s1 + $0x1a4] ss:$8 sps:$4 sm:$0xff]  }
  0x3d   :  { %1519 = vmatprep.subr.bf16.mxu0 %v2428_v63  ;;  %v3107_v63 = vld [vmem:[%s3574_s1 + $0x3a4] ss:$8 sps:$4 sm:$0xff]  }
  0x3f   :  { %1314 = vmatpush1.bf16.msra.mxu1 %v2430_v0  ;;  %v2522_v0 = vld [vmem:[%s3574_s1 + $0x1a0] ss:$8 sps:$4 sm:$0xff]  }
  0x40   :  { %1520 = vmatpush1.bf16.msra.mxu0 %v2431_v1  ;;  %1386 = vmatprep.subr.bf16.mxu1 %v2437_v2  ;;  %v3115_v1 = vld [vmem:[%s3574_s1 + $0x3a0] ss:$8 sps:$4 sm:$0xff]   ;;  %v2538_v2 = vld [vmem:[%s3575_s0 + $0x178] ss:$36 sps:$4 sm:$0xff]  }
  0x41   :  { %1592 = vmatprep.subr.bf16.mxu0 %v2868_v3 }
  0x42   :  { %1316 = vmatmul.mubr.bf16.vlgmr.msra.gmra.mrb[0].mxu1 %v2432_v4  ;;  %v2539_v4 = vld [vmem:[%s3575_s0 + $0x168] ss:$36 sps:$4 sm:$0xff]  }
  0x43   :  { %1522 = vmatmul.mubr.bf16.vlgmr.msra.gmra.mrb[0].mxu0 %v2438_v6  ;;  %1387 = vmatpush1.bf16.msra.mxu1 %v2435_v5  ;;  %v2530_v5 = vld [vmem:[%s3574_s1 + $0x1b4] ss:$8 sps:$4 sm:$0xff]  }
  0x44   :  { %1593 = vmatpush1.bf16.msra.mxu0 %v2882_v7  ;;  %1388 = vmatprep.subr.bf16.mxu1 %v2446_v8  ;;  %v3131_v6 = vld [vmem:[%s3574_s1 + $0x3b4] ss:$8 sps:$4 sm:$0xff]   ;;  %v2552_v8 = vld [vmem:[%s3575_s0 + $0x1c4] ss:$36 sps:$4 sm:$0xff]  }
  0x45   :  { %1594 = vmatprep.subr.bf16.mxu0 %v2891_v9  ;;  %1531 = vmatprep.mubr.bf16.mxu0 %v2462_v10  ;;  %v2554_v10 = vld [vmem:[%s3575_s0 + $0x1b4] ss:$36 sps:$4 sm:$0xff]  }
  0x46   :  { %1325 = vmatprep.mubr.bf16.mxu1 %v2464_v11  ;;  %v2528_v11 = vld [vmem:[%s3574_s1 + $0x1b0] ss:$8 sps:$4 sm:$0xff]  }
  0x47   :  { %1389 = vmatpush1.bf16.msra.mxu1 %v2444_v12  ;;  %v3145_v12 = vld [vmem:[%s3574_s1 + $0x3b0] ss:$8 sps:$4 sm:$0xff]  }
  0x48   :  { %1595 = vmatpush1.bf16.msra.mxu0 %v2905_v13  ;;  %1390 = vmatprep.subr.bf16.mxu1 %v2452_v14  ;;  %v2542_v14 = vld [vmem:[%s3574_s1 + $0x1c4] ss:$8 sps:$4 sm:$0xff]  }
  0x49   :  { %1596 = vmatprep.subr.bf16.mxu0 %v2915_v15 }
  0x4a   :  { %1326 = vmatmul.mubr.bf16.gmra.mrb[4].mxu1 %v2467_v19  ;;  %v3163_v19 = vld [vmem:[%s3574_s1 + $0x3c0] ss:$8 sps:$4 sm:$0xff]  }
  0x4b   :  { %1532 = vmatmul.mubr.bf16.gmra.mrb[4].mxu0 %v2466_v18  ;;  %1391 = vmatpush1.bf16.msra.mxu1 %v2450_v16  ;;  %v3155_v16 = vld [vmem:[%s3574_s1 + $0x3c4] ss:$8 sps:$4 sm:$0xff]   ;;  %v2540_v18 = vld [vmem:[%s3574_s1 + $0x1c0] ss:$8 sps:$4 sm:$0xff]  }
  0x4c   :  { %1597 = vmatpush1.bf16.msra.mxu0 %v2923_v17  ;;  %1392 = vmatprep.subr.bf16.mxu1 %v2458_v20  ;;  %v2556_v20 = vld [vmem:[%s3575_s0 + $0x1c0] ss:$36 sps:$4 sm:$0xff]  }
  0x4d   :  { %1598 = vmatprep.subr.bf16.mxu0 %v2939_v21  ;;  %1541 = vmatprep.mubr.bf16.mxu0 %v2480_v22  ;;  %v2557_v22 = vld [vmem:[%s3575_s0 + $0x1b0] ss:$36 sps:$4 sm:$0xff]  }
  0x4e   :  { %1335 = vmatprep.mubr.bf16.mxu1 %v2482_v23  ;;  %v2548_v23 = vld [vmem:[%s3574_s1 + $0x1d4] ss:$8 sps:$4 sm:$0xff]  }
  0x4f   :  { %1393 = vmatpush1.bf16.msra.mxu1 %v2456_v24  ;;  %v3179_v24 = vld [vmem:[%s3574_s1 + $0x3d4] ss:$8 sps:$4 sm:$0xff]  }
  0x50   :  { %1599 = vmatpush1.bf16.msra.mxu0 %v2953_v25  ;;  %1394 = vmatprep.subr.bf16.mxu1 %v2470_v26  ;;  %v2572_v26 = vld [vmem:[%s3575_s0 + $0xc] ss:$36 sps:$4 sm:$0xff]  }
  0x51   :  { %1600 = vmatprep.subr.bf16.mxu0 %v2963_v27 }
  0x52   :  { %1336 = vmatmul.mubr.bf16.gmra.mrb[8].mxu1 %v2485_v31  ;;  %v3194_v31 = vld [vmem:[%s3574_s1 + $0x3d0] ss:$8 sps:$4 sm:$0xff]  }
  0x53   :  { %1542 = vmatmul.mubr.bf16.gmra.mrb[8].mxu0 %v2484_v30  ;;  %1395 = vmatpush1.bf16.msra.mxu1 %v2468_v28  ;;  %v2575_v28 = vld [vmem:[%s3575_s0 + $0x1c] ss:$36 sps:$4 sm:$0xff]   ;;  %v2546_v30 = vld [vmem:[%s3574_s1 + $0x1d0] ss:$8 sps:$4 sm:$0xff]  }
  0x54   :  { %1601 = vmatpush1.bf16.msra.mxu0 %v2971_v29  ;;  %1396 = vmatprep.subr.bf16.mxu1 %v2476_v32  ;;  %v2560_v32 = vld [vmem:[%s3574_s1 + $0x1e4] ss:$8 sps:$4 sm:$0xff]  }
  0x55   :  { %1602 = vmatprep.subr.bf16.mxu0 %v2987_v33  ;;  %1551 = vmatprep.mubr.bf16.mxu0 %v2498_v34  ;;  %v3203_v34 = vld [vmem:[%s3574_s1 + $0x3e4] ss:$8 sps:$4 sm:$0xff]  }
  0x56   :  { %1345 = vmatprep.mubr.bf16.mxu1 %v2500_v35  ;;  %v2558_v35 = vld [vmem:[%s3574_s1 + $0x1e0] ss:$8 sps:$4 sm:$0xff]  }
  0x57   :  { %1397 = vmatpush1.bf16.msra.mxu1 %v2474_v36  ;;  %v3211_v36 = vld [vmem:[%s3574_s1 + $0x3e0] ss:$8 sps:$4 sm:$0xff]  }
  0x58   :  { %1603 = vmatpush1.bf16.msra.mxu0 %v3001_v37  ;;  %1398 = vmatprep.subr.bf16.mxu1 %v2488_v38  ;;  %v2566_v38 = vld [vmem:[%s3574_s1 + $0x1f4] ss:$8 sps:$4 sm:$0xff]  }
  0x59   :  { %1604 = vmatprep.subr.bf16.mxu0 %v3011_v39 }
  0x5a   :  { %1346 = vmatmul.mubr.bf16.gmra.mrb[12].mxu1 %v2503_v43  ;;  %v3230_v43 = vld [vmem:[%s3574_s1 + $0x3f0] ss:$8 sps:$4 sm:$0xff]  }
  0x5b   :  { %1552 = vmatmul.mubr.bf16.gmra.mrb[12].mxu0 %v2502_v42  ;;  %1399 = vmatpush1.bf16.msra.mxu1 %v2486_v40  ;;  %v3221_v40 = vld [vmem:[%s3574_s1 + $0x3f4] ss:$8 sps:$4 sm:$0xff]   ;;  %v2564_v42 = vld [vmem:[%s3574_s1 + $0x1f0] ss:$8 sps:$4 sm:$0xff]  }
  0x5c   :  { %1605 = vmatpush1.bf16.msra.mxu0 %v3019_v41  ;;  %1400 = vmatprep.subr.bf16.mxu1 %v2494_v44  ;;  %v2578_v44 = vld [vmem:[%s3574_s1 + $0x404] ss:$8 sps:$4 sm:$0xff]  }
  0x5d   :  { %1606 = vmatprep.subr.bf16.mxu0 %v3035_v45  ;;  %1561 = vmatprep.mubr.bf16.mxu0 %v2516_v46  ;;  %v2570_v46 = vld [vmem:[%s3575_s0 + $0x8] ss:$36 sps:$4 sm:$0xff]  }
  0x5e   :  { %1355 = vmatprep.mubr.bf16.mxu1 %v2518_v47  ;;  %v2573_v47 = vld [vmem:[%s3575_s0 + $0x18] ss:$36 sps:$4 sm:$0xff]  }
  0x5f   :  { %1401 = vmatpush1.bf16.msra.mxu1 %v2492_v48  ;;  %v2576_v48 = vld [vmem:[%s3574_s1 + $0x400] ss:$8 sps:$4 sm:$0xff]  }
  0x60   :  { %1607 = vmatpush1.bf16.msra.mxu0 %v3049_v49  ;;  %1402 = vmatprep.subr.bf16.mxu1 %v2506_v50  ;;  %v2581_v50 = vld [vmem:[%s3574_s1 + $0x414] ss:$8 sps:$4 sm:$0xff]  }
  0x61   :  { %1608 = vmatprep.subr.bf16.mxu0 %v3059_v51 }
  0x62   :  { %1356 = vmatmul.mubr.bf16.gmra.mrb[16].mxu1 %v2521_v55  ;;  %v2579_v55 = vld [vmem:[%s3574_s1 + $0x410] ss:$8 sps:$4 sm:$0xff]  }
  0x63   :  { %1562 = vmatmul.mubr.bf16.gmra.mrb[16].mxu0 %v2520_v54  ;;  %1403 = vmatpush1.bf16.msra.mxu1 %v2504_v52  ;;  %v2582_v52 = vld [vmem:[%s3575_s0 + $0x54] ss:$36 sps:$4 sm:$0xff]   ;;  %v2584_v54 = vld [vmem:[%s3575_s0 + $0x64] ss:$36 sps:$4 sm:$0xff]  }
  0x64   :  { %1609 = vmatpush1.bf16.msra.mxu0 %v3067_v53  ;;  %1404 = vmatprep.subr.bf16.mxu1 %v2512_v56  ;;  %v2586_v56 = vld [vmem:[%s3575_s0 + $0x50] ss:$36 sps:$4 sm:$0xff]  }
  0x65   :  { %1610 = vmatprep.subr.bf16.mxu0 %v3083_v57  ;;  %1571 = vmatprep.mubr.bf16.mxu0 %v2534_v58  ;;  %v2593_v58 = vld [vmem:[%s3574_s1 + $0x434] ss:$8 sps:$4 sm:$0xff]  }
  0x66   :  { %1365 = vmatprep.mubr.bf16.mxu1 %v2536_v59  ;;  %v2594_v59 = vld [vmem:[%s3575_s0 + $0x9c] ss:$36 sps:$4 sm:$0xff]  }
  0x67   :  { %1405 = vmatpush1.bf16.msra.mxu1 %v2510_v60  ;;  %v2591_v60 = vld [vmem:[%s3574_s1 + $0x430] ss:$8 sps:$4 sm:$0xff]  }
  0x68   :  { %1611 = vmatpush1.bf16.msra.mxu0 %v3097_v61  ;;  %1406 = vmatprep.subr.bf16.mxu1 %v2524_v62  ;;  %v2598_v62 = vld [vmem:[%s3575_s0 + $0x98] ss:$36 sps:$4 sm:$0xff]  }
  0x69   :  { %1612 = vmatprep.subr.bf16.mxu0 %v3107_v63 }
  0x6a   :  { %1366 = vmatmul.mubr.bf16.gmra.mrb[20].mxu1 %v2539_v4  ;;  %v2614_v4 = vld [vmem:[%s3574_s1 + $0x464] ss:$8 sps:$4 sm:$0xff]  }
  0x6b   :  { %1572 = vmatmul.mubr.bf16.gmra.mrb[20].mxu0 %v2538_v2  ;;  %1407 = vmatpush1.bf16.msra.mxu1 %v2522_v0  ;;  %v2605_v0 = vld [vmem:[%s3574_s1 + $0x454] ss:$8 sps:$4 sm:$0xff]   ;;  %v2606_v2 = vld [vmem:[%s3575_s0 + $0xe4] ss:$36 sps:$4 sm:$0xff]  }
  0x6c   :  { %1613 = vmatpush1.bf16.msra.mxu0 %v3115_v1  ;;  %1408 = vmatprep.subr.bf16.mxu1 %v2530_v5  ;;  %v2610_v5 = vld [vmem:[%s3575_s0 + $0xe0] ss:$36 sps:$4 sm:$0xff]  }
  0x6d   :  { %1614 = vmatprep.subr.bf16.mxu0 %v3131_v6  ;;  %1581 = vmatprep.mubr.bf16.mxu0 %v2552_v8  ;;  %v2617_v8 = vld [vmem:[%s3574_s1 + $0x474] ss:$8 sps:$4 sm:$0xff]  }
  0x6e   :  { %1375 = vmatprep.mubr.bf16.mxu1 %v2554_v10  ;;  %v2618_v10 = vld [vmem:[%s3575_s0 + $0x12c] ss:$36 sps:$4 sm:$0xff]  }
  0x6f   :  { %1409 = vmatpush1.bf16.msra.mxu1 %v2528_v11  ;;  %v2620_v11 = vld [vmem:[%s3575_s0 + $0x128] ss:$36 sps:$4 sm:$0xff]  }
  0x70   :  { %1615 = vmatpush1.bf16.msra.mxu0 %v3145_v12  ;;  %1410 = vmatprep.subr.bf16.mxu1 %v2542_v14  ;;  %v2621_v14 = vld [vmem:[%s3575_s0 + $0x20] ss:$36 sps:$4 sm:$0xff]  }
  0x71   :  { %1616 = vmatprep.subr.bf16.mxu0 %v3155_v16 }
  0x72   :  { %1376 = vmatmul.mubr.bf16.gmra.mrb[24].mxu1 %v2557_v22  ;;  %v2642_v22 = vld [vmem:[%s3575_s0 + $0x1d0] ss:$36 sps:$4 sm:$0xff]  }
  0x73   :  { %1582 = vmatmul.mubr.bf16.gmra.mrb[24].mxu0 %v2556_v20  ;;  %1411 = vmatpush1.bf16.msra.mxu1 %v2540_v18  ;;  %v2638_v18 = vld [vmem:[%s3575_s0 + $0x188] ss:$36 sps:$4 sm:$0xff]  }
  0x74   :  { %1617 = vmatpush1.bf16.msra.mxu0 %v3163_v19  ;;  %1412 = vmatprep.subr.bf16.mxu1 %v2548_v23  ;;  %v2641_v20 = vld [vmem:[%s3575_s0 + $0x1c8] ss:$36 sps:$4 sm:$0xff]  }
  0x75   :  { %1618 = vmatprep.subr.bf16.mxu0 %v3179_v24  ;;  %1418 = vmatprep.mubr.bf16.mxu1 %v2572_v26 }
  0x76   :  { %1624 = vmatprep.mubr.bf16.mxu0 %v2575_v28 }
  0x77   :  { %1413 = vmatpush1.bf16.msra.mxu1 %v2546_v30 }
  0x78   :  { %1619 = vmatpush1.bf16.msra.mxu0 %v3194_v31  ;;  %1414 = vmatprep.subr.bf16.mxu1 %v2560_v32 }
  0x79   :  { %1620 = vmatprep.subr.bf16.mxu0 %v3203_v34 }
  0x7b   :  { %1415 = vmatpush1.bf16.msra.mxu1 %v2558_v35 }
  0x7c   :  { %1621 = vmatpush1.bf16.msra.mxu0 %v3211_v36  ;;  %1416 = vmatprep.subr.bf16.mxu1 %v2566_v38 }
  0x7d   :  { %1622 = vmatprep.subr.bf16.mxu0 %v3221_v40 }
  0x7f   :  { %1417 = vmatpush1.bf16.msra.mxu1 %v2564_v42 }
  0x80   :  { %1623 = vmatpush1.bf16.msra.mxu0 %v3230_v43  ;;  %2163 = vmatprep.subr.bf16.mxu1 %v2868_v3  ;;  %v2590_v3 = vld [vmem:[%s3574_s1 + $0x424] ss:$8 sps:$4 sm:$0xff]  }
  0x81   :  { %1695 = vmatprep.subr.bf16.mxu0 %v2578_v44 }
  0x82   :  { %1419 = vmatmul.mubr.bf16.vlgmr.msra.gmra.mrb[0].mxu1 %v2570_v46 }
  0x83   :  { %1625 = vmatmul.mubr.bf16.vlgmr.msra.gmra.mrb[0].mxu0 %v2573_v47  ;;  %2179 = vmatpush1.bf16.msra.mxu1 %v2882_v7  ;;  %v2587_v7 = vld [vmem:[%s3575_s0 + $0x60] ss:$36 sps:$4 sm:$0xff]  }
  0x84   :  { %1696 = vmatpush1.bf16.msra.mxu0 %v2576_v48  ;;  %2164 = vmatprep.subr.bf16.mxu1 %v2891_v9  ;;  %v2588_v9 = vld [vmem:[%s3574_s1 + $0x420] ss:$8 sps:$4 sm:$0xff]  }
  0x85   :  { %1697 = vmatprep.subr.bf16.mxu0 %v2581_v50  ;;  %1428 = vmatprep.mubr.bf16.mxu1 %v2582_v52 }
  0x86   :  { %1634 = vmatprep.mubr.bf16.mxu0 %v2584_v54  ;;  %v231_v54 = vlaneseq }
  0x87   :  { %2180 = vmatpush1.bf16.msra.mxu1 %v2905_v13  ;;  %v2596_v13 = vld [vmem:[%s3575_s0 + $0xac] ss:$36 sps:$4 sm:$0xff]  }
  0x88   :  { %1698 = vmatpush1.bf16.msra.mxu0 %v2579_v55  ;;  %2165 = vmatprep.subr.bf16.mxu1 %v2915_v15  ;;  %v2602_v15 = vld [vmem:[%s3574_s1 + $0x444] ss:$8 sps:$4 sm:$0xff]  }
  0x89   :  { %1699 = vmatprep.subr.bf16.mxu0 %v2590_v3 }
  0x8a   :  { %1429 = vmatmul.mubr.bf16.gmra.mrb[4].mxu1 %v2586_v56 }
  0x8b   :  { %1635 = vmatmul.mubr.bf16.gmra.mrb[4].mxu0 %v2587_v7  ;;  %2181 = vmatpush1.bf16.msra.mxu1 %v2923_v17  ;;  %v2599_v17 = vld [vmem:[%s3575_s0 + $0xa8] ss:$36 sps:$4 sm:$0xff]   ;;  %v232_v7 = vshrl.u32 %v231_v54, 7 }
  0x8c   :  { %1700 = vmatpush1.bf16.msra.mxu0 %v2588_v9  ;;  %2166 = vmatprep.subr.bf16.mxu1 %v2939_v21  ;;  %v2600_v21 = vld [vmem:[%s3574_s1 + $0x440] ss:$8 sps:$4 sm:$0xff]  }
  0x8d   :  { %1701 = vmatprep.subr.bf16.mxu0 %v2593_v58  ;;  %1438 = vmatprep.mubr.bf16.mxu1 %v2594_v59  ;;  %v233_v58 = vsub.s32 0, %v232_v7  ;;  %v229_v59 = vld [vmem:[%s3576_s2] sm:$0x3] }
  0x8e   :  { %1644 = vmatprep.mubr.bf16.mxu0 %v2596_v13  ;;  %v237_v13 = vsub.s32 1, %v232_v7 }
  0x8f   :  { %2182 = vmatpush1.bf16.msra.mxu1 %v2953_v25  ;;  %v2608_v25 = vld [vmem:[%s3575_s0 + $0xf4] ss:$36 sps:$4 sm:$0xff]  }
  0x90   :  { %1702 = vmatpush1.bf16.msra.mxu0 %v2591_v60  ;;  %2167 = vmatprep.subr.bf16.mxu1 %v2963_v27  ;;  %v2603_v27 = vld [vmem:[%s3574_s1 + $0x450] ss:$8 sps:$4 sm:$0xff]  }
  0x91   :  { %1703 = vmatprep.subr.bf16.mxu0 %v2602_v15 }
  0x92   :  { %1439 = vmatmul.mubr.bf16.gmra.mrb[8].mxu1 %v2598_v62 }
  0x93   :  { %1645 = vmatmul.mubr.bf16.gmra.mrb[8].mxu0 %v2599_v17  ;;  %2183 = vmatpush1.bf16.msra.mxu1 %v2971_v29  ;;  %v2611_v29 = vld [vmem:[%s3575_s0 + $0xf0] ss:$36 sps:$4 sm:$0xff]   ;;  %v3446_v17 = vrot.slane %v229_v59, %v233_v58 }
  0x94   :  { %1704 = vmatpush1.bf16.msra.mxu0 %v2600_v21  ;;  %2168 = vmatprep.subr.bf16.mxu1 %v2987_v33  ;;  %v2612_v33 = vld [vmem:[%s3574_s1 + $0x460] ss:$8 sps:$4 sm:$0xff]  }
  0x95   :  { %1705 = vmatprep.subr.bf16.mxu0 %v2605_v0  ;;  %1448 = vmatprep.mubr.bf16.mxu1 %v2606_v2  ;;  %v3450_v0 = vrot.slane %v229_v59, %v237_v13 }
  0x96   :  { %1654 = vmatprep.mubr.bf16.mxu0 %v2608_v25 }
  0x97   :  { %2184 = vmatpush1.bf16.msra.mxu1 %v3001_v37  ;;  %v2615_v37 = vld [vmem:[%s3574_s1 + $0x470] ss:$8 sps:$4 sm:$0xff]  }
  0x98   :  { %1706 = vmatpush1.bf16.msra.mxu0 %v2603_v27  ;;  %2169 = vmatprep.subr.bf16.mxu1 %v3011_v39  ;;  %v2643_v39 = vmov 0  }
  0x99   :  { %1707 = vmatprep.subr.bf16.mxu0 %v2614_v4 }
  0x9a   :  { %1449 = vmatmul.mubr.bf16.gmra.mrb[12].mxu1 %v2610_v5 }
  0x9b   :  { %1655 = vmatmul.mubr.bf16.gmra.mrb[12].mxu0 %v2611_v29  ;;  %2185 = vmatpush1.bf16.msra.mxu1 %v3019_v41  ;;  %v2622_v41 = vld [vmem:[%s3575_s0 + $0x174] ss:$36 sps:$4 sm:$0xff]  }
  0x9c   :  { %1708 = vmatpush1.bf16.msra.mxu0 %v2612_v33  ;;  %2170 = vmatprep.subr.bf16.mxu1 %v3035_v45  ;;  %v2624_v45 = vld [vmem:[%s3575_s0 + $0x170] ss:$36 sps:$4 sm:$0xff]  }
  0x9d   :  { %1709 = vmatprep.subr.bf16.mxu0 %v2617_v8  ;;  %1458 = vmatprep.mubr.bf16.mxu1 %v2618_v10 }
  0x9e   :  { %1727 = vmatprep.mubr.bf16.mxu0 %v2643_v39 }
  0x9f   :  { %2186 = vmatpush1.bf16.msra.mxu1 %v3049_v49  ;;  %v2625_v49 = vld [vmem:[%s3575_s0 + $0x68] ss:$36 sps:$4 sm:$0xff]  }
  0xa0   :  { %1710 = vmatpush1.bf16.msra.mxu0 %v2615_v37  ;;  %2171 = vmatprep.subr.bf16.mxu1 %v3059_v51  ;;  %v2626_v51 = vld [vmem:[%s3575_s0 + $0x1bc] ss:$36 sps:$4 sm:$0xff]  }
  0xa2   :  { %1459 = vmatmul.mubr.bf16.gmra.mrb[16].mxu1 %v2620_v11 }
  0xa3   :  { %1728 = vmatmul.mubr.bf16.vlgmr.msra.gmra.mrb[0].mxu0 %v2621_v14  ;;  %2187 = vmatpush1.bf16.msra.mxu1 %v3067_v53  ;;  %v2628_v53 = vld [vmem:[%s3575_s0 + $0x1b8] ss:$36 sps:$4 sm:$0xff]  }
  0xa4   :  { %1468 = vmatprep.mubr.bf16.mxu1 %v2622_v41  ;;  %2172 = vmatprep.subr.bf16.mxu1 %v3083_v57  ;;  %v2629_v57 = vld [vmem:[%s3575_s0 + $0xb0] ss:$36 sps:$4 sm:$0xff]  }
  0xa5   :  { %1737 = vmatprep.mubr.bf16.mxu0 %v2643_v39 }
  0xa7   :  { %2188 = vmatpush1.bf16.msra.mxu1 %v3097_v61  ;;  %v2633_v61 = vld [vmem:[%s3575_s0 + $0x13c] ss:$36 sps:$4 sm:$0xff]  }
  0xa8   :  { %2173 = vmatprep.subr.bf16.mxu1 %v3107_v63  ;;  %v2630_v63 = vld [vmem:[%s3575_s0 + $0xf8] ss:$36 sps:$4 sm:$0xff]  }
  0xaa   :  { %1469 = vmatmul.mubr.bf16.gmra.mrb[20].mxu1 %v2624_v45 }
  0xab   :  { %1738 = vmatmul.mubr.bf16.gmra.mrb[4].mxu0 %v2625_v49  ;;  %2189 = vmatpush1.bf16.msra.mxu1 %v3115_v1  ;;  %v2631_v1 = vld [vmem:[%s3575_s0 + $0x138] ss:$36 sps:$4 sm:$0xff]  }
  0xac   :  { %1478 = vmatprep.mubr.bf16.mxu1 %v2626_v51  ;;  %2174 = vmatprep.subr.bf16.mxu1 %v3131_v6  ;;  %v2634_v6 = vld [vmem:[%s3575_s0 + $0x140] ss:$36 sps:$4 sm:$0xff]  }
  0xad   :  { %1747 = vmatprep.mubr.bf16.mxu0 %v2643_v39 }
  0xaf   :  { %2190 = vmatpush1.bf16.msra.mxu1 %v3145_v12  ;;  %v2635_v12 = vld [vmem:[%s3575_s0 + $0x184] ss:$36 sps:$4 sm:$0xff]  }
  0xb0   :  { %2175 = vmatprep.subr.bf16.mxu1 %v3155_v16  ;;  %v2637_v16 = vld [vmem:[%s3575_s0 + $0x180] ss:$36 sps:$4 sm:$0xff]  }
  0xb2   :  { %1479 = vmatmul.mubr.bf16.gmra.mrb[24].mxu1 %v2628_v53 }
  0xb3   :  { %1748 = vmatmul.mubr.bf16.gmra.mrb[8].mxu0 %v2629_v57  ;;  %2191 = vmatpush1.bf16.msra.mxu1 %v3163_v19  ;;  %v2639_v19 = vld [vmem:[%s3575_s0 + $0x1cc] ss:$36 sps:$4 sm:$0xff]  }
  0xb4   :  { %1757 = vmatprep.mubr.bf16.mxu0 %v2643_v39  ;;  %2176 = vmatprep.subr.bf16.mxu1 %v3179_v24 }
  0xb5   :  { %1664 = vmatprep.mubr.bf16.mxu1 %v2633_v61 }
  0xb7   :  { %2192 = vmatpush1.bf16.msra.mxu1 %v3194_v31 }
  0xb8   :  { %2177 = vmatprep.subr.bf16.mxu1 %v3203_v34 }
  0xbb   :  { %1758 = vmatmul.mubr.bf16.gmra.mrb[12].mxu0 %v2630_v63  ;;  %2193 = vmatpush1.bf16.msra.mxu1 %v3211_v36 }
  0xbc   :  { %1767 = vmatprep.mubr.bf16.mxu0 %v2643_v39  ;;  %2178 = vmatprep.subr.bf16.mxu1 %v3221_v40 }
  0xbf   :  { %2194 = vmatpush1.bf16.msra.mxu1 %v3230_v43 }
  0xc2   :  { %1665 = vmatmul.mubr.bf16.vlgmr.msra.gmra.mrb[28].mxu1 %v2631_v1 }
  0xc3   :  { %1768 = vmatmul.mubr.bf16.gmra.mrb[28].mxu0 %v2634_v6  ;;  %1674 = vmatprep.mubr.bf16.mxu1 %v2635_v12 }
  0xc4   :  { %1777 = vmatprep.mubr.bf16.mxu0 %v2643_v39 }
  0xca   :  { %1675 = vmatmul.mubr.bf16.gmra.mrb[32].mxu1 %v2637_v16 }
  0xcb   :  { %1778 = vmatmul.mubr.bf16.gmra.mrb[32].mxu0 %v2638_v18  ;;  %1684 = vmatprep.mubr.bf16.mxu1 %v2639_v19 }
  0xcc   :  { %1787 = vmatprep.mubr.bf16.mxu0 %v2643_v39 }
  0xd2   :  { %1685 = vmatmul.mubr.bf16.gmra.mrb[36].mxu1 %v2641_v20 }
  0xd3   :  { %1788 = vmatmul.mubr.bf16.gmra.mrb[36].mxu0 %v2642_v22 }
 0x136   :  { %v1563_v23 = vpop.f32.mrb[16].mxu0 }
 0x137   :  { %v1565_v24 = vpop.f32.mrb[17].mxu0 }
 0x138   :  { %v1567_v26 = vpop.f32.mrb[18].mxu0 }
 0x139   :  { %v1569_v28 = vpop.f32.mrb[19].mxu0 }
 0x13e   :  { %v3413_v30 = vpop.f32.mrb[20].mxu0 }
 0x13f   :  { %v3415_v31 = vpop.f32.mrb[21].mxu0 }
 0x140   :  { %v3417_v32 = vpop.f32.mrb[22].mxu0 }
 0x141   :  { %v3419_v34 = vpop.f32.mrb[23].mxu0 }
 0x146   :  { %v3421_v35 = vpop.f32.mrb[24].mxu0 }
 0x147   :  { %v3423_v36 = vpop.f32.mrb[25].mxu0 }
 0x148   :  { %v3425_v38 = vpop.f32.mrb[26].mxu0 }
 0x149   :  { %v3427_v40 = vpop.f32.mrb[27].mxu0 }
 0x155   :  { %v1420_v42 = vpop.f32.mrb[0].mxu1 }
 0x156   :  { %v1422_v43 = vpop.f32.mrb[1].mxu1  ;;  %v2195_v2 = vadd.f32 %v1420_v42, %v3446_v17 }
 0x157   :  { %v1424_v44 = vpop.f32.mrb[2].mxu1  ;;  %v2197_v25 = vadd.f32 %v1422_v43, %v3450_v0 }
 0x158   :  { %v1426_v46 = vpop.f32.mrb[3].mxu1  ;;  %v2199_v5 = vadd.f32 %v1424_v44, %v3446_v17 }
 0x159   :  { %v2201_v37 = vadd.f32 %v1426_v46, %v3450_v0 }
 0x15d   :  { %v1430_v47 = vpop.f32.mrb[4].mxu1 }
 0x15e   :  { %v1432_v48 = vpop.f32.mrb[5].mxu1  ;;  %v2203_v42 = vadd.f32 %v1430_v47, %v3446_v17 }
 0x15f   :  { %v1434_v50 = vpop.f32.mrb[6].mxu1  ;;  %v2205_v43 = vadd.f32 %v1432_v48, %v3450_v0 }
 0x160   :  { %v1436_v52 = vpop.f32.mrb[7].mxu1 }
 0x165   :  { %v3429_v55 = vpop.f32.mrb[8].mxu1 }
 0x166   :  { %v3431_v3 = vpop.f32.mrb[9].mxu1 }
 0x167   :  { %v3433_v56 = vpop.f32.mrb[10].mxu1 }
 0x168   :  { %v3435_v9 = vpop.f32.mrb[11].mxu1 }
 0x16d   :  { %v3440_v60 = vpop.f32.mrb[12].mxu1 }
 0x16e   :  { %v3442_v15 = vpop.f32.mrb[13].mxu1 }
 0x16f   :  { %v3444_v62 = vpop.f32.mrb[14].mxu1 }
 0x170   :  { %v3448_v21 = vpop.f32.mrb[15].mxu1 }
 0x175   :  { %v1460_v27 = vpop.f32.mrb[16].mxu1 }
 0x176   :  { %v1729_v4 = vpop.f32.mrb[0].mxu0  ;;  %v2227_v29 = vadd.f32 %v1460_v27, %v3446_v17  ;;  %v1462_v8 = vpop.f32.mrb[17].mxu1 }
 0x177   :  { %v2196_v33 = vadd.f32 %v2195_v2, %v1729_v4  ;;  %v1731_v10 = vpop.f32.mrb[1].mxu0  ;;  %v2231_v39 = vadd.f32 %v1462_v8, %v3450_v0  ;;  %v1464_v14 = vpop.f32.mrb[18].mxu1 }
 0x178   :  { %v2198_v11 = vadd.f32 %v2197_v25, %v1731_v10  ;;  %v1733_v41 = vpop.f32.mrb[2].mxu0  ;;  %v2235_v49 = vadd.f32 %v1464_v14, %v3446_v17  ;;  %v1466_v53 = vpop.f32.mrb[19].mxu1  ;;  %v3459_v61 = vadd.f32 %v2227_v29, %v1563_v23 }
 0x179   :  { %v1798_v45 = vmax.f32 %v2196_v33, 0.0  ;;  %v2200_v51 = vadd.f32 %v2199_v5, %v1733_v41  ;;  %v1735_v57 = vpop.f32.mrb[3].mxu0  ;;  %v2239_v1 = vadd.f32 %v1466_v53, %v3450_v0  ;;  %v3462_v12 = vadd.f32 %v2231_v39, %v1565_v24 }
 0x17a   :  { %v1799_v63 = vmax.f32 %v2198_v11, 0.0  ;;  %v2202_v6 = vadd.f32 %v2201_v37, %v1735_v57  ;;  %v3464_v18 = vadd.f32 %v2235_v49, %v1567_v26  ;;  %v2207_v24 = vadd.f32 %v1434_v50, %v3446_v17 }
 0x17b   :  { %v1800_v16 = vmax.f32 %v2200_v51, 0.0  ;;  %v3466_v22 = vadd.f32 %v2239_v1, %v1569_v28  ;;  %v2209_v28 = vadd.f32 %v1436_v52, %v3450_v0  ;;  %v2213_v41 = vadd.f32 %v3431_v3, %v3450_v0 }
 0x17c   :  { %v2149_v19 = vpack.c.bf16 %v1799_v63, %v1798_v45  ;;  %v1801_v20 = vmax.f32 %v2202_v6, 0.0 }
 0x17d   :  { %v1470_v44 = vpop.f32.mrb[20].mxu1 }
 0x17e   :  { %1910 = vst [vmem:[%s3577_s3] sm:$0xff] %v2149_v19  ;;  %v2150_v23 = vpack.c.bf16 %v1801_v20, %v1800_v16  ;;  %v1739_v46 = vpop.f32.mrb[4].mxu0  ;;  %v2243_v26 = vadd.f32 %v1470_v44, %v3446_v17  ;;  %v1472_v7 = vpop.f32.mrb[21].mxu1 }
 0x17f   :  { %v2204_v54 = vadd.f32 %v2203_v42, %v1739_v46  ;;  %v1741_v58 = vpop.f32.mrb[5].mxu0  ;;  %v2247_v47 = vadd.f32 %v1472_v7, %v3450_v0  ;;  %v1474_v59 = vpop.f32.mrb[22].mxu1 }
 0x180   :  { %1911 = vst [vmem:[%s3577_s3 + $0x8] sm:$0xff] %v2150_v23  ;;  %v2206_v48 = vadd.f32 %v2205_v43, %v1741_v58  ;;  %v1743_v13 = vpop.f32.mrb[6].mxu0  ;;  %v2251_v25 = vadd.f32 %v1474_v59, %v3446_v17  ;;  %v1476_v27 = vpop.f32.mrb[23].mxu1  ;;  %v3482_v5 = vadd.f32 %v2243_v26, %v3413_v30  ;;  %v2211_v30 = vadd.f32 %v3429_v55, %v3446_v17 }
 0x181   :  { %v1802_v2 = vmax.f32 %v2204_v54, 0.0  ;;  %v2208_v50 = vadd.f32 %v2207_v24, %v1743_v13  ;;  %v1745_v4 = vpop.f32.mrb[7].mxu0  ;;  %v2255_v52 = vadd.f32 %v1476_v27, %v3450_v0  ;;  %v3486_v8 = vadd.f32 %v2247_v47, %v3415_v31 }
 0x182   :  { %v1803_v29 = vmax.f32 %v2206_v48, 0.0  ;;  %v2210_v33 = vadd.f32 %v2209_v28, %v1745_v4  ;;  %v3489_v37 = vadd.f32 %v2251_v25, %v3417_v32  ;;  %v2215_v32 = vadd.f32 %v3433_v56, %v3446_v17 }
 0x183   :  { %v1804_v10 = vmax.f32 %v2208_v50, 0.0  ;;  %v3492_v14 = vadd.f32 %v2255_v52, %v3419_v34  ;;  %v2217_v55 = vadd.f32 %v3435_v9, %v3450_v0  ;;  %v2221_v28 = vadd.f32 %v3442_v15, %v3450_v0 }
 0x184   :  { %v2151_v39 = vpack.c.bf16 %v1803_v29, %v1802_v2  ;;  %v1805_v11 = vmax.f32 %v2210_v33, 0.0 }
 0x185   :  { %v1480_v45 = vpop.f32.mrb[24].mxu1 }
 0x186   :  { %1912 = vst [vmem:[%s3577_s3 + $0x10] sm:$0xff] %v2151_v39  ;;  %v2152_v31 = vpack.c.bf16 %v1805_v11, %v1804_v10  ;;  %v1749_v49 = vpop.f32.mrb[8].mxu0  ;;  %v2259_v51 = vadd.f32 %v1480_v45, %v3446_v17  ;;  %v1482_v53 = vpop.f32.mrb[25].mxu1 }
 0x187   :  { %v2212_v34 = vadd.f32 %v2211_v30, %v1749_v49  ;;  %v1751_v57 = vpop.f32.mrb[9].mxu0  ;;  %v2263_v3 = vadd.f32 %v1482_v53, %v3450_v0  ;;  %v1484_v1 = vpop.f32.mrb[26].mxu1 }
 0x188   :  { %1913 = vst [vmem:[%s3577_s3 + $0x18] sm:$0xff] %v2152_v31  ;;  %v2214_v63 = vadd.f32 %v2213_v41, %v1751_v57  ;;  %v1753_v6 = vpop.f32.mrb[10].mxu0  ;;  %v2267_v56 = vadd.f32 %v1484_v1, %v3446_v17  ;;  %v1486_v20 = vpop.f32.mrb[27].mxu1  ;;  %v3512_v43 = vadd.f32 %v2259_v51, %v3421_v35  ;;  %v2219_v35 = vadd.f32 %v3440_v60, %v3446_v17 }
 0x189   :  { %v1806_v16 = vmax.f32 %v2212_v34, 0.0  ;;  %v2216_v19 = vadd.f32 %v2215_v32, %v1753_v6  ;;  %v1755_v42 = vpop.f32.mrb[11].mxu0  ;;  %v2271_v9 = vadd.f32 %v1486_v20, %v3450_v0  ;;  %v3516_v46 = vadd.f32 %v2263_v3, %v3423_v36 }
 0x18a   :  { %v1807_v23 = vmax.f32 %v2214_v63, 0.0  ;;  %v2218_v44 = vadd.f32 %v2217_v55, %v1755_v42  ;;  %v3519_v26 = vadd.f32 %v2267_v56, %v3425_v38  ;;  %v2223_v38 = vadd.f32 %v3444_v62, %v3446_v17 }
 0x18b   :  { %v1808_v24 = vmax.f32 %v2216_v19, 0.0  ;;  %v3522_v58 = vadd.f32 %v2271_v9, %v3427_v40  ;;  %v2225_v40 = vadd.f32 %v3448_v21, %v3450_v0 }
 0x18c   :  { %v2153_v54 = vpack.c.bf16 %v1807_v23, %v1806_v16  ;;  %v1809_v7 = vmax.f32 %v2218_v44, 0.0 }
 0x18e   :  { %1914 = vst [vmem:[%s3577_s3 + $0x20] sm:$0xff] %v2153_v54  ;;  %v2154_v36 = vpack.c.bf16 %v1809_v7, %v1808_v24  ;;  %v1759_v47 = vpop.f32.mrb[12].mxu0 }
 0x18f   :  { %v2220_v48 = vadd.f32 %v2219_v35, %v1759_v47  ;;  %v1761_v59 = vpop.f32.mrb[13].mxu0 }
 0x190   :  { %1915 = vst [vmem:[%s3577_s3 + $0x28] sm:$0xff] %v2154_v36  ;;  %v2222_v60 = vadd.f32 %v2221_v28, %v1761_v59  ;;  %v1763_v15 = vpop.f32.mrb[14].mxu0 }
 0x191   :  { %v1810_v13 = vmax.f32 %v2220_v48, 0.0  ;;  %v2224_v2 = vadd.f32 %v2223_v38, %v1763_v15  ;;  %v1765_v25 = vpop.f32.mrb[15].mxu0 }
 0x192   :  { %v1811_v50 = vmax.f32 %v2222_v60, 0.0  ;;  %v2226_v27 = vadd.f32 %v2225_v40, %v1765_v25 }
 0x193   :  { %v1812_v4 = vmax.f32 %v2224_v2, 0.0 }
 0x194   :  { %v2155_v29 = vpack.c.bf16 %v1811_v50, %v1810_v13  ;;  %v1813_v52 = vmax.f32 %v2226_v27, 0.0 }
 0x195   :  { %v1666_v17 = vpop.f32.mrb[28].mxu1 }
 0x196   :  { %1916 = vst [vmem:[%s3577_s3 + $0x30] sm:$0xff] %v2155_v29  ;;  %v2156_v62 = vpack.c.bf16 %v1813_v52, %v1812_v4  ;;  %v1769_v21 = vpop.f32.mrb[28].mxu0  ;;  %v2229_v0 = vadd.f32 %v3459_v61, %v1666_v17  ;;  %v1668_v33 = vpop.f32.mrb[29].mxu1 }
 0x197   :  { %v1771_v10 = vpop.f32.mrb[29].mxu0  ;;  %v2233_v39 = vadd.f32 %v3462_v12, %v1668_v33  ;;  %v1670_v11 = vpop.f32.mrb[30].mxu1 }
 0x198   :  { %1917 = vst [vmem:[%s3577_s3 + $0x38] sm:$0xff] %v2156_v62  ;;  %v1773_v30 = vpop.f32.mrb[30].mxu0  ;;  %v2230_v41 = vadd.f32 %v2229_v0, %v1769_v21  ;;  %v2237_v31 = vadd.f32 %v3464_v18, %v1670_v11  ;;  %v1672_v45 = vpop.f32.mrb[31].mxu1 }
 0x199   :  { %v1775_v49 = vpop.f32.mrb[31].mxu0  ;;  %v2234_v32 = vadd.f32 %v2233_v39, %v1771_v10  ;;  %v2241_v51 = vadd.f32 %v3466_v22, %v1672_v45 }
 0x19a   :  { %v1814_v34 = vmax.f32 %v2230_v41, 0.0  ;;  %v2238_v61 = vadd.f32 %v2237_v31, %v1773_v30 }
 0x19b   :  { %v1815_v53 = vmax.f32 %v2234_v32, 0.0  ;;  %v2242_v57 = vadd.f32 %v2241_v51, %v1775_v49 }
 0x19c   :  { %v1816_v55 = vmax.f32 %v2238_v61, 0.0 }
 0x19d   :  { %v2157_v3 = vpack.c.bf16 %v1815_v53, %v1814_v34  ;;  %v1817_v63 = vmax.f32 %v2242_v57, 0.0  ;;  %v1676_v1 = vpop.f32.mrb[32].mxu1 }
 0x19e   :  { %v1779_v6 = vpop.f32.mrb[32].mxu0  ;;  %v2245_v12 = vadd.f32 %v3482_v5, %v1676_v1  ;;  %v1678_v16 = vpop.f32.mrb[33].mxu1 }
 0x19f   :  { %v1781_v56 = vpop.f32.mrb[33].mxu0  ;;  %1918 = vst [vmem:[%s3577_s3 + $0x40] sm:$0xff] %v2157_v3  ;;  %v2158_v18 = vpack.c.bf16 %v1817_v63, %v1816_v55  ;;  %v2249_v22 = vadd.f32 %v3486_v8, %v1678_v16  ;;  %v1680_v19 = vpop.f32.mrb[34].mxu1 }
 0x1a0   :  { %v1783_v20 = vpop.f32.mrb[34].mxu0  ;;  %v2246_v42 = vadd.f32 %v2245_v12, %v1779_v6  ;;  %v2253_v23 = vadd.f32 %v3489_v37, %v1680_v19  ;;  %v1682_v9 = vpop.f32.mrb[35].mxu1 }
 0x1a1   :  { %v1785_v44 = vpop.f32.mrb[35].mxu0  ;;  %1919 = vst [vmem:[%s3577_s3 + $0x48] sm:$0xff] %v2158_v18  ;;  %v2250_v5 = vadd.f32 %v2249_v22, %v1781_v56  ;;  %v2257_v24 = vadd.f32 %v3492_v14, %v1682_v9 }
 0x1a2   :  { %v1818_v54 = vmax.f32 %v2246_v42, 0.0  ;;  %v2254_v7 = vadd.f32 %v2253_v23, %v1783_v20 }
 0x1a3   :  { %v1819_v35 = vmax.f32 %v2250_v5, 0.0  ;;  %v2258_v28 = vadd.f32 %v2257_v24, %v1785_v44 }
 0x1a4   :  { %v1820_v36 = vmax.f32 %v2254_v7, 0.0 }
 0x1a5   :  { %v2159_v8 = vpack.c.bf16 %v1819_v35, %v1818_v54  ;;  %v1821_v47 = vmax.f32 %v2258_v28, 0.0  ;;  %v1686_v38 = vpop.f32.mrb[36].mxu1 }
 0x1a6   :  { %v1789_v48 = vpop.f32.mrb[36].mxu0  ;;  %v2261_v37 = vadd.f32 %v3512_v43, %v1686_v38  ;;  %v1688_v59 = vpop.f32.mrb[37].mxu1 }
 0x1a7   :  { %v1791_v40 = vpop.f32.mrb[37].mxu0  ;;  %1920 = vst [vmem:[%s3577_s3 + $0x50] sm:$0xff] %v2159_v8  ;;  %v2160_v60 = vpack.c.bf16 %v1821_v47, %v1820_v36  ;;  %v2265_v14 = vadd.f32 %v3516_v46, %v1688_v59  ;;  %v1690_v15 = vpop.f32.mrb[38].mxu1 }
 0x1a8   :  { %v1793_v13 = vpop.f32.mrb[38].mxu0  ;;  %v2262_v2 = vadd.f32 %v2261_v37, %v1789_v48  ;;  %v2269_v25 = vadd.f32 %v3519_v26, %v1690_v15  ;;  %v1692_v50 = vpop.f32.mrb[39].mxu1 }
 0x1a9   :  { %v1795_v27 = vpop.f32.mrb[39].mxu0  ;;  %1921 = vst [vmem:[%s3577_s3 + $0x58] sm:$0xff] %v2160_v60  ;;  %v2266_v43 = vadd.f32 %v2265_v14, %v1791_v40  ;;  %v2273_v4 = vadd.f32 %v3522_v58, %v1692_v50 }
 0x1aa   :  { %v1822_v29 = vmax.f32 %v2262_v2, 0.0  ;;  %v2270_v52 = vadd.f32 %v2269_v25, %v1793_v13 }
 0x1ab   :  { %v1823_v62 = vmax.f32 %v2266_v43, 0.0  ;;  %v2274_v17 = vadd.f32 %v2273_v4, %v1795_v27 }
 0x1ac   :  { %v1824_v21 = vmax.f32 %v2270_v52, 0.0 }
 0x1ad   :  { %v2161_v46 = vpack.c.bf16 %v1823_v62, %v1822_v29  ;;  %v1825_v0 = vmax.f32 %v2274_v17, 0.0 }
 0x1af   :  { %1922 = vst [vmem:[%s3577_s3 + $0x60] sm:$0xff] %v2161_v46  ;;  %v2162_v26 = vpack.c.bf16 %v1825_v0, %v1824_v21 }
 0x1b1   :  { %1923 = vst [vmem:[%s3577_s3 + $0x68] sm:$0xff] %v2162_v26 }

// kernel: tile.33
= control target key start
LH: loop header
LB: loop body
LE: loop exit
PB: predicated region body
PF: predicated region fallthrough
CT: control target
= control target key end

     0   :  { %s22_s0 = inlined_call_operand.vmem [shape: f32[32], index: 0, kind: input, shape index: {}]   ;;  %s23_s1 = inlined_call_operand.vmem [shape: f32[4,32], index: 1, kind: output, shape index: {}]  }
   0x1   :  { %v4_v0 = vld [vmem:[%s22_s0] ss:$0 sm:$0xff] }
   0x2   :  { %5 = vst [vmem:[%s23_s1] sm:$0xf] %v4_v0 }

// kernel: tile.34
= control target key start
LH: loop header
LB: loop body
LE: loop exit
PB: predicated region body
PF: predicated region fallthrough
CT: control target
= control target key end

     0   :  { %vm7_vm0 = vcmask 261120   ;;  %s37_s8 = smov 32   ;;  %s38_s9 = smov 64   ;;  %vm13_vm1 = vcmask 1048320   ;;  %vm19_vm2 = vcmask 785920   ;;  %vm25_vm3 = vcmask 523520   ;;  %s55_s0 = inlined_call_operand.vmem [shape: f32[4,32], index: 0, kind: input, shape index: {}]   ;;  %s56_s1 = inlined_call_operand.vmem [shape: f32[1,128], index: 1, kind: output, shape index: {}]  }
   0x1   :  { %v4_v0 = vld [vmem:[%s55_s0] sm:$0xf]  ;;  %s36_s0 = smov 96  }
   0x2   :  { %5 = vst [vmem:[#allocation1] sm:$0xf] %v4_v0 }
   0x9   :  { %v10_v1 = vld [vmem:[#allocation1 + $0x3] sm:$0x1]   ;;  %v22_v2 = vld [vmem:[#allocation1 + $0x1] sm:$0x1]   ;;  %v6_v3 = vld [vmem:[#allocation1] sm:$0x1]  }
   0xa   :  { %11 = vrot.lane.b32.xlu0 %v10_v1, %s36_s0  ;;  %23 = vrot.lane.b32.xlu1 %v22_v2, %s37_s8  ;;  %v16_v4 = vld [vmem:[#allocation1 + $0x2] sm:$0x1]   ;;  %8 = vst.msk [vmem:[#allocation0] sm:$0x1] %vm7_vm0, %v6_v3  }
   0xe   :  { %17 = vrot.lane.b32.xlu0 %v16_v4, %s38_s9 }
  0x7c   :  { %v12_v5 = vpop.permute.xlu0 %11   ;;  %v24_v6 = vpop.permute.xlu1 %23  }
  0x7d   :  { %14 = vst.msk [vmem:[#allocation0] sm:$0x1] %vm13_vm1, %v12_v5  }
  0x80   :  { %v18_v7 = vpop.permute.xlu0 %17  }
  0x81   :  { %20 = vst.msk [vmem:[#allocation0] sm:$0x1] %vm19_vm2, %v18_v7  }
  0x82   :  { %26 = vst.msk [vmem:[#allocation0] sm:$0x1] %vm25_vm3, %v24_v6  }
  0x89   :  { %v30_v8 = vld [vmem:[#allocation0] sm:$0x1] }
  0x8a   :  { %32 = vst [vmem:[%s56_s1] sm:$0x1] %v30_v8 }

// kernel: vae_forward.18
= control target key start
LH: loop header
LB: loop body
LE: loop exit
PB: predicated region body
PF: predicated region fallthrough
CT: control target
= control target key end

     0   :  { %s2671_s12 = smov 0   ;;  %s2673_s13 = smov 0   ;;  %s3076_s0 = inlined_call_operand.vmem [shape: bf16[512,640], index: 0, kind: input, shape index: {}]   ;;  %s3077_s1 = inlined_call_operand.vmem [shape: bf16[640,128], index: 1, kind: input, shape index: {}]   ;;  %s3078_s2 = inlined_call_operand.vmem [shape: f32[1,128], index: 2, kind: input, shape index: {}]   ;;  %s3079_s3 = inlined_call_operand.vmem [shape: bf16[512,128], index: 3, kind: output, shape index: {}]  }
   0x1   :  { %s2675_s14 = smov 0  }
   0x2 LB: > { %s25_s15 = sadd.s32 1, %s2645_s13  ;;  %p1851_p0 = scmp.ge.s32.totalorder %s2649_s14, 1  ;;  %s2649_s14 = sphi %s2675_s14, %s13_s14   ;;  %s2645_s13 = sphi %s2673_s13, %s3081_s13   ;;  %s2641_s12 = sphi %s2671_s12, %s3080_s12  }
   0x3   : > { %p27_p1 = scmp.ge.s32.totalorder %s25_s15, 2  ;;  %p170_p2 = scmp.lt.s32.totalorder %s2649_s14, 3 }
   0x5   : > { %s3083_s15 = smov (%p27_p1, %s25_s15), 0  ;;  %p171_p3 = pnand %p1851_p0, %p170_p2 }
   0x6   : > { %v2475_v0 = vld [vmem:[%s3077_s1 + $0x40] sm:$0xff] (!%p171_p3)   ;;  %s1852_s18 = sshll.u32 (!%p171_p3), %s2641_s12, 5  ;;  %v2477_v2 = vld [vmem:[%s3077_s1 + $0x48] sm:$0xff] (!%p171_p3)   ;;  %v2479_v4 = vld [vmem:[%s3077_s1 + $0x50] sm:$0xff] (!%p171_p3)  }
   0x7   : > { %174 = sbr.rel (%p171_p3) target bundleno = 417 (0x1a1), region = 32  ;;  %v2476_v1 = vld [vmem:[%s3077_s1] sm:$0xff] (!%p171_p3)   ;;  %2138 = vmatprep.subr.bf16.mxu0 (!%p171_p3), %v2475_v0  ;;  %2434 = vmatprep.subr.bf16.mxu1 (!%p171_p3), %v2475_v0  ;;  %p206_p4 = scmp.lt.s32.totalorder (!%p171_p3), %s1852_s18, 63  ;;  %v2478_v3 = vld [vmem:[%s3077_s1 + $0x8] sm:$0xff] (!%p171_p3)   ;;  %v2480_v5 = vld [vmem:[%s3077_s1 + $0x10] sm:$0xff] (!%p171_p3)  }
   0x8   : > { %2139 = vmatpush3.bf16.msra.mxu0 (!%p171_p3), %v2476_v1  ;;  %2442 = vmatpush3.bf16.msra.mxu1 (!%p171_p3), %v2476_v1  ;;  %v2481_v6 = vld [vmem:[%s3077_s1 + $0x58] sm:$0xff] (!%p171_p3)   ;;  %v2483_v8 = vld [vmem:[%s3077_s1 + $0x60] sm:$0xff] (!%p171_p3)   ;;  %v2485_v10 = vld [vmem:[%s3077_s1 + $0x68] sm:$0xff] (!%p171_p3)  }
   0x9   : > { %2140 = vmatprep.subr.bf16.mxu0 (!%p171_p3), %v2477_v2  ;;  %2435 = vmatprep.subr.bf16.mxu1 (!%p171_p3), %v2477_v2  ;;  %v2482_v7 = vld [vmem:[%s3077_s1 + $0x18] sm:$0xff] (!%p171_p3)   ;;  %v2484_v9 = vld [vmem:[%s3077_s1 + $0x20] sm:$0xff] (!%p171_p3)   ;;  %v2486_v13 = vld [vmem:[%s3077_s1 + $0x28] sm:$0xff] (!%p171_p3)  }
   0xa   : > { %v2487_v14 = vld [vmem:[%s3077_s1 + $0x70] sm:$0xff] (!%p171_p3)   ;;  %v2489_v16 = vld [vmem:[%s3077_s1 + $0x78] sm:$0xff] (!%p171_p3)   ;;  %v2497_v18 = vld [vmem:[%s3077_s1 + $0xc0] sm:$0xff] (!%p171_p3)  }
   0xb   : > { %v2488_v15 = vld [vmem:[%s3077_s1 + $0x30] sm:$0xff] (!%p171_p3)   ;;  %v2490_v17 = vld [vmem:[%s3077_s1 + $0x38] sm:$0xff] (!%p171_p3)   ;;  %v2500_v19 = vld [vmem:[%s3077_s1 + $0x100] sm:$0xff] (!%p171_p3)  }
   0xc   : > { %2141 = vmatpush3.bf16.msra.mxu0 (!%p171_p3), %v2478_v3  ;;  %2443 = vmatpush3.bf16.msra.mxu1 (!%p171_p3), %v2478_v3  ;;  %v2498_v22 = vld [vmem:[%s3077_s1 + $0x80] sm:$0xff] (!%p171_p3)   ;;  %v2499_v23 = vld [vmem:[%s3077_s1 + $0xc8] sm:$0xff] (!%p171_p3)   ;;  %v2508_v29 = vld [vmem:[%s3077_s1 + $0xd0] sm:$0xff] (!%p171_p3)  }
   0xd   : > { %2142 = vmatprep.subr.bf16.mxu0 (!%p171_p3), %v2479_v4  ;;  %2436 = vmatprep.subr.bf16.mxu1 (!%p171_p3), %v2479_v4  ;;  %v2519_v26 = vld [vmem:[%s3077_s1 + $0x108] sm:$0xff] (!%p171_p3)   ;;  %v2509_v31 = vld [vmem:[%s3077_s1 + $0x90] sm:$0xff] (!%p171_p3)   ;;  %v2510_v33 = vld [vmem:[%s3077_s1 + $0xd8] sm:$0xff] (!%p171_p3)  }
   0xe   : > { %s3085_s18 = smov (!%p206_p4, %s1852_s18), 63  ;;  %v2501_v27 = vld [vmem:[%s3077_s1 + $0x88] sm:$0xff]   ;;  %v2511_v35 = vld [vmem:[%s3077_s1 + $0x98] sm:$0xff]   ;;  %v2518_v36 = vld [vmem:[%s3077_s1 + $0xe0] sm:$0xff]  }
   0xf   : > { %s2450_s4 = smul.u32 20, %s3085_s18  ;;  %v2532_v38 = vld [vmem:[%s3077_s1 + $0x110] sm:$0xff]   ;;  %v2520_v40 = vld [vmem:[%s3077_s1 + $0xa0] sm:$0xff]   ;;  %v2521_v41 = vld [vmem:[%s3077_s1 + $0xe8] sm:$0xff]   ;;  %s1855_s8 = sshll.u32 %s3085_s18, 2 }
  0x10   : > { %2143 = vmatpush3.bf16.msra.mxu0 %v2480_v5  ;;  %2444 = vmatpush3.bf16.msra.mxu1 %v2480_v5  ;;  %v2522_v44 = vld [vmem:[%s3077_s1 + $0xa8] sm:$0xff]   ;;  %v2546_v45 = vld [vmem:[%s3077_s1 + $0x118] sm:$0xff]   ;;  %v2529_v48 = vld [vmem:[%s3077_s1 + $0xf0] sm:$0xff]   ;;  %s2993_s12 = scalar_lea.vmem %s3079_s3, %s1855_s8 }
  0x11   : > { %2144 = vmatprep.subr.bf16.mxu0 %v2481_v6  ;;  %2437 = vmatprep.subr.bf16.mxu1 %v2481_v6  ;;  %s2722_s11 = scalar_lea.vmem %s3076_s0, %s2450_s4  ;;  %v2530_v49 = vld [vmem:[%s3077_s1 + $0xb0] sm:$0xff]   ;;  %v2531_v50 = vld [vmem:[%s3077_s1 + $0xf8] sm:$0xff]   ;;  %v2553_v52 = vld [vmem:[%s3077_s1 + $0x120] sm:$0xff]  }
  0x12   : > { %v2493_v11 = vld [vmem:[%s2722_s11 + $0x4] ss:$20 sps:$4 sm:$0xff]   ;;  %v2491_v20 = vld [vmem:[%s2722_s11] ss:$20 sps:$4 sm:$0xff]   ;;  %v2506_v28 = vld [vmem:[%s2722_s11 + $0x28] ss:$20 sps:$4 sm:$0xff]  }
  0x13   : > { %v2496_v12 = vld [vmem:[%s2722_s11 + $0x1e4] ss:$20 sps:$4 sm:$0xff]   ;;  %1100 = vmatprep.mubr.bf16.mxu0 %v2493_v11  ;;  %v2494_v21 = vld [vmem:[%s2722_s11 + $0x1e0] ss:$20 sps:$4 sm:$0xff]   ;;  %v2507_v30 = vld [vmem:[%s2722_s11 + $0x208] ss:$20 sps:$4 sm:$0xff]  }
  0x14   : > { %2145 = vmatpush3.bf16.msra.mxu0 %v2482_v7  ;;  %2445 = vmatpush3.bf16.msra.mxu1 %v2482_v7  ;;  %v2502_v24 = vld [vmem:[%s2722_s11 + $0x2c] ss:$20 sps:$4 sm:$0xff]   ;;  %v2512_v32 = vld [vmem:[%s2722_s11 + $0x54] ss:$20 sps:$4 sm:$0xff]   ;;  %v2516_v37 = vld [vmem:[%s2722_s11 + $0x50] ss:$20 sps:$4 sm:$0xff]  }
  0x15   : > { %2146 = vmatprep.subr.bf16.mxu0 %v2483_v8  ;;  %2438 = vmatprep.subr.bf16.mxu1 %v2483_v8  ;;  %v2504_v25 = vld [vmem:[%s2722_s11 + $0x20c] ss:$20 sps:$4 sm:$0xff]   ;;  %v2514_v34 = vld [vmem:[%s2722_s11 + $0x234] ss:$20 sps:$4 sm:$0xff]   ;;  %v2517_v39 = vld [vmem:[%s2722_s11 + $0x230] ss:$20 sps:$4 sm:$0xff]  }
  0x16   : > { %1196 = vmatprep.mubr.bf16.mxu1 %v2496_v12  ;;  %v2523_v42 = vld [vmem:[%s2722_s11 + $0x7c] ss:$20 sps:$4 sm:$0xff]   ;;  %v2527_v46 = vld [vmem:[%s2722_s11 + $0x78] ss:$20 sps:$4 sm:$0xff]   ;;  %v2539_v56 = vld [vmem:[%s2722_s11 + $0xa0] ss:$20 sps:$4 sm:$0xff]  }
  0x17   : > { %v2525_v43 = vld [vmem:[%s2722_s11 + $0x25c] ss:$20 sps:$4 sm:$0xff]   ;;  %v2528_v47 = vld [vmem:[%s2722_s11 + $0x258] ss:$20 sps:$4 sm:$0xff]   ;;  %v2542_v59 = vld [vmem:[%s2722_s11 + $0x34] ss:$20 sps:$4 sm:$0xff]  }
  0x18   : > { %2147 = vmatpush3.bf16.msra.mxu0 %v2484_v9  ;;  %2446 = vmatpush3.bf16.msra.mxu1 %v2484_v9  ;;  %v2534_v51 = vld [vmem:[%s2722_s11 + $0xa4] ss:$20 sps:$4 sm:$0xff]   ;;  %v2538_v53 = vld [vmem:[%s2722_s11 + $0xc] ss:$20 sps:$4 sm:$0xff]   ;;  %v2536_v55 = vld [vmem:[%s2722_s11 + $0x8] ss:$20 sps:$4 sm:$0xff]  }
  0x19   : > { %2148 = vmatprep.subr.bf16.mxu0 %v2485_v10  ;;  %2439 = vmatprep.subr.bf16.mxu1 %v2485_v10  ;;  %v2533_v54 = vld [vmem:[%s3077_s1 + $0xb8] sm:$0xff]   ;;  %v2566_v57 = vld [vmem:[%s3077_s1 + $0x128] sm:$0xff]   ;;  %v2573_v60 = vld [vmem:[%s3077_s1 + $0x130] sm:$0xff]  }
  0x1a   : > { %v2540_v58 = vld [vmem:[%s2722_s11 + $0xcc] ss:$20 sps:$4 sm:$0xff]   ;;  %v2544_v61 = vld [vmem:[%s2722_s11 + $0xc8] ss:$20 sps:$4 sm:$0xff]   ;;  %v2545_v62 = vld [vmem:[%s2722_s11 + $0x30] ss:$20 sps:$4 sm:$0xff]  }
  0x1b   : > { %v2547_v63 = vld [vmem:[%s2722_s11 + $0xf4] ss:$20 sps:$4 sm:$0xff]   ;;  %v2549_v0 = vld [vmem:[%s2722_s11 + $0x5c] ss:$20 sps:$4 sm:$0xff]   ;;  %v2552_v3 = vld [vmem:[%s2722_s11 + $0x58] ss:$20 sps:$4 sm:$0xff]  }
  0x1c   : > { %2149 = vmatpush3.bf16.msra.mxu0 %v2486_v13  ;;  %2447 = vmatpush3.bf16.msra.mxu1 %v2486_v13  ;;  %v2586_v1 = vld [vmem:[%s3077_s1 + $0x138] sm:$0xff]   ;;  %v2551_v2 = vld [vmem:[%s2722_s11 + $0xf0] ss:$20 sps:$4 sm:$0xff]   ;;  %v2559_v7 = vld [vmem:[%s2722_s11 + $0x80] ss:$20 sps:$4 sm:$0xff]  }
  0x1d   : > { %2150 = vmatprep.subr.bf16.mxu0 %v2487_v14  ;;  %2440 = vmatprep.subr.bf16.mxu1 %v2487_v14  ;;  %v2554_v4 = vld [vmem:[%s2722_s11 + $0x11c] ss:$20 sps:$4 sm:$0xff]   ;;  %v2556_v5 = vld [vmem:[%s2722_s11 + $0x84] ss:$20 sps:$4 sm:$0xff]   ;;  %v2562_v9 = vld [vmem:[%s2722_s11 + $0xac] ss:$20 sps:$4 sm:$0xff]  }
  0x1e   : > { %v2558_v6 = vld [vmem:[%s2722_s11 + $0x118] ss:$20 sps:$4 sm:$0xff]   ;;  %v2564_v10 = vld [vmem:[%s2722_s11 + $0x140] ss:$20 sps:$4 sm:$0xff]   ;;  %v2565_v11 = vld [vmem:[%s2722_s11 + $0xa8] ss:$20 sps:$4 sm:$0xff]  }
  0x1f   : > { %v2560_v8 = vld [vmem:[%s2722_s11 + $0x144] ss:$20 sps:$4 sm:$0xff]   ;;  %v2567_v12 = vld [vmem:[%s2722_s11 + $0x16c] ss:$20 sps:$4 sm:$0xff]   ;;  %v2569_v13 = vld [vmem:[%s2722_s11 + $0xd4] ss:$20 sps:$4 sm:$0xff]  }
  0x20   : > { %2151 = vmatpush3.bf16.msra.mxu0 %v2488_v15  ;;  %2448 = vmatpush3.bf16.msra.mxu1 %v2488_v15  ;;  %v2571_v14 = vld [vmem:[%s2722_s11 + $0x168] ss:$20 sps:$4 sm:$0xff]   ;;  %v2572_v15 = vld [vmem:[%s2722_s11 + $0xd0] ss:$20 sps:$4 sm:$0xff]  }
  0x21   : > { %2152 = vmatprep.subr.bf16.mxu0 %v2489_v16  ;;  %2441 = vmatprep.subr.bf16.mxu1 %v2489_v16  ;;  %v2574_v16 = vld [vmem:[%s2722_s11 + $0x194] ss:$20 sps:$4 sm:$0xff]  }
  0x24   : > { %2153 = vmatpush3.bf16.msra.mxu0 %v2490_v17  ;;  %2449 = vmatpush3.bf16.msra.mxu1 %v2490_v17  ;;  %v2576_v17 = vld [vmem:[%s2722_s11 + $0xfc] ss:$20 sps:$4 sm:$0xff]  }
  0x25   : > { %2250 = vmatprep.subr.bf16.mxu1 %v2497_v18  ;;  %2386 = vmatprep.subr.bf16.mxu0 %v2500_v19  ;;  %v2578_v18 = vld [vmem:[%s2722_s11 + $0x190] ss:$20 sps:$4 sm:$0xff]  }
  0x27   : > { %1101 = vmatmul.mubr.bf16.vlgmr.msra.gmra.mrb[0].mxu0 %v2491_v20  ;;  %1197 = vmatmul.mubr.bf16.vlgmr.msra.gmra.mrb[0].mxu1 %v2494_v21  ;;  %v2580_v20 = vld [vmem:[%s2722_s11 + $0x1bc] ss:$20 sps:$4 sm:$0xff]   ;;  %v2582_v21 = vld [vmem:[%s2722_s11 + $0x124] ss:$20 sps:$4 sm:$0xff]  }
  0x28   : > { %2251 = vmatpush3.bf16.msra.mxu1 %v2498_v22  ;;  %2387 = vmatpush3.bf16.msra.mxu0 %v2500_v19  ;;  %v2579_v19 = vld [vmem:[%s2722_s11 + $0xf8] ss:$20 sps:$4 sm:$0xff]  }
  0x29   : > { %2252 = vmatprep.subr.bf16.mxu1 %v2499_v23  ;;  %1108 = vmatprep.mubr.bf16.mxu0 %v2502_v24  ;;  %v2584_v22 = vld [vmem:[%s2722_s11 + $0x1b8] ss:$20 sps:$4 sm:$0xff]   ;;  %v2585_v23 = vld [vmem:[%s2722_s11 + $0x120] ss:$20 sps:$4 sm:$0xff]  }
  0x2a   : > { %1204 = vmatprep.mubr.bf16.mxu1 %v2504_v25  ;;  %2388 = vmatprep.subr.bf16.mxu0 %v2519_v26  ;;  %v2587_v24 = vld [vmem:[%s2722_s11 + $0x14c] ss:$20 sps:$4 sm:$0xff]   ;;  %v2589_v25 = vld [vmem:[%s2722_s11 + $0x10] ss:$20 sps:$4 sm:$0xff]  }
  0x2c   : > { %2253 = vmatpush3.bf16.msra.mxu1 %v2501_v27  ;;  %2389 = vmatpush3.bf16.msra.mxu0 %v2519_v26  ;;  %v2590_v26 = vld [vmem:[%s2722_s11 + $0x148] ss:$20 sps:$4 sm:$0xff]   ;;  %v2591_v27 = vld [vmem:[%s2722_s11 + $0x38] ss:$20 sps:$4 sm:$0xff]  }
  0x2d   : > { %2254 = vmatprep.subr.bf16.mxu1 %v2508_v29  ;;  %2390 = vmatprep.subr.bf16.mxu0 %v2532_v38  ;;  %v2594_v29 = vld [vmem:[%s2722_s11 + $0x60] ss:$20 sps:$4 sm:$0xff]  }
  0x2f   : > { %1109 = vmatmul.mubr.bf16.gmra.mrb[4].mxu0 %v2506_v28  ;;  %1205 = vmatmul.mubr.bf16.gmra.mrb[4].mxu1 %v2507_v30  ;;  %v2592_v28 = vld [vmem:[%s2722_s11 + $0x174] ss:$20 sps:$4 sm:$0xff]   ;;  %v2595_v30 = vld [vmem:[%s2722_s11 + $0x170] ss:$20 sps:$4 sm:$0xff]  }
  0x30   : > { %2255 = vmatpush3.bf16.msra.mxu1 %v2509_v31  ;;  %1116 = vmatprep.mubr.bf16.mxu0 %v2512_v32  ;;  %v2596_v31 = vld [vmem:[%s2722_s11 + $0x88] ss:$20 sps:$4 sm:$0xff]  }
  0x31   : > { %2256 = vmatprep.subr.bf16.mxu1 %v2510_v33  ;;  %1212 = vmatprep.mubr.bf16.mxu1 %v2514_v34  ;;  %v2597_v32 = vld [vmem:[%s2722_s11 + $0x19c] ss:$20 sps:$4 sm:$0xff]   ;;  %v2600_v34 = vld [vmem:[%s2722_s11 + $0x198] ss:$20 sps:$4 sm:$0xff]  }
  0x32   : > { %2391 = vmatpush3.bf16.msra.mxu0 %v2532_v38  ;;  %v2599_v33 = vld [vmem:[%s2722_s11 + $0xb0] ss:$20 sps:$4 sm:$0xff]   ;;  %v2605_v38 = vld [vmem:[%s2722_s11 + $0x1c0] ss:$20 sps:$4 sm:$0xff]  }
  0x33   : > { %2392 = vmatprep.subr.bf16.mxu0 %v2546_v45 }
  0x34   : > { %2257 = vmatpush3.bf16.msra.mxu1 %v2511_v35  ;;  %v2601_v35 = vld [vmem:[%s2722_s11 + $0xd8] ss:$20 sps:$4 sm:$0xff]  }
  0x35   : > { %2258 = vmatprep.subr.bf16.mxu1 %v2518_v36  ;;  %v2602_v36 = vld [vmem:[%s2722_s11 + $0x1c4] ss:$20 sps:$4 sm:$0xff]  }
  0x36   : > { %2393 = vmatpush3.bf16.msra.mxu0 %v2546_v45  ;;  %v2614_v45 = vld [vmem:[%s2722_s11 + $0x1a0] ss:$20 sps:$4 sm:$0xff]  }
  0x37   : > { %1117 = vmatmul.mubr.bf16.gmra.mrb[8].mxu0 %v2516_v37  ;;  %1213 = vmatmul.mubr.bf16.gmra.mrb[8].mxu1 %v2517_v39  ;;  %v2604_v37 = vld [vmem:[%s2722_s11 + $0x100] ss:$20 sps:$4 sm:$0xff]   ;;  %v2606_v39 = vld [vmem:[%s2722_s11 + $0x128] ss:$20 sps:$4 sm:$0xff]  }
  0x38   : > { %2259 = vmatpush3.bf16.msra.mxu1 %v2520_v40  ;;  %1124 = vmatprep.mubr.bf16.mxu0 %v2523_v42  ;;  %v2607_v40 = vld [vmem:[%s2722_s11 + $0x1ec] ss:$20 sps:$4 sm:$0xff]   ;;  %v2610_v42 = vld [vmem:[%s2722_s11 + $0x1e8] ss:$20 sps:$4 sm:$0xff]  }
  0x39   : > { %2260 = vmatprep.subr.bf16.mxu1 %v2521_v41  ;;  %1220 = vmatprep.mubr.bf16.mxu1 %v2525_v43  ;;  %v2609_v41 = vld [vmem:[%s2722_s11 + $0x150] ss:$20 sps:$4 sm:$0xff]   ;;  %v2611_v43 = vld [vmem:[%s2722_s11 + $0x178] ss:$20 sps:$4 sm:$0xff]  }
  0x3a   : > { %2394 = vmatprep.subr.bf16.mxu0 %v2553_v52 }
  0x3b   : > { %2395 = vmatpush3.bf16.msra.mxu0 %v2553_v52  ;;  %v2622_v52 = vld [vmem:[%s2722_s11 + $0x264] ss:$20 sps:$4 sm:$0xff]  }
  0x3c   : > { %2261 = vmatpush3.bf16.msra.mxu1 %v2522_v44  ;;  %2396 = vmatprep.subr.bf16.mxu0 %v2566_v57  ;;  %v2612_v44 = vld [vmem:[%s2722_s11 + $0x214] ss:$20 sps:$4 sm:$0xff]  }
  0x3d   : > { %2262 = vmatprep.subr.bf16.mxu1 %v2529_v48  ;;  %v2617_v48 = vld [vmem:[%s2722_s11 + $0x23c] ss:$20 sps:$4 sm:$0xff]  }
  0x3f   : > { %1125 = vmatmul.mubr.bf16.gmra.mrb[12].mxu0 %v2527_v46  ;;  %1221 = vmatmul.mubr.bf16.gmra.mrb[12].mxu1 %v2528_v47  ;;  %v2615_v46 = vld [vmem:[%s2722_s11 + $0x210] ss:$20 sps:$4 sm:$0xff]   ;;  %v2616_v47 = vld [vmem:[%s2722_s11 + $0x1c8] ss:$20 sps:$4 sm:$0xff]  }
  0x40   : > { %2263 = vmatpush3.bf16.msra.mxu1 %v2530_v49  ;;  %1132 = vmatprep.mubr.bf16.mxu0 %v2534_v51  ;;  %v2619_v49 = vld [vmem:[%s2722_s11 + $0x1f0] ss:$20 sps:$4 sm:$0xff]   ;;  %v2621_v51 = vld [vmem:[%s2722_s11 + $0x218] ss:$20 sps:$4 sm:$0xff]  }
  0x41   : > { %2264 = vmatprep.subr.bf16.mxu1 %v2531_v50  ;;  %1261 = vmatprep.mubr.bf16.mxu1 %v2538_v53  ;;  %v2620_v50 = vld [vmem:[%s2722_s11 + $0x238] ss:$20 sps:$4 sm:$0xff]   ;;  %v2624_v53 = vld [vmem:[%s2722_s11 + $0x240] ss:$20 sps:$4 sm:$0xff]  }
  0x42   : > { %2397 = vmatpush3.bf16.msra.mxu0 %v2566_v57 }
  0x43   : > { %2398 = vmatprep.subr.bf16.mxu0 %v2573_v60 }
  0x44   : > { %2265 = vmatpush3.bf16.msra.mxu1 %v2533_v54  ;;  %v2625_v54 = vld [vmem:[%s2722_s11 + $0x260] ss:$20 sps:$4 sm:$0xff]  }
  0x46   : > { %2399 = vmatpush3.bf16.msra.mxu0 %v2573_v60 }
  0x47   : > { %1133 = vmatmul.mubr.bf16.gmra.mrb[16].mxu0 %v2539_v56  ;;  %1262 = vmatmul.mubr.bf16.vlgmr.msra.gmra.mrb[16].mxu1 %v2536_v55  ;;  %v2626_v55 = vld [vmem:[%s2722_s11 + $0x268] ss:$20 sps:$4 sm:$0xff]  }
  0x48   : > { %1140 = vmatprep.mubr.bf16.mxu0 %v2540_v58  ;;  %1269 = vmatprep.mubr.bf16.mxu1 %v2542_v59 }
  0x49   : > { %2400 = vmatprep.subr.bf16.mxu0 %v2586_v1 }
  0x4a   : > { %2401 = vmatpush3.bf16.msra.mxu0 %v2586_v1 }
  0x4f   : > { %1141 = vmatmul.mubr.bf16.gmra.mrb[20].mxu0 %v2544_v61  ;;  %1270 = vmatmul.mubr.bf16.gmra.mrb[20].mxu1 %v2545_v62 }
  0x50   : > { %1148 = vmatprep.mubr.bf16.mxu0 %v2547_v63  ;;  %1277 = vmatprep.mubr.bf16.mxu1 %v2549_v0 }
  0x57   : > { %1149 = vmatmul.mubr.bf16.gmra.mrb[24].mxu0 %v2551_v2  ;;  %1278 = vmatmul.mubr.bf16.gmra.mrb[24].mxu1 %v2552_v3 }
  0x58   : > { %1156 = vmatprep.mubr.bf16.mxu0 %v2554_v4  ;;  %1285 = vmatprep.mubr.bf16.mxu1 %v2556_v5 }
  0x5f   : > { %1157 = vmatmul.mubr.bf16.gmra.mrb[28].mxu0 %v2558_v6  ;;  %1286 = vmatmul.mubr.bf16.gmra.mrb[28].mxu1 %v2559_v7 }
  0x60   : > { %1164 = vmatprep.mubr.bf16.mxu0 %v2560_v8  ;;  %1293 = vmatprep.mubr.bf16.mxu1 %v2562_v9 }
  0x67   : > { %1165 = vmatmul.mubr.bf16.gmra.mrb[32].mxu0 %v2564_v10  ;;  %1294 = vmatmul.mubr.bf16.gmra.mrb[32].mxu1 %v2565_v11 }
  0x68   : > { %1172 = vmatprep.mubr.bf16.mxu0 %v2567_v12  ;;  %1301 = vmatprep.mubr.bf16.mxu1 %v2569_v13 }
  0x6f   : > { %1173 = vmatmul.mubr.bf16.gmra.mrb[36].mxu0 %v2571_v14  ;;  %1302 = vmatmul.mubr.bf16.gmra.mrb[36].mxu1 %v2572_v15 }
  0x70   : > { %1180 = vmatprep.mubr.bf16.mxu0 %v2574_v16  ;;  %1309 = vmatprep.mubr.bf16.mxu1 %v2576_v17 }
  0x77   : > { %1181 = vmatmul.mubr.bf16.gmra.mrb[40].mxu0 %v2578_v18  ;;  %1310 = vmatmul.mubr.bf16.gmra.mrb[40].mxu1 %v2579_v19 }
  0x78   : > { %1188 = vmatprep.mubr.bf16.mxu0 %v2580_v20  ;;  %1317 = vmatprep.mubr.bf16.mxu1 %v2582_v21 }
  0x7f   : > { %1189 = vmatmul.mubr.bf16.gmra.mrb[44].mxu0 %v2584_v22  ;;  %1318 = vmatmul.mubr.bf16.gmra.mrb[44].mxu1 %v2585_v23 }
  0x80   : > { %1325 = vmatprep.mubr.bf16.mxu1 %v2587_v24  ;;  %2402 = vmatprep.mubr.bf16.mxu0 %v2589_v25 }
  0x87   : > { %1326 = vmatmul.mubr.bf16.gmra.mrb[48].mxu1 %v2590_v26  ;;  %2403 = vmatmul.mubr.bf16.vlgmr.msra.gmra.mrb[48].mxu0 %v2591_v27 }
  0x88   : > { %1333 = vmatprep.mubr.bf16.mxu1 %v2592_v28  ;;  %2406 = vmatprep.mubr.bf16.mxu0 %v2594_v29 }
  0x8f   : > { %1334 = vmatmul.mubr.bf16.gmra.mrb[52].mxu1 %v2595_v30  ;;  %2407 = vmatmul.mubr.bf16.gmra.mrb[52].mxu0 %v2596_v31 }
  0x90   : > { %1341 = vmatprep.mubr.bf16.mxu1 %v2597_v32  ;;  %2410 = vmatprep.mubr.bf16.mxu0 %v2599_v33 }
  0x97   : > { %1342 = vmatmul.mubr.bf16.gmra.mrb[56].mxu1 %v2600_v34  ;;  %2411 = vmatmul.mubr.bf16.gmra.mrb[56].mxu0 %v2601_v35 }
  0x98   : > { %1349 = vmatprep.mubr.bf16.mxu1 %v2602_v36  ;;  %2414 = vmatprep.mubr.bf16.mxu0 %v2604_v37 }
  0x9f   : > { %1350 = vmatmul.mubr.bf16.gmra.mrb[60].mxu1 %v2605_v38  ;;  %2415 = vmatmul.mubr.bf16.gmra.mrb[60].mxu0 %v2606_v39 }
  0xa0   : > { %1357 = vmatprep.mubr.bf16.mxu1 %v2607_v40  ;;  %2418 = vmatprep.mubr.bf16.mxu0 %v2609_v41 }
  0xa7   : > { %1358 = vmatmul.mubr.bf16.gmra.mrb[64].mxu1 %v2610_v42  ;;  %2419 = vmatmul.mubr.bf16.gmra.mrb[64].mxu0 %v2611_v43  ;;  %v2916_v42 = vld [vmem:[%s3078_s2] ss:$0 sm:$0xff] }
  0xa8   : > { %1365 = vmatprep.mubr.bf16.mxu1 %v2612_v44  ;;  %2422 = vmatprep.mubr.bf16.mxu0 %v2614_v45 }
  0xaf   : > { %1366 = vmatmul.mubr.bf16.gmra.mrb[68].mxu1 %v2615_v46  ;;  %2423 = vmatmul.mubr.bf16.gmra.mrb[68].mxu0 %v2616_v47 }
  0xb0   : > { %1373 = vmatprep.mubr.bf16.mxu1 %v2617_v48  ;;  %2426 = vmatprep.mubr.bf16.mxu0 %v2619_v49 }
  0xb7   : > { %1374 = vmatmul.mubr.bf16.gmra.mrb[72].mxu1 %v2620_v50  ;;  %2427 = vmatmul.mubr.bf16.gmra.mrb[72].mxu0 %v2621_v51 }
  0xb8   : > { %1381 = vmatprep.mubr.bf16.mxu1 %v2622_v52  ;;  %2430 = vmatprep.mubr.bf16.mxu0 %v2624_v53 }
  0xbf   : > { %1382 = vmatmul.mubr.bf16.gmra.mrb[76].mxu1 %v2625_v54  ;;  %2431 = vmatmul.mubr.bf16.gmra.mrb[76].mxu0 %v2626_v55 }
  0xfa   : > { %v2226_v56 = vpop.f32.mrb[0].mxu1  ;;  %v2154_v57 = vpop.f32.mrb[0].mxu0 }
  0xfb   : > { %v2227_v58 = vpop.f32.mrb[1].mxu1  ;;  %v2155_v59 = vpop.f32.mrb[1].mxu0 }
  0xfc   : > { %v2897_v60 = vadd.f32 %v2227_v58, %v2226_v56  ;;  %v2229_v61 = vpop.f32.mrb[2].mxu1  ;;  %v2156_v62 = vadd.f32 %v2155_v59, %v2154_v57  ;;  %v2157_v63 = vpop.f32.mrb[2].mxu0 }
  0xfd   : > { %v2230_v0 = vpop.f32.mrb[3].mxu1  ;;  %v2158_v1 = vpop.f32.mrb[3].mxu0 }
  0xfe   : > { %v2899_v2 = vadd.f32 %v2230_v0, %v2229_v61  ;;  %v2159_v3 = vadd.f32 %v2158_v1, %v2157_v63  ;;  %v1103_v45 = vadd.f32 %v2156_v62, %v2916_v42 }
 0x100   : > { %v1106_v52 = vadd.f32 %v2159_v3, %v2916_v42 }
 0x102   : > { %v2232_v4 = vpop.f32.mrb[4].mxu1  ;;  %v2160_v5 = vpop.f32.mrb[4].mxu0 }
 0x103   : > { %v2233_v6 = vpop.f32.mrb[5].mxu1  ;;  %v2161_v7 = vpop.f32.mrb[5].mxu0 }
 0x104   : > { %v2901_v8 = vadd.f32 %v2233_v6, %v2232_v4  ;;  %v2235_v9 = vpop.f32.mrb[6].mxu1  ;;  %v2162_v10 = vadd.f32 %v2161_v7, %v2160_v5  ;;  %v2163_v11 = vpop.f32.mrb[6].mxu0 }
 0x105   : > { %v2236_v12 = vpop.f32.mrb[7].mxu1  ;;  %v2164_v13 = vpop.f32.mrb[7].mxu0 }
 0x106   : > { %v2903_v14 = vadd.f32 %v2236_v12, %v2235_v9  ;;  %v2165_v15 = vadd.f32 %v2164_v13, %v2163_v11  ;;  %v1111_v62 = vadd.f32 %v2162_v10, %v2916_v42 }
 0x108   : > { %v1114_v3 = vadd.f32 %v2165_v15, %v2916_v42 }
 0x10a   : > { %v2238_v16 = vpop.f32.mrb[8].mxu1  ;;  %v2166_v17 = vpop.f32.mrb[8].mxu0 }
 0x10b   : > { %v2239_v18 = vpop.f32.mrb[9].mxu1  ;;  %v2167_v19 = vpop.f32.mrb[9].mxu0 }
 0x10c   : > { %v2905_v20 = vadd.f32 %v2239_v18, %v2238_v16  ;;  %v2241_v21 = vpop.f32.mrb[10].mxu1  ;;  %v2168_v22 = vadd.f32 %v2167_v19, %v2166_v17  ;;  %v2169_v23 = vpop.f32.mrb[10].mxu0 }
 0x10d   : > { %v2242_v24 = vpop.f32.mrb[11].mxu1  ;;  %v2170_v25 = vpop.f32.mrb[11].mxu0 }
 0x10e   : > { %v2907_v26 = vadd.f32 %v2242_v24, %v2241_v21  ;;  %v2171_v27 = vadd.f32 %v2170_v25, %v2169_v23  ;;  %v1119_v10 = vadd.f32 %v2168_v22, %v2916_v42 }
 0x110   : > { %v1122_v15 = vadd.f32 %v2171_v27, %v2916_v42 }
 0x112   : > { %v2244_v28 = vpop.f32.mrb[12].mxu1  ;;  %v2172_v29 = vpop.f32.mrb[12].mxu0 }
 0x113   : > { %v2245_v30 = vpop.f32.mrb[13].mxu1  ;;  %v2173_v31 = vpop.f32.mrb[13].mxu0 }
 0x114   : > { %v2909_v32 = vadd.f32 %v2245_v30, %v2244_v28  ;;  %v2247_v33 = vpop.f32.mrb[14].mxu1  ;;  %v2174_v34 = vadd.f32 %v2173_v31, %v2172_v29  ;;  %v2175_v35 = vpop.f32.mrb[14].mxu0 }
 0x115   : > { %v2248_v36 = vpop.f32.mrb[15].mxu1  ;;  %v2176_v37 = vpop.f32.mrb[15].mxu0 }
 0x116   : > { %v2911_v38 = vadd.f32 %v2248_v36, %v2247_v33  ;;  %v2177_v39 = vadd.f32 %v2176_v37, %v2175_v35  ;;  %v1127_v22 = vadd.f32 %v2174_v34, %v2916_v42 }
 0x118   : > { %v1130_v27 = vadd.f32 %v2177_v39, %v2916_v42 }
 0x11a   : > { %v2266_v40 = vpop.f32.mrb[16].mxu1  ;;  %v2178_v41 = vpop.f32.mrb[16].mxu0 }
 0x11b   : > { %v2267_v43 = vpop.f32.mrb[17].mxu1  ;;  %v2179_v44 = vpop.f32.mrb[17].mxu0 }
 0x11c   : > { %v2268_v46 = vadd.f32 %v2267_v43, %v2266_v40  ;;  %v2269_v47 = vpop.f32.mrb[18].mxu1  ;;  %v2180_v48 = vadd.f32 %v2179_v44, %v2178_v41  ;;  %v2181_v49 = vpop.f32.mrb[18].mxu0 }
 0x11d   : > { %v2270_v50 = vpop.f32.mrb[19].mxu1  ;;  %v2182_v51 = vpop.f32.mrb[19].mxu0 }
 0x11e   : > { %v2271_v53 = vadd.f32 %v2270_v50, %v2269_v47  ;;  %v2183_v54 = vadd.f32 %v2182_v51, %v2181_v49  ;;  %v2920_v55 = vadd.f32 %v2268_v46, %v1103_v45  ;;  %v1135_v34 = vadd.f32 %v2180_v48, %v2916_v42 }
 0x120   : > { %v2922_v56 = vadd.f32 %v2271_v53, %v1106_v52  ;;  %v1138_v39 = vadd.f32 %v2183_v54, %v2916_v42 }
 0x122   : > { %v2272_v57 = vpop.f32.mrb[20].mxu1  ;;  %v2184_v58 = vpop.f32.mrb[20].mxu0 }
 0x123   : > { %v2273_v59 = vpop.f32.mrb[21].mxu1  ;;  %v2185_v61 = vpop.f32.mrb[21].mxu0 }
 0x124   : > { %v2274_v63 = vadd.f32 %v2273_v59, %v2272_v57  ;;  %v2275_v0 = vpop.f32.mrb[22].mxu1  ;;  %v2186_v1 = vadd.f32 %v2185_v61, %v2184_v58  ;;  %v2187_v4 = vpop.f32.mrb[22].mxu0 }
 0x125   : > { %v2276_v5 = vpop.f32.mrb[23].mxu1  ;;  %v2188_v6 = vpop.f32.mrb[23].mxu0 }
 0x126   : > { %v2277_v7 = vadd.f32 %v2276_v5, %v2275_v0  ;;  %v2189_v9 = vadd.f32 %v2188_v6, %v2187_v4  ;;  %v2926_v11 = vadd.f32 %v2274_v63, %v1111_v62  ;;  %v1143_v48 = vadd.f32 %v2186_v1, %v2916_v42 }
 0x128   : > { %v2928_v12 = vadd.f32 %v2277_v7, %v1114_v3 }
 0x12a   : > { %v2278_v13 = vpop.f32.mrb[24].mxu1  ;;  %v2190_v16 = vpop.f32.mrb[24].mxu0 }
 0x12b   : > { %v2279_v17 = vpop.f32.mrb[25].mxu1  ;;  %v2191_v18 = vpop.f32.mrb[25].mxu0 }
 0x12c   : > { %v2280_v19 = vadd.f32 %v2279_v17, %v2278_v13  ;;  %v2281_v21 = vpop.f32.mrb[26].mxu1  ;;  %v2192_v23 = vadd.f32 %v2191_v18, %v2190_v16  ;;  %v2193_v24 = vpop.f32.mrb[26].mxu0 }
 0x12d   : > { %v2282_v25 = vpop.f32.mrb[27].mxu1  ;;  %v2194_v28 = vpop.f32.mrb[27].mxu0 }
 0x12e   : > { %v2283_v29 = vadd.f32 %v2282_v25, %v2281_v21  ;;  %v2195_v30 = vadd.f32 %v2194_v28, %v2193_v24  ;;  %v2932_v31 = vadd.f32 %v2280_v19, %v1119_v10 }
 0x130   : > { %v2934_v33 = vadd.f32 %v2283_v29, %v1122_v15  ;;  %v1146_v15 = vadd.f32 %v2189_v9, %v2916_v42 }
 0x132   : > { %v2284_v35 = vpop.f32.mrb[28].mxu1  ;;  %v2196_v36 = vpop.f32.mrb[28].mxu0 }
 0x133   : > { %v2285_v37 = vpop.f32.mrb[29].mxu1  ;;  %v2197_v40 = vpop.f32.mrb[29].mxu0 }
 0x134   : > { %v2286_v41 = vadd.f32 %v2285_v37, %v2284_v35  ;;  %v2287_v43 = vpop.f32.mrb[30].mxu1  ;;  %v2198_v44 = vadd.f32 %v2197_v40, %v2196_v36  ;;  %v2199_v45 = vpop.f32.mrb[30].mxu0 }
 0x135   : > { %v2288_v46 = vpop.f32.mrb[31].mxu1  ;;  %v2200_v47 = vpop.f32.mrb[31].mxu0 }
 0x136   : > { %v2289_v49 = vadd.f32 %v2288_v46, %v2287_v43  ;;  %v2201_v50 = vadd.f32 %v2200_v47, %v2199_v45  ;;  %v2938_v51 = vadd.f32 %v2286_v41, %v1127_v22  ;;  %v1151_v43 = vadd.f32 %v2192_v23, %v2916_v42 }
 0x138   : > { %v2940_v52 = vadd.f32 %v2289_v49, %v1130_v27 }
 0x13a   : > { %v2290_v53 = vpop.f32.mrb[32].mxu1  ;;  %v2202_v57 = vpop.f32.mrb[32].mxu0 }
 0x13b   : > { %v2291_v58 = vpop.f32.mrb[33].mxu1  ;;  %v2203_v59 = vpop.f32.mrb[33].mxu0 }
 0x13c   : > { %v2292_v61 = vadd.f32 %v2291_v58, %v2290_v53  ;;  %v2293_v62 = vpop.f32.mrb[34].mxu1  ;;  %v2204_v63 = vadd.f32 %v2203_v59, %v2202_v57  ;;  %v2205_v0 = vpop.f32.mrb[34].mxu0  ;;  %v1154_v53 = vadd.f32 %v2195_v30, %v2916_v42 }
 0x13d   : > { %v2294_v4 = vpop.f32.mrb[35].mxu1  ;;  %v2206_v5 = vpop.f32.mrb[35].mxu0 }
 0x13e   : > { %v2295_v6 = vadd.f32 %v2294_v4, %v2293_v62  ;;  %v2944_v3 = vadd.f32 %v2206_v5, %v2205_v0  ;;  %v2946_v7 = vadd.f32 %v2292_v61, %v1135_v34  ;;  %v1159_v4 = vadd.f32 %v2198_v44, %v2916_v42 }
 0x140   : > { %v2948_v13 = vadd.f32 %v2295_v6, %v1138_v39 }
 0x142   : > { %v2296_v16 = vpop.f32.mrb[36].mxu1  ;;  %v2208_v17 = vpop.f32.mrb[36].mxu0 }
 0x143   : > { %v2297_v18 = vpop.f32.mrb[37].mxu1  ;;  %v2209_v10 = vpop.f32.mrb[37].mxu0 }
 0x144   : > { %v2298_v19 = vadd.f32 %v2297_v18, %v2296_v16  ;;  %v2299_v21 = vpop.f32.mrb[38].mxu1  ;;  %v2951_v24 = vadd.f32 %v2209_v10, %v2208_v17  ;;  %v2211_v25 = vpop.f32.mrb[38].mxu0  ;;  %v1162_v18 = vadd.f32 %v2201_v50, %v2916_v42 }
 0x145   : > { %v2300_v28 = vpop.f32.mrb[39].mxu1  ;;  %v2212_v54 = vpop.f32.mrb[39].mxu0 }
 0x146   : > { %v2301_v29 = vadd.f32 %v2300_v28, %v2299_v21  ;;  %v2954_v35 = vadd.f32 %v2212_v54, %v2211_v25  ;;  %v2956_v36 = vadd.f32 %v2298_v19, %v1143_v48 }
 0x148   : > { %v2958_v37 = vadd.f32 %v2301_v29, %v1146_v15  ;;  %v1167_v29 = vadd.f32 %v2204_v63, %v2916_v42 }
 0x14a   : > { %v2302_v40 = vpop.f32.mrb[40].mxu1  ;;  %v2214_v22 = vpop.f32.mrb[40].mxu0 }
 0x14b   : > { %v2303_v41 = vpop.f32.mrb[41].mxu1  ;;  %v2215_v1 = vpop.f32.mrb[41].mxu0 }
 0x14c   : > { %v2304_v45 = vadd.f32 %v2303_v41, %v2302_v40  ;;  %v2305_v46 = vpop.f32.mrb[42].mxu1  ;;  %v2961_v47 = vadd.f32 %v2215_v1, %v2214_v22  ;;  %v2217_v27 = vpop.f32.mrb[42].mxu0 }
 0x14d   : > { %v2306_v49 = vpop.f32.mrb[43].mxu1  ;;  %v2218_v9 = vpop.f32.mrb[43].mxu0 }
 0x14e   : > { %v2307_v57 = vadd.f32 %v2306_v49, %v2305_v46  ;;  %v2964_v58 = vadd.f32 %v2218_v9, %v2217_v27  ;;  %v2966_v59 = vadd.f32 %v2304_v45, %v1151_v43  ;;  %v1170_v46 = vadd.f32 %v2944_v3, %v2916_v42 }
 0x150   : > { %v2968_v34 = vadd.f32 %v2307_v57, %v1154_v53 }
 0x152   : > { %v2308_v61 = vpop.f32.mrb[44].mxu1  ;;  %v2220_v62 = vpop.f32.mrb[44].mxu0 }
 0x153   : > { %v2309_v0 = vpop.f32.mrb[45].mxu1  ;;  %v2221_v23 = vpop.f32.mrb[45].mxu0 }
 0x154   : > { %v2310_v5 = vadd.f32 %v2309_v0, %v2308_v61  ;;  %v2311_v39 = vpop.f32.mrb[46].mxu1  ;;  %v2971_v6 = vadd.f32 %v2221_v23, %v2220_v62  ;;  %v2223_v16 = vpop.f32.mrb[46].mxu0 }
 0x155   : > { %v2312_v17 = vpop.f32.mrb[47].mxu1  ;;  %v2224_v30 = vpop.f32.mrb[47].mxu0 }
 0x156   : > { %v2313_v10 = vadd.f32 %v2312_v17, %v2311_v39  ;;  %v2974_v48 = vadd.f32 %v2224_v30, %v2223_v16  ;;  %v2976_v19 = vadd.f32 %v2310_v5, %v1159_v4  ;;  %v1175_v4 = vadd.f32 %v2951_v24, %v2916_v42 }
 0x158   : > { %v2978_v21 = vadd.f32 %v2313_v10, %v1162_v18 }
 0x15a   : > { %v2314_v25 = vpop.f32.mrb[48].mxu1  ;;  %v2404_v28 = vpop.f32.mrb[48].mxu0 }
 0x15b   : > { %v1433_v44 = vadd.f32 %v2404_v28, %v2926_v11  ;;  %v2315_v54 = vpop.f32.mrb[49].mxu1  ;;  %v1424_v15 = vpop.f32.mrb[49].mxu0 }
 0x15c   : > { %v2316_v40 = vadd.f32 %v2315_v54, %v2314_v25  ;;  %v1425_v22 = vadd.f32 %v1424_v15, %v2920_v55  ;;  %v2317_v41 = vpop.f32.mrb[50].mxu1  ;;  %v2405_v50 = vpop.f32.mrb[50].mxu0  ;;  %v1178_v25 = vadd.f32 %v2954_v35, %v2916_v42 }
 0x15d   : > { %v1436_v1 = vadd.f32 %v2405_v50, %v2928_v12  ;;  %v2318_v43 = vpop.f32.mrb[51].mxu1  ;;  %v1427_v45 = vpop.f32.mrb[51].mxu0  ;;  %v1553_v9 = vmax.f32 %v1433_v44, 0.0 }
 0x15e   : > { %v2319_v27 = vadd.f32 %v2318_v43, %v2317_v41  ;;  %v1428_v11 = vadd.f32 %v1427_v45, %v2922_v56  ;;  %v2988_v49 = vadd.f32 %v2316_v40, %v1167_v29  ;;  %v1551_v53 = vmax.f32 %v1425_v22, 0.0 }
 0x15f   : > { %v1554_v63 = vmax.f32 %v1436_v1, 0.0 }
 0x160   : > { %v1552_v55 = vmax.f32 %v1428_v11, 0.0  ;;  %v2995_v12 = vadd.f32 %v2319_v27, %v1170_v46 }
 0x161   : > { %v2051_v57 = vpack.c.bf16 %v1554_v63, %v1553_v9 }
 0x162   : > { %v2046_v3 = vpack.c.bf16 %v1552_v55, %v1551_v53  ;;  %v2320_v61 = vpop.f32.mrb[52].mxu1  ;;  %v2408_v62 = vpop.f32.mrb[52].mxu0  ;;  %v1186_v53 = vadd.f32 %v2964_v58, %v2916_v42 }
 0x163   : > { %2123 = vst [vmem:[%s2993_s12 + $0x8] sm:$0xff] %v2051_v57   ;;  %v1449_v56 = vadd.f32 %v2408_v62, %v2938_v51  ;;  %v2321_v0 = vpop.f32.mrb[53].mxu1  ;;  %v1440_v23 = vpop.f32.mrb[53].mxu0 }
 0x164   : > { %2047 = vst [vmem:[%s2993_s12] sm:$0xff] %v2046_v3   ;;  %v2322_v5 = vadd.f32 %v2321_v0, %v2320_v61  ;;  %v1441_v39 = vadd.f32 %v1440_v23, %v2932_v31  ;;  %v2323_v16 = vpop.f32.mrb[54].mxu1  ;;  %v2409_v17 = vpop.f32.mrb[54].mxu0 }
 0x165   : > { %v1452_v30 = vadd.f32 %v2409_v17, %v2940_v52  ;;  %v2324_v18 = vpop.f32.mrb[55].mxu1  ;;  %v1443_v10 = vpop.f32.mrb[55].mxu0  ;;  %v1557_v24 = vmax.f32 %v1449_v56, 0.0 }
 0x166   : > { %v2325_v51 = vadd.f32 %v2324_v18, %v2323_v16  ;;  %v1444_v28 = vadd.f32 %v1443_v10, %v2934_v33  ;;  %v3007_v44 = vadd.f32 %v2322_v5, %v1175_v4  ;;  %v1555_v15 = vmax.f32 %v1441_v39, 0.0 }
 0x167   : > { %v1558_v54 = vmax.f32 %v1452_v30, 0.0  ;;  %v1183_v33 = vadd.f32 %v2961_v47, %v2916_v42 }
 0x168   : > { %v1556_v31 = vmax.f32 %v1444_v28, 0.0  ;;  %v3009_v29 = vadd.f32 %v2325_v51, %v1178_v25  ;;  %v1194_v51 = vadd.f32 %v2974_v48, %v2916_v42  ;;  %v1199_v48 = vadd.f32 %v2897_v60, %v2916_v42 }
 0x169   : > { %v2061_v40 = vpack.c.bf16 %v1558_v54, %v1557_v24 }
 0x16a   : > { %v2056_v52 = vpack.c.bf16 %v1556_v31, %v1555_v15  ;;  %v2326_v22 = vpop.f32.mrb[56].mxu1  ;;  %v2412_v41 = vpop.f32.mrb[56].mxu0 }
 0x16b   : > { %2125 = vst [vmem:[%s2993_s12 + $0x18] sm:$0xff] %v2061_v40   ;;  %v1465_v50 = vadd.f32 %v2412_v41, %v2956_v36  ;;  %v2327_v35 = vpop.f32.mrb[57].mxu1  ;;  %v1456_v1 = vpop.f32.mrb[57].mxu0 }
 0x16c   : > { %2124 = vst [vmem:[%s2993_s12 + $0x10] sm:$0xff] %v2056_v52   ;;  %v2328_v43 = vadd.f32 %v2327_v35, %v2326_v22  ;;  %v1457_v45 = vadd.f32 %v1456_v1, %v2946_v7  ;;  %v2329_v46 = vpop.f32.mrb[58].mxu1  ;;  %v2413_v27 = vpop.f32.mrb[58].mxu0 }
 0x16d   : > { %v1468_v11 = vadd.f32 %v2413_v27, %v2958_v37  ;;  %v2330_v9 = vpop.f32.mrb[59].mxu1  ;;  %v1459_v63 = vpop.f32.mrb[59].mxu0  ;;  %v1561_v47 = vmax.f32 %v1465_v50, 0.0 }
 0x16e   : > { %v2331_v36 = vadd.f32 %v2330_v9, %v2329_v46  ;;  %v1460_v55 = vadd.f32 %v1459_v63, %v2948_v13  ;;  %v3021_v57 = vadd.f32 %v2328_v43, %v1183_v33  ;;  %v1559_v61 = vmax.f32 %v1457_v45, 0.0 }
 0x16f   : > { %v1562_v3 = vmax.f32 %v1468_v11, 0.0  ;;  %v1191_v13 = vadd.f32 %v2971_v6, %v2916_v42  ;;  %v1202_v11 = vadd.f32 %v2899_v2, %v2916_v42  ;;  %v1207_v2 = vadd.f32 %v2901_v8, %v2916_v42 }
 0x170   : > { %v1560_v7 = vmax.f32 %v1460_v55, 0.0  ;;  %v3023_v62 = vadd.f32 %v2331_v36, %v1186_v53 }
 0x171   : > { %v2071_v56 = vpack.c.bf16 %v1562_v3, %v1561_v47 }
 0x172   : > { %v2066_v37 = vpack.c.bf16 %v1560_v7, %v1559_v61  ;;  %v2332_v0 = vpop.f32.mrb[60].mxu1  ;;  %v2416_v23 = vpop.f32.mrb[60].mxu0 }
 0x173   : > { %2127 = vst [vmem:[%s2993_s12 + $0x28] sm:$0xff] %v2071_v56   ;;  %v1481_v4 = vadd.f32 %v2416_v23, %v2976_v19  ;;  %v2333_v58 = vpop.f32.mrb[61].mxu1  ;;  %v1472_v5 = vpop.f32.mrb[61].mxu0 }
 0x174   : > { %2126 = vst [vmem:[%s2993_s12 + $0x20] sm:$0xff] %v2066_v37   ;;  %v2334_v39 = vadd.f32 %v2333_v58, %v2332_v0  ;;  %v1473_v16 = vadd.f32 %v1472_v5, %v2966_v59  ;;  %v2335_v17 = vpop.f32.mrb[62].mxu1  ;;  %v2417_v30 = vpop.f32.mrb[62].mxu0 }
 0x175   : > { %v1484_v18 = vadd.f32 %v2417_v30, %v2978_v21  ;;  %v2336_v10 = vpop.f32.mrb[63].mxu1  ;;  %v1475_v25 = vpop.f32.mrb[63].mxu0  ;;  %v1565_v6 = vmax.f32 %v1481_v4, 0.0 }
 0x176   : > { %v2337_v19 = vadd.f32 %v2336_v10, %v2335_v17  ;;  %v1476_v28 = vadd.f32 %v1475_v25, %v2968_v34  ;;  %v1352_v24 = vadd.f32 %v2334_v39, %v1191_v13  ;;  %v1563_v15 = vmax.f32 %v1473_v16, 0.0 }
 0x177   : > { %v1566_v54 = vmax.f32 %v1484_v18, 0.0  ;;  %v1210_v39 = vadd.f32 %v2903_v14, %v2916_v42  ;;  %v1215_v14 = vadd.f32 %v2905_v20, %v2916_v42 }
 0x178   : > { %v1564_v31 = vmax.f32 %v1476_v28, 0.0  ;;  %v1355_v59 = vadd.f32 %v2337_v19, %v1194_v51 }
 0x179   : > { %v2081_v40 = vpack.c.bf16 %v1566_v54, %v1565_v6 }
 0x17a   : > { %v2076_v52 = vpack.c.bf16 %v1564_v31, %v1563_v15  ;;  %v2338_v22 = vpop.f32.mrb[64].mxu1  ;;  %v2420_v21 = vpop.f32.mrb[64].mxu0 }
 0x17b   : > { %2129 = vst [vmem:[%s2993_s12 + $0x38] sm:$0xff] %v2081_v40   ;;  %v1497_v41 = vadd.f32 %v2420_v21, %v3007_v44  ;;  %v2339_v50 = vpop.f32.mrb[65].mxu1  ;;  %v1488_v35 = vpop.f32.mrb[65].mxu0 }
 0x17c   : > { %2128 = vst [vmem:[%s2993_s12 + $0x30] sm:$0xff] %v2076_v52   ;;  %v2340_v34 = vadd.f32 %v2339_v50, %v2338_v22  ;;  %v1489_v1 = vadd.f32 %v1488_v35, %v2988_v49  ;;  %v2341_v33 = vpop.f32.mrb[66].mxu1  ;;  %v2421_v43 = vpop.f32.mrb[66].mxu0 }
 0x17d   : > { %v1500_v45 = vadd.f32 %v2421_v43, %v3009_v29  ;;  %v2342_v46 = vpop.f32.mrb[67].mxu1  ;;  %v1491_v27 = vpop.f32.mrb[67].mxu0  ;;  %v1569_v60 = vmax.f32 %v1497_v41, 0.0  ;;  %v1218_v41 = vadd.f32 %v2907_v26, %v2916_v42 }
 0x17e   : > { %v2343_v44 = vadd.f32 %v2342_v46, %v2341_v33  ;;  %v1492_v9 = vadd.f32 %v1491_v27, %v2995_v12  ;;  %v1360_v63 = vadd.f32 %v2340_v34, %v1199_v48  ;;  %v1567_v36 = vmax.f32 %v1489_v1, 0.0 }
 0x17f   : > { %v1570_v53 = vmax.f32 %v1500_v45, 0.0 }
 0x180   : > { %v1568_v55 = vmax.f32 %v1492_v9, 0.0  ;;  %v1363_v49 = vadd.f32 %v2343_v44, %v1202_v11 }
 0x181   : > { %v2091_v47 = vpack.c.bf16 %v1570_v53, %v1569_v60 }
 0x182   : > { %v2086_v3 = vpack.c.bf16 %v1568_v55, %v1567_v36  ;;  %v2344_v61 = vpop.f32.mrb[68].mxu1  ;;  %v2424_v29 = vpop.f32.mrb[68].mxu0 }
 0x183   : > { %2131 = vst [vmem:[%s2993_s12 + $0x48] sm:$0xff] %v2091_v47   ;;  %v1513_v7 = vadd.f32 %v2424_v29, %v1352_v24  ;;  %v2345_v56 = vpop.f32.mrb[69].mxu1  ;;  %v1504_v37 = vpop.f32.mrb[69].mxu0  ;;  %v1226_v47 = vadd.f32 %v2911_v38, %v2916_v42 }
 0x184   : > { %2130 = vst [vmem:[%s2993_s12 + $0x40] sm:$0xff] %v2086_v3   ;;  %v2346_v12 = vadd.f32 %v2345_v56, %v2344_v61  ;;  %v1505_v0 = vadd.f32 %v1504_v37, %v3021_v57  ;;  %v2347_v23 = vpop.f32.mrb[70].mxu1  ;;  %v2425_v4 = vpop.f32.mrb[70].mxu0 }
 0x185   : > { %v1516_v58 = vadd.f32 %v2425_v4, %v1355_v59  ;;  %v2348_v5 = vpop.f32.mrb[71].mxu1  ;;  %v1507_v13 = vpop.f32.mrb[71].mxu0  ;;  %v1573_v18 = vmax.f32 %v1513_v7, 0.0 }
 0x186   : > { %v2349_v16 = vadd.f32 %v2348_v5, %v2347_v23  ;;  %v1508_v17 = vadd.f32 %v1507_v13, %v3023_v62  ;;  %v1368_v30 = vadd.f32 %v2346_v12, %v1207_v2  ;;  %v1571_v10 = vmax.f32 %v1505_v0, 0.0 }
 0x187   : > { %v1574_v8 = vmax.f32 %v1516_v58, 0.0 }
 0x188   : > { %v1572_v25 = vmax.f32 %v1508_v17, 0.0  ;;  %v1371_v51 = vadd.f32 %v2349_v16, %v1210_v39 }
 0x189   : > { %v2101_v57 = vpack.c.bf16 %v1574_v8, %v1573_v18 }
 0x18a   : > { %v2096_v19 = vpack.c.bf16 %v1572_v25, %v1571_v10  ;;  %v2350_v28 = vpop.f32.mrb[72].mxu1  ;;  %v2428_v24 = vpop.f32.mrb[72].mxu0 }
 0x18b   : > { %2133 = vst [vmem:[%s2993_s12 + $0x58] sm:$0xff] %v2101_v57   ;;  %v1529_v6 = vadd.f32 %v2428_v24, %v1368_v30  ;;  %v2351_v54 = vpop.f32.mrb[73].mxu1  ;;  %v1520_v15 = vpop.f32.mrb[73].mxu0 }
 0x18c   : > { %2132 = vst [vmem:[%s2993_s12 + $0x50] sm:$0xff] %v2096_v19   ;;  %v2352_v62 = vadd.f32 %v2351_v54, %v2350_v28  ;;  %v1521_v31 = vadd.f32 %v1520_v15, %v1360_v63  ;;  %v2353_v59 = vpop.f32.mrb[74].mxu1  ;;  %v2429_v40 = vpop.f32.mrb[74].mxu0  ;;  %v1223_v63 = vadd.f32 %v2909_v32, %v2916_v42 }
 0x18d   : > { %v1532_v52 = vadd.f32 %v2429_v40, %v1371_v51  ;;  %v2354_v22 = vpop.f32.mrb[75].mxu1  ;;  %v1523_v21 = vpop.f32.mrb[75].mxu0  ;;  %v1577_v34 = vmax.f32 %v1529_v6, 0.0 }
 0x18e   : > { %v2355_v50 = vadd.f32 %v2354_v22, %v2353_v59  ;;  %v1524_v35 = vadd.f32 %v1523_v21, %v1363_v49  ;;  %v1376_v48 = vadd.f32 %v2352_v62, %v1215_v14  ;;  %v1575_v33 = vmax.f32 %v1521_v31, 0.0 }
 0x18f   : > { %v1578_v1 = vmax.f32 %v1532_v52, 0.0 }
 0x190   : > { %v1576_v20 = vmax.f32 %v1524_v35, 0.0  ;;  %v1379_v43 = vadd.f32 %v2355_v50, %v1218_v41 }
 0x191   : > { %v2111_v45 = vpack.c.bf16 %v1578_v1, %v1577_v34 }
 0x192   : > { %v2106_v46 = vpack.c.bf16 %v1576_v20, %v1575_v33  ;;  %v2356_v27 = vpop.f32.mrb[76].mxu1  ;;  %v2432_v11 = vpop.f32.mrb[76].mxu0 }
 0x193   : > { %2135 = vst [vmem:[%s2993_s12 + $0x68] sm:$0xff] %v2111_v45   ;;  %v2357_v44 = vpop.f32.mrb[77].mxu1  ;;  %v1536_v9 = vpop.f32.mrb[77].mxu0 }
 0x194   : > { %2134 = vst [vmem:[%s2993_s12 + $0x60] sm:$0xff] %v2106_v46   ;;  %v2358_v26 = vadd.f32 %v2357_v44, %v2356_v27  ;;  %v1537_v60 = vadd.f32 %v1536_v9, %v1376_v48  ;;  %v2359_v53 = vpop.f32.mrb[78].mxu1  ;;  %v2433_v36 = vpop.f32.mrb[78].mxu0 }
 0x195   : > { %v2360_v55 = vpop.f32.mrb[79].mxu1  ;;  %v1539_v49 = vpop.f32.mrb[79].mxu0 }
 0x196   : > { %v1384_v3 = vadd.f32 %v2358_v26, %v1223_v63  ;;  %v2361_v61 = vadd.f32 %v2360_v55, %v2359_v53  ;;  %v1540_v29 = vadd.f32 %v1539_v49, %v1379_v43  ;;  %v1579_v56 = vmax.f32 %v1537_v60, 0.0 }
 0x198   : > { %v1545_v7 = vadd.f32 %v2432_v11, %v1384_v3  ;;  %v1387_v37 = vadd.f32 %v2361_v61, %v1226_v47  ;;  %v1580_v2 = vmax.f32 %v1540_v29, 0.0 }
 0x19a   : > { %v1548_v32 = vadd.f32 %v2433_v36, %v1387_v37  ;;  %v2116_v12 = vpack.c.bf16 %v1580_v2, %v1579_v56  ;;  %v1581_v0 = vmax.f32 %v1545_v7, 0.0 }
 0x19c   : > { %v1582_v23 = vmax.f32 %v1548_v32, 0.0  ;;  %2136 = vst [vmem:[%s2993_s12 + $0x70] sm:$0xff] %v2116_v12  }
 0x19e   : > { %v2121_v4 = vpack.c.bf16 %v1582_v23, %v1581_v0 }
 0x1a0   : > { %2137 = vst [vmem:[%s2993_s12 + $0x78] sm:$0xff] %v2121_v4  }
 0x1a1 PF: > { %s13_s14 = sadd.s32 1, %s2649_s14   ;;  %s3080_s12 = smov %s2645_s13 }
 0x1a2   : > { %p10_p5 = scmp.ge.s32.totalorder %s13_s14, 4   ;;  %s3081_s13 = smov %s3083_s15 }
 0x1a4   :  { %12 = sbr.rel (!%p10_p5) target bundleno = 2 (0x2), region = 68 }

// kernel: tile.38
= control target key start
LH: loop header
LB: loop body
LE: loop exit
PB: predicated region body
PF: predicated region fallthrough
CT: control target
= control target key end

     0   :  { %s22_s0 = inlined_call_operand.vmem [shape: f32[3], index: 0, kind: input, shape index: {}]   ;;  %s23_s1 = inlined_call_operand.vmem [shape: f32[4,3], index: 1, kind: output, shape index: {}]  }
   0x1   :  { %v4_v0 = vld [vmem:[%s22_s0] ss:$0 sm:$0xff] }
   0x2   :  { %5 = vst [vmem:[%s23_s1] sm:$0xf] %v4_v0 }

// kernel: tile.39
= control target key start
LH: loop header
LB: loop body
LE: loop exit
PB: predicated region body
PF: predicated region fallthrough
CT: control target
= control target key end

     0   :  { %vm7_vm0 = vcmask 23552   ;;  %s37_s8 = smov 3   ;;  %s38_s9 = smov 6   ;;  %vm13_vm1 = vcmask 97352   ;;  %vm19_vm2 = vcmask 72752   ;;  %vm25_vm3 = vcmask 48152   ;;  %s55_s0 = inlined_call_operand.vmem [shape: f32[4,3], index: 0, kind: input, shape index: {}]   ;;  %s56_s1 = inlined_call_operand.vmem [shape: f32[1,12], index: 1, kind: output, shape index: {}]  }
   0x1   :  { %v4_v0 = vld [vmem:[%s55_s0] sm:$0xf]  ;;  %s36_s0 = smov 9  }
   0x2   :  { %5 = vst [vmem:[#allocation1] sm:$0xf] %v4_v0 }
   0x9   :  { %v10_v1 = vld [vmem:[#allocation1 + $0x3] sm:$0x1]   ;;  %v22_v2 = vld [vmem:[#allocation1 + $0x1] sm:$0x1]   ;;  %v6_v3 = vld [vmem:[#allocation1] sm:$0x1]  }
   0xa   :  { %11 = vrot.lane.b32.xlu0 %v10_v1, %s36_s0  ;;  %23 = vrot.lane.b32.xlu1 %v22_v2, %s37_s8  ;;  %v16_v4 = vld [vmem:[#allocation1 + $0x2] sm:$0x1]   ;;  %8 = vst.msk [vmem:[#allocation0] sm:$0x1] %vm7_vm0, %v6_v3  }
   0xe   :  { %17 = vrot.lane.b32.xlu0 %v16_v4, %s38_s9 }
  0x7c   :  { %v12_v5 = vpop.permute.xlu0 %11   ;;  %v24_v6 = vpop.permute.xlu1 %23  }
  0x7d   :  { %14 = vst.msk [vmem:[#allocation0] sm:$0x1] %vm13_vm1, %v12_v5  }
  0x80   :  { %v18_v7 = vpop.permute.xlu0 %17  }
  0x81   :  { %20 = vst.msk [vmem:[#allocation0] sm:$0x1] %vm19_vm2, %v18_v7  }
  0x82   :  { %26 = vst.msk [vmem:[#allocation0] sm:$0x1] %vm25_vm3, %v24_v6  }
  0x89   :  { %v30_v8 = vld [vmem:[#allocation0] sm:$0x1] }
  0x8a   :  { %32 = vst [vmem:[%s56_s1] sm:$0x1] %v30_v8 }

// kernel: vae_forward.19
= control target key start
LH: loop header
LB: loop body
LE: loop exit
PB: predicated region body
PF: predicated region fallthrough
CT: control target
= control target key end

     0   :  { %s1967_s12 = smov 0   ;;  %s1969_s13 = smov 0   ;;  %s2239_s0 = inlined_call_operand.vmem [shape: bf16[2048,384], index: 0, kind: input, shape index: {}]   ;;  %s2240_s1 = inlined_call_operand.vmem [shape: bf16[384,128], index: 1, kind: input, shape index: {}]   ;;  %s2241_s2 = inlined_call_operand.vmem [shape: f32[1,128], index: 2, kind: input, shape index: {}]   ;;  %s2242_s3 = inlined_call_operand.vmem [shape: f32[2048,128], index: 3, kind: output, shape index: {}]  }
   0x1   :  { %s1971_s14 = smov 0  }
   0x2 LB: > { %s25_s15 = sadd.s32 1, %s1941_s13  ;;  %p1402_p0 = scmp.ge.s32.totalorder %s1945_s14, 1  ;;  %s1945_s14 = sphi %s1971_s14, %s13_s14   ;;  %s1941_s13 = sphi %s1969_s13, %s2244_s13   ;;  %s1937_s12 = sphi %s1967_s12, %s2243_s12  }
   0x3   : > { %p27_p1 = scmp.ge.s32.totalorder %s25_s15, 8  ;;  %p170_p2 = scmp.lt.s32.totalorder %s1945_s14, 9 }
   0x5   : > { %s2246_s15 = smov (%p27_p1, %s25_s15), 0  ;;  %p171_p3 = pnand %p1402_p0, %p170_p2 }
   0x6   : > { %v1707_v0 = vld [vmem:[%s2240_s1 + $0x40] sm:$0xff] (!%p171_p3)   ;;  %s1403_s18 = sshll.u32 (!%p171_p3), %s1937_s12, 5  ;;  %v1709_v2 = vld [vmem:[%s2240_s1 + $0x48] sm:$0xff] (!%p171_p3)   ;;  %v1711_v4 = vld [vmem:[%s2240_s1 + $0x50] sm:$0xff] (!%p171_p3)  }
   0x7   : > { %174 = sbr.rel (%p171_p3) target bundleno = 387 (0x183), region = 32  ;;  %v1708_v1 = vld [vmem:[%s2240_s1] sm:$0xff] (!%p171_p3)   ;;  %1482 = vmatprep.subr.bf16.mxu0 (!%p171_p3), %v1707_v0  ;;  %1666 = vmatprep.subr.bf16.mxu1 (!%p171_p3), %v1707_v0  ;;  %p206_p4 = scmp.lt.s32.totalorder (!%p171_p3), %s1403_s18, 255  ;;  %v1710_v3 = vld [vmem:[%s2240_s1 + $0x8] sm:$0xff] (!%p171_p3)   ;;  %v1712_v5 = vld [vmem:[%s2240_s1 + $0x10] sm:$0xff] (!%p171_p3)  }
   0x8   : > { %1483 = vmatpush3.bf16.msra.mxu0 (!%p171_p3), %v1708_v1  ;;  %1674 = vmatpush3.bf16.msra.mxu1 (!%p171_p3), %v1708_v1  ;;  %v1713_v6 = vld [vmem:[%s2240_s1 + $0x58] sm:$0xff] (!%p171_p3)   ;;  %v1715_v8 = vld [vmem:[%s2240_s1 + $0x60] sm:$0xff] (!%p171_p3)   ;;  %v1717_v10 = vld [vmem:[%s2240_s1 + $0x68] sm:$0xff] (!%p171_p3)  }
   0x9   : > { %1484 = vmatprep.subr.bf16.mxu0 (!%p171_p3), %v1709_v2  ;;  %1667 = vmatprep.subr.bf16.mxu1 (!%p171_p3), %v1709_v2  ;;  %v1714_v7 = vld [vmem:[%s2240_s1 + $0x18] sm:$0xff] (!%p171_p3)   ;;  %v1716_v9 = vld [vmem:[%s2240_s1 + $0x20] sm:$0xff] (!%p171_p3)   ;;  %v1718_v13 = vld [vmem:[%s2240_s1 + $0x28] sm:$0xff] (!%p171_p3)  }
   0xa   : > { %v1719_v14 = vld [vmem:[%s2240_s1 + $0x70] sm:$0xff] (!%p171_p3)   ;;  %v1721_v16 = vld [vmem:[%s2240_s1 + $0x78] sm:$0xff] (!%p171_p3)   ;;  %v1729_v18 = vld [vmem:[%s2240_s1 + $0x80] sm:$0xff] (!%p171_p3)  }
   0xb   : > { %v1720_v15 = vld [vmem:[%s2240_s1 + $0x30] sm:$0xff] (!%p171_p3)   ;;  %v1722_v17 = vld [vmem:[%s2240_s1 + $0x38] sm:$0xff] (!%p171_p3)   ;;  %v1730_v22 = vld [vmem:[%s2240_s1 + $0x88] sm:$0xff] (!%p171_p3)  }
   0xc   : > { %1485 = vmatpush3.bf16.msra.mxu0 (!%p171_p3), %v1710_v3  ;;  %1675 = vmatpush3.bf16.msra.mxu1 (!%p171_p3), %v1710_v3  ;;  %v1737_v25 = vld [vmem:[%s2240_s1 + $0x90] sm:$0xff] (!%p171_p3)   ;;  %v1738_v27 = vld [vmem:[%s2240_s1 + $0x98] sm:$0xff] (!%p171_p3)   ;;  %v1745_v30 = vld [vmem:[%s2240_s1 + $0xa0] sm:$0xff] (!%p171_p3)  }
   0xd   : > { %1486 = vmatprep.subr.bf16.mxu0 (!%p171_p3), %v1711_v4  ;;  %1668 = vmatprep.subr.bf16.mxu1 (!%p171_p3), %v1711_v4  ;;  %v1746_v33 = vld [vmem:[%s2240_s1 + $0xa8] sm:$0xff] (!%p171_p3)   ;;  %v1753_v36 = vld [vmem:[%s2240_s1 + $0xb0] sm:$0xff] (!%p171_p3)   ;;  %v1754_v40 = vld [vmem:[%s2240_s1 + $0xb8] sm:$0xff] (!%p171_p3)  }
   0xe   : > { %s2248_s18 = smov (!%p206_p4, %s1403_s18), 255 }
   0xf   : > { %s1682_s4 = smul.u32 12, %s2248_s18  ;;  %s1406_s25 = sshll.u32 %s2248_s18, 3 }
  0x10   : > { %1487 = vmatpush3.bf16.msra.mxu0 %v1712_v5  ;;  %1676 = vmatpush3.bf16.msra.mxu1 %v1712_v5  ;;  %s2152_s27 = scalar_lea.vmem %s2242_s3, %s1406_s25 }
  0x11   : > { %1488 = vmatprep.subr.bf16.mxu0 %v1713_v6  ;;  %1669 = vmatprep.subr.bf16.mxu1 %v1713_v6  ;;  %s2018_s11 = scalar_lea.vmem %s2239_s0, %s1682_s4 }
  0x12   : > { %v1725_v11 = vld [vmem:[%s2018_s11 + $0x4] ss:$12 sps:$4 sm:$0xff]   ;;  %v1723_v19 = vld [vmem:[%s2018_s11] ss:$12 sps:$4 sm:$0xff]   ;;  %v1731_v21 = vld [vmem:[%s2018_s11 + $0x1c] ss:$12 sps:$4 sm:$0xff]  }
  0x13   : > { %v1728_v12 = vld [vmem:[%s2018_s11 + $0x124] ss:$12 sps:$4 sm:$0xff]   ;;  %780 = vmatprep.mubr.bf16.mxu0 %v1725_v11  ;;  %v1726_v20 = vld [vmem:[%s2018_s11 + $0x120] ss:$12 sps:$4 sm:$0xff]   ;;  %v1733_v23 = vld [vmem:[%s2018_s11 + $0x13c] ss:$12 sps:$4 sm:$0xff]  }
  0x14   : > { %1489 = vmatpush3.bf16.msra.mxu0 %v1714_v7  ;;  %1677 = vmatpush3.bf16.msra.mxu1 %v1714_v7  ;;  %v1735_v24 = vld [vmem:[%s2018_s11 + $0x18] ss:$12 sps:$4 sm:$0xff]   ;;  %v1739_v28 = vld [vmem:[%s2018_s11 + $0x34] ss:$12 sps:$4 sm:$0xff]   ;;  %v1743_v31 = vld [vmem:[%s2018_s11 + $0x30] ss:$12 sps:$4 sm:$0xff]  }
  0x15   : > { %1490 = vmatprep.subr.bf16.mxu0 %v1715_v8  ;;  %1670 = vmatprep.subr.bf16.mxu1 %v1715_v8  ;;  %v1736_v26 = vld [vmem:[%s2018_s11 + $0x138] ss:$12 sps:$4 sm:$0xff]   ;;  %v1741_v29 = vld [vmem:[%s2018_s11 + $0x154] ss:$12 sps:$4 sm:$0xff]   ;;  %v1744_v32 = vld [vmem:[%s2018_s11 + $0x150] ss:$12 sps:$4 sm:$0xff]  }
  0x16   : > { %876 = vmatprep.mubr.bf16.mxu1 %v1728_v12  ;;  %v1747_v34 = vld [vmem:[%s2018_s11 + $0x4c] ss:$12 sps:$4 sm:$0xff]   ;;  %v1751_v37 = vld [vmem:[%s2018_s11 + $0x48] ss:$12 sps:$4 sm:$0xff]   ;;  %v1755_v39 = vld [vmem:[%s2018_s11 + $0x64] ss:$12 sps:$4 sm:$0xff]  }
  0x17   : > { %v1749_v35 = vld [vmem:[%s2018_s11 + $0x16c] ss:$12 sps:$4 sm:$0xff]   ;;  %v1752_v38 = vld [vmem:[%s2018_s11 + $0x168] ss:$12 sps:$4 sm:$0xff]   ;;  %v1764_v47 = vld [vmem:[%s2018_s11 + $0x50] ss:$12 sps:$4 sm:$0xff]  }
  0x18   : > { %1491 = vmatpush3.bf16.msra.mxu0 %v1716_v9  ;;  %1678 = vmatpush3.bf16.msra.mxu1 %v1716_v9  ;;  %v1757_v41 = vld [vmem:[%s2018_s11 + $0x8] ss:$12 sps:$4 sm:$0xff]   ;;  %v1758_v42 = vld [vmem:[%s2018_s11 + $0x60] ss:$12 sps:$4 sm:$0xff]   ;;  %v1762_v45 = vld [vmem:[%s2018_s11 + $0x38] ss:$12 sps:$4 sm:$0xff]  }
  0x19   : > { %1492 = vmatprep.subr.bf16.mxu0 %v1717_v10  ;;  %1671 = vmatprep.subr.bf16.mxu1 %v1717_v10  ;;  %v1759_v43 = vld [vmem:[%s2018_s11 + $0x20] ss:$12 sps:$4 sm:$0xff]   ;;  %v1760_v44 = vld [vmem:[%s2018_s11 + $0x7c] ss:$12 sps:$4 sm:$0xff]   ;;  %v1763_v46 = vld [vmem:[%s2018_s11 + $0x78] ss:$12 sps:$4 sm:$0xff]  }
  0x1a   : > { %v1765_v48 = vld [vmem:[%s2018_s11 + $0x94] ss:$12 sps:$4 sm:$0xff]   ;;  %v1768_v50 = vld [vmem:[%s2018_s11 + $0x90] ss:$12 sps:$4 sm:$0xff]   ;;  %v1770_v52 = vld [vmem:[%s2018_s11 + $0xac] ss:$12 sps:$4 sm:$0xff]  }
  0x1b   : > { %v1767_v49 = vld [vmem:[%s2018_s11 + $0x68] ss:$12 sps:$4 sm:$0xff]   ;;  %v1769_v51 = vld [vmem:[%s2018_s11 + $0x80] ss:$12 sps:$4 sm:$0xff]   ;;  %v1772_v53 = vld [vmem:[%s2018_s11 + $0x98] ss:$12 sps:$4 sm:$0xff]  }
  0x1c   : > { %1493 = vmatpush3.bf16.msra.mxu0 %v1718_v13  ;;  %1679 = vmatpush3.bf16.msra.mxu1 %v1718_v13  ;;  %v1773_v54 = vld [vmem:[%s2018_s11 + $0xa8] ss:$12 sps:$4 sm:$0xff]   ;;  %v1774_v55 = vld [vmem:[%s2018_s11 + $0xb0] ss:$12 sps:$4 sm:$0xff]   ;;  %v1778_v58 = vld [vmem:[%s2018_s11 + $0xc0] ss:$12 sps:$4 sm:$0xff]  }
  0x1d   : > { %1494 = vmatprep.subr.bf16.mxu0 %v1719_v14  ;;  %1672 = vmatprep.subr.bf16.mxu1 %v1719_v14  ;;  %v1775_v56 = vld [vmem:[%s2018_s11 + $0xc4] ss:$12 sps:$4 sm:$0xff]   ;;  %v1777_v57 = vld [vmem:[%s2018_s11 + $0xc8] ss:$12 sps:$4 sm:$0xff]   ;;  %v1779_v59 = vld [vmem:[%s2018_s11 + $0xe0] ss:$12 sps:$4 sm:$0xff]  }
  0x1e   : > { %v1780_v60 = vld [vmem:[%s2018_s11 + $0xdc] ss:$12 sps:$4 sm:$0xff]   ;;  %v1782_v61 = vld [vmem:[%s2018_s11 + $0xf8] ss:$12 sps:$4 sm:$0xff]   ;;  %v1785_v0 = vld [vmem:[%s2018_s11 + $0xf4] ss:$12 sps:$4 sm:$0xff]  }
  0x1f   : > { %v1783_v62 = vld [vmem:[%s2018_s11 + $0xd8] ss:$12 sps:$4 sm:$0xff]   ;;  %v1784_v63 = vld [vmem:[%s2018_s11 + $0x110] ss:$12 sps:$4 sm:$0xff]   ;;  %v1787_v1 = vld [vmem:[%s2018_s11 + $0x128] ss:$12 sps:$4 sm:$0xff]  }
  0x20   : > { %1495 = vmatpush3.bf16.msra.mxu0 %v1720_v15  ;;  %1680 = vmatpush3.bf16.msra.mxu1 %v1720_v15  ;;  %v1788_v2 = vld [vmem:[%s2018_s11 + $0xf0] ss:$12 sps:$4 sm:$0xff]   ;;  %v1789_v3 = vld [vmem:[%s2018_s11 + $0x140] ss:$12 sps:$4 sm:$0xff]   ;;  %v1792_v5 = vld [vmem:[%s2018_s11 + $0x158] ss:$12 sps:$4 sm:$0xff]  }
  0x21   : > { %1496 = vmatprep.subr.bf16.mxu0 %v1721_v16  ;;  %1673 = vmatprep.subr.bf16.mxu1 %v1721_v16  ;;  %v1790_v4 = vld [vmem:[%s2018_s11 + $0x10c] ss:$12 sps:$4 sm:$0xff]   ;;  %v1793_v6 = vld [vmem:[%s2018_s11 + $0x108] ss:$12 sps:$4 sm:$0xff]   ;;  %v1794_v7 = vld [vmem:[%s2018_s11 + $0x170] ss:$12 sps:$4 sm:$0xff]  }
  0x24   : > { %1497 = vmatpush3.bf16.msra.mxu0 %v1722_v17  ;;  %1681 = vmatpush3.bf16.msra.mxu1 %v1722_v17 }
  0x25   : > { %1618 = vmatprep.subr.bf16.mxu1 %v1729_v18 }
  0x27   : > { %781 = vmatmul.mubr.bf16.vlgmr.msra.gmra.mrb[0].mxu0 %v1723_v19  ;;  %877 = vmatmul.mubr.bf16.vlgmr.msra.gmra.mrb[0].mxu1 %v1726_v20 }
  0x28   : > { %1619 = vmatpush3.bf16.msra.mxu1 %v1729_v18  ;;  %788 = vmatprep.mubr.bf16.mxu0 %v1731_v21 }
  0x29   : > { %1620 = vmatprep.subr.bf16.mxu1 %v1730_v22  ;;  %884 = vmatprep.mubr.bf16.mxu1 %v1733_v23 }
  0x2c   : > { %1621 = vmatpush3.bf16.msra.mxu1 %v1730_v22 }
  0x2d   : > { %1622 = vmatprep.subr.bf16.mxu1 %v1737_v25 }
  0x2f   : > { %789 = vmatmul.mubr.bf16.gmra.mrb[4].mxu0 %v1735_v24  ;;  %885 = vmatmul.mubr.bf16.gmra.mrb[4].mxu1 %v1736_v26 }
  0x30   : > { %1623 = vmatpush3.bf16.msra.mxu1 %v1737_v25  ;;  %796 = vmatprep.mubr.bf16.mxu0 %v1739_v28 }
  0x31   : > { %1624 = vmatprep.subr.bf16.mxu1 %v1738_v27  ;;  %892 = vmatprep.mubr.bf16.mxu1 %v1741_v29 }
  0x34   : > { %1625 = vmatpush3.bf16.msra.mxu1 %v1738_v27 }
  0x35   : > { %1626 = vmatprep.subr.bf16.mxu1 %v1745_v30 }
  0x37   : > { %797 = vmatmul.mubr.bf16.gmra.mrb[8].mxu0 %v1743_v31  ;;  %893 = vmatmul.mubr.bf16.gmra.mrb[8].mxu1 %v1744_v32 }
  0x38   : > { %1627 = vmatpush3.bf16.msra.mxu1 %v1745_v30  ;;  %804 = vmatprep.mubr.bf16.mxu0 %v1747_v34 }
  0x39   : > { %1628 = vmatprep.subr.bf16.mxu1 %v1746_v33  ;;  %900 = vmatprep.mubr.bf16.mxu1 %v1749_v35 }
  0x3c   : > { %1629 = vmatpush3.bf16.msra.mxu1 %v1746_v33 }
  0x3d   : > { %1630 = vmatprep.subr.bf16.mxu1 %v1753_v36 }
  0x3f   : > { %805 = vmatmul.mubr.bf16.gmra.mrb[12].mxu0 %v1751_v37  ;;  %901 = vmatmul.mubr.bf16.gmra.mrb[12].mxu1 %v1752_v38 }
  0x40   : > { %1631 = vmatpush3.bf16.msra.mxu1 %v1753_v36  ;;  %812 = vmatprep.mubr.bf16.mxu0 %v1755_v39 }
  0x41   : > { %1632 = vmatprep.subr.bf16.mxu1 %v1754_v40  ;;  %1634 = vmatprep.mubr.bf16.mxu1 %v1757_v41 }
  0x44   : > { %1633 = vmatpush3.bf16.msra.mxu1 %v1754_v40 }
  0x47   : > { %813 = vmatmul.mubr.bf16.gmra.mrb[16].mxu0 %v1758_v42  ;;  %1635 = vmatmul.mubr.bf16.vlgmr.msra.gmra.mrb[16].mxu1 %v1759_v43 }
  0x48   : > { %820 = vmatprep.mubr.bf16.mxu0 %v1760_v44  ;;  %1638 = vmatprep.mubr.bf16.mxu1 %v1762_v45 }
  0x4f   : > { %821 = vmatmul.mubr.bf16.gmra.mrb[20].mxu0 %v1763_v46  ;;  %1639 = vmatmul.mubr.bf16.gmra.mrb[20].mxu1 %v1764_v47 }
  0x50   : > { %828 = vmatprep.mubr.bf16.mxu0 %v1765_v48  ;;  %1642 = vmatprep.mubr.bf16.mxu1 %v1767_v49 }
  0x57   : > { %829 = vmatmul.mubr.bf16.gmra.mrb[24].mxu0 %v1768_v50  ;;  %1643 = vmatmul.mubr.bf16.gmra.mrb[24].mxu1 %v1769_v51 }
  0x58   : > { %836 = vmatprep.mubr.bf16.mxu0 %v1770_v52  ;;  %1646 = vmatprep.mubr.bf16.mxu1 %v1772_v53 }
  0x5f   : > { %837 = vmatmul.mubr.bf16.gmra.mrb[28].mxu0 %v1773_v54  ;;  %1647 = vmatmul.mubr.bf16.gmra.mrb[28].mxu1 %v1774_v55 }
  0x60   : > { %844 = vmatprep.mubr.bf16.mxu0 %v1775_v56  ;;  %1650 = vmatprep.mubr.bf16.mxu1 %v1777_v57  ;;  %v2132_v56 = vld [vmem:[%s2241_s2] ss:$0 sm:$0xff] }
  0x67   : > { %845 = vmatmul.mubr.bf16.gmra.mrb[32].mxu0 %v1778_v58  ;;  %1651 = vmatmul.mubr.bf16.gmra.mrb[32].mxu1 %v1779_v59 }
  0x68   : > { %852 = vmatprep.mubr.bf16.mxu0 %v1780_v60  ;;  %1654 = vmatprep.mubr.bf16.mxu1 %v1782_v61 }
  0x6f   : > { %853 = vmatmul.mubr.bf16.gmra.mrb[36].mxu0 %v1783_v62  ;;  %1655 = vmatmul.mubr.bf16.gmra.mrb[36].mxu1 %v1784_v63 }
  0x70   : > { %860 = vmatprep.mubr.bf16.mxu0 %v1785_v0  ;;  %1658 = vmatprep.mubr.bf16.mxu1 %v1787_v1 }
  0x77   : > { %861 = vmatmul.mubr.bf16.gmra.mrb[40].mxu0 %v1788_v2  ;;  %1659 = vmatmul.mubr.bf16.gmra.mrb[40].mxu1 %v1789_v3 }
  0x78   : > { %868 = vmatprep.mubr.bf16.mxu0 %v1790_v4  ;;  %1662 = vmatprep.mubr.bf16.mxu1 %v1792_v5 }
  0x7f   : > { %869 = vmatmul.mubr.bf16.gmra.mrb[44].mxu0 %v1793_v6  ;;  %1663 = vmatmul.mubr.bf16.gmra.mrb[44].mxu1 %v1794_v7 }
  0xfa   : > { %v1498_v8 = vpop.f32.mrb[0].mxu0  ;;  %v1570_v9 = vpop.f32.mrb[0].mxu1 }
  0xfb   : > { %v1499_v10 = vpop.f32.mrb[1].mxu0  ;;  %v1571_v11 = vpop.f32.mrb[1].mxu1 }
  0xfc   : > { %v1500_v12 = vadd.f32 %v1499_v10, %v1498_v8  ;;  %v1501_v13 = vpop.f32.mrb[2].mxu0  ;;  %v2113_v14 = vadd.f32 %v1571_v11, %v1570_v9  ;;  %v1573_v15 = vpop.f32.mrb[2].mxu1 }
  0xfd   : > { %v1502_v16 = vpop.f32.mrb[3].mxu0  ;;  %v1574_v17 = vpop.f32.mrb[3].mxu1 }
  0xfe   : > { %v1503_v18 = vadd.f32 %v1502_v16, %v1501_v13  ;;  %v2115_v19 = vadd.f32 %v1574_v17, %v1573_v15  ;;  %v783_v60 = vadd.f32 %v1500_v12, %v2132_v56 }
 0x100   : > { %v786_v5 = vadd.f32 %v1503_v18, %v2132_v56 }
 0x102   : > { %v1504_v20 = vpop.f32.mrb[4].mxu0  ;;  %v1576_v21 = vpop.f32.mrb[4].mxu1 }
 0x103   : > { %v1505_v22 = vpop.f32.mrb[5].mxu0  ;;  %v1577_v23 = vpop.f32.mrb[5].mxu1 }
 0x104   : > { %v1506_v24 = vadd.f32 %v1505_v22, %v1504_v20  ;;  %v1507_v25 = vpop.f32.mrb[6].mxu0  ;;  %v2117_v26 = vadd.f32 %v1577_v23, %v1576_v21  ;;  %v1579_v27 = vpop.f32.mrb[6].mxu1 }
 0x105   : > { %v1508_v28 = vpop.f32.mrb[7].mxu0  ;;  %v1580_v29 = vpop.f32.mrb[7].mxu1 }
 0x106   : > { %v1509_v30 = vadd.f32 %v1508_v28, %v1507_v25  ;;  %v2119_v31 = vadd.f32 %v1580_v29, %v1579_v27  ;;  %v791_v57 = vadd.f32 %v1506_v24, %v2132_v56 }
 0x108   : > { %v794_v0 = vadd.f32 %v1509_v30, %v2132_v56 }
 0x10a   : > { %v1510_v32 = vpop.f32.mrb[8].mxu0  ;;  %v1582_v33 = vpop.f32.mrb[8].mxu1 }
 0x10b   : > { %v1511_v34 = vpop.f32.mrb[9].mxu0  ;;  %v1583_v35 = vpop.f32.mrb[9].mxu1 }
 0x10c   : > { %v1512_v36 = vadd.f32 %v1511_v34, %v1510_v32  ;;  %v1513_v37 = vpop.f32.mrb[10].mxu0  ;;  %v2121_v38 = vadd.f32 %v1583_v35, %v1582_v33  ;;  %v1585_v39 = vpop.f32.mrb[10].mxu1 }
 0x10d   : > { %v1514_v40 = vpop.f32.mrb[11].mxu0  ;;  %v1586_v41 = vpop.f32.mrb[11].mxu1 }
 0x10e   : > { %v1515_v42 = vadd.f32 %v1514_v40, %v1513_v37  ;;  %v2123_v43 = vadd.f32 %v1586_v41, %v1585_v39  ;;  %v799_v18 = vadd.f32 %v1512_v36, %v2132_v56 }
 0x110   : > { %v802_v35 = vadd.f32 %v1515_v42, %v2132_v56 }
 0x112   : > { %v1516_v44 = vpop.f32.mrb[12].mxu0  ;;  %v1588_v45 = vpop.f32.mrb[12].mxu1 }
 0x113   : > { %v1517_v46 = vpop.f32.mrb[13].mxu0  ;;  %v1589_v47 = vpop.f32.mrb[13].mxu1 }
 0x114   : > { %v1518_v48 = vadd.f32 %v1517_v46, %v1516_v44  ;;  %v1519_v49 = vpop.f32.mrb[14].mxu0  ;;  %v2125_v50 = vadd.f32 %v1589_v47, %v1588_v45  ;;  %v1591_v51 = vpop.f32.mrb[14].mxu1 }
 0x115   : > { %v1520_v52 = vpop.f32.mrb[15].mxu0  ;;  %v1592_v53 = vpop.f32.mrb[15].mxu1 }
 0x116   : > { %v1521_v54 = vadd.f32 %v1520_v52, %v1519_v49  ;;  %v2127_v55 = vadd.f32 %v1592_v53, %v1591_v51  ;;  %v807_v21 = vadd.f32 %v1518_v48, %v2132_v56 }
 0x118   : > { %v810_v29 = vadd.f32 %v1521_v54, %v2132_v56 }
 0x11a   : > { %v1522_v58 = vpop.f32.mrb[16].mxu0  ;;  %v1636_v59 = vpop.f32.mrb[16].mxu1 }
 0x11b   : > { %v952_v61 = vadd.f32 %v1636_v59, %v791_v57  ;;  %v1523_v62 = vpop.f32.mrb[17].mxu0  ;;  %v943_v63 = vpop.f32.mrb[17].mxu1 }
 0x11c   : > { %v1524_v1 = vadd.f32 %v1523_v62, %v1522_v58  ;;  %v944_v2 = vadd.f32 %v943_v63, %v783_v60  ;;  %v1525_v3 = vpop.f32.mrb[18].mxu0  ;;  %v1637_v4 = vpop.f32.mrb[18].mxu1 }
 0x11d   : > { %v1072_v6 = vsub.f32 0.0, %v952_v61  ;;  %v955_v7 = vadd.f32 %v1637_v4, %v794_v0  ;;  %v1526_v8 = vpop.f32.mrb[19].mxu0  ;;  %v946_v9 = vpop.f32.mrb[19].mxu1 }
 0x11e   : > { %v1070_v10 = vsub.f32 0.0, %v944_v2  ;;  %v1527_v11 = vadd.f32 %v1526_v8, %v1525_v3  ;;  %v947_v13 = vadd.f32 %v946_v9, %v786_v5  ;;  %v815_v42 = vadd.f32 %v1524_v1, %v2132_v56 }
 0x11f   : > { %v1106_v15 = vmul.f32 1.442695, %v1072_v6  ;;  %v1073_v12 = vsub.f32 0.0, %v955_v7 }
 0x120   : > { %v1102_v16 = vmul.f32 1.442695, %v1070_v10  ;;  %v1071_v17 = vsub.f32 0.0, %v947_v13  ;;  %v818_v1 = vadd.f32 %v1527_v11, %v2132_v56 }
 0x121   : > { %1795 = vpow2.f32 %v1106_v15  ;;  %v1108_v20 = vmul.f32 1.442695, %v1073_v12 }
 0x122   : > { %1797 = vpow2.f32 %v1102_v16  ;;  %v1104_v22 = vmul.f32 1.442695, %v1071_v17  ;;  %v1528_v23 = vpop.f32.mrb[20].mxu0  ;;  %v1640_v24 = vpop.f32.mrb[20].mxu1 }
 0x123   : > { %1799 = vpow2.f32 %v1108_v20  ;;  %v968_v25 = vadd.f32 %v1640_v24, %v807_v21  ;;  %v1529_v27 = vpop.f32.mrb[21].mxu0  ;;  %v959_v28 = vpop.f32.mrb[21].mxu1 }
 0x124   : > { %1801 = vpow2.f32 %v1104_v22  ;;  %v1530_v30 = vadd.f32 %v1529_v27, %v1528_v23  ;;  %v960_v32 = vadd.f32 %v959_v28, %v799_v18  ;;  %v1531_v33 = vpop.f32.mrb[22].mxu0  ;;  %v1641_v34 = vpop.f32.mrb[22].mxu1 }
 0x125   : > { %v1076_v37 = vsub.f32 0.0, %v968_v25  ;;  %v971_v39 = vadd.f32 %v1641_v34, %v810_v29  ;;  %v1532_v40 = vpop.f32.mrb[23].mxu0  ;;  %v962_v41 = vpop.f32.mrb[23].mxu1 }
 0x126   : > { %v1074_v44 = vsub.f32 0.0, %v960_v32  ;;  %v1533_v45 = vadd.f32 %v1532_v40, %v1531_v33  ;;  %v963_v36 = vadd.f32 %v962_v41, %v802_v35  ;;  %v823_v52 = vadd.f32 %v1530_v30, %v2132_v56 }
 0x127   : > { %v1114_v46 = vmul.f32 1.442695, %v1076_v37  ;;  %v1077_v47 = vsub.f32 0.0, %v971_v39 }
 0x128   : > { %v1110_v48 = vmul.f32 1.442695, %v1074_v44  ;;  %v1075_v49 = vsub.f32 0.0, %v963_v36  ;;  %v826_v62 = vadd.f32 %v1533_v45, %v2132_v56 }
 0x129   : > { %1803 = vpow2.f32 %v1114_v46  ;;  %v1116_v51 = vmul.f32 1.442695, %v1077_v47 }
 0x12a   : > { %1805 = vpow2.f32 %v1110_v48  ;;  %v1112_v53 = vmul.f32 1.442695, %v1075_v49  ;;  %v1534_v54 = vpop.f32.mrb[24].mxu0  ;;  %v1644_v57 = vpop.f32.mrb[24].mxu1 }
 0x12b   : > { %v1796_v58 = vpop.eup %1795  ;;  %1807 = vpow2.f32 %v1116_v51  ;;  %v984_v59 = vadd.f32 %v1644_v57, %v823_v52  ;;  %v1535_v60 = vpop.f32.mrb[25].mxu0 }
 0x12c   : > { %v975_v61 = vpop.f32.mrb[25].mxu1  ;;  %v1798_v63 = vpop.eup %1797  ;;  %v1168_v0 = vadd.f32 1.0, %v1796_v58  ;;  %1809 = vpow2.f32 %v1112_v53  ;;  %v1536_v2 = vadd.f32 %v1535_v60, %v1534_v54 }
 0x12d   : > { %v976_v3 = vadd.f32 %v975_v61, %v815_v42  ;;  %v1537_v4 = vpop.f32.mrb[26].mxu0  ;;  %v1645_v5 = vpop.f32.mrb[26].mxu1  ;;  %v1166_v7 = vadd.f32 1.0, %v1798_v63  ;;  %v1080_v8 = vsub.f32 0.0, %v984_v59 }
 0x12e   : > { %v1800_v6 = vpop.eup %1799  ;;  %v987_v9 = vadd.f32 %v1645_v5, %v826_v62  ;;  %v1538_v10 = vpop.f32.mrb[27].mxu0  ;;  %1811 = vrcp.f32 %v1168_v0  ;;  %v831_v30 = vadd.f32 %v1536_v2, %v2132_v56 }
 0x12f   : > { %v978_v13 = vpop.f32.mrb[27].mxu1  ;;  %v1802_v15 = vpop.eup %1801  ;;  %v1169_v12 = vadd.f32 1.0, %v1800_v6  ;;  %v1078_v16 = vsub.f32 0.0, %v976_v3  ;;  %v1539_v17 = vadd.f32 %v1538_v10, %v1537_v4  ;;  %1813 = vrcp.f32 %v1166_v7 }
 0x130   : > { %v1167_v20 = vadd.f32 1.0, %v1802_v15  ;;  %v1122_v21 = vmul.f32 1.442695, %v1080_v8  ;;  %v1081_v22 = vsub.f32 0.0, %v987_v9  ;;  %v979_v24 = vadd.f32 %v978_v13, %v818_v1 }
 0x131   : > { %1815 = vrcp.f32 %v1169_v12  ;;  %v1118_v23 = vmul.f32 1.442695, %v1078_v16  ;;  %v834_v46 = vadd.f32 %v1539_v17, %v2132_v56 }
 0x132   : > { %1817 = vrcp.f32 %v1167_v20  ;;  %v1124_v18 = vmul.f32 1.442695, %v1081_v22  ;;  %v1079_v25 = vsub.f32 0.0, %v979_v24  ;;  %v1540_v27 = vpop.f32.mrb[28].mxu0  ;;  %v1648_v11 = vpop.f32.mrb[28].mxu1 }
 0x133   : > { %1819 = vpow2.f32 %v1122_v21  ;;  %v1804_v28 = vpop.eup %1803  ;;  %v1541_v29 = vpop.f32.mrb[29].mxu0 }
 0x134   : > { %1821 = vpow2.f32 %v1118_v23  ;;  %v991_v32 = vpop.f32.mrb[29].mxu1  ;;  %v1806_v33 = vpop.eup %1805  ;;  %v1172_v34 = vadd.f32 1.0, %v1804_v28  ;;  %v1542_v35 = vadd.f32 %v1541_v29, %v1540_v27  ;;  %v1120_v44 = vmul.f32 1.442695, %v1079_v25 }
 0x135   : > { %1823 = vpow2.f32 %v1124_v18  ;;  %v1543_v37 = vpop.f32.mrb[30].mxu0  ;;  %v1649_v39 = vpop.f32.mrb[30].mxu1  ;;  %v1170_v41 = vadd.f32 1.0, %v1806_v33  ;;  %v992_v45 = vadd.f32 %v991_v32, %v831_v30 }
 0x136   : > { %v1808_v40 = vpop.eup %1807  ;;  %v1544_v36 = vpop.f32.mrb[31].mxu0  ;;  %1825 = vrcp.f32 %v1172_v34  ;;  %v839_v51 = vadd.f32 %v1542_v35, %v2132_v56 }
 0x137   : > { %v994_v47 = vpop.f32.mrb[31].mxu1  ;;  %v1810_v48 = vpop.eup %1809  ;;  %v1173_v49 = vadd.f32 1.0, %v1808_v40  ;;  %v1545_v52 = vadd.f32 %v1544_v36, %v1543_v37  ;;  %1827 = vrcp.f32 %v1170_v41  ;;  %v1082_v54 = vsub.f32 0.0, %v992_v45 }
 0x138   : > { %v1171_v53 = vadd.f32 1.0, %v1810_v48  ;;  %v995_v57 = vadd.f32 %v994_v47, %v834_v46  ;;  %v1812_v42 = vpop.eup %1811  ;;  %v1000_v58 = vadd.f32 %v1648_v11, %v839_v51 }
 0x139   : > { %1829 = vrcp.f32 %v1173_v49  ;;  %v842_v59 = vadd.f32 %v1545_v52, %v2132_v56  ;;  %v1814_v60 = vpop.eup %1813  ;;  %1264 = vst [vmem:[%s2152_s27 + $0x10] sm:$0xff] %v1812_v42  ;;  %v1126_v61 = vmul.f32 1.442695, %v1082_v54 }
 0x13a   : > { %1831 = vrcp.f32 %v1171_v53  ;;  %v1083_v62 = vsub.f32 0.0, %v995_v57  ;;  %1262 = vst [vmem:[%s2152_s27] sm:$0xff] %v1814_v60  ;;  %v1084_v0 = vsub.f32 0.0, %v1000_v58  ;;  %v1546_v3 = vpop.f32.mrb[32].mxu0  ;;  %v2158_v4 = vpop.f32.mrb[32].mxu1 }
 0x13b   : > { %v1816_v63 = vpop.eup %1815  ;;  %1833 = vpow2.f32 %v1120_v44  ;;  %v1003_v2 = vadd.f32 %v1649_v39, %v842_v59  ;;  %v1547_v7 = vpop.f32.mrb[33].mxu0 }
 0x13c   : > { %v1818_v5 = vpop.eup %1817  ;;  %1265 = vst [vmem:[%s2152_s27 + $0x18] sm:$0xff] %v1816_v63  ;;  %1835 = vpow2.f32 %v1126_v61  ;;  %v1128_v6 = vmul.f32 1.442695, %v1083_v62  ;;  %v1007_v8 = vpop.f32.mrb[33].mxu1  ;;  %v1130_v10 = vmul.f32 1.442695, %v1084_v0  ;;  %v1548_v13 = vadd.f32 %v1547_v7, %v1546_v3 }
 0x13d   : > { %v1820_v9 = vpop.eup %1819  ;;  %1263 = vst [vmem:[%s2152_s27 + $0x8] sm:$0xff] %v1818_v5  ;;  %v1085_v1 = vsub.f32 0.0, %v1003_v2  ;;  %v1549_v15 = vpop.f32.mrb[34].mxu0  ;;  %v887_v3 = vadd.f32 %v2117_v26, %v2132_v56  ;;  %v890_v26 = vadd.f32 %v2119_v31, %v2132_v56 }
 0x13e   : > { %v2162_v12 = vpop.f32.mrb[34].mxu1  ;;  %v1822_v16 = vpop.eup %1821  ;;  %v1176_v17 = vadd.f32 1.0, %v1820_v9  ;;  %1837 = vpow2.f32 %v1128_v6  ;;  %v847_v18 = vadd.f32 %v1548_v13, %v2132_v56 }
 0x13f   : > { %v1550_v20 = vpop.f32.mrb[35].mxu0  ;;  %v1010_v21 = vpop.f32.mrb[35].mxu1  ;;  %v1174_v23 = vadd.f32 1.0, %v1822_v16  ;;  %1839 = vpow2.f32 %v1130_v10  ;;  %v1132_v24 = vmul.f32 1.442695, %v1085_v1  ;;  %v882_v16 = vadd.f32 %v2115_v19, %v2132_v56 }
 0x140   : > { %v1824_v22 = vpop.eup %1823  ;;  %1841 = vrcp.f32 %v1176_v17  ;;  %v1551_v27 = vadd.f32 %v1550_v20, %v1549_v15  ;;  %v1008_v28 = vadd.f32 %v1007_v8, %v847_v18 }
 0x141   : > { %v1177_v25 = vadd.f32 1.0, %v1824_v22  ;;  %v1826_v11 = vpop.eup %1825  ;;  %1843 = vrcp.f32 %v1174_v23 }
 0x142   : > { %v1828_v29 = vpop.eup %1827  ;;  %1268 = vst [vmem:[%s2152_s27 + $0x30] sm:$0xff] %v1826_v11  ;;  %v850_v30 = vadd.f32 %v1551_v27, %v2132_v56  ;;  %v1086_v33 = vsub.f32 0.0, %v1008_v28  ;;  %v1552_v34 = vpop.f32.mrb[36].mxu0  ;;  %v903_v28 = vadd.f32 %v2125_v50, %v2132_v56 }
 0x143   : > { %1845 = vrcp.f32 %v1177_v25  ;;  %v1830_v32 = vpop.eup %1829  ;;  %1266 = vst [vmem:[%s2152_s27 + $0x20] sm:$0xff] %v1828_v29  ;;  %v2168_v35 = vpop.f32.mrb[36].mxu1 }
 0x144   : > { %1847 = vpow2.f32 %v1132_v24  ;;  %v1832_v37 = vpop.eup %1831  ;;  %1269 = vst [vmem:[%s2152_s27 + $0x38] sm:$0xff] %v1830_v32  ;;  %v1011_v39 = vadd.f32 %v1010_v21, %v850_v30  ;;  %v1553_v40 = vpop.f32.mrb[37].mxu0  ;;  %v1134_v45 = vmul.f32 1.442695, %v1086_v33 }
 0x145   : > { %v2171_v41 = vpop.f32.mrb[37].mxu1  ;;  %v1834_v44 = vpop.eup %1833  ;;  %1267 = vst [vmem:[%s2152_s27 + $0x28] sm:$0xff] %v1832_v37  ;;  %v1554_v36 = vadd.f32 %v1553_v40, %v1552_v34 }
 0x146   : > { %v1555_v46 = vpop.f32.mrb[38].mxu0  ;;  %v2174_v47 = vpop.f32.mrb[38].mxu1  ;;  %v1175_v49 = vadd.f32 1.0, %v1834_v44  ;;  %v1087_v51 = vsub.f32 0.0, %v1011_v39  ;;  %1849 = vpow2.f32 %v1134_v45 }
 0x147   : > { %v1836_v48 = vpop.eup %1835  ;;  %v1556_v52 = vpop.f32.mrb[39].mxu0  ;;  %v855_v57 = vadd.f32 %v1554_v36, %v2132_v56 }
 0x148   : > { %v2176_v53 = vpop.f32.mrb[39].mxu1  ;;  %v1178_v54 = vadd.f32 1.0, %v1836_v48  ;;  %v1557_v42 = vadd.f32 %v1556_v52, %v1555_v46  ;;  %v1838_v58 = vpop.eup %1837  ;;  %1851 = vrcp.f32 %v1175_v49  ;;  %v1136_v59 = vmul.f32 1.442695, %v1087_v51 }
 0x149   : > { %v1840_v60 = vpop.eup %1839  ;;  %v1179_v61 = vadd.f32 1.0, %v1838_v58  ;;  %v1016_v62 = vadd.f32 %v2158_v4, %v855_v57  ;;  %v879_v4 = vadd.f32 %v2113_v14, %v2132_v56 }
 0x14a   : > { %1853 = vrcp.f32 %v1178_v54  ;;  %v858_v63 = vadd.f32 %v1557_v42, %v2132_v56  ;;  %v1842_v0 = vpop.eup %1841  ;;  %v1180_v2 = vadd.f32 1.0, %v1840_v60  ;;  %v1558_v8 = vpop.f32.mrb[40].mxu0  ;;  %v895_v54 = vadd.f32 %v2121_v38, %v2132_v56 }
 0x14b   : > { %1855 = vpow2.f32 %v1136_v59  ;;  %v1844_v5 = vpop.eup %1843  ;;  %1272 = vst [vmem:[%s2152_s27 + $0x50] sm:$0xff] %v1842_v0  ;;  %v1088_v6 = vsub.f32 0.0, %v1016_v62  ;;  %v1660_v9 = vpop.f32.mrb[40].mxu1  ;;  %v906_v60 = vadd.f32 %v2127_v55, %v2132_v56  ;;  %v898_v55 = vadd.f32 %v2123_v43, %v2132_v56 }
 0x14c   : > { %1857 = vrcp.f32 %v1179_v61  ;;  %v1019_v7 = vadd.f32 %v2162_v12, %v858_v63  ;;  %1270 = vst [vmem:[%s2152_s27 + $0x40] sm:$0xff] %v1844_v5  ;;  %v1048_v1 = vadd.f32 %v1660_v9, %v887_v3  ;;  %v1559_v13 = vpop.f32.mrb[41].mxu0  ;;  %v1039_v15 = vpop.f32.mrb[41].mxu1 }
 0x14d   : > { %v1846_v10 = vpop.eup %1845  ;;  %1859 = vrcp.f32 %v1180_v2  ;;  %v1138_v12 = vmul.f32 1.442695, %v1088_v6  ;;  %v1560_v21 = vadd.f32 %v1559_v13, %v1558_v8  ;;  %v1040_v22 = vadd.f32 %v1039_v15, %v879_v4  ;;  %v1561_v23 = vpop.f32.mrb[42].mxu0 }
 0x14e   : > { %v1848_v17 = vpop.eup %1847  ;;  %1273 = vst [vmem:[%s2152_s27 + $0x58] sm:$0xff] %v1846_v10  ;;  %v1089_v20 = vsub.f32 0.0, %v1019_v7  ;;  %v1661_v14 = vpop.f32.mrb[42].mxu1  ;;  %v1096_v18 = vsub.f32 0.0, %v1048_v1 }
 0x14f   : > { %v1181_v24 = vadd.f32 1.0, %v1848_v17  ;;  %v1051_v25 = vadd.f32 %v1661_v14, %v890_v26  ;;  %v1562_v27 = vpop.f32.mrb[43].mxu0  ;;  %v1042_v11 = vpop.f32.mrb[43].mxu1  ;;  %1861 = vpow2.f32 %v1138_v12  ;;  %v863_v19 = vadd.f32 %v1560_v21, %v2132_v56 }
 0x150   : > { %v1140_v31 = vmul.f32 1.442695, %v1089_v20  ;;  %v1094_v29 = vsub.f32 0.0, %v1040_v22  ;;  %v1154_v30 = vmul.f32 1.442695, %v1096_v18  ;;  %v1563_v33 = vadd.f32 %v1562_v27, %v1561_v23  ;;  %v1850_v34 = vpop.eup %1849 }
 0x151   : > { %1863 = vrcp.f32 %v1181_v24  ;;  %v1097_v32 = vsub.f32 0.0, %v1051_v25  ;;  %v1024_v37 = vadd.f32 %v2171_v41, %v863_v19  ;;  %v1043_v40 = vadd.f32 %v1042_v11, %v882_v16 }
 0x152   : > { %1865 = vpow2.f32 %v1140_v31  ;;  %v1150_v39 = vmul.f32 1.442695, %v1094_v29  ;;  %v1852_v44 = vpop.eup %1851  ;;  %v1182_v45 = vadd.f32 1.0, %v1850_v34  ;;  %v866_v36 = vadd.f32 %v1563_v33, %v2132_v56  ;;  %v1564_v51 = vpop.f32.mrb[44].mxu0 }
 0x153   : > { %1867 = vpow2.f32 %v1154_v30  ;;  %v1156_v50 = vmul.f32 1.442695, %v1097_v32  ;;  %1271 = vst [vmem:[%s2152_s27 + $0x48] sm:$0xff] %v1852_v44  ;;  %v1090_v48 = vsub.f32 0.0, %v1024_v37  ;;  %v1095_v49 = vsub.f32 0.0, %v1043_v40  ;;  %v1664_v52 = vpop.f32.mrb[44].mxu1 }
 0x154   : > { %v1854_v46 = vpop.eup %1853  ;;  %1869 = vpow2.f32 %v1150_v39  ;;  %v1027_v57 = vadd.f32 %v2176_v53, %v866_v36  ;;  %v1064_v42 = vadd.f32 %v1664_v52, %v903_v28  ;;  %v1565_v58 = vpop.f32.mrb[45].mxu0 }
 0x155   : > { %v1856_v41 = vpop.eup %1855  ;;  %1274 = vst [vmem:[%s2152_s27 + $0x60] sm:$0xff] %v1854_v46  ;;  %1871 = vrcp.f32 %v1182_v45  ;;  %v1055_v59 = vpop.f32.mrb[45].mxu1  ;;  %v1142_v63 = vmul.f32 1.442695, %v1090_v48  ;;  %v1152_v0 = vmul.f32 1.442695, %v1095_v49  ;;  %v1566_v6 = vadd.f32 %v1565_v58, %v1564_v51 }
 0x156   : > { %v1858_v61 = vpop.eup %1857  ;;  %v1183_v62 = vadd.f32 1.0, %v1856_v41  ;;  %1873 = vpow2.f32 %v1156_v50  ;;  %v1567_v2 = vpop.f32.mrb[46].mxu0  ;;  %v1091_v3 = vsub.f32 0.0, %v1027_v57  ;;  %v1100_v5 = vsub.f32 0.0, %v1064_v42 }
 0x157   : > { %v1860_v38 = vpop.eup %1859  ;;  %1275 = vst [vmem:[%s2152_s27 + $0x68] sm:$0xff] %v1858_v61  ;;  %v1056_v7 = vadd.f32 %v1055_v59, %v895_v54  ;;  %v1665_v53 = vpop.f32.mrb[46].mxu1  ;;  %v871_v15 = vadd.f32 %v1566_v6, %v2132_v56 }
 0x158   : > { %v1568_v8 = vpop.f32.mrb[47].mxu0  ;;  %1276 = vst [vmem:[%s2152_s27 + $0x70] sm:$0xff] %v1860_v38  ;;  %1875 = vrcp.f32 %v1183_v62  ;;  %v1067_v9 = vadd.f32 %v1665_v53, %v906_v60  ;;  %v1058_v10 = vpop.f32.mrb[47].mxu1  ;;  %v1144_v1 = vmul.f32 1.442695, %v1091_v3 }
 0x159   : > { %v1569_v4 = vadd.f32 %v1568_v8, %v1567_v2  ;;  %1877 = vpow2.f32 %v1142_v63  ;;  %v1162_v13 = vmul.f32 1.442695, %v1100_v5  ;;  %v1862_v26 = vpop.eup %1861  ;;  %v1098_v16 = vsub.f32 0.0, %v1056_v7 }
 0x15a   : > { %1879 = vpow2.f32 %v1152_v0  ;;  %v1184_v20 = vadd.f32 1.0, %v1862_v26  ;;  %v1032_v21 = vadd.f32 %v2168_v35, %v871_v15  ;;  %v1059_v22 = vadd.f32 %v1058_v10, %v898_v55 }
 0x15b   : > { %v874_v17 = vadd.f32 %v1569_v4, %v2132_v56  ;;  %v1864_v12 = vpop.eup %1863  ;;  %1881 = vpow2.f32 %v1144_v1  ;;  %v1158_v43 = vmul.f32 1.442695, %v1098_v16  ;;  %v1101_v14 = vsub.f32 0.0, %v1067_v9 }
 0x15c   : > { %v1866_v23 = vpop.eup %1865  ;;  %1277 = vst [vmem:[%s2152_s27 + $0x78] sm:$0xff] %v1864_v12  ;;  %1883 = vpow2.f32 %v1162_v13  ;;  %v1092_v27 = vsub.f32 0.0, %v1032_v21  ;;  %v1099_v34 = vsub.f32 0.0, %v1059_v22 }
 0x15d   : > { %v1035_v24 = vadd.f32 %v2174_v47, %v874_v17  ;;  %v1868_v18 = vpop.eup %1867  ;;  %1885 = vrcp.f32 %v1184_v20  ;;  %v1185_v25 = vadd.f32 1.0, %v1866_v23  ;;  %v1164_v30 = vmul.f32 1.442695, %v1101_v14 }
 0x15e   : > { %v1870_v11 = vpop.eup %1869  ;;  %v1192_v56 = vadd.f32 1.0, %v1868_v18  ;;  %1887 = vpow2.f32 %v1158_v43  ;;  %v1146_v19 = vmul.f32 1.442695, %v1092_v27  ;;  %v1160_v46 = vmul.f32 1.442695, %v1099_v34 }
 0x15f   : > { %v1093_v28 = vsub.f32 0.0, %v1035_v24  ;;  %v1872_v31 = vpop.eup %1871  ;;  %1889 = vrcp.f32 %v1185_v25  ;;  %v1190_v35 = vadd.f32 1.0, %v1870_v11 }
 0x160   : > { %v1874_v29 = vpop.eup %1873  ;;  %1278 = vst [vmem:[%s2152_s27 + $0x80] sm:$0xff] %v1872_v31  ;;  %1891 = vrcp.f32 %v1192_v56 }
 0x161   : > { %1893 = vrcp.f32 %v1190_v35  ;;  %v1193_v32 = vadd.f32 1.0, %v1874_v29  ;;  %v1148_v47 = vmul.f32 1.442695, %v1093_v28 }
 0x162   : > { %v1876_v33 = vpop.eup %1875  ;;  %1895 = vpow2.f32 %v1146_v19 }
 0x163   : > { %v1878_v37 = vpop.eup %1877  ;;  %1279 = vst [vmem:[%s2152_s27 + $0x88] sm:$0xff] %v1876_v33  ;;  %1897 = vrcp.f32 %v1193_v32 }
 0x164   : > { %v1880_v39 = vpop.eup %1879  ;;  %v1186_v40 = vadd.f32 1.0, %v1878_v37  ;;  %1899 = vpow2.f32 %v1164_v30 }
 0x165   : > { %v1882_v44 = vpop.eup %1881  ;;  %v1191_v45 = vadd.f32 1.0, %v1880_v39  ;;  %1901 = vpow2.f32 %v1148_v47 }
 0x166   : > { %v1884_v50 = vpop.eup %1883  ;;  %1903 = vrcp.f32 %v1186_v40  ;;  %v1187_v36 = vadd.f32 1.0, %v1882_v44 }
 0x167   : > { %v1886_v48 = vpop.eup %1885  ;;  %1905 = vrcp.f32 %v1191_v45  ;;  %v1196_v49 = vadd.f32 1.0, %v1884_v50 }
 0x168   : > { %v1888_v51 = vpop.eup %1887  ;;  %1280 = vst [vmem:[%s2152_s27 + $0x90] sm:$0xff] %v1886_v48  ;;  %1907 = vrcp.f32 %v1187_v36 }
 0x169   : > { %v1890_v52 = vpop.eup %1889  ;;  %1909 = vrcp.f32 %v1196_v49  ;;  %v1194_v54 = vadd.f32 1.0, %v1888_v51 }
 0x16a   : > { %v1892_v41 = vpop.eup %1891  ;;  %1281 = vst [vmem:[%s2152_s27 + $0x98] sm:$0xff] %v1890_v52  ;;  %1911 = vpow2.f32 %v1160_v46 }
 0x16b   : > { %v1894_v57 = vpop.eup %1893  ;;  %1288 = vst [vmem:[%s2152_s27 + $0xd0] sm:$0xff] %v1892_v41  ;;  %1913 = vrcp.f32 %v1194_v54 }
 0x16c   : > { %v1896_v42 = vpop.eup %1895  ;;  %1286 = vst [vmem:[%s2152_s27 + $0xc0] sm:$0xff] %v1894_v57 }
 0x16d   : > { %v1898_v58 = vpop.eup %1897  ;;  %v1188_v59 = vadd.f32 1.0, %v1896_v42 }
 0x16e   : > { %v1900_v60 = vpop.eup %1899  ;;  %1289 = vst [vmem:[%s2152_s27 + $0xd8] sm:$0xff] %v1898_v58 }
 0x16f   : > { %v1902_v61 = vpop.eup %1901  ;;  %1915 = vrcp.f32 %v1188_v59  ;;  %v1197_v62 = vadd.f32 1.0, %v1900_v60 }
 0x170   : > { %v1904_v63 = vpop.eup %1903  ;;  %v1189_v0 = vadd.f32 1.0, %v1902_v61 }
 0x171   : > { %v1906_v2 = vpop.eup %1905  ;;  %1282 = vst [vmem:[%s2152_s27 + $0xa0] sm:$0xff] %v1904_v63  ;;  %1917 = vrcp.f32 %v1197_v62 }
 0x172   : > { %v1908_v38 = vpop.eup %1907  ;;  %1287 = vst [vmem:[%s2152_s27 + $0xc8] sm:$0xff] %v1906_v2  ;;  %1919 = vrcp.f32 %v1189_v0 }
 0x173   : > { %v1910_v3 = vpop.eup %1909  ;;  %1283 = vst [vmem:[%s2152_s27 + $0xa8] sm:$0xff] %v1908_v38 }
 0x174   : > { %v1912_v5 = vpop.eup %1911  ;;  %1292 = vst [vmem:[%s2152_s27 + $0xf0] sm:$0xff] %v1910_v3 }
 0x175   : > { %v1914_v6 = vpop.eup %1913  ;;  %v1195_v7 = vadd.f32 1.0, %v1912_v5 }
 0x176   : > { %1290 = vst [vmem:[%s2152_s27 + $0xe0] sm:$0xff] %v1914_v6 }
 0x177   : > { %1921 = vrcp.f32 %v1195_v7 }
 0x179   : > { %v1916_v53 = vpop.eup %1915 }
 0x17a   : > { %1284 = vst [vmem:[%s2152_s27 + $0xb0] sm:$0xff] %v1916_v53 }
 0x17b   : > { %v1918_v8 = vpop.eup %1917 }
 0x17c   : > { %v1920_v9 = vpop.eup %1919  ;;  %1293 = vst [vmem:[%s2152_s27 + $0xf8] sm:$0xff] %v1918_v8 }
 0x17d   : > { %1285 = vst [vmem:[%s2152_s27 + $0xb8] sm:$0xff] %v1920_v9 }
 0x181   : > { %v1922_v4 = vpop.eup %1921 }
 0x182   : > { %1291 = vst [vmem:[%s2152_s27 + $0xe8] sm:$0xff] %v1922_v4 }
 0x183 PF: > { %s13_s14 = sadd.s32 1, %s1945_s14   ;;  %s2243_s12 = smov %s1941_s13 }
 0x184   : > { %p10_p5 = scmp.ge.s32.totalorder %s13_s14, 10   ;;  %s2244_s13 = smov %s2246_s15 }
 0x186   :  { %12 = sbr.rel (!%p10_p5) target bundleno = 2 (0x2), region = 68 }

</bundles_post_ra>
